<compile_context>
chip_gen: v6e
topology: v6e:2x2x1
jax: 0.10.0
libtpu: 0.0.40
codegen_flags: <defaults>
</compile_context>

<pallas_src>
import functools

import numpy as np
import jax
import jax.numpy as jnp
from jax import lax
from jax.experimental import pallas as pl
from jax.experimental.pallas import tpu as pltpu

# ----- module hyper-parameters (the PyTorch file's globals dimgroup/dimhead) --
DIMGROUP = 4               # `dimgroup`
DIMHEAD = 8                # `dimhead`
NHEAD = 16
H = DIMHEAD * NHEAD        # 128 hidden channels
B = 2                      # batch
CIO1 = 16                  # cio1 (divisible by dimgroup)
CIO2 = 8                   # cio2 == spatial length L (forced by the forward reshape)
L = CIO2
G1 = CIO1 // DIMGROUP      # 4 channel groups == gate samples per batch element
NG = B * G1                # 8 gate-branch rows
BL = B * L                 # 16 value-branch rows
DEPTH = 4                  # module default is 64; only changes the trip count

_EPS = 1e-5
_F32 = jnp.float32
_BF16 = jnp.bfloat16
_NT = (((1,), (1,)), ((), ()))       # dot_general "A @ B^T"

# v6e/v7x: 256x256 MXU -> one block-diagonal 256-lane matmul fuses the gate and
# value 1x1 convs into a single native pass.  On v5e (128x128 MXU) set this to
# False: two separate 128-wide matmuls then skip the zero off-diagonal blocks.
_FUSE_CONV_256 = True

# ------------------- packed parameter slab layouts (host <-> kernel) ----------
# slab 1 (f32, 64x128): per-channel vectors (rows) + small affine/bias tiles.
_VEC_ROWS = (
    ('g_b1', 128), ('g_gn2_w', 128), ('g_gn2_b', 128), ('g_b2', 128),
    ('g_gn3_w', 128), ('g_gn3_b', 128), ('g_b3', 128),
    ('g_gn4_w', 128), ('g_gn4_b', 128),
    ('v_gn1_w', CIO1), ('v_gn1_b', CIO1), ('v_b1', 128),
    ('v_gn2_w', 128), ('v_gn2_b', 128), ('v_b2', 128),
    ('v_gn3_w', 128), ('v_gn3_b', 128), ('v_b3', 128),
    ('v_gn4_w', 128), ('v_gn4_b', 128), ('v_b4', CIO1), ('rez', CIO1),
)
_VEC_ROW = {name: i for i, (name, _) in enumerate(_VEC_ROWS)}
_VEC_W = dict(_VEC_ROWS)
_F32_TILES = {                      # name: (row, col, nrows, ncols)
    'a1w':  (32, 0, DIMGROUP * NG, L),    # gate GN1 affine weight, stacked layout
    'a1b':  (32, 8, DIMGROUP * NG, L),    # gate GN1 affine bias
    'gb4':  (32, 16, CIO2, NG),           # conv4 bias as (l, n) column tile
    'glnw': (32, 24, CIO2, NG),           # LayerNorm weight column tile
    'glnb': (32, 32, CIO2, NG),           # LayerNorm bias column tile
}
_CONSTS_SHAPE = (64, 128)

# slab 2 (bf16, 304x128): small matrices that feed the MXU.
_MAT_TILES = {
    'm_h':   (0, 0, H, H),                # lane-group-4 averaging over H
    'gw4':   (128, 0, CIO2, H),           # gate conv4 weight (used A @ B^T)
    'sel':   (144, 0, DIMGROUP * NG, 2 * CIO1),   # gate gather selector
    'r_avg': (144, 32, 2 * BL, 2 * BL),   # per-batch row averaging over [x; x*x]
    'm_c':   (144, 64, CIO1, CIO1),       # lane-group-4 averaging over cio1
    'vw4':   (176, 0, H, CIO1),           # value conv4 weight
}
_MATS_SHAPE = (304, 128)

# slab 3 (bf16, 560x256): fused block-diagonal [gate | value] 1x1-conv weights.
_WBIG_TILES = {
    'w1big': (0, 0, DIMGROUP * L + CIO1, 2 * H),
    'w2big': (48, 0, 2 * H, 2 * H),
    'w3big': (304, 0, 2 * H, 2 * H),
}
_WBIG_SHAPE = (560, 256)


# ----------------------------- shared math ------------------------------------
def _gelu(x):
    # tanh-approx GELU (== nn.GELU(approximate='tanh'), EUP-friendly on TPU).
    c = 0.7978845608028654  # sqrt(2/pi)
    return 0.5 * x * (1.0 + jnp.tanh(c * (x + 0.044715 * x * x * x)))


def _group_avg(n, chunk):
    idx = np.arange(n)
    return (idx[:, None] // chunk == idx[None, :] // chunk).astype(np.float32) / chunk


def _np_block_diag(w):
    nh, dh, _ = w.shape
    out = np.zeros((nh * dh, nh * dh), np.float32)
    for hh in range(nh):
        out[hh * dh:(hh + 1) * dh, hh * dh:(hh + 1) * dh] = w[hh]
    return out


# ------------------------------ fused Pallas kernel ---------------------------
def _resmixer_kernel(x_ref, c_ref, m_ref, w_ref, out_ref, *, depth):
    bf = lambda a: a.astype(_BF16)

    def vrow(name):                                   # (1, width) f32, broadcasts
        r = _VEC_ROW[name]
        return c_ref[r:r + 1, 0:_VEC_W[name]]

    def ctile(name):                                  # f32 tile, point-of-use read
        r, c, h, w = _F32_TILES[name]
        return c_ref[r:r + h, c:c + w]

    def mtile(name):                                  # bf16 tile, point-of-use read
        r, c, h, w = _MAT_TILES[name]
        return m_ref[r:r + h, c:c + w]

    def conv_pair(ga, va, wname, gk, vk, gbias, vbias):
        """Gate (NG,gk) and value (BL,vk) 1x1 convs -> (NG,H), (BL,H)."""
        r, _, hh, _ = _WBIG_TILES[wname]
        if _FUSE_CONV_256:
            # one block-diagonal 256-lane matmul (native pass on v6e/v7x MXU);
            # the duplicated gate rows 8..15 only produce ignored outputs.
            op = jnp.concatenate([jnp.concatenate([ga, ga], axis=0), va], axis=1)
            o = jnp.dot(bf(op), w_ref[r:r + hh, :], preferred_element_type=_F32)
            hg, vv = o[0:NG, 0:H], o[:, H:2 * H]
        else:
            hg = jnp.dot(bf(ga), w_ref[r:r + gk, 0:H], preferred_element_type=_F32)
            vv = jnp.dot(bf(va), w_ref[r + gk:r + gk + vk, H:2 * H],
                         preferred_element_type=_F32)
        return hg + vrow(gbias), vv + vrow(vbias)

    def gn_pair(hg, vv, gwn, gbn, vwn, vbn):
        """Gate + value GroupNorm(.,128) sharing one moment matmul, then GELU."""
        rv = jnp.dot(mtile('r_avg'), bf(jnp.concatenate([vv, vv * vv], axis=0)),
                     preferred_element_type=_F32)                       # (2*BL, H)
        mom = jnp.dot(bf(jnp.concatenate([hg, hg * hg, rv], axis=0)), mtile('m_h'),
                      preferred_element_type=_F32)                      # (48, H)
        gmu = mom[0:NG]
        gvr = jnp.maximum(mom[NG:2 * NG] - gmu * gmu, 0.0)
        vmu = mom[2 * NG:2 * NG + BL]
        vvr = jnp.maximum(mom[2 * NG + BL:2 * NG + 2 * BL] - vmu * vmu, 0.0)
        hg = _gelu((hg - gmu) * lax.rsqrt(gvr + _EPS) * vrow(gwn) + vrow(gbn))
        vv = _gelu((vv - vmu) * lax.rsqrt(vvr + _EPS) * vrow(vwn) + vrow(vbn))
        return hg, vv

    def step(xv):
        # ------ gate branch front end: gather + GroupNorm(4,32) + GELU -------
        xv2 = jnp.concatenate([xv[0:L, :], xv[L:2 * L, :]], axis=1)     # (L, 2*CIO1)
        z = lax.dot_general(mtile('sel'), bf(xv2), _NT,
                            preferred_element_type=_F32)                # (32, L)
        zm = jnp.mean(z, axis=-1, keepdims=True)
        zv = jnp.maximum(jnp.mean(z * z, axis=-1, keepdims=True) - zm * zm, 0.0)
        za = _gelu((z - zm) * lax.rsqrt(zv + _EPS) * ctile('a1w') + ctile('a1b'))
        zc = jnp.concatenate([za[d * NG:(d + 1) * NG, :] for d in range(DIMGROUP)],
                             axis=1)                                    # (NG, 32)

        # ------ value branch front end: GroupNorm(4,16) + GELU ---------------
        xs = jnp.concatenate([xv, xv * xv], axis=0)                     # (2*BL, CIO1)
        rv1 = jnp.dot(mtile('r_avg'), bf(xs), preferred_element_type=_F32)
        mom1 = jnp.dot(bf(rv1), mtile('m_c'), preferred_element_type=_F32)
        vmu = mom1[0:BL]
        vvr = jnp.maximum(mom1[BL:2 * BL] - vmu * vmu, 0.0)
        va = _gelu((xv - vmu) * lax.rsqrt(vvr + _EPS) * vrow('v_gn1_w')
                   + vrow('v_gn1_b'))                                   # (BL, CIO1)

        # ------ conv1 then 2x [GroupNorm + GELU + conv], gate || value -------
        hg, vv = conv_pair(zc, va, 'w1big', DIMGROUP * L, CIO1, 'g_b1', 'v_b1')
        hg, vv = gn_pair(hg, vv, 'g_gn2_w', 'g_gn2_b', 'v_gn2_w', 'v_gn2_b')
        hg, vv = conv_pair(hg, vv, 'w2big', H, H, 'g_b2', 'v_b2')
        hg, vv = gn_pair(hg, vv, 'g_gn3_w', 'g_gn3_b', 'v_gn3_w', 'v_gn3_b')
        hg, vv = conv_pair(hg, vv, 'w3big', H, H, 'g_b3', 'v_b3')
        hg, vv = gn_pair(hg, vv, 'g_gn4_w', 'g_gn4_b', 'v_gn4_w', 'v_gn4_b')

        # ------ gate tail: conv4 emitted transposed + LayerNorm + exp --------
        ht = lax.dot_general(mtile('gw4'), bf(hg), _NT,
                             preferred_element_type=_F32) + ctile('gb4')  # (CIO2, NG)
        htc = jnp.concatenate([ht, ht * ht], axis=1)                      # (CIO2, 2*NG)
        lmom = jnp.dot(jnp.full((CIO2, CIO2), 1.0 / CIO2, _BF16), bf(htc),
                       preferred_element_type=_F32)
        lmu = lmom[:, 0:NG]
        lvr = jnp.maximum(lmom[:, NG:2 * NG] - lmu * lmu, 0.0)
        gate_t = jnp.exp((ht - lmu) * lax.rsqrt(lvr + _EPS) * ctile('glnw')
                         + ctile('glnb'))                                 # (CIO2, NG)

        # ------ value tail: conv4 + ReZero ------------------------------------
        vo = jnp.dot(bf(vv), mtile('vw4'), preferred_element_type=_F32)   # (BL, CIO1)
        vo = (vo + vrow('v_b4')) * vrow('rez')

        # ------ gate -> value-layout broadcast (XLU/VPU only) + residual ------
        gbl = jnp.concatenate([gate_t[:, 0:G1], gate_t[:, G1:2 * G1]], axis=0)  # (BL, G1)
        gx = jnp.concatenate(
            [jnp.broadcast_to(gbl[:, g:g + 1], (BL, DIMGROUP)) for g in range(G1)],
            axis=1)                                                        # (BL, CIO1)
        return xv + gx * vo

    xv = x_ref[...]
    if depth <= 8:
        for _ in range(depth):          # fully unrolled for the demo depth
            xv = step(xv)
    else:
        xv = lax.fori_loop(0, depth, lambda i, s: step(s), xv, unroll=4)
    out_ref[...] = xv


# --------------------------------- wrapper ------------------------------------
@functools.partial(jax.jit, static_argnums=(2,))
def resmixer_forward(x, kparams, depth):
    """x: (B, CIO1, L) in the PyTorch Conv1d (N, C, L) convention."""
    consts, mats, wbig = kparams
    vmem = pl.BlockSpec(memory_space=pltpu.MemorySpace.VMEM)
    xv0 = jnp.transpose(x, (0, 2, 1)).reshape(BL, CIO1)    # rows = (b, l), lanes = c
    out_xv = pl.pallas_call(
        functools.partial(_resmixer_kernel, depth=depth),
        out_shape=jax.ShapeDtypeStruct((BL, CIO1), _F32),
        in_specs=[vmem, vmem, vmem, vmem],
        out_specs=vmem,
    )(xv0, consts, mats, wbig)
    return jnp.transpose(out_xv.reshape(B, L, CIO1), (0, 2, 1))


# ------------------------- parameters (deterministic) --------------------------
def init_raw_params(key):
    keys = iter(jax.random.split(key, 64))
    nxt = lambda: next(keys)

    def norm_p(c):
        w = 1.0 + 0.1 * jax.random.normal(nxt(), (c,), _F32)
        b = 0.1 * jax.random.normal(nxt(), (c,), _F32)
        return w, b

    def conv_p(out_c, in_c):
        w = jax.random.normal(nxt(), (out_c, in_c), _F32) / np.sqrt(in_c)
        b = 0.05 * jax.random.normal(nxt(), (out_c,), _F32)
        return w, b

    def gconv_p(nhead, dh):
        w = jax.random.normal(nxt(), (nhead, dh, dh), _F32) / np.sqrt(dh)
        b = 0.05 * jax.random.normal(nxt(), (nhead * dh,), _F32)
        return w, b

    raw = {}
    raw['g_gn1_w'], raw['g_gn1_b'] = norm_p(DIMGROUP * L)
    raw['g_c1_w'], raw['g_c1_b'] = conv_p(H, DIMGROUP * L)
    raw['g_gn2_w'], raw['g_gn2_b'] = norm_p(H)
    raw['g_c2_w'], raw['g_c2_b'] = gconv_p(NHEAD, DIMHEAD)
    raw['g_gn3_w'], raw['g_gn3_b'] = norm_p(H)
    raw['g_c3_w'], raw['g_c3_b'] = gconv_p(NHEAD, DIMHEAD)
    raw['g_gn4_w'], raw['g_gn4_b'] = norm_p(H)
    raw['g_c4_w'], raw['g_c4_b'] = conv_p(CIO2, H)
    raw['g_ln_w'], raw['g_ln_b'] = norm_p(CIO2)

    raw['v_gn1_w'], raw['v_gn1_b'] = norm_p(CIO1)
    raw['v_c1_w'], raw['v_c1_b'] = conv_p(H, CIO1)
    raw['v_gn2_w'], raw['v_gn2_b'] = norm_p(H)
    raw['v_c2_w'], raw['v_c2_b'] = gconv_p(NHEAD, DIMHEAD)
    raw['v_gn3_w'], raw['v_gn3_b'] = norm_p(H)
    raw['v_c3_w'], raw['v_c3_b'] = gconv_p(NHEAD, DIMHEAD)
    raw['v_gn4_w'], raw['v_gn4_b'] = norm_p(H)
    raw['v_c4_w'], raw['v_c4_b'] = conv_p(CIO1, H)
    # ReZero init is zeros in PyTorch (block == identity); use small deterministic
    # non-zero values so the kernel path is actually exercised.
    raw['rez_w0'] = jnp.linspace(0.02, 0.08, G1, dtype=_F32)
    return raw


def pack_kernel_params(raw):
    f = lambda a: np.asarray(a, np.float32)

    def put(dst, layout, name, tile):
        r, c, h, w = layout[name]
        assert tile.shape == (h, w), (name, tile.shape, (h, w))
        dst[r:r + h, c:c + w] = tile

    # ---- slab 1: f32 per-channel vectors + small affine/bias tiles -----------
    consts = np.zeros(_CONSTS_SHAPE, np.float32)
    vec_vals = {
        'g_b1': raw['g_c1_b'],
        'g_gn2_w': raw['g_gn2_w'], 'g_gn2_b': raw['g_gn2_b'], 'g_b2': raw['g_c2_b'],
        'g_gn3_w': raw['g_gn3_w'], 'g_gn3_b': raw['g_gn3_b'], 'g_b3': raw['g_c3_b'],
        'g_gn4_w': raw['g_gn4_w'], 'g_gn4_b': raw['g_gn4_b'],
        'v_gn1_w': raw['v_gn1_w'], 'v_gn1_b': raw['v_gn1_b'], 'v_b1': raw['v_c1_b'],
        'v_gn2_w': raw['v_gn2_w'], 'v_gn2_b': raw['v_gn2_b'], 'v_b2': raw['v_c2_b'],
        'v_gn3_w': raw['v_gn3_w'], 'v_gn3_b': raw['v_gn3_b'], 'v_b3': raw['v_c3_b'],
        'v_gn4_w': raw['v_gn4_w'], 'v_gn4_b': raw['v_gn4_b'], 'v_b4': raw['v_c4_b'],
        'rez': np.repeat(f(raw['rez_w0']).reshape(-1), DIMGROUP),
    }
    for name, width in _VEC_ROWS:
        consts[_VEC_ROW[name], :width] = f(vec_vals[name]).reshape(-1)
    a1w = np.repeat(f(raw['g_gn1_w']).reshape(DIMGROUP, 1, L), NG, axis=1
                    ).reshape(DIMGROUP * NG, L)
    a1b = np.repeat(f(raw['g_gn1_b']).reshape(DIMGROUP, 1, L), NG, axis=1
                    ).reshape(DIMGROUP * NG, L)
    put(consts, _F32_TILES, 'a1w', a1w)
    put(consts, _F32_TILES, 'a1b', a1b)
    put(consts, _F32_TILES, 'gb4', np.tile(f(raw['g_c4_b']).reshape(CIO2, 1), (1, NG)))
    put(consts, _F32_TILES, 'glnw', np.tile(f(raw['g_ln_w']).reshape(CIO2, 1), (1, NG)))
    put(consts, _F32_TILES, 'glnb', np.tile(f(raw['g_ln_b']).reshape(CIO2, 1), (1, NG)))

    # ---- slab 2: bf16 small MXU matrices --------------------------------------
    mats = np.zeros(_MATS_SHAPE, np.float32)
    put(mats, _MAT_TILES, 'm_h', _group_avg(H, DIMGROUP))
    put(mats, _MAT_TILES, 'm_c', _group_avg(CIO1, DIMGROUP))
    put(mats, _MAT_TILES, 'r_avg', _group_avg(2 * BL, L))
    put(mats, _MAT_TILES, 'gw4', f(raw['g_c4_w']))
    put(mats, _MAT_TILES, 'vw4', f(raw['v_c4_w']).T)
    sel = np.zeros((DIMGROUP * NG, 2 * CIO1), np.float32)
    for d in range(DIMGROUP):
        for b in range(B):
            for g in range(G1):
                sel[d * NG + b * G1 + g, b * CIO1 + g * DIMGROUP + d] = 1.0
    put(mats, _MAT_TILES, 'sel', sel)

    # ---- slab 3: bf16 fused block-diagonal [gate | value] conv weights --------
    wbig = np.zeros(_WBIG_SHAPE, np.float32)
    w1 = np.zeros((DIMGROUP * L + CIO1, 2 * H), np.float32)
    w1[0:DIMGROUP * L, 0:H] = f(raw['g_c1_w']).T
    w1[DIMGROUP * L:, H:] = f(raw['v_c1_w']).T
    w2 = np.zeros((2 * H, 2 * H), np.float32)
    w2[0:H, 0:H] = _np_block_diag(f(raw['g_c2_w'])).T
    w2[H:, H:] = _np_block_diag(f(raw['v_c2_w'])).T
    w3 = np.zeros((2 * H, 2 * H), np.float32)
    w3[0:H, 0:H] = _np_block_diag(f(raw['g_c3_w'])).T
    w3[H:, H:] = _np_block_diag(f(raw['v_c3_w'])).T
    put(wbig, _WBIG_TILES, 'w1big', w1)
    put(wbig, _WBIG_TILES, 'w2big', w2)
    put(wbig, _WBIG_TILES, 'w3big', w3)

    return (jnp.asarray(consts),
            jnp.asarray(mats, dtype=_BF16),
            jnp.asarray(wbig, dtype=_BF16))


# ----------------------- plain-JAX f32 reference (for check) -------------------
def _group_norm_ncl(x, num_groups, w, b):
    n, c, l = x.shape
    xg = x.reshape(n, num_groups, -1)
    mu = xg.mean(axis=-1, keepdims=True)
    var = jnp.maximum((xg * xg).mean(axis=-1, keepdims=True) - mu * mu, 0.0)
    xn = ((xg - mu) * lax.rsqrt(var + _EPS)).reshape(n, c, l)
    return xn * w[None, :, None] + b[None, :, None]


def _conv1x1_ncl(x, w, b):
    return jnp.einsum('ncl,oc->nol', x, jnp.asarray(w)) + jnp.asarray(b)[None, :, None]


def reference_forward(x, raw, depth):
    w2g = jnp.asarray(_np_block_diag(np.asarray(raw['g_c2_w'], np.float32)))
    w3g = jnp.asarray(_np_block_diag(np.asarray(raw['g_c3_w'], np.float32)))
    w2v = jnp.asarray(_np_block_diag(np.asarray(raw['v_c2_w'], np.float32)))
    w3v = jnp.asarray(_np_block_diag(np.asarray(raw['v_c3_w'], np.float32)))
    xx = x
    for _ in range(depth):
        # gate branch
        z = xx.reshape(-1, DIMGROUP * L, 1)
        h = _group_norm_ncl(z, DIMGROUP, raw['g_gn1_w'], raw['g_gn1_b'])
        h = _conv1x1_ncl(_gelu(h), raw['g_c1_w'], raw['g_c1_b'])
        h = _group_norm_ncl(h, H // DIMGROUP, raw['g_gn2_w'], raw['g_gn2_b'])
        h = _conv1x1_ncl(_gelu(h), w2g, raw['g_c2_b'])
        h = _group_norm_ncl(h, H // DIMGROUP, raw['g_gn3_w'], raw['g_gn3_b'])
        h = _conv1x1_ncl(_gelu(h), w3g, raw['g_c3_b'])
        h = _group_norm_ncl(h, H // DIMGROUP, raw['g_gn4_w'], raw['g_gn4_b'])
        h = _conv1x1_ncl(_gelu(h), raw['g_c4_w'], raw['g_c4_b'])        # (NG, CIO2, 1)
        mu = h.mean(axis=(1, 2), keepdims=True)
        var = jnp.maximum((h * h).mean(axis=(1, 2), keepdims=True) - mu * mu, 0.0)
        h = (h - mu) * lax.rsqrt(var + _EPS)
        h = h * raw['g_ln_w'][None, :, None] + raw['g_ln_b'][None, :, None]
        g = jnp.exp(h).reshape(B, G1, 1, L)
        # value branch
        v = _group_norm_ncl(xx, G1, raw['v_gn1_w'], raw['v_gn1_b'])
        v = _conv1x1_ncl(_gelu(v), raw['v_c1_w'], raw['v_c1_b'])
        v = _group_norm_ncl(v, H // DIMGROUP, raw['v_gn2_w'], raw['v_gn2_b'])
        v = _conv1x1_ncl(_gelu(v), w2v, raw['v_c2_b'])
        v = _group_norm_ncl(v, H // DIMGROUP, raw['v_gn3_w'], raw['v_gn3_b'])
        v = _conv1x1_ncl(_gelu(v), w3v, raw['v_c3_b'])
        v = _group_norm_ncl(v, H // DIMGROUP, raw['v_gn4_w'], raw['v_gn4_b'])
        v = _conv1x1_ncl(_gelu(v), raw['v_c4_w'], raw['v_c4_b'])        # (B, CIO1, L)
        v = (v.reshape(B, G1, -1) * raw['rez_w0'][None, :, None]
             ).reshape(B, G1, DIMGROUP, L)
        xx = xx + (g * v).reshape(B, CIO1, L)
    return xx


# ------------------------------------ main -------------------------------------
if __name__ == "__main__":
    key = jax.random.PRNGKey(0)
    kp, kx = jax.random.split(key)
    raw = init_raw_params(kp)
    kparams = pack_kernel_params(raw)
    x = jax.random.normal(kx, (B, CIO1, L), _F32)

    out = jax.block_until_ready(resmixer_forward(x, kparams, DEPTH))
    assert out.shape == (B, CIO1, L)
    assert bool(jnp.all(jnp.isfinite(out)))

    # The kernel runs its matmuls with bf16 operands (f32 accumulation); the
    # gate's exp(LayerNorm(.)) amplifies that rounding at the tails, so the
    # check against the plain-f32 reference uses max-abs + mean-abs bounds
    # sized for bf16 mixed precision over `DEPTH` residual steps.
    ref = reference_forward(x, raw, DEPTH)
    err = jnp.abs(out - ref)
    max_err = float(jnp.max(err))
    mean_err = float(jnp.mean(err))
    assert max_err < 2.5e-1, f"max |kernel - reference| too large: {max_err}"
    assert mean_err < 2.5e-2, f"mean |kernel - reference| too large: {mean_err}"
    print("KERNEL_OK")
</pallas_src>

<mosaic_0001>
module attributes {stable_mosaic.version = 11 : i64} {
  func.func @_resmixer_kernel(%arg0: memref<16x16xf32, #tpu.memory_space<vmem>>, %arg1: memref<64x128xf32, #tpu.memory_space<vmem>>, %arg2: memref<304x128xbf16, #tpu.memory_space<vmem>>, %arg3: memref<560x256xbf16, #tpu.memory_space<vmem>>, %arg4: memref<16x16xf32, #tpu.memory_space<vmem>>) attributes {dimension_semantics = [], scalar_prefetch = 0 : i64, scratch_operands = 0 : i64, tpu.core_type = #tpu.core_type<tc>} {
    %c0 = arith.constant 0 : index
    %c0_0 = arith.constant 0 : index
    %0 = vector.load %arg0[%c0, %c0_0] : memref<16x16xf32, #tpu.memory_space<vmem>>, vector<16x16xf32>
    %1 = vector.extract_strided_slice %0 {offsets = [0, 0], sizes = [8, 16], strides = [1, 1]} : vector<16x16xf32> to vector<8x16xf32>
    %2 = vector.extract_strided_slice %0 {offsets = [8, 0], sizes = [8, 16], strides = [1, 1]} : vector<16x16xf32> to vector<8x16xf32>
    %3 = tpu.concatenate %1, %2 in 1 : vector<8x16xf32>, vector<8x16xf32> -> vector<8x32xf32>
    %c144 = arith.constant 144 : index
    %c0_1 = arith.constant 0 : index
    %4 = vector.load %arg2[%c144, %c0_1] : memref<304x128xbf16, #tpu.memory_space<vmem>>, vector<32x32xbf16>
    %5 = arith.truncf %3 : vector<8x32xf32> to vector<8x32xbf16>
    %cst = arith.constant dense<0.000000e+00> : vector<32x8xf32>
    %6 = tpu.matmul %4, %5, %cst {dimension_numbers = #tpu.dot_dimension_numbers<[1], [1], [0], [0], [0, 0, 1, 0], [], []>} : vector<32x32xbf16>, vector<8x32xbf16>, vector<32x8xf32> -> vector<32x8xf32>
    %cst_2 = arith.constant dense<0.000000e+00> : vector<32xf32>
    %7 = vector.multi_reduction <add>, %6, %cst_2 [1] : vector<32x8xf32> to vector<32xf32>
    %8 = vector.shape_cast %7 : vector<32xf32> to vector<32x1xf32>
    %cst_3 = arith.constant 8.000000e+00 : f32
    %9 = vector.broadcast %cst_3 : f32 to vector<32x1xf32>
    %10 = arith.divf %8, %9 : vector<32x1xf32>
    %11 = arith.mulf %6, %6 : vector<32x8xf32>
    %cst_4 = arith.constant dense<0.000000e+00> : vector<32xf32>
    %12 = vector.multi_reduction <add>, %11, %cst_4 [1] : vector<32x8xf32> to vector<32xf32>
    %13 = vector.shape_cast %12 : vector<32xf32> to vector<32x1xf32>
    %cst_5 = arith.constant 8.000000e+00 : f32
    %14 = vector.broadcast %cst_5 : f32 to vector<32x1xf32>
    %15 = arith.divf %13, %14 : vector<32x1xf32>
    %16 = arith.mulf %10, %10 : vector<32x1xf32>
    %17 = arith.subf %15, %16 : vector<32x1xf32>
    %cst_6 = arith.constant 0.000000e+00 : f32
    %18 = vector.broadcast %cst_6 : f32 to vector<32x1xf32>
    %19 = arith.maximumf %17, %18 : vector<32x1xf32>
    %20 = vector.broadcast %10 : vector<32x1xf32> to vector<32x8xf32>
    %21 = arith.subf %6, %20 : vector<32x8xf32>
    %cst_7 = arith.constant 9.99999974E-6 : f32
    %22 = vector.broadcast %cst_7 : f32 to vector<32x1xf32>
    %23 = arith.addf %19, %22 : vector<32x1xf32>
    %24 = math.rsqrt %23 : vector<32x1xf32>
    %25 = vector.broadcast %24 : vector<32x1xf32> to vector<32x8xf32>
    %26 = arith.mulf %21, %25 : vector<32x8xf32>
    %c32 = arith.constant 32 : index
    %c0_8 = arith.constant 0 : index
    %27 = vector.load %arg1[%c32, %c0_8] : memref<64x128xf32, #tpu.memory_space<vmem>>, vector<32x8xf32>
    %28 = arith.mulf %26, %27 : vector<32x8xf32>
    %c32_9 = arith.constant 32 : index
    %c8 = arith.constant 8 : index
    %29 = vector.load %arg1[%c32_9, %c8] : memref<64x128xf32, #tpu.memory_space<vmem>>, vector<32x8xf32>
    %30 = arith.addf %28, %29 : vector<32x8xf32>
    %cst_10 = arith.constant 5.000000e-01 : f32
    %31 = vector.broadcast %cst_10 : f32 to vector<32x8xf32>
    %32 = arith.mulf %31, %30 : vector<32x8xf32>
    %cst_11 = arith.constant 4.471500e-02 : f32
    %33 = vector.broadcast %cst_11 : f32 to vector<32x8xf32>
    %34 = arith.mulf %33, %30 : vector<32x8xf32>
    %35 = arith.mulf %34, %30 : vector<32x8xf32>
    %36 = arith.mulf %35, %30 : vector<32x8xf32>
    %37 = arith.addf %30, %36 : vector<32x8xf32>
    %cst_12 = arith.constant 0.797884583 : f32
    %38 = vector.broadcast %cst_12 : f32 to vector<32x8xf32>
    %39 = arith.mulf %38, %37 : vector<32x8xf32>
    %40 = math.tanh %39 : vector<32x8xf32>
    %cst_13 = arith.constant 1.000000e+00 : f32
    %41 = vector.broadcast %cst_13 : f32 to vector<32x8xf32>
    %42 = arith.addf %41, %40 : vector<32x8xf32>
    %43 = arith.mulf %32, %42 : vector<32x8xf32>
    %44 = vector.extract_strided_slice %43 {offsets = [0, 0], sizes = [8, 8], strides = [1, 1]} : vector<32x8xf32> to vector<8x8xf32>
    %45 = vector.extract_strided_slice %43 {offsets = [8, 0], sizes = [8, 8], strides = [1, 1]} : vector<32x8xf32> to vector<8x8xf32>
    %46 = vector.extract_strided_slice %43 {offsets = [16, 0], sizes = [8, 8], strides = [1, 1]} : vector<32x8xf32> to vector<8x8xf32>
    %47 = vector.extract_strided_slice %43 {offsets = [24, 0], sizes = [8, 8], strides = [1, 1]} : vector<32x8xf32> to vector<8x8xf32>
    %48 = tpu.concatenate %44, %45, %46, %47 in 1 : vector<8x8xf32>, vector<8x8xf32>, vector<8x8xf32>, vector<8x8xf32> -> vector<8x32xf32>
    %49 = arith.mulf %0, %0 : vector<16x16xf32>
    %50 = tpu.concatenate %0, %49 in 0 : vector<16x16xf32>, vector<16x16xf32> -> vector<32x16xf32>
    %c144_14 = arith.constant 144 : index
    %c32_15 = arith.constant 32 : index
    %51 = vector.load %arg2[%c144_14, %c32_15] : memref<304x128xbf16, #tpu.memory_space<vmem>>, vector<32x32xbf16>
    %52 = arith.truncf %50 : vector<32x16xf32> to vector<32x16xbf16>
    %cst_16 = arith.constant dense<0.000000e+00> : vector<32x16xf32>
    %53 = tpu.matmul %51, %52, %cst_16 {dimension_numbers = #tpu.dot_dimension_numbers<[1], [0], [0], [1], [0, 0, 1, 1], [], []>} : vector<32x32xbf16>, vector<32x16xbf16>, vector<32x16xf32> -> vector<32x16xf32>
    %54 = arith.truncf %53 : vector<32x16xf32> to vector<32x16xbf16>
    %c144_17 = arith.constant 144 : index
    %c64 = arith.constant 64 : index
    %55 = vector.load %arg2[%c144_17, %c64] : memref<304x128xbf16, #tpu.memory_space<vmem>>, vector<16x16xbf16>
    %cst_18 = arith.constant dense<0.000000e+00> : vector<32x16xf32>
    %56 = tpu.matmul %54, %55, %cst_18 {dimension_numbers = #tpu.dot_dimension_numbers<[1], [0], [0], [1], [0, 0, 1, 1], [], []>} : vector<32x16xbf16>, vector<16x16xbf16>, vector<32x16xf32> -> vector<32x16xf32>
    %57 = vector.extract_strided_slice %56 {offsets = [0, 0], sizes = [16, 16], strides = [1, 1]} : vector<32x16xf32> to vector<16x16xf32>
    %58 = vector.extract_strided_slice %56 {offsets = [16, 0], sizes = [16, 16], strides = [1, 1]} : vector<32x16xf32> to vector<16x16xf32>
    %59 = arith.mulf %57, %57 : vector<16x16xf32>
    %60 = arith.subf %58, %59 : vector<16x16xf32>
    %cst_19 = arith.constant 0.000000e+00 : f32
    %61 = vector.broadcast %cst_19 : f32 to vector<16x16xf32>
    %62 = arith.maximumf %60, %61 : vector<16x16xf32>
    %63 = arith.subf %0, %57 : vector<16x16xf32>
    %cst_20 = arith.constant 9.99999974E-6 : f32
    %64 = vector.broadcast %cst_20 : f32 to vector<16x16xf32>
    %65 = arith.addf %62, %64 : vector<16x16xf32>
    %66 = math.rsqrt %65 : vector<16x16xf32>
    %67 = arith.mulf %63, %66 : vector<16x16xf32>
    %c9 = arith.constant 9 : index
    %c0_21 = arith.constant 0 : index
    %68 = vector.load %arg1[%c9, %c0_21] : memref<64x128xf32, #tpu.memory_space<vmem>>, vector<1x16xf32>
    %69 = vector.broadcast %68 : vector<1x16xf32> to vector<16x16xf32>
    %70 = arith.mulf %67, %69 : vector<16x16xf32>
    %c10 = arith.constant 10 : index
    %c0_22 = arith.constant 0 : index
    %71 = vector.load %arg1[%c10, %c0_22] : memref<64x128xf32, #tpu.memory_space<vmem>>, vector<1x16xf32>
    %72 = vector.broadcast %71 : vector<1x16xf32> to vector<16x16xf32>
    %73 = arith.addf %70, %72 : vector<16x16xf32>
    %cst_23 = arith.constant 5.000000e-01 : f32
    %74 = vector.broadcast %cst_23 : f32 to vector<16x16xf32>
    %75 = arith.mulf %74, %73 : vector<16x16xf32>
    %cst_24 = arith.constant 4.471500e-02 : f32
    %76 = vector.broadcast %cst_24 : f32 to vector<16x16xf32>
    %77 = arith.mulf %76, %73 : vector<16x16xf32>
    %78 = arith.mulf %77, %73 : vector<16x16xf32>
    %79 = arith.mulf %78, %73 : vector<16x16xf32>
    %80 = arith.addf %73, %79 : vector<16x16xf32>
    %cst_25 = arith.constant 0.797884583 : f32
    %81 = vector.broadcast %cst_25 : f32 to vector<16x16xf32>
    %82 = arith.mulf %81, %80 : vector<16x16xf32>
    %83 = math.tanh %82 : vector<16x16xf32>
    %cst_26 = arith.constant 1.000000e+00 : f32
    %84 = vector.broadcast %cst_26 : f32 to vector<16x16xf32>
    %85 = arith.addf %84, %83 : vector<16x16xf32>
    %86 = arith.mulf %75, %85 : vector<16x16xf32>
    %87 = tpu.concatenate %48, %48 in 0 : vector<8x32xf32>, vector<8x32xf32> -> vector<16x32xf32>
    %88 = tpu.concatenate %87, %86 in 1 : vector<16x32xf32>, vector<16x16xf32> -> vector<16x48xf32>
    %89 = arith.truncf %88 : vector<16x48xf32> to vector<16x48xbf16>
    %c0_27 = arith.constant 0 : index
    %c0_28 = arith.constant 0 : index
    %90 = vector.load %arg3[%c0_27, %c0_28] : memref<560x256xbf16, #tpu.memory_space<vmem>>, vector<48x256xbf16>
    %cst_29 = arith.constant dense<0.000000e+00> : vector<16x256xf32>
    %91 = tpu.matmul %89, %90, %cst_29 {dimension_numbers = #tpu.dot_dimension_numbers<[1], [0], [0], [1], [0, 0, 1, 1], [], []>} : vector<16x48xbf16>, vector<48x256xbf16>, vector<16x256xf32> -> vector<16x256xf32>
    %92 = vector.extract_strided_slice %91 {offsets = [0, 0], sizes = [8, 128], strides = [1, 1]} : vector<16x256xf32> to vector<8x128xf32>
    %93 = vector.extract_strided_slice %91 {offsets = [0, 128], sizes = [16, 128], strides = [1, 1]} : vector<16x256xf32> to vector<16x128xf32>
    %c0_30 = arith.constant 0 : index
    %c0_31 = arith.constant 0 : index
    %94 = vector.load %arg1[%c0_30, %c0_31] : memref<64x128xf32, #tpu.memory_space<vmem>>, vector<1x128xf32>
    %95 = vector.broadcast %94 : vector<1x128xf32> to vector<8x128xf32>
    %96 = arith.addf %92, %95 : vector<8x128xf32>
    %c11 = arith.constant 11 : index
    %c0_32 = arith.constant 0 : index
    %97 = vector.load %arg1[%c11, %c0_32] : memref<64x128xf32, #tpu.memory_space<vmem>>, vector<1x128xf32>
    %98 = vector.broadcast %97 : vector<1x128xf32> to vector<16x128xf32>
    %99 = arith.addf %93, %98 : vector<16x128xf32>
    %c144_33 = arith.constant 144 : index
    %c32_34 = arith.constant 32 : index
    %100 = vector.load %arg2[%c144_33, %c32_34] : memref<304x128xbf16, #tpu.memory_space<vmem>>, vector<32x32xbf16>
    %101 = arith.mulf %99, %99 : vector<16x128xf32>
    %102 = tpu.concatenate %99, %101 in 0 : vector<16x128xf32>, vector<16x128xf32> -> vector<32x128xf32>
    %103 = arith.truncf %102 : vector<32x128xf32> to vector<32x128xbf16>
    %cst_35 = arith.constant dense<0.000000e+00> : vector<32x128xf32>
    %104 = tpu.matmul %100, %103, %cst_35 {dimension_numbers = #tpu.dot_dimension_numbers<[1], [0], [0], [1], [0, 0, 1, 1], [], []>} : vector<32x32xbf16>, vector<32x128xbf16>, vector<32x128xf32> -> vector<32x128xf32>
    %105 = arith.mulf %96, %96 : vector<8x128xf32>
    %106 = tpu.concatenate %96, %105, %104 in 0 : vector<8x128xf32>, vector<8x128xf32>, vector<32x128xf32> -> vector<48x128xf32>
    %107 = arith.truncf %106 : vector<48x128xf32> to vector<48x128xbf16>
    %c0_36 = arith.constant 0 : index
    %c0_37 = arith.constant 0 : index
    %108 = vector.load %arg2[%c0_36, %c0_37] : memref<304x128xbf16, #tpu.memory_space<vmem>>, vector<128x128xbf16>
    %cst_38 = arith.constant dense<0.000000e+00> : vector<48x128xf32>
    %109 = tpu.matmul %107, %108, %cst_38 {dimension_numbers = #tpu.dot_dimension_numbers<[1], [0], [0], [1], [0, 0, 1, 1], [], []>} : vector<48x128xbf16>, vector<128x128xbf16>, vector<48x128xf32> -> vector<48x128xf32>
    %110 = vector.extract_strided_slice %109 {offsets = [0, 0], sizes = [8, 128], strides = [1, 1]} : vector<48x128xf32> to vector<8x128xf32>
    %111 = vector.extract_strided_slice %109 {offsets = [8, 0], sizes = [8, 128], strides = [1, 1]} : vector<48x128xf32> to vector<8x128xf32>
    %112 = arith.mulf %110, %110 : vector<8x128xf32>
    %113 = arith.subf %111, %112 : vector<8x128xf32>
    %cst_39 = arith.constant 0.000000e+00 : f32
    %114 = vector.broadcast %cst_39 : f32 to vector<8x128xf32>
    %115 = arith.maximumf %113, %114 : vector<8x128xf32>
    %116 = vector.extract_strided_slice %109 {offsets = [16, 0], sizes = [16, 128], strides = [1, 1]} : vector<48x128xf32> to vector<16x128xf32>
    %117 = vector.extract_strided_slice %109 {offsets = [32, 0], sizes = [16, 128], strides = [1, 1]} : vector<48x128xf32> to vector<16x128xf32>
    %118 = arith.mulf %116, %116 : vector<16x128xf32>
    %119 = arith.subf %117, %118 : vector<16x128xf32>
    %cst_40 = arith.constant 0.000000e+00 : f32
    %120 = vector.broadcast %cst_40 : f32 to vector<16x128xf32>
    %121 = arith.maximumf %119, %120 : vector<16x128xf32>
    %122 = arith.subf %96, %110 : vector<8x128xf32>
    %cst_41 = arith.constant 9.99999974E-6 : f32
    %123 = vector.broadcast %cst_41 : f32 to vector<8x128xf32>
    %124 = arith.addf %115, %123 : vector<8x128xf32>
    %125 = math.rsqrt %124 : vector<8x128xf32>
    %126 = arith.mulf %122, %125 : vector<8x128xf32>
    %c1 = arith.constant 1 : index
    %c0_42 = arith.constant 0 : index
    %127 = vector.load %arg1[%c1, %c0_42] : memref<64x128xf32, #tpu.memory_space<vmem>>, vector<1x128xf32>
    %128 = vector.broadcast %127 : vector<1x128xf32> to vector<8x128xf32>
    %129 = arith.mulf %126, %128 : vector<8x128xf32>
    %c2 = arith.constant 2 : index
    %c0_43 = arith.constant 0 : index
    %130 = vector.load %arg1[%c2, %c0_43] : memref<64x128xf32, #tpu.memory_space<vmem>>, vector<1x128xf32>
    %131 = vector.broadcast %130 : vector<1x128xf32> to vector<8x128xf32>
    %132 = arith.addf %129, %131 : vector<8x128xf32>
    %cst_44 = arith.constant 5.000000e-01 : f32
    %133 = vector.broadcast %cst_44 : f32 to vector<8x128xf32>
    %134 = arith.mulf %133, %132 : vector<8x128xf32>
    %cst_45 = arith.constant 4.471500e-02 : f32
    %135 = vector.broadcast %cst_45 : f32 to vector<8x128xf32>
    %136 = arith.mulf %135, %132 : vector<8x128xf32>
    %137 = arith.mulf %136, %132 : vector<8x128xf32>
    %138 = arith.mulf %137, %132 : vector<8x128xf32>
    %139 = arith.addf %132, %138 : vector<8x128xf32>
    %cst_46 = arith.constant 0.797884583 : f32
    %140 = vector.broadcast %cst_46 : f32 to vector<8x128xf32>
    %141 = arith.mulf %140, %139 : vector<8x128xf32>
    %142 = math.tanh %141 : vector<8x128xf32>
    %cst_47 = arith.constant 1.000000e+00 : f32
    %143 = vector.broadcast %cst_47 : f32 to vector<8x128xf32>
    %144 = arith.addf %143, %142 : vector<8x128xf32>
    %145 = arith.mulf %134, %144 : vector<8x128xf32>
    %146 = arith.subf %99, %116 : vector<16x128xf32>
    %cst_48 = arith.constant 9.99999974E-6 : f32
    %147 = vector.broadcast %cst_48 : f32 to vector<16x128xf32>
    %148 = arith.addf %121, %147 : vector<16x128xf32>
    %149 = math.rsqrt %148 : vector<16x128xf32>
    %150 = arith.mulf %146, %149 : vector<16x128xf32>
    %c12 = arith.constant 12 : index
    %c0_49 = arith.constant 0 : index
    %151 = vector.load %arg1[%c12, %c0_49] : memref<64x128xf32, #tpu.memory_space<vmem>>, vector<1x128xf32>
    %152 = vector.broadcast %151 : vector<1x128xf32> to vector<16x128xf32>
    %153 = arith.mulf %150, %152 : vector<16x128xf32>
    %c13 = arith.constant 13 : index
    %c0_50 = arith.constant 0 : index
    %154 = vector.load %arg1[%c13, %c0_50] : memref<64x128xf32, #tpu.memory_space<vmem>>, vector<1x128xf32>
    %155 = vector.broadcast %154 : vector<1x128xf32> to vector<16x128xf32>
    %156 = arith.addf %153, %155 : vector<16x128xf32>
    %cst_51 = arith.constant 5.000000e-01 : f32
    %157 = vector.broadcast %cst_51 : f32 to vector<16x128xf32>
    %158 = arith.mulf %157, %156 : vector<16x128xf32>
    %cst_52 = arith.constant 4.471500e-02 : f32
    %159 = vector.broadcast %cst_52 : f32 to vector<16x128xf32>
    %160 = arith.mulf %159, %156 : vector<16x128xf32>
    %161 = arith.mulf %160, %156 : vector<16x128xf32>
    %162 = arith.mulf %161, %156 : vector<16x128xf32>
    %163 = arith.addf %156, %162 : vector<16x128xf32>
    %cst_53 = arith.constant 0.797884583 : f32
    %164 = vector.broadcast %cst_53 : f32 to vector<16x128xf32>
    %165 = arith.mulf %164, %163 : vector<16x128xf32>
    %166 = math.tanh %165 : vector<16x128xf32>
    %cst_54 = arith.constant 1.000000e+00 : f32
    %167 = vector.broadcast %cst_54 : f32 to vector<16x128xf32>
    %168 = arith.addf %167, %166 : vector<16x128xf32>
    %169 = arith.mulf %158, %168 : vector<16x128xf32>
    %170 = tpu.concatenate %145, %145 in 0 : vector<8x128xf32>, vector<8x128xf32> -> vector<16x128xf32>
    %171 = tpu.concatenate %170, %169 in 1 : vector<16x128xf32>, vector<16x128xf32> -> vector<16x256xf32>
    %172 = arith.truncf %171 : vector<16x256xf32> to vector<16x256xbf16>
    %c48 = arith.constant 48 : index
    %c0_55 = arith.constant 0 : index
    %173 = vector.load %arg3[%c48, %c0_55] : memref<560x256xbf16, #tpu.memory_space<vmem>>, vector<256x256xbf16>
    %cst_56 = arith.constant dense<0.000000e+00> : vector<16x256xf32>
    %174 = tpu.matmul %172, %173, %cst_56 {dimension_numbers = #tpu.dot_dimension_numbers<[1], [0], [0], [1], [0, 0, 1, 1], [], []>} : vector<16x256xbf16>, vector<256x256xbf16>, vector<16x256xf32> -> vector<16x256xf32>
    %175 = vector.extract_strided_slice %174 {offsets = [0, 0], sizes = [8, 128], strides = [1, 1]} : vector<16x256xf32> to vector<8x128xf32>
    %176 = vector.extract_strided_slice %174 {offsets = [0, 128], sizes = [16, 128], strides = [1, 1]} : vector<16x256xf32> to vector<16x128xf32>
    %c3 = arith.constant 3 : index
    %c0_57 = arith.constant 0 : index
    %177 = vector.load %arg1[%c3, %c0_57] : memref<64x128xf32, #tpu.memory_space<vmem>>, vector<1x128xf32>
    %178 = vector.broadcast %177 : vector<1x128xf32> to vector<8x128xf32>
    %179 = arith.addf %175, %178 : vector<8x128xf32>
    %c14 = arith.constant 14 : index
    %c0_58 = arith.constant 0 : index
    %180 = vector.load %arg1[%c14, %c0_58] : memref<64x128xf32, #tpu.memory_space<vmem>>, vector<1x128xf32>
    %181 = vector.broadcast %180 : vector<1x128xf32> to vector<16x128xf32>
    %182 = arith.addf %176, %181 : vector<16x128xf32>
    %c144_59 = arith.constant 144 : index
    %c32_60 = arith.constant 32 : index
    %183 = vector.load %arg2[%c144_59, %c32_60] : memref<304x128xbf16, #tpu.memory_space<vmem>>, vector<32x32xbf16>
    %184 = arith.mulf %182, %182 : vector<16x128xf32>
    %185 = tpu.concatenate %182, %184 in 0 : vector<16x128xf32>, vector<16x128xf32> -> vector<32x128xf32>
    %186 = arith.truncf %185 : vector<32x128xf32> to vector<32x128xbf16>
    %cst_61 = arith.constant dense<0.000000e+00> : vector<32x128xf32>
    %187 = tpu.matmul %183, %186, %cst_61 {dimension_numbers = #tpu.dot_dimension_numbers<[1], [0], [0], [1], [0, 0, 1, 1], [], []>} : vector<32x32xbf16>, vector<32x128xbf16>, vector<32x128xf32> -> vector<32x128xf32>
    %188 = arith.mulf %179, %179 : vector<8x128xf32>
    %189 = tpu.concatenate %179, %188, %187 in 0 : vector<8x128xf32>, vector<8x128xf32>, vector<32x128xf32> -> vector<48x128xf32>
    %190 = arith.truncf %189 : vector<48x128xf32> to vector<48x128xbf16>
    %c0_62 = arith.constant 0 : index
    %c0_63 = arith.constant 0 : index
    %191 = vector.load %arg2[%c0_62, %c0_63] : memref<304x128xbf16, #tpu.memory_space<vmem>>, vector<128x128xbf16>
    %cst_64 = arith.constant dense<0.000000e+00> : vector<48x128xf32>
    %192 = tpu.matmul %190, %191, %cst_64 {dimension_numbers = #tpu.dot_dimension_numbers<[1], [0], [0], [1], [0, 0, 1, 1], [], []>} : vector<48x128xbf16>, vector<128x128xbf16>, vector<48x128xf32> -> vector<48x128xf32>
    %193 = vector.extract_strided_slice %192 {offsets = [0, 0], sizes = [8, 128], strides = [1, 1]} : vector<48x128xf32> to vector<8x128xf32>
    %194 = vector.extract_strided_slice %192 {offsets = [8, 0], sizes = [8, 128], strides = [1, 1]} : vector<48x128xf32> to vector<8x128xf32>
    %195 = arith.mulf %193, %193 : vector<8x128xf32>
    %196 = arith.subf %194, %195 : vector<8x128xf32>
    %cst_65 = arith.constant 0.000000e+00 : f32
    %197 = vector.broadcast %cst_65 : f32 to vector<8x128xf32>
    %198 = arith.maximumf %196, %197 : vector<8x128xf32>
    %199 = vector.extract_strided_slice %192 {offsets = [16, 0], sizes = [16, 128], strides = [1, 1]} : vector<48x128xf32> to vector<16x128xf32>
    %200 = vector.extract_strided_slice %192 {offsets = [32, 0], sizes = [16, 128], strides = [1, 1]} : vector<48x128xf32> to vector<16x128xf32>
    %201 = arith.mulf %199, %199 : vector<16x128xf32>
    %202 = arith.subf %200, %201 : vector<16x128xf32>
    %cst_66 = arith.constant 0.000000e+00 : f32
    %203 = vector.broadcast %cst_66 : f32 to vector<16x128xf32>
    %204 = arith.maximumf %202, %203 : vector<16x128xf32>
    %205 = arith.subf %179, %193 : vector<8x128xf32>
    %cst_67 = arith.constant 9.99999974E-6 : f32
    %206 = vector.broadcast %cst_67 : f32 to vector<8x128xf32>
    %207 = arith.addf %198, %206 : vector<8x128xf32>
    %208 = math.rsqrt %207 : vector<8x128xf32>
    %209 = arith.mulf %205, %208 : vector<8x128xf32>
    %c4 = arith.constant 4 : index
    %c0_68 = arith.constant 0 : index
    %210 = vector.load %arg1[%c4, %c0_68] : memref<64x128xf32, #tpu.memory_space<vmem>>, vector<1x128xf32>
    %211 = vector.broadcast %210 : vector<1x128xf32> to vector<8x128xf32>
    %212 = arith.mulf %209, %211 : vector<8x128xf32>
    %c5 = arith.constant 5 : index
    %c0_69 = arith.constant 0 : index
    %213 = vector.load %arg1[%c5, %c0_69] : memref<64x128xf32, #tpu.memory_space<vmem>>, vector<1x128xf32>
    %214 = vector.broadcast %213 : vector<1x128xf32> to vector<8x128xf32>
    %215 = arith.addf %212, %214 : vector<8x128xf32>
    %cst_70 = arith.constant 5.000000e-01 : f32
    %216 = vector.broadcast %cst_70 : f32 to vector<8x128xf32>
    %217 = arith.mulf %216, %215 : vector<8x128xf32>
    %cst_71 = arith.constant 4.471500e-02 : f32
    %218 = vector.broadcast %cst_71 : f32 to vector<8x128xf32>
    %219 = arith.mulf %218, %215 : vector<8x128xf32>
    %220 = arith.mulf %219, %215 : vector<8x128xf32>
    %221 = arith.mulf %220, %215 : vector<8x128xf32>
    %222 = arith.addf %215, %221 : vector<8x128xf32>
    %cst_72 = arith.constant 0.797884583 : f32
    %223 = vector.broadcast %cst_72 : f32 to vector<8x128xf32>
    %224 = arith.mulf %223, %222 : vector<8x128xf32>
    %225 = math.tanh %224 : vector<8x128xf32>
    %cst_73 = arith.constant 1.000000e+00 : f32
    %226 = vector.broadcast %cst_73 : f32 to vector<8x128xf32>
    %227 = arith.addf %226, %225 : vector<8x128xf32>
    %228 = arith.mulf %217, %227 : vector<8x128xf32>
    %229 = arith.subf %182, %199 : vector<16x128xf32>
    %cst_74 = arith.constant 9.99999974E-6 : f32
    %230 = vector.broadcast %cst_74 : f32 to vector<16x128xf32>
    %231 = arith.addf %204, %230 : vector<16x128xf32>
    %232 = math.rsqrt %231 : vector<16x128xf32>
    %233 = arith.mulf %229, %232 : vector<16x128xf32>
    %c15 = arith.constant 15 : index
    %c0_75 = arith.constant 0 : index
    %234 = vector.load %arg1[%c15, %c0_75] : memref<64x128xf32, #tpu.memory_space<vmem>>, vector<1x128xf32>
    %235 = vector.broadcast %234 : vector<1x128xf32> to vector<16x128xf32>
    %236 = arith.mulf %233, %235 : vector<16x128xf32>
    %c16 = arith.constant 16 : index
    %c0_76 = arith.constant 0 : index
    %237 = vector.load %arg1[%c16, %c0_76] : memref<64x128xf32, #tpu.memory_space<vmem>>, vector<1x128xf32>
    %238 = vector.broadcast %237 : vector<1x128xf32> to vector<16x128xf32>
    %239 = arith.addf %236, %238 : vector<16x128xf32>
    %cst_77 = arith.constant 5.000000e-01 : f32
    %240 = vector.broadcast %cst_77 : f32 to vector<16x128xf32>
    %241 = arith.mulf %240, %239 : vector<16x128xf32>
    %cst_78 = arith.constant 4.471500e-02 : f32
    %242 = vector.broadcast %cst_78 : f32 to vector<16x128xf32>
    %243 = arith.mulf %242, %239 : vector<16x128xf32>
    %244 = arith.mulf %243, %239 : vector<16x128xf32>
    %245 = arith.mulf %244, %239 : vector<16x128xf32>
    %246 = arith.addf %239, %245 : vector<16x128xf32>
    %cst_79 = arith.constant 0.797884583 : f32
    %247 = vector.broadcast %cst_79 : f32 to vector<16x128xf32>
    %248 = arith.mulf %247, %246 : vector<16x128xf32>
    %249 = math.tanh %248 : vector<16x128xf32>
    %cst_80 = arith.constant 1.000000e+00 : f32
    %250 = vector.broadcast %cst_80 : f32 to vector<16x128xf32>
    %251 = arith.addf %250, %249 : vector<16x128xf32>
    %252 = arith.mulf %241, %251 : vector<16x128xf32>
    %253 = tpu.concatenate %228, %228 in 0 : vector<8x128xf32>, vector<8x128xf32> -> vector<16x128xf32>
    %254 = tpu.concatenate %253, %252 in 1 : vector<16x128xf32>, vector<16x128xf32> -> vector<16x256xf32>
    %255 = arith.truncf %254 : vector<16x256xf32> to vector<16x256xbf16>
    %c304 = arith.constant 304 : index
    %c0_81 = arith.constant 0 : index
    %256 = vector.load %arg3[%c304, %c0_81] : memref<560x256xbf16, #tpu.memory_space<vmem>>, vector<256x256xbf16>
    %cst_82 = arith.constant dense<0.000000e+00> : vector<16x256xf32>
    %257 = tpu.matmul %255, %256, %cst_82 {dimension_numbers = #tpu.dot_dimension_numbers<[1], [0], [0], [1], [0, 0, 1, 1], [], []>} : vector<16x256xbf16>, vector<256x256xbf16>, vector<16x256xf32> -> vector<16x256xf32>
    %258 = vector.extract_strided_slice %257 {offsets = [0, 0], sizes = [8, 128], strides = [1, 1]} : vector<16x256xf32> to vector<8x128xf32>
    %259 = vector.extract_strided_slice %257 {offsets = [0, 128], sizes = [16, 128], strides = [1, 1]} : vector<16x256xf32> to vector<16x128xf32>
    %c6 = arith.constant 6 : index
    %c0_83 = arith.constant 0 : index
    %260 = vector.load %arg1[%c6, %c0_83] : memref<64x128xf32, #tpu.memory_space<vmem>>, vector<1x128xf32>
    %261 = vector.broadcast %260 : vector<1x128xf32> to vector<8x128xf32>
    %262 = arith.addf %258, %261 : vector<8x128xf32>
    %c17 = arith.constant 17 : index
    %c0_84 = arith.constant 0 : index
    %263 = vector.load %arg1[%c17, %c0_84] : memref<64x128xf32, #tpu.memory_space<vmem>>, vector<1x128xf32>
    %264 = vector.broadcast %263 : vector<1x128xf32> to vector<16x128xf32>
    %265 = arith.addf %259, %264 : vector<16x128xf32>
    %c144_85 = arith.constant 144 : index
    %c32_86 = arith.constant 32 : index
    %266 = vector.load %arg2[%c144_85, %c32_86] : memref<304x128xbf16, #tpu.memory_space<vmem>>, vector<32x32xbf16>
    %267 = arith.mulf %265, %265 : vector<16x128xf32>
    %268 = tpu.concatenate %265, %267 in 0 : vector<16x128xf32>, vector<16x128xf32> -> vector<32x128xf32>
    %269 = arith.truncf %268 : vector<32x128xf32> to vector<32x128xbf16>
    %cst_87 = arith.constant dense<0.000000e+00> : vector<32x128xf32>
    %270 = tpu.matmul %266, %269, %cst_87 {dimension_numbers = #tpu.dot_dimension_numbers<[1], [0], [0], [1], [0, 0, 1, 1], [], []>} : vector<32x32xbf16>, vector<32x128xbf16>, vector<32x128xf32> -> vector<32x128xf32>
    %271 = arith.mulf %262, %262 : vector<8x128xf32>
    %272 = tpu.concatenate %262, %271, %270 in 0 : vector<8x128xf32>, vector<8x128xf32>, vector<32x128xf32> -> vector<48x128xf32>
    %273 = arith.truncf %272 : vector<48x128xf32> to vector<48x128xbf16>
    %c0_88 = arith.constant 0 : index
    %c0_89 = arith.constant 0 : index
    %274 = vector.load %arg2[%c0_88, %c0_89] : memref<304x128xbf16, #tpu.memory_space<vmem>>, vector<128x128xbf16>
    %cst_90 = arith.constant dense<0.000000e+00> : vector<48x128xf32>
    %275 = tpu.matmul %273, %274, %cst_90 {dimension_numbers = #tpu.dot_dimension_numbers<[1], [0], [0], [1], [0, 0, 1, 1], [], []>} : vector<48x128xbf16>, vector<128x128xbf16>, vector<48x128xf32> -> vector<48x128xf32>
    %276 = vector.extract_strided_slice %275 {offsets = [0, 0], sizes = [8, 128], strides = [1, 1]} : vector<48x128xf32> to vector<8x128xf32>
    %277 = vector.extract_strided_slice %275 {offsets = [8, 0], sizes = [8, 128], strides = [1, 1]} : vector<48x128xf32> to vector<8x128xf32>
    %278 = arith.mulf %276, %276 : vector<8x128xf32>
    %279 = arith.subf %277, %278 : vector<8x128xf32>
    %cst_91 = arith.constant 0.000000e+00 : f32
    %280 = vector.broadcast %cst_91 : f32 to vector<8x128xf32>
    %281 = arith.maximumf %279, %280 : vector<8x128xf32>
    %282 = vector.extract_strided_slice %275 {offsets = [16, 0], sizes = [16, 128], strides = [1, 1]} : vector<48x128xf32> to vector<16x128xf32>
    %283 = vector.extract_strided_slice %275 {offsets = [32, 0], sizes = [16, 128], strides = [1, 1]} : vector<48x128xf32> to vector<16x128xf32>
    %284 = arith.mulf %282, %282 : vector<16x128xf32>
    %285 = arith.subf %283, %284 : vector<16x128xf32>
    %cst_92 = arith.constant 0.000000e+00 : f32
    %286 = vector.broadcast %cst_92 : f32 to vector<16x128xf32>
    %287 = arith.maximumf %285, %286 : vector<16x128xf32>
    %288 = arith.subf %262, %276 : vector<8x128xf32>
    %cst_93 = arith.constant 9.99999974E-6 : f32
    %289 = vector.broadcast %cst_93 : f32 to vector<8x128xf32>
    %290 = arith.addf %281, %289 : vector<8x128xf32>
    %291 = math.rsqrt %290 : vector<8x128xf32>
    %292 = arith.mulf %288, %291 : vector<8x128xf32>
    %c7 = arith.constant 7 : index
    %c0_94 = arith.constant 0 : index
    %293 = vector.load %arg1[%c7, %c0_94] : memref<64x128xf32, #tpu.memory_space<vmem>>, vector<1x128xf32>
    %294 = vector.broadcast %293 : vector<1x128xf32> to vector<8x128xf32>
    %295 = arith.mulf %292, %294 : vector<8x128xf32>
    %c8_95 = arith.constant 8 : index
    %c0_96 = arith.constant 0 : index
    %296 = vector.load %arg1[%c8_95, %c0_96] : memref<64x128xf32, #tpu.memory_space<vmem>>, vector<1x128xf32>
    %297 = vector.broadcast %296 : vector<1x128xf32> to vector<8x128xf32>
    %298 = arith.addf %295, %297 : vector<8x128xf32>
    %cst_97 = arith.constant 5.000000e-01 : f32
    %299 = vector.broadcast %cst_97 : f32 to vector<8x128xf32>
    %300 = arith.mulf %299, %298 : vector<8x128xf32>
    %cst_98 = arith.constant 4.471500e-02 : f32
    %301 = vector.broadcast %cst_98 : f32 to vector<8x128xf32>
    %302 = arith.mulf %301, %298 : vector<8x128xf32>
    %303 = arith.mulf %302, %298 : vector<8x128xf32>
    %304 = arith.mulf %303, %298 : vector<8x128xf32>
    %305 = arith.addf %298, %304 : vector<8x128xf32>
    %cst_99 = arith.constant 0.797884583 : f32
    %306 = vector.broadcast %cst_99 : f32 to vector<8x128xf32>
    %307 = arith.mulf %306, %305 : vector<8x128xf32>
    %308 = math.tanh %307 : vector<8x128xf32>
    %cst_100 = arith.constant 1.000000e+00 : f32
    %309 = vector.broadcast %cst_100 : f32 to vector<8x128xf32>
    %310 = arith.addf %309, %308 : vector<8x128xf32>
    %311 = arith.mulf %300, %310 : vector<8x128xf32>
    %312 = arith.subf %265, %282 : vector<16x128xf32>
    %cst_101 = arith.constant 9.99999974E-6 : f32
    %313 = vector.broadcast %cst_101 : f32 to vector<16x128xf32>
    %314 = arith.addf %287, %313 : vector<16x128xf32>
    %315 = math.rsqrt %314 : vector<16x128xf32>
    %316 = arith.mulf %312, %315 : vector<16x128xf32>
    %c18 = arith.constant 18 : index
    %c0_102 = arith.constant 0 : index
    %317 = vector.load %arg1[%c18, %c0_102] : memref<64x128xf32, #tpu.memory_space<vmem>>, vector<1x128xf32>
    %318 = vector.broadcast %317 : vector<1x128xf32> to vector<16x128xf32>
    %319 = arith.mulf %316, %318 : vector<16x128xf32>
    %c19 = arith.constant 19 : index
    %c0_103 = arith.constant 0 : index
    %320 = vector.load %arg1[%c19, %c0_103] : memref<64x128xf32, #tpu.memory_space<vmem>>, vector<1x128xf32>
    %321 = vector.broadcast %320 : vector<1x128xf32> to vector<16x128xf32>
    %322 = arith.addf %319, %321 : vector<16x128xf32>
    %cst_104 = arith.constant 5.000000e-01 : f32
    %323 = vector.broadcast %cst_104 : f32 to vector<16x128xf32>
    %324 = arith.mulf %323, %322 : vector<16x128xf32>
    %cst_105 = arith.constant 4.471500e-02 : f32
    %325 = vector.broadcast %cst_105 : f32 to vector<16x128xf32>
    %326 = arith.mulf %325, %322 : vector<16x128xf32>
    %327 = arith.mulf %326, %322 : vector<16x128xf32>
    %328 = arith.mulf %327, %322 : vector<16x128xf32>
    %329 = arith.addf %322, %328 : vector<16x128xf32>
    %cst_106 = arith.constant 0.797884583 : f32
    %330 = vector.broadcast %cst_106 : f32 to vector<16x128xf32>
    %331 = arith.mulf %330, %329 : vector<16x128xf32>
    %332 = math.tanh %331 : vector<16x128xf32>
    %cst_107 = arith.constant 1.000000e+00 : f32
    %333 = vector.broadcast %cst_107 : f32 to vector<16x128xf32>
    %334 = arith.addf %333, %332 : vector<16x128xf32>
    %335 = arith.mulf %324, %334 : vector<16x128xf32>
    %c128 = arith.constant 128 : index
    %c0_108 = arith.constant 0 : index
    %336 = vector.load %arg2[%c128, %c0_108] : memref<304x128xbf16, #tpu.memory_space<vmem>>, vector<8x128xbf16>
    %337 = arith.truncf %311 : vector<8x128xf32> to vector<8x128xbf16>
    %cst_109 = arith.constant dense<0.000000e+00> : vector<8x8xf32>
    %338 = tpu.matmul %336, %337, %cst_109 {dimension_numbers = #tpu.dot_dimension_numbers<[1], [1], [0], [0], [0, 0, 1, 0], [], []>} : vector<8x128xbf16>, vector<8x128xbf16>, vector<8x8xf32> -> vector<8x8xf32>
    %c32_110 = arith.constant 32 : index
    %c16_111 = arith.constant 16 : index
    %339 = vector.load %arg1[%c32_110, %c16_111] : memref<64x128xf32, #tpu.memory_space<vmem>>, vector<8x8xf32>
    %340 = arith.addf %338, %339 : vector<8x8xf32>
    %341 = arith.mulf %340, %340 : vector<8x8xf32>
    %342 = tpu.concatenate %340, %341 in 1 : vector<8x8xf32>, vector<8x8xf32> -> vector<8x16xf32>
    %cst_112 = arith.constant 1.250000e-01 : bf16
    %343 = vector.broadcast %cst_112 : bf16 to vector<8x8xbf16>
    %344 = arith.truncf %342 : vector<8x16xf32> to vector<8x16xbf16>
    %cst_113 = arith.constant dense<0.000000e+00> : vector<8x16xf32>
    %345 = tpu.matmul %343, %344, %cst_113 {dimension_numbers = #tpu.dot_dimension_numbers<[1], [0], [0], [1], [0, 0, 1, 1], [], []>} : vector<8x8xbf16>, vector<8x16xbf16>, vector<8x16xf32> -> vector<8x16xf32>
    %346 = vector.extract_strided_slice %345 {offsets = [0, 0], sizes = [8, 8], strides = [1, 1]} : vector<8x16xf32> to vector<8x8xf32>
    %347 = vector.extract_strided_slice %345 {offsets = [0, 8], sizes = [8, 8], strides = [1, 1]} : vector<8x16xf32> to vector<8x8xf32>
    %348 = arith.mulf %346, %346 : vector<8x8xf32>
    %349 = arith.subf %347, %348 : vector<8x8xf32>
    %cst_114 = arith.constant 0.000000e+00 : f32
    %350 = vector.broadcast %cst_114 : f32 to vector<8x8xf32>
    %351 = arith.maximumf %349, %350 : vector<8x8xf32>
    %352 = arith.subf %340, %346 : vector<8x8xf32>
    %cst_115 = arith.constant 9.99999974E-6 : f32
    %353 = vector.broadcast %cst_115 : f32 to vector<8x8xf32>
    %354 = arith.addf %351, %353 : vector<8x8xf32>
    %355 = math.rsqrt %354 : vector<8x8xf32>
    %356 = arith.mulf %352, %355 : vector<8x8xf32>
    %c32_116 = arith.constant 32 : index
    %c24 = arith.constant 24 : index
    %357 = vector.load %arg1[%c32_116, %c24] : memref<64x128xf32, #tpu.memory_space<vmem>>, vector<8x8xf32>
    %358 = arith.mulf %356, %357 : vector<8x8xf32>
    %c32_117 = arith.constant 32 : index
    %c32_118 = arith.constant 32 : index
    %359 = vector.load %arg1[%c32_117, %c32_118] : memref<64x128xf32, #tpu.memory_space<vmem>>, vector<8x8xf32>
    %360 = arith.addf %358, %359 : vector<8x8xf32>
    %361 = math.exp %360 : vector<8x8xf32>
    %362 = arith.truncf %335 : vector<16x128xf32> to vector<16x128xbf16>
    %c176 = arith.constant 176 : index
    %c0_119 = arith.constant 0 : index
    %363 = vector.load %arg2[%c176, %c0_119] : memref<304x128xbf16, #tpu.memory_space<vmem>>, vector<128x16xbf16>
    %cst_120 = arith.constant dense<0.000000e+00> : vector<16x16xf32>
    %364 = tpu.matmul %362, %363, %cst_120 {dimension_numbers = #tpu.dot_dimension_numbers<[1], [0], [0], [1], [0, 0, 1, 1], [], []>} : vector<16x128xbf16>, vector<128x16xbf16>, vector<16x16xf32> -> vector<16x16xf32>
    %c20 = arith.constant 20 : index
    %c0_121 = arith.constant 0 : index
    %365 = vector.load %arg1[%c20, %c0_121] : memref<64x128xf32, #tpu.memory_space<vmem>>, vector<1x16xf32>
    %366 = vector.broadcast %365 : vector<1x16xf32> to vector<16x16xf32>
    %367 = arith.addf %364, %366 : vector<16x16xf32>
    %c21 = arith.constant 21 : index
    %c0_122 = arith.constant 0 : index
    %368 = vector.load %arg1[%c21, %c0_122] : memref<64x128xf32, #tpu.memory_space<vmem>>, vector<1x16xf32>
    %369 = vector.broadcast %368 : vector<1x16xf32> to vector<16x16xf32>
    %370 = arith.mulf %367, %369 : vector<16x16xf32>
    %371 = vector.extract_strided_slice %361 {offsets = [0, 0], sizes = [8, 4], strides = [1, 1]} : vector<8x8xf32> to vector<8x4xf32>
    %372 = vector.extract_strided_slice %361 {offsets = [0, 4], sizes = [8, 4], strides = [1, 1]} : vector<8x8xf32> to vector<8x4xf32>
    %373 = tpu.concatenate %371, %372 in 0 : vector<8x4xf32>, vector<8x4xf32> -> vector<16x4xf32>
    %374 = vector.extract_strided_slice %373 {offsets = [0, 0], sizes = [16, 1], strides = [1, 1]} : vector<16x4xf32> to vector<16x1xf32>
    %375 = vector.shape_cast %374 : vector<16x1xf32> to vector<16x1xf32>
    %376 = vector.broadcast %375 : vector<16x1xf32> to vector<16x4xf32>
    %377 = vector.extract_strided_slice %373 {offsets = [0, 1], sizes = [16, 1], strides = [1, 1]} : vector<16x4xf32> to vector<16x1xf32>
    %378 = vector.shape_cast %377 : vector<16x1xf32> to vector<16x1xf32>
    %379 = vector.broadcast %378 : vector<16x1xf32> to vector<16x4xf32>
    %380 = vector.extract_strided_slice %373 {offsets = [0, 2], sizes = [16, 1], strides = [1, 1]} : vector<16x4xf32> to vector<16x1xf32>
    %381 = vector.shape_cast %380 : vector<16x1xf32> to vector<16x1xf32>
    %382 = vector.broadcast %381 : vector<16x1xf32> to vector<16x4xf32>
    %383 = vector.extract_strided_slice %373 {offsets = [0, 3], sizes = [16, 1], strides = [1, 1]} : vector<16x4xf32> to vector<16x1xf32>
    %384 = vector.shape_cast %383 : vector<16x1xf32> to vector<16x1xf32>
    %385 = vector.broadcast %384 : vector<16x1xf32> to vector<16x4xf32>
    %386 = tpu.concatenate %376, %379, %382, %385 in 1 : vector<16x4xf32>, vector<16x4xf32>, vector<16x4xf32>, vector<16x4xf32> -> vector<16x16xf32>
    %387 = arith.mulf %386, %370 : vector<16x16xf32>
    %388 = arith.addf %0, %387 : vector<16x16xf32>
    %389 = vector.extract_strided_slice %388 {offsets = [0, 0], sizes = [8, 16], strides = [1, 1]} : vector<16x16xf32> to vector<8x16xf32>
    %390 = vector.extract_strided_slice %388 {offsets = [8, 0], sizes = [8, 16], strides = [1, 1]} : vector<16x16xf32> to vector<8x16xf32>
    %391 = tpu.concatenate %389, %390 in 1 : vector<8x16xf32>, vector<8x16xf32> -> vector<8x32xf32>
    %c144_123 = arith.constant 144 : index
    %c0_124 = arith.constant 0 : index
    %392 = vector.load %arg2[%c144_123, %c0_124] : memref<304x128xbf16, #tpu.memory_space<vmem>>, vector<32x32xbf16>
    %393 = arith.truncf %391 : vector<8x32xf32> to vector<8x32xbf16>
    %cst_125 = arith.constant dense<0.000000e+00> : vector<32x8xf32>
    %394 = tpu.matmul %392, %393, %cst_125 {dimension_numbers = #tpu.dot_dimension_numbers<[1], [1], [0], [0], [0, 0, 1, 0], [], []>} : vector<32x32xbf16>, vector<8x32xbf16>, vector<32x8xf32> -> vector<32x8xf32>
    %cst_126 = arith.constant dense<0.000000e+00> : vector<32xf32>
    %395 = vector.multi_reduction <add>, %394, %cst_126 [1] : vector<32x8xf32> to vector<32xf32>
    %396 = vector.shape_cast %395 : vector<32xf32> to vector<32x1xf32>
    %cst_127 = arith.constant 8.000000e+00 : f32
    %397 = vector.broadcast %cst_127 : f32 to vector<32x1xf32>
    %398 = arith.divf %396, %397 : vector<32x1xf32>
    %399 = arith.mulf %394, %394 : vector<32x8xf32>
    %cst_128 = arith.constant dense<0.000000e+00> : vector<32xf32>
    %400 = vector.multi_reduction <add>, %399, %cst_128 [1] : vector<32x8xf32> to vector<32xf32>
    %401 = vector.shape_cast %400 : vector<32xf32> to vector<32x1xf32>
    %cst_129 = arith.constant 8.000000e+00 : f32
    %402 = vector.broadcast %cst_129 : f32 to vector<32x1xf32>
    %403 = arith.divf %401, %402 : vector<32x1xf32>
    %404 = arith.mulf %398, %398 : vector<32x1xf32>
    %405 = arith.subf %403, %404 : vector<32x1xf32>
    %cst_130 = arith.constant 0.000000e+00 : f32
    %406 = vector.broadcast %cst_130 : f32 to vector<32x1xf32>
    %407 = arith.maximumf %405, %406 : vector<32x1xf32>
    %408 = vector.broadcast %398 : vector<32x1xf32> to vector<32x8xf32>
    %409 = arith.subf %394, %408 : vector<32x8xf32>
    %cst_131 = arith.constant 9.99999974E-6 : f32
    %410 = vector.broadcast %cst_131 : f32 to vector<32x1xf32>
    %411 = arith.addf %407, %410 : vector<32x1xf32>
    %412 = math.rsqrt %411 : vector<32x1xf32>
    %413 = vector.broadcast %412 : vector<32x1xf32> to vector<32x8xf32>
    %414 = arith.mulf %409, %413 : vector<32x8xf32>
    %c32_132 = arith.constant 32 : index
    %c0_133 = arith.constant 0 : index
    %415 = vector.load %arg1[%c32_132, %c0_133] : memref<64x128xf32, #tpu.memory_space<vmem>>, vector<32x8xf32>
    %416 = arith.mulf %414, %415 : vector<32x8xf32>
    %c32_134 = arith.constant 32 : index
    %c8_135 = arith.constant 8 : index
    %417 = vector.load %arg1[%c32_134, %c8_135] : memref<64x128xf32, #tpu.memory_space<vmem>>, vector<32x8xf32>
    %418 = arith.addf %416, %417 : vector<32x8xf32>
    %cst_136 = arith.constant 5.000000e-01 : f32
    %419 = vector.broadcast %cst_136 : f32 to vector<32x8xf32>
    %420 = arith.mulf %419, %418 : vector<32x8xf32>
    %cst_137 = arith.constant 4.471500e-02 : f32
    %421 = vector.broadcast %cst_137 : f32 to vector<32x8xf32>
    %422 = arith.mulf %421, %418 : vector<32x8xf32>
    %423 = arith.mulf %422, %418 : vector<32x8xf32>
    %424 = arith.mulf %423, %418 : vector<32x8xf32>
    %425 = arith.addf %418, %424 : vector<32x8xf32>
    %cst_138 = arith.constant 0.797884583 : f32
    %426 = vector.broadcast %cst_138 : f32 to vector<32x8xf32>
    %427 = arith.mulf %426, %425 : vector<32x8xf32>
    %428 = math.tanh %427 : vector<32x8xf32>
    %cst_139 = arith.constant 1.000000e+00 : f32
    %429 = vector.broadcast %cst_139 : f32 to vector<32x8xf32>
    %430 = arith.addf %429, %428 : vector<32x8xf32>
    %431 = arith.mulf %420, %430 : vector<32x8xf32>
    %432 = vector.extract_strided_slice %431 {offsets = [0, 0], sizes = [8, 8], strides = [1, 1]} : vector<32x8xf32> to vector<8x8xf32>
    %433 = vector.extract_strided_slice %431 {offsets = [8, 0], sizes = [8, 8], strides = [1, 1]} : vector<32x8xf32> to vector<8x8xf32>
    %434 = vector.extract_strided_slice %431 {offsets = [16, 0], sizes = [8, 8], strides = [1, 1]} : vector<32x8xf32> to vector<8x8xf32>
    %435 = vector.extract_strided_slice %431 {offsets = [24, 0], sizes = [8, 8], strides = [1, 1]} : vector<32x8xf32> to vector<8x8xf32>
    %436 = tpu.concatenate %432, %433, %434, %435 in 1 : vector<8x8xf32>, vector<8x8xf32>, vector<8x8xf32>, vector<8x8xf32> -> vector<8x32xf32>
    %437 = arith.mulf %388, %388 : vector<16x16xf32>
    %438 = tpu.concatenate %388, %437 in 0 : vector<16x16xf32>, vector<16x16xf32> -> vector<32x16xf32>
    %c144_140 = arith.constant 144 : index
    %c32_141 = arith.constant 32 : index
    %439 = vector.load %arg2[%c144_140, %c32_141] : memref<304x128xbf16, #tpu.memory_space<vmem>>, vector<32x32xbf16>
    %440 = arith.truncf %438 : vector<32x16xf32> to vector<32x16xbf16>
    %cst_142 = arith.constant dense<0.000000e+00> : vector<32x16xf32>
    %441 = tpu.matmul %439, %440, %cst_142 {dimension_numbers = #tpu.dot_dimension_numbers<[1], [0], [0], [1], [0, 0, 1, 1], [], []>} : vector<32x32xbf16>, vector<32x16xbf16>, vector<32x16xf32> -> vector<32x16xf32>
    %442 = arith.truncf %441 : vector<32x16xf32> to vector<32x16xbf16>
    %c144_143 = arith.constant 144 : index
    %c64_144 = arith.constant 64 : index
    %443 = vector.load %arg2[%c144_143, %c64_144] : memref<304x128xbf16, #tpu.memory_space<vmem>>, vector<16x16xbf16>
    %cst_145 = arith.constant dense<0.000000e+00> : vector<32x16xf32>
    %444 = tpu.matmul %442, %443, %cst_145 {dimension_numbers = #tpu.dot_dimension_numbers<[1], [0], [0], [1], [0, 0, 1, 1], [], []>} : vector<32x16xbf16>, vector<16x16xbf16>, vector<32x16xf32> -> vector<32x16xf32>
    %445 = vector.extract_strided_slice %444 {offsets = [0, 0], sizes = [16, 16], strides = [1, 1]} : vector<32x16xf32> to vector<16x16xf32>
    %446 = vector.extract_strided_slice %444 {offsets = [16, 0], sizes = [16, 16], strides = [1, 1]} : vector<32x16xf32> to vector<16x16xf32>
    %447 = arith.mulf %445, %445 : vector<16x16xf32>
    %448 = arith.subf %446, %447 : vector<16x16xf32>
    %cst_146 = arith.constant 0.000000e+00 : f32
    %449 = vector.broadcast %cst_146 : f32 to vector<16x16xf32>
    %450 = arith.maximumf %448, %449 : vector<16x16xf32>
    %451 = arith.subf %388, %445 : vector<16x16xf32>
    %cst_147 = arith.constant 9.99999974E-6 : f32
    %452 = vector.broadcast %cst_147 : f32 to vector<16x16xf32>
    %453 = arith.addf %450, %452 : vector<16x16xf32>
    %454 = math.rsqrt %453 : vector<16x16xf32>
    %455 = arith.mulf %451, %454 : vector<16x16xf32>
    %c9_148 = arith.constant 9 : index
    %c0_149 = arith.constant 0 : index
    %456 = vector.load %arg1[%c9_148, %c0_149] : memref<64x128xf32, #tpu.memory_space<vmem>>, vector<1x16xf32>
    %457 = vector.broadcast %456 : vector<1x16xf32> to vector<16x16xf32>
    %458 = arith.mulf %455, %457 : vector<16x16xf32>
    %c10_150 = arith.constant 10 : index
    %c0_151 = arith.constant 0 : index
    %459 = vector.load %arg1[%c10_150, %c0_151] : memref<64x128xf32, #tpu.memory_space<vmem>>, vector<1x16xf32>
    %460 = vector.broadcast %459 : vector<1x16xf32> to vector<16x16xf32>
    %461 = arith.addf %458, %460 : vector<16x16xf32>
    %cst_152 = arith.constant 5.000000e-01 : f32
    %462 = vector.broadcast %cst_152 : f32 to vector<16x16xf32>
    %463 = arith.mulf %462, %461 : vector<16x16xf32>
    %cst_153 = arith.constant 4.471500e-02 : f32
    %464 = vector.broadcast %cst_153 : f32 to vector<16x16xf32>
    %465 = arith.mulf %464, %461 : vector<16x16xf32>
    %466 = arith.mulf %465, %461 : vector<16x16xf32>
    %467 = arith.mulf %466, %461 : vector<16x16xf32>
    %468 = arith.addf %461, %467 : vector<16x16xf32>
    %cst_154 = arith.constant 0.797884583 : f32
    %469 = vector.broadcast %cst_154 : f32 to vector<16x16xf32>
    %470 = arith.mulf %469, %468 : vector<16x16xf32>
    %471 = math.tanh %470 : vector<16x16xf32>
    %cst_155 = arith.constant 1.000000e+00 : f32
    %472 = vector.broadcast %cst_155 : f32 to vector<16x16xf32>
    %473 = arith.addf %472, %471 : vector<16x16xf32>
    %474 = arith.mulf %463, %473 : vector<16x16xf32>
    %475 = tpu.concatenate %436, %436 in 0 : vector<8x32xf32>, vector<8x32xf32> -> vector<16x32xf32>
    %476 = tpu.concatenate %475, %474 in 1 : vector<16x32xf32>, vector<16x16xf32> -> vector<16x48xf32>
    %477 = arith.truncf %476 : vector<16x48xf32> to vector<16x48xbf16>
    %c0_156 = arith.constant 0 : index
    %c0_157 = arith.constant 0 : index
    %478 = vector.load %arg3[%c0_156, %c0_157] : memref<560x256xbf16, #tpu.memory_space<vmem>>, vector<48x256xbf16>
    %cst_158 = arith.constant dense<0.000000e+00> : vector<16x256xf32>
    %479 = tpu.matmul %477, %478, %cst_158 {dimension_numbers = #tpu.dot_dimension_numbers<[1], [0], [0], [1], [0, 0, 1, 1], [], []>} : vector<16x48xbf16>, vector<48x256xbf16>, vector<16x256xf32> -> vector<16x256xf32>
    %480 = vector.extract_strided_slice %479 {offsets = [0, 0], sizes = [8, 128], strides = [1, 1]} : vector<16x256xf32> to vector<8x128xf32>
    %481 = vector.extract_strided_slice %479 {offsets = [0, 128], sizes = [16, 128], strides = [1, 1]} : vector<16x256xf32> to vector<16x128xf32>
    %c0_159 = arith.constant 0 : index
    %c0_160 = arith.constant 0 : index
    %482 = vector.load %arg1[%c0_159, %c0_160] : memref<64x128xf32, #tpu.memory_space<vmem>>, vector<1x128xf32>
    %483 = vector.broadcast %482 : vector<1x128xf32> to vector<8x128xf32>
    %484 = arith.addf %480, %483 : vector<8x128xf32>
    %c11_161 = arith.constant 11 : index
    %c0_162 = arith.constant 0 : index
    %485 = vector.load %arg1[%c11_161, %c0_162] : memref<64x128xf32, #tpu.memory_space<vmem>>, vector<1x128xf32>
    %486 = vector.broadcast %485 : vector<1x128xf32> to vector<16x128xf32>
    %487 = arith.addf %481, %486 : vector<16x128xf32>
    %c144_163 = arith.constant 144 : index
    %c32_164 = arith.constant 32 : index
    %488 = vector.load %arg2[%c144_163, %c32_164] : memref<304x128xbf16, #tpu.memory_space<vmem>>, vector<32x32xbf16>
    %489 = arith.mulf %487, %487 : vector<16x128xf32>
    %490 = tpu.concatenate %487, %489 in 0 : vector<16x128xf32>, vector<16x128xf32> -> vector<32x128xf32>
    %491 = arith.truncf %490 : vector<32x128xf32> to vector<32x128xbf16>
    %cst_165 = arith.constant dense<0.000000e+00> : vector<32x128xf32>
    %492 = tpu.matmul %488, %491, %cst_165 {dimension_numbers = #tpu.dot_dimension_numbers<[1], [0], [0], [1], [0, 0, 1, 1], [], []>} : vector<32x32xbf16>, vector<32x128xbf16>, vector<32x128xf32> -> vector<32x128xf32>
    %493 = arith.mulf %484, %484 : vector<8x128xf32>
    %494 = tpu.concatenate %484, %493, %492 in 0 : vector<8x128xf32>, vector<8x128xf32>, vector<32x128xf32> -> vector<48x128xf32>
    %495 = arith.truncf %494 : vector<48x128xf32> to vector<48x128xbf16>
    %c0_166 = arith.constant 0 : index
    %c0_167 = arith.constant 0 : index
    %496 = vector.load %arg2[%c0_166, %c0_167] : memref<304x128xbf16, #tpu.memory_space<vmem>>, vector<128x128xbf16>
    %cst_168 = arith.constant dense<0.000000e+00> : vector<48x128xf32>
    %497 = tpu.matmul %495, %496, %cst_168 {dimension_numbers = #tpu.dot_dimension_numbers<[1], [0], [0], [1], [0, 0, 1, 1], [], []>} : vector<48x128xbf16>, vector<128x128xbf16>, vector<48x128xf32> -> vector<48x128xf32>
    %498 = vector.extract_strided_slice %497 {offsets = [0, 0], sizes = [8, 128], strides = [1, 1]} : vector<48x128xf32> to vector<8x128xf32>
    %499 = vector.extract_strided_slice %497 {offsets = [8, 0], sizes = [8, 128], strides = [1, 1]} : vector<48x128xf32> to vector<8x128xf32>
    %500 = arith.mulf %498, %498 : vector<8x128xf32>
    %501 = arith.subf %499, %500 : vector<8x128xf32>
    %cst_169 = arith.constant 0.000000e+00 : f32
    %502 = vector.broadcast %cst_169 : f32 to vector<8x128xf32>
    %503 = arith.maximumf %501, %502 : vector<8x128xf32>
    %504 = vector.extract_strided_slice %497 {offsets = [16, 0], sizes = [16, 128], strides = [1, 1]} : vector<48x128xf32> to vector<16x128xf32>
    %505 = vector.extract_strided_slice %497 {offsets = [32, 0], sizes = [16, 128], strides = [1, 1]} : vector<48x128xf32> to vector<16x128xf32>
    %506 = arith.mulf %504, %504 : vector<16x128xf32>
    %507 = arith.subf %505, %506 : vector<16x128xf32>
    %cst_170 = arith.constant 0.000000e+00 : f32
    %508 = vector.broadcast %cst_170 : f32 to vector<16x128xf32>
    %509 = arith.maximumf %507, %508 : vector<16x128xf32>
    %510 = arith.subf %484, %498 : vector<8x128xf32>
    %cst_171 = arith.constant 9.99999974E-6 : f32
    %511 = vector.broadcast %cst_171 : f32 to vector<8x128xf32>
    %512 = arith.addf %503, %511 : vector<8x128xf32>
    %513 = math.rsqrt %512 : vector<8x128xf32>
    %514 = arith.mulf %510, %513 : vector<8x128xf32>
    %c1_172 = arith.constant 1 : index
    %c0_173 = arith.constant 0 : index
    %515 = vector.load %arg1[%c1_172, %c0_173] : memref<64x128xf32, #tpu.memory_space<vmem>>, vector<1x128xf32>
    %516 = vector.broadcast %515 : vector<1x128xf32> to vector<8x128xf32>
    %517 = arith.mulf %514, %516 : vector<8x128xf32>
    %c2_174 = arith.constant 2 : index
    %c0_175 = arith.constant 0 : index
    %518 = vector.load %arg1[%c2_174, %c0_175] : memref<64x128xf32, #tpu.memory_space<vmem>>, vector<1x128xf32>
    %519 = vector.broadcast %518 : vector<1x128xf32> to vector<8x128xf32>
    %520 = arith.addf %517, %519 : vector<8x128xf32>
    %cst_176 = arith.constant 5.000000e-01 : f32
    %521 = vector.broadcast %cst_176 : f32 to vector<8x128xf32>
    %522 = arith.mulf %521, %520 : vector<8x128xf32>
    %cst_177 = arith.constant 4.471500e-02 : f32
    %523 = vector.broadcast %cst_177 : f32 to vector<8x128xf32>
    %524 = arith.mulf %523, %520 : vector<8x128xf32>
    %525 = arith.mulf %524, %520 : vector<8x128xf32>
    %526 = arith.mulf %525, %520 : vector<8x128xf32>
    %527 = arith.addf %520, %526 : vector<8x128xf32>
    %cst_178 = arith.constant 0.797884583 : f32
    %528 = vector.broadcast %cst_178 : f32 to vector<8x128xf32>
    %529 = arith.mulf %528, %527 : vector<8x128xf32>
    %530 = math.tanh %529 : vector<8x128xf32>
    %cst_179 = arith.constant 1.000000e+00 : f32
    %531 = vector.broadcast %cst_179 : f32 to vector<8x128xf32>
    %532 = arith.addf %531, %530 : vector<8x128xf32>
    %533 = arith.mulf %522, %532 : vector<8x128xf32>
    %534 = arith.subf %487, %504 : vector<16x128xf32>
    %cst_180 = arith.constant 9.99999974E-6 : f32
    %535 = vector.broadcast %cst_180 : f32 to vector<16x128xf32>
    %536 = arith.addf %509, %535 : vector<16x128xf32>
    %537 = math.rsqrt %536 : vector<16x128xf32>
    %538 = arith.mulf %534, %537 : vector<16x128xf32>
    %c12_181 = arith.constant 12 : index
    %c0_182 = arith.constant 0 : index
    %539 = vector.load %arg1[%c12_181, %c0_182] : memref<64x128xf32, #tpu.memory_space<vmem>>, vector<1x128xf32>
    %540 = vector.broadcast %539 : vector<1x128xf32> to vector<16x128xf32>
    %541 = arith.mulf %538, %540 : vector<16x128xf32>
    %c13_183 = arith.constant 13 : index
    %c0_184 = arith.constant 0 : index
    %542 = vector.load %arg1[%c13_183, %c0_184] : memref<64x128xf32, #tpu.memory_space<vmem>>, vector<1x128xf32>
    %543 = vector.broadcast %542 : vector<1x128xf32> to vector<16x128xf32>
    %544 = arith.addf %541, %543 : vector<16x128xf32>
    %cst_185 = arith.constant 5.000000e-01 : f32
    %545 = vector.broadcast %cst_185 : f32 to vector<16x128xf32>
    %546 = arith.mulf %545, %544 : vector<16x128xf32>
    %cst_186 = arith.constant 4.471500e-02 : f32
    %547 = vector.broadcast %cst_186 : f32 to vector<16x128xf32>
    %548 = arith.mulf %547, %544 : vector<16x128xf32>
    %549 = arith.mulf %548, %544 : vector<16x128xf32>
    %550 = arith.mulf %549, %544 : vector<16x128xf32>
    %551 = arith.addf %544, %550 : vector<16x128xf32>
    %cst_187 = arith.constant 0.797884583 : f32
    %552 = vector.broadcast %cst_187 : f32 to vector<16x128xf32>
    %553 = arith.mulf %552, %551 : vector<16x128xf32>
    %554 = math.tanh %553 : vector<16x128xf32>
    %cst_188 = arith.constant 1.000000e+00 : f32
    %555 = vector.broadcast %cst_188 : f32 to vector<16x128xf32>
    %556 = arith.addf %555, %554 : vector<16x128xf32>
    %557 = arith.mulf %546, %556 : vector<16x128xf32>
    %558 = tpu.concatenate %533, %533 in 0 : vector<8x128xf32>, vector<8x128xf32> -> vector<16x128xf32>
    %559 = tpu.concatenate %558, %557 in 1 : vector<16x128xf32>, vector<16x128xf32> -> vector<16x256xf32>
    %560 = arith.truncf %559 : vector<16x256xf32> to vector<16x256xbf16>
    %c48_189 = arith.constant 48 : index
    %c0_190 = arith.constant 0 : index
    %561 = vector.load %arg3[%c48_189, %c0_190] : memref<560x256xbf16, #tpu.memory_space<vmem>>, vector<256x256xbf16>
    %cst_191 = arith.constant dense<0.000000e+00> : vector<16x256xf32>
    %562 = tpu.matmul %560, %561, %cst_191 {dimension_numbers = #tpu.dot_dimension_numbers<[1], [0], [0], [1], [0, 0, 1, 1], [], []>} : vector<16x256xbf16>, vector<256x256xbf16>, vector<16x256xf32> -> vector<16x256xf32>
    %563 = vector.extract_strided_slice %562 {offsets = [0, 0], sizes = [8, 128], strides = [1, 1]} : vector<16x256xf32> to vector<8x128xf32>
    %564 = vector.extract_strided_slice %562 {offsets = [0, 128], sizes = [16, 128], strides = [1, 1]} : vector<16x256xf32> to vector<16x128xf32>
    %c3_192 = arith.constant 3 : index
    %c0_193 = arith.constant 0 : index
    %565 = vector.load %arg1[%c3_192, %c0_193] : memref<64x128xf32, #tpu.memory_space<vmem>>, vector<1x128xf32>
    %566 = vector.broadcast %565 : vector<1x128xf32> to vector<8x128xf32>
    %567 = arith.addf %563, %566 : vector<8x128xf32>
    %c14_194 = arith.constant 14 : index
    %c0_195 = arith.constant 0 : index
    %568 = vector.load %arg1[%c14_194, %c0_195] : memref<64x128xf32, #tpu.memory_space<vmem>>, vector<1x128xf32>
    %569 = vector.broadcast %568 : vector<1x128xf32> to vector<16x128xf32>
    %570 = arith.addf %564, %569 : vector<16x128xf32>
    %c144_196 = arith.constant 144 : index
    %c32_197 = arith.constant 32 : index
    %571 = vector.load %arg2[%c144_196, %c32_197] : memref<304x128xbf16, #tpu.memory_space<vmem>>, vector<32x32xbf16>
    %572 = arith.mulf %570, %570 : vector<16x128xf32>
    %573 = tpu.concatenate %570, %572 in 0 : vector<16x128xf32>, vector<16x128xf32> -> vector<32x128xf32>
    %574 = arith.truncf %573 : vector<32x128xf32> to vector<32x128xbf16>
    %cst_198 = arith.constant dense<0.000000e+00> : vector<32x128xf32>
    %575 = tpu.matmul %571, %574, %cst_198 {dimension_numbers = #tpu.dot_dimension_numbers<[1], [0], [0], [1], [0, 0, 1, 1], [], []>} : vector<32x32xbf16>, vector<32x128xbf16>, vector<32x128xf32> -> vector<32x128xf32>
    %576 = arith.mulf %567, %567 : vector<8x128xf32>
    %577 = tpu.concatenate %567, %576, %575 in 0 : vector<8x128xf32>, vector<8x128xf32>, vector<32x128xf32> -> vector<48x128xf32>
    %578 = arith.truncf %577 : vector<48x128xf32> to vector<48x128xbf16>
    %c0_199 = arith.constant 0 : index
    %c0_200 = arith.constant 0 : index
    %579 = vector.load %arg2[%c0_199, %c0_200] : memref<304x128xbf16, #tpu.memory_space<vmem>>, vector<128x128xbf16>
    %cst_201 = arith.constant dense<0.000000e+00> : vector<48x128xf32>
    %580 = tpu.matmul %578, %579, %cst_201 {dimension_numbers = #tpu.dot_dimension_numbers<[1], [0], [0], [1], [0, 0, 1, 1], [], []>} : vector<48x128xbf16>, vector<128x128xbf16>, vector<48x128xf32> -> vector<48x128xf32>
    %581 = vector.extract_strided_slice %580 {offsets = [0, 0], sizes = [8, 128], strides = [1, 1]} : vector<48x128xf32> to vector<8x128xf32>
    %582 = vector.extract_strided_slice %580 {offsets = [8, 0], sizes = [8, 128], strides = [1, 1]} : vector<48x128xf32> to vector<8x128xf32>
    %583 = arith.mulf %581, %581 : vector<8x128xf32>
    %584 = arith.subf %582, %583 : vector<8x128xf32>
    %cst_202 = arith.constant 0.000000e+00 : f32
    %585 = vector.broadcast %cst_202 : f32 to vector<8x128xf32>
    %586 = arith.maximumf %584, %585 : vector<8x128xf32>
    %587 = vector.extract_strided_slice %580 {offsets = [16, 0], sizes = [16, 128], strides = [1, 1]} : vector<48x128xf32> to vector<16x128xf32>
    %588 = vector.extract_strided_slice %580 {offsets = [32, 0], sizes = [16, 128], strides = [1, 1]} : vector<48x128xf32> to vector<16x128xf32>
    %589 = arith.mulf %587, %587 : vector<16x128xf32>
    %590 = arith.subf %588, %589 : vector<16x128xf32>
    %cst_203 = arith.constant 0.000000e+00 : f32
    %591 = vector.broadcast %cst_203 : f32 to vector<16x128xf32>
    %592 = arith.maximumf %590, %591 : vector<16x128xf32>
    %593 = arith.subf %567, %581 : vector<8x128xf32>
    %cst_204 = arith.constant 9.99999974E-6 : f32
    %594 = vector.broadcast %cst_204 : f32 to vector<8x128xf32>
    %595 = arith.addf %586, %594 : vector<8x128xf32>
    %596 = math.rsqrt %595 : vector<8x128xf32>
    %597 = arith.mulf %593, %596 : vector<8x128xf32>
    %c4_205 = arith.constant 4 : index
    %c0_206 = arith.constant 0 : index
    %598 = vector.load %arg1[%c4_205, %c0_206] : memref<64x128xf32, #tpu.memory_space<vmem>>, vector<1x128xf32>
    %599 = vector.broadcast %598 : vector<1x128xf32> to vector<8x128xf32>
    %600 = arith.mulf %597, %599 : vector<8x128xf32>
    %c5_207 = arith.constant 5 : index
    %c0_208 = arith.constant 0 : index
    %601 = vector.load %arg1[%c5_207, %c0_208] : memref<64x128xf32, #tpu.memory_space<vmem>>, vector<1x128xf32>
    %602 = vector.broadcast %601 : vector<1x128xf32> to vector<8x128xf32>
    %603 = arith.addf %600, %602 : vector<8x128xf32>
    %cst_209 = arith.constant 5.000000e-01 : f32
    %604 = vector.broadcast %cst_209 : f32 to vector<8x128xf32>
    %605 = arith.mulf %604, %603 : vector<8x128xf32>
    %cst_210 = arith.constant 4.471500e-02 : f32
    %606 = vector.broadcast %cst_210 : f32 to vector<8x128xf32>
    %607 = arith.mulf %606, %603 : vector<8x128xf32>
    %608 = arith.mulf %607, %603 : vector<8x128xf32>
    %609 = arith.mulf %608, %603 : vector<8x128xf32>
    %610 = arith.addf %603, %609 : vector<8x128xf32>
    %cst_211 = arith.constant 0.797884583 : f32
    %611 = vector.broadcast %cst_211 : f32 to vector<8x128xf32>
    %612 = arith.mulf %611, %610 : vector<8x128xf32>
    %613 = math.tanh %612 : vector<8x128xf32>
    %cst_212 = arith.constant 1.000000e+00 : f32
    %614 = vector.broadcast %cst_212 : f32 to vector<8x128xf32>
    %615 = arith.addf %614, %613 : vector<8x128xf32>
    %616 = arith.mulf %605, %615 : vector<8x128xf32>
    %617 = arith.subf %570, %587 : vector<16x128xf32>
    %cst_213 = arith.constant 9.99999974E-6 : f32
    %618 = vector.broadcast %cst_213 : f32 to vector<16x128xf32>
    %619 = arith.addf %592, %618 : vector<16x128xf32>
    %620 = math.rsqrt %619 : vector<16x128xf32>
    %621 = arith.mulf %617, %620 : vector<16x128xf32>
    %c15_214 = arith.constant 15 : index
    %c0_215 = arith.constant 0 : index
    %622 = vector.load %arg1[%c15_214, %c0_215] : memref<64x128xf32, #tpu.memory_space<vmem>>, vector<1x128xf32>
    %623 = vector.broadcast %622 : vector<1x128xf32> to vector<16x128xf32>
    %624 = arith.mulf %621, %623 : vector<16x128xf32>
    %c16_216 = arith.constant 16 : index
    %c0_217 = arith.constant 0 : index
    %625 = vector.load %arg1[%c16_216, %c0_217] : memref<64x128xf32, #tpu.memory_space<vmem>>, vector<1x128xf32>
    %626 = vector.broadcast %625 : vector<1x128xf32> to vector<16x128xf32>
    %627 = arith.addf %624, %626 : vector<16x128xf32>
    %cst_218 = arith.constant 5.000000e-01 : f32
    %628 = vector.broadcast %cst_218 : f32 to vector<16x128xf32>
    %629 = arith.mulf %628, %627 : vector<16x128xf32>
    %cst_219 = arith.constant 4.471500e-02 : f32
    %630 = vector.broadcast %cst_219 : f32 to vector<16x128xf32>
    %631 = arith.mulf %630, %627 : vector<16x128xf32>
    %632 = arith.mulf %631, %627 : vector<16x128xf32>
    %633 = arith.mulf %632, %627 : vector<16x128xf32>
    %634 = arith.addf %627, %633 : vector<16x128xf32>
    %cst_220 = arith.constant 0.797884583 : f32
    %635 = vector.broadcast %cst_220 : f32 to vector<16x128xf32>
    %636 = arith.mulf %635, %634 : vector<16x128xf32>
    %637 = math.tanh %636 : vector<16x128xf32>
    %cst_221 = arith.constant 1.000000e+00 : f32
    %638 = vector.broadcast %cst_221 : f32 to vector<16x128xf32>
    %639 = arith.addf %638, %637 : vector<16x128xf32>
    %640 = arith.mulf %629, %639 : vector<16x128xf32>
    %641 = tpu.concatenate %616, %616 in 0 : vector<8x128xf32>, vector<8x128xf32> -> vector<16x128xf32>
    %642 = tpu.concatenate %641, %640 in 1 : vector<16x128xf32>, vector<16x128xf32> -> vector<16x256xf32>
    %643 = arith.truncf %642 : vector<16x256xf32> to vector<16x256xbf16>
    %c304_222 = arith.constant 304 : index
    %c0_223 = arith.constant 0 : index
    %644 = vector.load %arg3[%c304_222, %c0_223] : memref<560x256xbf16, #tpu.memory_space<vmem>>, vector<256x256xbf16>
    %cst_224 = arith.constant dense<0.000000e+00> : vector<16x256xf32>
    %645 = tpu.matmul %643, %644, %cst_224 {dimension_numbers = #tpu.dot_dimension_numbers<[1], [0], [0], [1], [0, 0, 1, 1], [], []>} : vector<16x256xbf16>, vector<256x256xbf16>, vector<16x256xf32> -> vector<16x256xf32>
    %646 = vector.extract_strided_slice %645 {offsets = [0, 0], sizes = [8, 128], strides = [1, 1]} : vector<16x256xf32> to vector<8x128xf32>
    %647 = vector.extract_strided_slice %645 {offsets = [0, 128], sizes = [16, 128], strides = [1, 1]} : vector<16x256xf32> to vector<16x128xf32>
    %c6_225 = arith.constant 6 : index
    %c0_226 = arith.constant 0 : index
    %648 = vector.load %arg1[%c6_225, %c0_226] : memref<64x128xf32, #tpu.memory_space<vmem>>, vector<1x128xf32>
    %649 = vector.broadcast %648 : vector<1x128xf32> to vector<8x128xf32>
    %650 = arith.addf %646, %649 : vector<8x128xf32>
    %c17_227 = arith.constant 17 : index
    %c0_228 = arith.constant 0 : index
    %651 = vector.load %arg1[%c17_227, %c0_228] : memref<64x128xf32, #tpu.memory_space<vmem>>, vector<1x128xf32>
    %652 = vector.broadcast %651 : vector<1x128xf32> to vector<16x128xf32>
    %653 = arith.addf %647, %652 : vector<16x128xf32>
    %c144_229 = arith.constant 144 : index
    %c32_230 = arith.constant 32 : index
    %654 = vector.load %arg2[%c144_229, %c32_230] : memref<304x128xbf16, #tpu.memory_space<vmem>>, vector<32x32xbf16>
    %655 = arith.mulf %653, %653 : vector<16x128xf32>
    %656 = tpu.concatenate %653, %655 in 0 : vector<16x128xf32>, vector<16x128xf32> -> vector<32x128xf32>
    %657 = arith.truncf %656 : vector<32x128xf32> to vector<32x128xbf16>
    %cst_231 = arith.constant dense<0.000000e+00> : vector<32x128xf32>
    %658 = tpu.matmul %654, %657, %cst_231 {dimension_numbers = #tpu.dot_dimension_numbers<[1], [0], [0], [1], [0, 0, 1, 1], [], []>} : vector<32x32xbf16>, vector<32x128xbf16>, vector<32x128xf32> -> vector<32x128xf32>
    %659 = arith.mulf %650, %650 : vector<8x128xf32>
    %660 = tpu.concatenate %650, %659, %658 in 0 : vector<8x128xf32>, vector<8x128xf32>, vector<32x128xf32> -> vector<48x128xf32>
    %661 = arith.truncf %660 : vector<48x128xf32> to vector<48x128xbf16>
    %c0_232 = arith.constant 0 : index
    %c0_233 = arith.constant 0 : index
    %662 = vector.load %arg2[%c0_232, %c0_233] : memref<304x128xbf16, #tpu.memory_space<vmem>>, vector<128x128xbf16>
    %cst_234 = arith.constant dense<0.000000e+00> : vector<48x128xf32>
    %663 = tpu.matmul %661, %662, %cst_234 {dimension_numbers = #tpu.dot_dimension_numbers<[1], [0], [0], [1], [0, 0, 1, 1], [], []>} : vector<48x128xbf16>, vector<128x128xbf16>, vector<48x128xf32> -> vector<48x128xf32>
    %664 = vector.extract_strided_slice %663 {offsets = [0, 0], sizes = [8, 128], strides = [1, 1]} : vector<48x128xf32> to vector<8x128xf32>
    %665 = vector.extract_strided_slice %663 {offsets = [8, 0], sizes = [8, 128], strides = [1, 1]} : vector<48x128xf32> to vector<8x128xf32>
    %666 = arith.mulf %664, %664 : vector<8x128xf32>
    %667 = arith.subf %665, %666 : vector<8x128xf32>
    %cst_235 = arith.constant 0.000000e+00 : f32
    %668 = vector.broadcast %cst_235 : f32 to vector<8x128xf32>
    %669 = arith.maximumf %667, %668 : vector<8x128xf32>
    %670 = vector.extract_strided_slice %663 {offsets = [16, 0], sizes = [16, 128], strides = [1, 1]} : vector<48x128xf32> to vector<16x128xf32>
    %671 = vector.extract_strided_slice %663 {offsets = [32, 0], sizes = [16, 128], strides = [1, 1]} : vector<48x128xf32> to vector<16x128xf32>
    %672 = arith.mulf %670, %670 : vector<16x128xf32>
    %673 = arith.subf %671, %672 : vector<16x128xf32>
    %cst_236 = arith.constant 0.000000e+00 : f32
    %674 = vector.broadcast %cst_236 : f32 to vector<16x128xf32>
    %675 = arith.maximumf %673, %674 : vector<16x128xf32>
    %676 = arith.subf %650, %664 : vector<8x128xf32>
    %cst_237 = arith.constant 9.99999974E-6 : f32
    %677 = vector.broadcast %cst_237 : f32 to vector<8x128xf32>
    %678 = arith.addf %669, %677 : vector<8x128xf32>
    %679 = math.rsqrt %678 : vector<8x128xf32>
    %680 = arith.mulf %676, %679 : vector<8x128xf32>
    %c7_238 = arith.constant 7 : index
    %c0_239 = arith.constant 0 : index
    %681 = vector.load %arg1[%c7_238, %c0_239] : memref<64x128xf32, #tpu.memory_space<vmem>>, vector<1x128xf32>
    %682 = vector.broadcast %681 : vector<1x128xf32> to vector<8x128xf32>
    %683 = arith.mulf %680, %682 : vector<8x128xf32>
    %c8_240 = arith.constant 8 : index
    %c0_241 = arith.constant 0 : index
    %684 = vector.load %arg1[%c8_240, %c0_241] : memref<64x128xf32, #tpu.memory_space<vmem>>, vector<1x128xf32>
    %685 = vector.broadcast %684 : vector<1x128xf32> to vector<8x128xf32>
    %686 = arith.addf %683, %685 : vector<8x128xf32>
    %cst_242 = arith.constant 5.000000e-01 : f32
    %687 = vector.broadcast %cst_242 : f32 to vector<8x128xf32>
    %688 = arith.mulf %687, %686 : vector<8x128xf32>
    %cst_243 = arith.constant 4.471500e-02 : f32
    %689 = vector.broadcast %cst_243 : f32 to vector<8x128xf32>
    %690 = arith.mulf %689, %686 : vector<8x128xf32>
    %691 = arith.mulf %690, %686 : vector<8x128xf32>
    %692 = arith.mulf %691, %686 : vector<8x128xf32>
    %693 = arith.addf %686, %692 : vector<8x128xf32>
    %cst_244 = arith.constant 0.797884583 : f32
    %694 = vector.broadcast %cst_244 : f32 to vector<8x128xf32>
    %695 = arith.mulf %694, %693 : vector<8x128xf32>
    %696 = math.tanh %695 : vector<8x128xf32>
    %cst_245 = arith.constant 1.000000e+00 : f32
    %697 = vector.broadcast %cst_245 : f32 to vector<8x128xf32>
    %698 = arith.addf %697, %696 : vector<8x128xf32>
    %699 = arith.mulf %688, %698 : vector<8x128xf32>
    %700 = arith.subf %653, %670 : vector<16x128xf32>
    %cst_246 = arith.constant 9.99999974E-6 : f32
    %701 = vector.broadcast %cst_246 : f32 to vector<16x128xf32>
    %702 = arith.addf %675, %701 : vector<16x128xf32>
    %703 = math.rsqrt %702 : vector<16x128xf32>
    %704 = arith.mulf %700, %703 : vector<16x128xf32>
    %c18_247 = arith.constant 18 : index
    %c0_248 = arith.constant 0 : index
    %705 = vector.load %arg1[%c18_247, %c0_248] : memref<64x128xf32, #tpu.memory_space<vmem>>, vector<1x128xf32>
    %706 = vector.broadcast %705 : vector<1x128xf32> to vector<16x128xf32>
    %707 = arith.mulf %704, %706 : vector<16x128xf32>
    %c19_249 = arith.constant 19 : index
    %c0_250 = arith.constant 0 : index
    %708 = vector.load %arg1[%c19_249, %c0_250] : memref<64x128xf32, #tpu.memory_space<vmem>>, vector<1x128xf32>
    %709 = vector.broadcast %708 : vector<1x128xf32> to vector<16x128xf32>
    %710 = arith.addf %707, %709 : vector<16x128xf32>
    %cst_251 = arith.constant 5.000000e-01 : f32
    %711 = vector.broadcast %cst_251 : f32 to vector<16x128xf32>
    %712 = arith.mulf %711, %710 : vector<16x128xf32>
    %cst_252 = arith.constant 4.471500e-02 : f32
    %713 = vector.broadcast %cst_252 : f32 to vector<16x128xf32>
    %714 = arith.mulf %713, %710 : vector<16x128xf32>
    %715 = arith.mulf %714, %710 : vector<16x128xf32>
    %716 = arith.mulf %715, %710 : vector<16x128xf32>
    %717 = arith.addf %710, %716 : vector<16x128xf32>
    %cst_253 = arith.constant 0.797884583 : f32
    %718 = vector.broadcast %cst_253 : f32 to vector<16x128xf32>
    %719 = arith.mulf %718, %717 : vector<16x128xf32>
    %720 = math.tanh %719 : vector<16x128xf32>
    %cst_254 = arith.constant 1.000000e+00 : f32
    %721 = vector.broadcast %cst_254 : f32 to vector<16x128xf32>
    %722 = arith.addf %721, %720 : vector<16x128xf32>
    %723 = arith.mulf %712, %722 : vector<16x128xf32>
    %c128_255 = arith.constant 128 : index
    %c0_256 = arith.constant 0 : index
    %724 = vector.load %arg2[%c128_255, %c0_256] : memref<304x128xbf16, #tpu.memory_space<vmem>>, vector<8x128xbf16>
    %725 = arith.truncf %699 : vector<8x128xf32> to vector<8x128xbf16>
    %cst_257 = arith.constant dense<0.000000e+00> : vector<8x8xf32>
    %726 = tpu.matmul %724, %725, %cst_257 {dimension_numbers = #tpu.dot_dimension_numbers<[1], [1], [0], [0], [0, 0, 1, 0], [], []>} : vector<8x128xbf16>, vector<8x128xbf16>, vector<8x8xf32> -> vector<8x8xf32>
    %c32_258 = arith.constant 32 : index
    %c16_259 = arith.constant 16 : index
    %727 = vector.load %arg1[%c32_258, %c16_259] : memref<64x128xf32, #tpu.memory_space<vmem>>, vector<8x8xf32>
    %728 = arith.addf %726, %727 : vector<8x8xf32>
    %729 = arith.mulf %728, %728 : vector<8x8xf32>
    %730 = tpu.concatenate %728, %729 in 1 : vector<8x8xf32>, vector<8x8xf32> -> vector<8x16xf32>
    %cst_260 = arith.constant 1.250000e-01 : bf16
    %731 = vector.broadcast %cst_260 : bf16 to vector<8x8xbf16>
    %732 = arith.truncf %730 : vector<8x16xf32> to vector<8x16xbf16>
    %cst_261 = arith.constant dense<0.000000e+00> : vector<8x16xf32>
    %733 = tpu.matmul %731, %732, %cst_261 {dimension_numbers = #tpu.dot_dimension_numbers<[1], [0], [0], [1], [0, 0, 1, 1], [], []>} : vector<8x8xbf16>, vector<8x16xbf16>, vector<8x16xf32> -> vector<8x16xf32>
    %734 = vector.extract_strided_slice %733 {offsets = [0, 0], sizes = [8, 8], strides = [1, 1]} : vector<8x16xf32> to vector<8x8xf32>
    %735 = vector.extract_strided_slice %733 {offsets = [0, 8], sizes = [8, 8], strides = [1, 1]} : vector<8x16xf32> to vector<8x8xf32>
    %736 = arith.mulf %734, %734 : vector<8x8xf32>
    %737 = arith.subf %735, %736 : vector<8x8xf32>
    %cst_262 = arith.constant 0.000000e+00 : f32
    %738 = vector.broadcast %cst_262 : f32 to vector<8x8xf32>
    %739 = arith.maximumf %737, %738 : vector<8x8xf32>
    %740 = arith.subf %728, %734 : vector<8x8xf32>
    %cst_263 = arith.constant 9.99999974E-6 : f32
    %741 = vector.broadcast %cst_263 : f32 to vector<8x8xf32>
    %742 = arith.addf %739, %741 : vector<8x8xf32>
    %743 = math.rsqrt %742 : vector<8x8xf32>
    %744 = arith.mulf %740, %743 : vector<8x8xf32>
    %c32_264 = arith.constant 32 : index
    %c24_265 = arith.constant 24 : index
    %745 = vector.load %arg1[%c32_264, %c24_265] : memref<64x128xf32, #tpu.memory_space<vmem>>, vector<8x8xf32>
    %746 = arith.mulf %744, %745 : vector<8x8xf32>
    %c32_266 = arith.constant 32 : index
    %c32_267 = arith.constant 32 : index
    %747 = vector.load %arg1[%c32_266, %c32_267] : memref<64x128xf32, #tpu.memory_space<vmem>>, vector<8x8xf32>
    %748 = arith.addf %746, %747 : vector<8x8xf32>
    %749 = math.exp %748 : vector<8x8xf32>
    %750 = arith.truncf %723 : vector<16x128xf32> to vector<16x128xbf16>
    %c176_268 = arith.constant 176 : index
    %c0_269 = arith.constant 0 : index
    %751 = vector.load %arg2[%c176_268, %c0_269] : memref<304x128xbf16, #tpu.memory_space<vmem>>, vector<128x16xbf16>
    %cst_270 = arith.constant dense<0.000000e+00> : vector<16x16xf32>
    %752 = tpu.matmul %750, %751, %cst_270 {dimension_numbers = #tpu.dot_dimension_numbers<[1], [0], [0], [1], [0, 0, 1, 1], [], []>} : vector<16x128xbf16>, vector<128x16xbf16>, vector<16x16xf32> -> vector<16x16xf32>
    %c20_271 = arith.constant 20 : index
    %c0_272 = arith.constant 0 : index
    %753 = vector.load %arg1[%c20_271, %c0_272] : memref<64x128xf32, #tpu.memory_space<vmem>>, vector<1x16xf32>
    %754 = vector.broadcast %753 : vector<1x16xf32> to vector<16x16xf32>
    %755 = arith.addf %752, %754 : vector<16x16xf32>
    %c21_273 = arith.constant 21 : index
    %c0_274 = arith.constant 0 : index
    %756 = vector.load %arg1[%c21_273, %c0_274] : memref<64x128xf32, #tpu.memory_space<vmem>>, vector<1x16xf32>
    %757 = vector.broadcast %756 : vector<1x16xf32> to vector<16x16xf32>
    %758 = arith.mulf %755, %757 : vector<16x16xf32>
    %759 = vector.extract_strided_slice %749 {offsets = [0, 0], sizes = [8, 4], strides = [1, 1]} : vector<8x8xf32> to vector<8x4xf32>
    %760 = vector.extract_strided_slice %749 {offsets = [0, 4], sizes = [8, 4], strides = [1, 1]} : vector<8x8xf32> to vector<8x4xf32>
    %761 = tpu.concatenate %759, %760 in 0 : vector<8x4xf32>, vector<8x4xf32> -> vector<16x4xf32>
    %762 = vector.extract_strided_slice %761 {offsets = [0, 0], sizes = [16, 1], strides = [1, 1]} : vector<16x4xf32> to vector<16x1xf32>
    %763 = vector.shape_cast %762 : vector<16x1xf32> to vector<16x1xf32>
    %764 = vector.broadcast %763 : vector<16x1xf32> to vector<16x4xf32>
    %765 = vector.extract_strided_slice %761 {offsets = [0, 1], sizes = [16, 1], strides = [1, 1]} : vector<16x4xf32> to vector<16x1xf32>
    %766 = vector.shape_cast %765 : vector<16x1xf32> to vector<16x1xf32>
    %767 = vector.broadcast %766 : vector<16x1xf32> to vector<16x4xf32>
    %768 = vector.extract_strided_slice %761 {offsets = [0, 2], sizes = [16, 1], strides = [1, 1]} : vector<16x4xf32> to vector<16x1xf32>
    %769 = vector.shape_cast %768 : vector<16x1xf32> to vector<16x1xf32>
    %770 = vector.broadcast %769 : vector<16x1xf32> to vector<16x4xf32>
    %771 = vector.extract_strided_slice %761 {offsets = [0, 3], sizes = [16, 1], strides = [1, 1]} : vector<16x4xf32> to vector<16x1xf32>
    %772 = vector.shape_cast %771 : vector<16x1xf32> to vector<16x1xf32>
    %773 = vector.broadcast %772 : vector<16x1xf32> to vector<16x4xf32>
    %774 = tpu.concatenate %764, %767, %770, %773 in 1 : vector<16x4xf32>, vector<16x4xf32>, vector<16x4xf32>, vector<16x4xf32> -> vector<16x16xf32>
    %775 = arith.mulf %774, %758 : vector<16x16xf32>
    %776 = arith.addf %388, %775 : vector<16x16xf32>
    %777 = vector.extract_strided_slice %776 {offsets = [0, 0], sizes = [8, 16], strides = [1, 1]} : vector<16x16xf32> to vector<8x16xf32>
    %778 = vector.extract_strided_slice %776 {offsets = [8, 0], sizes = [8, 16], strides = [1, 1]} : vector<16x16xf32> to vector<8x16xf32>
    %779 = tpu.concatenate %777, %778 in 1 : vector<8x16xf32>, vector<8x16xf32> -> vector<8x32xf32>
    %c144_275 = arith.constant 144 : index
    %c0_276 = arith.constant 0 : index
    %780 = vector.load %arg2[%c144_275, %c0_276] : memref<304x128xbf16, #tpu.memory_space<vmem>>, vector<32x32xbf16>
    %781 = arith.truncf %779 : vector<8x32xf32> to vector<8x32xbf16>
    %cst_277 = arith.constant dense<0.000000e+00> : vector<32x8xf32>
    %782 = tpu.matmul %780, %781, %cst_277 {dimension_numbers = #tpu.dot_dimension_numbers<[1], [1], [0], [0], [0, 0, 1, 0], [], []>} : vector<32x32xbf16>, vector<8x32xbf16>, vector<32x8xf32> -> vector<32x8xf32>
    %cst_278 = arith.constant dense<0.000000e+00> : vector<32xf32>
    %783 = vector.multi_reduction <add>, %782, %cst_278 [1] : vector<32x8xf32> to vector<32xf32>
    %784 = vector.shape_cast %783 : vector<32xf32> to vector<32x1xf32>
    %cst_279 = arith.constant 8.000000e+00 : f32
    %785 = vector.broadcast %cst_279 : f32 to vector<32x1xf32>
    %786 = arith.divf %784, %785 : vector<32x1xf32>
    %787 = arith.mulf %782, %782 : vector<32x8xf32>
    %cst_280 = arith.constant dense<0.000000e+00> : vector<32xf32>
    %788 = vector.multi_reduction <add>, %787, %cst_280 [1] : vector<32x8xf32> to vector<32xf32>
    %789 = vector.shape_cast %788 : vector<32xf32> to vector<32x1xf32>
    %cst_281 = arith.constant 8.000000e+00 : f32
    %790 = vector.broadcast %cst_281 : f32 to vector<32x1xf32>
    %791 = arith.divf %789, %790 : vector<32x1xf32>
    %792 = arith.mulf %786, %786 : vector<32x1xf32>
    %793 = arith.subf %791, %792 : vector<32x1xf32>
    %cst_282 = arith.constant 0.000000e+00 : f32
    %794 = vector.broadcast %cst_282 : f32 to vector<32x1xf32>
    %795 = arith.maximumf %793, %794 : vector<32x1xf32>
    %796 = vector.broadcast %786 : vector<32x1xf32> to vector<32x8xf32>
    %797 = arith.subf %782, %796 : vector<32x8xf32>
    %cst_283 = arith.constant 9.99999974E-6 : f32
    %798 = vector.broadcast %cst_283 : f32 to vector<32x1xf32>
    %799 = arith.addf %795, %798 : vector<32x1xf32>
    %800 = math.rsqrt %799 : vector<32x1xf32>
    %801 = vector.broadcast %800 : vector<32x1xf32> to vector<32x8xf32>
    %802 = arith.mulf %797, %801 : vector<32x8xf32>
    %c32_284 = arith.constant 32 : index
    %c0_285 = arith.constant 0 : index
    %803 = vector.load %arg1[%c32_284, %c0_285] : memref<64x128xf32, #tpu.memory_space<vmem>>, vector<32x8xf32>
    %804 = arith.mulf %802, %803 : vector<32x8xf32>
    %c32_286 = arith.constant 32 : index
    %c8_287 = arith.constant 8 : index
    %805 = vector.load %arg1[%c32_286, %c8_287] : memref<64x128xf32, #tpu.memory_space<vmem>>, vector<32x8xf32>
    %806 = arith.addf %804, %805 : vector<32x8xf32>
    %cst_288 = arith.constant 5.000000e-01 : f32
    %807 = vector.broadcast %cst_288 : f32 to vector<32x8xf32>
    %808 = arith.mulf %807, %806 : vector<32x8xf32>
    %cst_289 = arith.constant 4.471500e-02 : f32
    %809 = vector.broadcast %cst_289 : f32 to vector<32x8xf32>
    %810 = arith.mulf %809, %806 : vector<32x8xf32>
    %811 = arith.mulf %810, %806 : vector<32x8xf32>
    %812 = arith.mulf %811, %806 : vector<32x8xf32>
    %813 = arith.addf %806, %812 : vector<32x8xf32>
    %cst_290 = arith.constant 0.797884583 : f32
    %814 = vector.broadcast %cst_290 : f32 to vector<32x8xf32>
    %815 = arith.mulf %814, %813 : vector<32x8xf32>
    %816 = math.tanh %815 : vector<32x8xf32>
    %cst_291 = arith.constant 1.000000e+00 : f32
    %817 = vector.broadcast %cst_291 : f32 to vector<32x8xf32>
    %818 = arith.addf %817, %816 : vector<32x8xf32>
    %819 = arith.mulf %808, %818 : vector<32x8xf32>
    %820 = vector.extract_strided_slice %819 {offsets = [0, 0], sizes = [8, 8], strides = [1, 1]} : vector<32x8xf32> to vector<8x8xf32>
    %821 = vector.extract_strided_slice %819 {offsets = [8, 0], sizes = [8, 8], strides = [1, 1]} : vector<32x8xf32> to vector<8x8xf32>
    %822 = vector.extract_strided_slice %819 {offsets = [16, 0], sizes = [8, 8], strides = [1, 1]} : vector<32x8xf32> to vector<8x8xf32>
    %823 = vector.extract_strided_slice %819 {offsets = [24, 0], sizes = [8, 8], strides = [1, 1]} : vector<32x8xf32> to vector<8x8xf32>
    %824 = tpu.concatenate %820, %821, %822, %823 in 1 : vector<8x8xf32>, vector<8x8xf32>, vector<8x8xf32>, vector<8x8xf32> -> vector<8x32xf32>
    %825 = arith.mulf %776, %776 : vector<16x16xf32>
    %826 = tpu.concatenate %776, %825 in 0 : vector<16x16xf32>, vector<16x16xf32> -> vector<32x16xf32>
    %c144_292 = arith.constant 144 : index
    %c32_293 = arith.constant 32 : index
    %827 = vector.load %arg2[%c144_292, %c32_293] : memref<304x128xbf16, #tpu.memory_space<vmem>>, vector<32x32xbf16>
    %828 = arith.truncf %826 : vector<32x16xf32> to vector<32x16xbf16>
    %cst_294 = arith.constant dense<0.000000e+00> : vector<32x16xf32>
    %829 = tpu.matmul %827, %828, %cst_294 {dimension_numbers = #tpu.dot_dimension_numbers<[1], [0], [0], [1], [0, 0, 1, 1], [], []>} : vector<32x32xbf16>, vector<32x16xbf16>, vector<32x16xf32> -> vector<32x16xf32>
    %830 = arith.truncf %829 : vector<32x16xf32> to vector<32x16xbf16>
    %c144_295 = arith.constant 144 : index
    %c64_296 = arith.constant 64 : index
    %831 = vector.load %arg2[%c144_295, %c64_296] : memref<304x128xbf16, #tpu.memory_space<vmem>>, vector<16x16xbf16>
    %cst_297 = arith.constant dense<0.000000e+00> : vector<32x16xf32>
    %832 = tpu.matmul %830, %831, %cst_297 {dimension_numbers = #tpu.dot_dimension_numbers<[1], [0], [0], [1], [0, 0, 1, 1], [], []>} : vector<32x16xbf16>, vector<16x16xbf16>, vector<32x16xf32> -> vector<32x16xf32>
    %833 = vector.extract_strided_slice %832 {offsets = [0, 0], sizes = [16, 16], strides = [1, 1]} : vector<32x16xf32> to vector<16x16xf32>
    %834 = vector.extract_strided_slice %832 {offsets = [16, 0], sizes = [16, 16], strides = [1, 1]} : vector<32x16xf32> to vector<16x16xf32>
    %835 = arith.mulf %833, %833 : vector<16x16xf32>
    %836 = arith.subf %834, %835 : vector<16x16xf32>
    %cst_298 = arith.constant 0.000000e+00 : f32
    %837 = vector.broadcast %cst_298 : f32 to vector<16x16xf32>
    %838 = arith.maximumf %836, %837 : vector<16x16xf32>
    %839 = arith.subf %776, %833 : vector<16x16xf32>
    %cst_299 = arith.constant 9.99999974E-6 : f32
    %840 = vector.broadcast %cst_299 : f32 to vector<16x16xf32>
    %841 = arith.addf %838, %840 : vector<16x16xf32>
    %842 = math.rsqrt %841 : vector<16x16xf32>
    %843 = arith.mulf %839, %842 : vector<16x16xf32>
    %c9_300 = arith.constant 9 : index
    %c0_301 = arith.constant 0 : index
    %844 = vector.load %arg1[%c9_300, %c0_301] : memref<64x128xf32, #tpu.memory_space<vmem>>, vector<1x16xf32>
    %845 = vector.broadcast %844 : vector<1x16xf32> to vector<16x16xf32>
    %846 = arith.mulf %843, %845 : vector<16x16xf32>
    %c10_302 = arith.constant 10 : index
    %c0_303 = arith.constant 0 : index
    %847 = vector.load %arg1[%c10_302, %c0_303] : memref<64x128xf32, #tpu.memory_space<vmem>>, vector<1x16xf32>
    %848 = vector.broadcast %847 : vector<1x16xf32> to vector<16x16xf32>
    %849 = arith.addf %846, %848 : vector<16x16xf32>
    %cst_304 = arith.constant 5.000000e-01 : f32
    %850 = vector.broadcast %cst_304 : f32 to vector<16x16xf32>
    %851 = arith.mulf %850, %849 : vector<16x16xf32>
    %cst_305 = arith.constant 4.471500e-02 : f32
    %852 = vector.broadcast %cst_305 : f32 to vector<16x16xf32>
    %853 = arith.mulf %852, %849 : vector<16x16xf32>
    %854 = arith.mulf %853, %849 : vector<16x16xf32>
    %855 = arith.mulf %854, %849 : vector<16x16xf32>
    %856 = arith.addf %849, %855 : vector<16x16xf32>
    %cst_306 = arith.constant 0.797884583 : f32
    %857 = vector.broadcast %cst_306 : f32 to vector<16x16xf32>
    %858 = arith.mulf %857, %856 : vector<16x16xf32>
    %859 = math.tanh %858 : vector<16x16xf32>
    %cst_307 = arith.constant 1.000000e+00 : f32
    %860 = vector.broadcast %cst_307 : f32 to vector<16x16xf32>
    %861 = arith.addf %860, %859 : vector<16x16xf32>
    %862 = arith.mulf %851, %861 : vector<16x16xf32>
    %863 = tpu.concatenate %824, %824 in 0 : vector<8x32xf32>, vector<8x32xf32> -> vector<16x32xf32>
    %864 = tpu.concatenate %863, %862 in 1 : vector<16x32xf32>, vector<16x16xf32> -> vector<16x48xf32>
    %865 = arith.truncf %864 : vector<16x48xf32> to vector<16x48xbf16>
    %c0_308 = arith.constant 0 : index
    %c0_309 = arith.constant 0 : index
    %866 = vector.load %arg3[%c0_308, %c0_309] : memref<560x256xbf16, #tpu.memory_space<vmem>>, vector<48x256xbf16>
    %cst_310 = arith.constant dense<0.000000e+00> : vector<16x256xf32>
    %867 = tpu.matmul %865, %866, %cst_310 {dimension_numbers = #tpu.dot_dimension_numbers<[1], [0], [0], [1], [0, 0, 1, 1], [], []>} : vector<16x48xbf16>, vector<48x256xbf16>, vector<16x256xf32> -> vector<16x256xf32>
    %868 = vector.extract_strided_slice %867 {offsets = [0, 0], sizes = [8, 128], strides = [1, 1]} : vector<16x256xf32> to vector<8x128xf32>
    %869 = vector.extract_strided_slice %867 {offsets = [0, 128], sizes = [16, 128], strides = [1, 1]} : vector<16x256xf32> to vector<16x128xf32>
    %c0_311 = arith.constant 0 : index
    %c0_312 = arith.constant 0 : index
    %870 = vector.load %arg1[%c0_311, %c0_312] : memref<64x128xf32, #tpu.memory_space<vmem>>, vector<1x128xf32>
    %871 = vector.broadcast %870 : vector<1x128xf32> to vector<8x128xf32>
    %872 = arith.addf %868, %871 : vector<8x128xf32>
    %c11_313 = arith.constant 11 : index
    %c0_314 = arith.constant 0 : index
    %873 = vector.load %arg1[%c11_313, %c0_314] : memref<64x128xf32, #tpu.memory_space<vmem>>, vector<1x128xf32>
    %874 = vector.broadcast %873 : vector<1x128xf32> to vector<16x128xf32>
    %875 = arith.addf %869, %874 : vector<16x128xf32>
    %c144_315 = arith.constant 144 : index
    %c32_316 = arith.constant 32 : index
    %876 = vector.load %arg2[%c144_315, %c32_316] : memref<304x128xbf16, #tpu.memory_space<vmem>>, vector<32x32xbf16>
    %877 = arith.mulf %875, %875 : vector<16x128xf32>
    %878 = tpu.concatenate %875, %877 in 0 : vector<16x128xf32>, vector<16x128xf32> -> vector<32x128xf32>
    %879 = arith.truncf %878 : vector<32x128xf32> to vector<32x128xbf16>
    %cst_317 = arith.constant dense<0.000000e+00> : vector<32x128xf32>
    %880 = tpu.matmul %876, %879, %cst_317 {dimension_numbers = #tpu.dot_dimension_numbers<[1], [0], [0], [1], [0, 0, 1, 1], [], []>} : vector<32x32xbf16>, vector<32x128xbf16>, vector<32x128xf32> -> vector<32x128xf32>
    %881 = arith.mulf %872, %872 : vector<8x128xf32>
    %882 = tpu.concatenate %872, %881, %880 in 0 : vector<8x128xf32>, vector<8x128xf32>, vector<32x128xf32> -> vector<48x128xf32>
    %883 = arith.truncf %882 : vector<48x128xf32> to vector<48x128xbf16>
    %c0_318 = arith.constant 0 : index
    %c0_319 = arith.constant 0 : index
    %884 = vector.load %arg2[%c0_318, %c0_319] : memref<304x128xbf16, #tpu.memory_space<vmem>>, vector<128x128xbf16>
    %cst_320 = arith.constant dense<0.000000e+00> : vector<48x128xf32>
    %885 = tpu.matmul %883, %884, %cst_320 {dimension_numbers = #tpu.dot_dimension_numbers<[1], [0], [0], [1], [0, 0, 1, 1], [], []>} : vector<48x128xbf16>, vector<128x128xbf16>, vector<48x128xf32> -> vector<48x128xf32>
    %886 = vector.extract_strided_slice %885 {offsets = [0, 0], sizes = [8, 128], strides = [1, 1]} : vector<48x128xf32> to vector<8x128xf32>
    %887 = vector.extract_strided_slice %885 {offsets = [8, 0], sizes = [8, 128], strides = [1, 1]} : vector<48x128xf32> to vector<8x128xf32>
    %888 = arith.mulf %886, %886 : vector<8x128xf32>
    %889 = arith.subf %887, %888 : vector<8x128xf32>
    %cst_321 = arith.constant 0.000000e+00 : f32
    %890 = vector.broadcast %cst_321 : f32 to vector<8x128xf32>
    %891 = arith.maximumf %889, %890 : vector<8x128xf32>
    %892 = vector.extract_strided_slice %885 {offsets = [16, 0], sizes = [16, 128], strides = [1, 1]} : vector<48x128xf32> to vector<16x128xf32>
    %893 = vector.extract_strided_slice %885 {offsets = [32, 0], sizes = [16, 128], strides = [1, 1]} : vector<48x128xf32> to vector<16x128xf32>
    %894 = arith.mulf %892, %892 : vector<16x128xf32>
    %895 = arith.subf %893, %894 : vector<16x128xf32>
    %cst_322 = arith.constant 0.000000e+00 : f32
    %896 = vector.broadcast %cst_322 : f32 to vector<16x128xf32>
    %897 = arith.maximumf %895, %896 : vector<16x128xf32>
    %898 = arith.subf %872, %886 : vector<8x128xf32>
    %cst_323 = arith.constant 9.99999974E-6 : f32
    %899 = vector.broadcast %cst_323 : f32 to vector<8x128xf32>
    %900 = arith.addf %891, %899 : vector<8x128xf32>
    %901 = math.rsqrt %900 : vector<8x128xf32>
    %902 = arith.mulf %898, %901 : vector<8x128xf32>
    %c1_324 = arith.constant 1 : index
    %c0_325 = arith.constant 0 : index
    %903 = vector.load %arg1[%c1_324, %c0_325] : memref<64x128xf32, #tpu.memory_space<vmem>>, vector<1x128xf32>
    %904 = vector.broadcast %903 : vector<1x128xf32> to vector<8x128xf32>
    %905 = arith.mulf %902, %904 : vector<8x128xf32>
    %c2_326 = arith.constant 2 : index
    %c0_327 = arith.constant 0 : index
    %906 = vector.load %arg1[%c2_326, %c0_327] : memref<64x128xf32, #tpu.memory_space<vmem>>, vector<1x128xf32>
    %907 = vector.broadcast %906 : vector<1x128xf32> to vector<8x128xf32>
    %908 = arith.addf %905, %907 : vector<8x128xf32>
    %cst_328 = arith.constant 5.000000e-01 : f32
    %909 = vector.broadcast %cst_328 : f32 to vector<8x128xf32>
    %910 = arith.mulf %909, %908 : vector<8x128xf32>
    %cst_329 = arith.constant 4.471500e-02 : f32
    %911 = vector.broadcast %cst_329 : f32 to vector<8x128xf32>
    %912 = arith.mulf %911, %908 : vector<8x128xf32>
    %913 = arith.mulf %912, %908 : vector<8x128xf32>
    %914 = arith.mulf %913, %908 : vector<8x128xf32>
    %915 = arith.addf %908, %914 : vector<8x128xf32>
    %cst_330 = arith.constant 0.797884583 : f32
    %916 = vector.broadcast %cst_330 : f32 to vector<8x128xf32>
    %917 = arith.mulf %916, %915 : vector<8x128xf32>
    %918 = math.tanh %917 : vector<8x128xf32>
    %cst_331 = arith.constant 1.000000e+00 : f32
    %919 = vector.broadcast %cst_331 : f32 to vector<8x128xf32>
    %920 = arith.addf %919, %918 : vector<8x128xf32>
    %921 = arith.mulf %910, %920 : vector<8x128xf32>
    %922 = arith.subf %875, %892 : vector<16x128xf32>
    %cst_332 = arith.constant 9.99999974E-6 : f32
    %923 = vector.broadcast %cst_332 : f32 to vector<16x128xf32>
    %924 = arith.addf %897, %923 : vector<16x128xf32>
    %925 = math.rsqrt %924 : vector<16x128xf32>
    %926 = arith.mulf %922, %925 : vector<16x128xf32>
    %c12_333 = arith.constant 12 : index
    %c0_334 = arith.constant 0 : index
    %927 = vector.load %arg1[%c12_333, %c0_334] : memref<64x128xf32, #tpu.memory_space<vmem>>, vector<1x128xf32>
    %928 = vector.broadcast %927 : vector<1x128xf32> to vector<16x128xf32>
    %929 = arith.mulf %926, %928 : vector<16x128xf32>
    %c13_335 = arith.constant 13 : index
    %c0_336 = arith.constant 0 : index
    %930 = vector.load %arg1[%c13_335, %c0_336] : memref<64x128xf32, #tpu.memory_space<vmem>>, vector<1x128xf32>
    %931 = vector.broadcast %930 : vector<1x128xf32> to vector<16x128xf32>
    %932 = arith.addf %929, %931 : vector<16x128xf32>
    %cst_337 = arith.constant 5.000000e-01 : f32
    %933 = vector.broadcast %cst_337 : f32 to vector<16x128xf32>
    %934 = arith.mulf %933, %932 : vector<16x128xf32>
    %cst_338 = arith.constant 4.471500e-02 : f32
    %935 = vector.broadcast %cst_338 : f32 to vector<16x128xf32>
    %936 = arith.mulf %935, %932 : vector<16x128xf32>
    %937 = arith.mulf %936, %932 : vector<16x128xf32>
    %938 = arith.mulf %937, %932 : vector<16x128xf32>
    %939 = arith.addf %932, %938 : vector<16x128xf32>
    %cst_339 = arith.constant 0.797884583 : f32
    %940 = vector.broadcast %cst_339 : f32 to vector<16x128xf32>
    %941 = arith.mulf %940, %939 : vector<16x128xf32>
    %942 = math.tanh %941 : vector<16x128xf32>
    %cst_340 = arith.constant 1.000000e+00 : f32
    %943 = vector.broadcast %cst_340 : f32 to vector<16x128xf32>
    %944 = arith.addf %943, %942 : vector<16x128xf32>
    %945 = arith.mulf %934, %944 : vector<16x128xf32>
    %946 = tpu.concatenate %921, %921 in 0 : vector<8x128xf32>, vector<8x128xf32> -> vector<16x128xf32>
    %947 = tpu.concatenate %946, %945 in 1 : vector<16x128xf32>, vector<16x128xf32> -> vector<16x256xf32>
    %948 = arith.truncf %947 : vector<16x256xf32> to vector<16x256xbf16>
    %c48_341 = arith.constant 48 : index
    %c0_342 = arith.constant 0 : index
    %949 = vector.load %arg3[%c48_341, %c0_342] : memref<560x256xbf16, #tpu.memory_space<vmem>>, vector<256x256xbf16>
    %cst_343 = arith.constant dense<0.000000e+00> : vector<16x256xf32>
    %950 = tpu.matmul %948, %949, %cst_343 {dimension_numbers = #tpu.dot_dimension_numbers<[1], [0], [0], [1], [0, 0, 1, 1], [], []>} : vector<16x256xbf16>, vector<256x256xbf16>, vector<16x256xf32> -> vector<16x256xf32>
    %951 = vector.extract_strided_slice %950 {offsets = [0, 0], sizes = [8, 128], strides = [1, 1]} : vector<16x256xf32> to vector<8x128xf32>
    %952 = vector.extract_strided_slice %950 {offsets = [0, 128], sizes = [16, 128], strides = [1, 1]} : vector<16x256xf32> to vector<16x128xf32>
    %c3_344 = arith.constant 3 : index
    %c0_345 = arith.constant 0 : index
    %953 = vector.load %arg1[%c3_344, %c0_345] : memref<64x128xf32, #tpu.memory_space<vmem>>, vector<1x128xf32>
    %954 = vector.broadcast %953 : vector<1x128xf32> to vector<8x128xf32>
    %955 = arith.addf %951, %954 : vector<8x128xf32>
    %c14_346 = arith.constant 14 : index
    %c0_347 = arith.constant 0 : index
    %956 = vector.load %arg1[%c14_346, %c0_347] : memref<64x128xf32, #tpu.memory_space<vmem>>, vector<1x128xf32>
    %957 = vector.broadcast %956 : vector<1x128xf32> to vector<16x128xf32>
    %958 = arith.addf %952, %957 : vector<16x128xf32>
    %c144_348 = arith.constant 144 : index
    %c32_349 = arith.constant 32 : index
    %959 = vector.load %arg2[%c144_348, %c32_349] : memref<304x128xbf16, #tpu.memory_space<vmem>>, vector<32x32xbf16>
    %960 = arith.mulf %958, %958 : vector<16x128xf32>
    %961 = tpu.concatenate %958, %960 in 0 : vector<16x128xf32>, vector<16x128xf32> -> vector<32x128xf32>
    %962 = arith.truncf %961 : vector<32x128xf32> to vector<32x128xbf16>
    %cst_350 = arith.constant dense<0.000000e+00> : vector<32x128xf32>
    %963 = tpu.matmul %959, %962, %cst_350 {dimension_numbers = #tpu.dot_dimension_numbers<[1], [0], [0], [1], [0, 0, 1, 1], [], []>} : vector<32x32xbf16>, vector<32x128xbf16>, vector<32x128xf32> -> vector<32x128xf32>
    %964 = arith.mulf %955, %955 : vector<8x128xf32>
    %965 = tpu.concatenate %955, %964, %963 in 0 : vector<8x128xf32>, vector<8x128xf32>, vector<32x128xf32> -> vector<48x128xf32>
    %966 = arith.truncf %965 : vector<48x128xf32> to vector<48x128xbf16>
    %c0_351 = arith.constant 0 : index
    %c0_352 = arith.constant 0 : index
    %967 = vector.load %arg2[%c0_351, %c0_352] : memref<304x128xbf16, #tpu.memory_space<vmem>>, vector<128x128xbf16>
    %cst_353 = arith.constant dense<0.000000e+00> : vector<48x128xf32>
    %968 = tpu.matmul %966, %967, %cst_353 {dimension_numbers = #tpu.dot_dimension_numbers<[1], [0], [0], [1], [0, 0, 1, 1], [], []>} : vector<48x128xbf16>, vector<128x128xbf16>, vector<48x128xf32> -> vector<48x128xf32>
    %969 = vector.extract_strided_slice %968 {offsets = [0, 0], sizes = [8, 128], strides = [1, 1]} : vector<48x128xf32> to vector<8x128xf32>
    %970 = vector.extract_strided_slice %968 {offsets = [8, 0], sizes = [8, 128], strides = [1, 1]} : vector<48x128xf32> to vector<8x128xf32>
    %971 = arith.mulf %969, %969 : vector<8x128xf32>
    %972 = arith.subf %970, %971 : vector<8x128xf32>
    %cst_354 = arith.constant 0.000000e+00 : f32
    %973 = vector.broadcast %cst_354 : f32 to vector<8x128xf32>
    %974 = arith.maximumf %972, %973 : vector<8x128xf32>
    %975 = vector.extract_strided_slice %968 {offsets = [16, 0], sizes = [16, 128], strides = [1, 1]} : vector<48x128xf32> to vector<16x128xf32>
    %976 = vector.extract_strided_slice %968 {offsets = [32, 0], sizes = [16, 128], strides = [1, 1]} : vector<48x128xf32> to vector<16x128xf32>
    %977 = arith.mulf %975, %975 : vector<16x128xf32>
    %978 = arith.subf %976, %977 : vector<16x128xf32>
    %cst_355 = arith.constant 0.000000e+00 : f32
    %979 = vector.broadcast %cst_355 : f32 to vector<16x128xf32>
    %980 = arith.maximumf %978, %979 : vector<16x128xf32>
    %981 = arith.subf %955, %969 : vector<8x128xf32>
    %cst_356 = arith.constant 9.99999974E-6 : f32
    %982 = vector.broadcast %cst_356 : f32 to vector<8x128xf32>
    %983 = arith.addf %974, %982 : vector<8x128xf32>
    %984 = math.rsqrt %983 : vector<8x128xf32>
    %985 = arith.mulf %981, %984 : vector<8x128xf32>
    %c4_357 = arith.constant 4 : index
    %c0_358 = arith.constant 0 : index
    %986 = vector.load %arg1[%c4_357, %c0_358] : memref<64x128xf32, #tpu.memory_space<vmem>>, vector<1x128xf32>
    %987 = vector.broadcast %986 : vector<1x128xf32> to vector<8x128xf32>
    %988 = arith.mulf %985, %987 : vector<8x128xf32>
    %c5_359 = arith.constant 5 : index
    %c0_360 = arith.constant 0 : index
    %989 = vector.load %arg1[%c5_359, %c0_360] : memref<64x128xf32, #tpu.memory_space<vmem>>, vector<1x128xf32>
    %990 = vector.broadcast %989 : vector<1x128xf32> to vector<8x128xf32>
    %991 = arith.addf %988, %990 : vector<8x128xf32>
    %cst_361 = arith.constant 5.000000e-01 : f32
    %992 = vector.broadcast %cst_361 : f32 to vector<8x128xf32>
    %993 = arith.mulf %992, %991 : vector<8x128xf32>
    %cst_362 = arith.constant 4.471500e-02 : f32
    %994 = vector.broadcast %cst_362 : f32 to vector<8x128xf32>
    %995 = arith.mulf %994, %991 : vector<8x128xf32>
    %996 = arith.mulf %995, %991 : vector<8x128xf32>
    %997 = arith.mulf %996, %991 : vector<8x128xf32>
    %998 = arith.addf %991, %997 : vector<8x128xf32>
    %cst_363 = arith.constant 0.797884583 : f32
    %999 = vector.broadcast %cst_363 : f32 to vector<8x128xf32>
    %1000 = arith.mulf %999, %998 : vector<8x128xf32>
    %1001 = math.tanh %1000 : vector<8x128xf32>
    %cst_364 = arith.constant 1.000000e+00 : f32
    %1002 = vector.broadcast %cst_364 : f32 to vector<8x128xf32>
    %1003 = arith.addf %1002, %1001 : vector<8x128xf32>
    %1004 = arith.mulf %993, %1003 : vector<8x128xf32>
    %1005 = arith.subf %958, %975 : vector<16x128xf32>
    %cst_365 = arith.constant 9.99999974E-6 : f32
    %1006 = vector.broadcast %cst_365 : f32 to vector<16x128xf32>
    %1007 = arith.addf %980, %1006 : vector<16x128xf32>
    %1008 = math.rsqrt %1007 : vector<16x128xf32>
    %1009 = arith.mulf %1005, %1008 : vector<16x128xf32>
    %c15_366 = arith.constant 15 : index
    %c0_367 = arith.constant 0 : index
    %1010 = vector.load %arg1[%c15_366, %c0_367] : memref<64x128xf32, #tpu.memory_space<vmem>>, vector<1x128xf32>
    %1011 = vector.broadcast %1010 : vector<1x128xf32> to vector<16x128xf32>
    %1012 = arith.mulf %1009, %1011 : vector<16x128xf32>
    %c16_368 = arith.constant 16 : index
    %c0_369 = arith.constant 0 : index
    %1013 = vector.load %arg1[%c16_368, %c0_369] : memref<64x128xf32, #tpu.memory_space<vmem>>, vector<1x128xf32>
    %1014 = vector.broadcast %1013 : vector<1x128xf32> to vector<16x128xf32>
    %1015 = arith.addf %1012, %1014 : vector<16x128xf32>
    %cst_370 = arith.constant 5.000000e-01 : f32
    %1016 = vector.broadcast %cst_370 : f32 to vector<16x128xf32>
    %1017 = arith.mulf %1016, %1015 : vector<16x128xf32>
    %cst_371 = arith.constant 4.471500e-02 : f32
    %1018 = vector.broadcast %cst_371 : f32 to vector<16x128xf32>
    %1019 = arith.mulf %1018, %1015 : vector<16x128xf32>
    %1020 = arith.mulf %1019, %1015 : vector<16x128xf32>
    %1021 = arith.mulf %1020, %1015 : vector<16x128xf32>
    %1022 = arith.addf %1015, %1021 : vector<16x128xf32>
    %cst_372 = arith.constant 0.797884583 : f32
    %1023 = vector.broadcast %cst_372 : f32 to vector<16x128xf32>
    %1024 = arith.mulf %1023, %1022 : vector<16x128xf32>
    %1025 = math.tanh %1024 : vector<16x128xf32>
    %cst_373 = arith.constant 1.000000e+00 : f32
    %1026 = vector.broadcast %cst_373 : f32 to vector<16x128xf32>
    %1027 = arith.addf %1026, %1025 : vector<16x128xf32>
    %1028 = arith.mulf %1017, %1027 : vector<16x128xf32>
    %1029 = tpu.concatenate %1004, %1004 in 0 : vector<8x128xf32>, vector<8x128xf32> -> vector<16x128xf32>
    %1030 = tpu.concatenate %1029, %1028 in 1 : vector<16x128xf32>, vector<16x128xf32> -> vector<16x256xf32>
    %1031 = arith.truncf %1030 : vector<16x256xf32> to vector<16x256xbf16>
    %c304_374 = arith.constant 304 : index
    %c0_375 = arith.constant 0 : index
    %1032 = vector.load %arg3[%c304_374, %c0_375] : memref<560x256xbf16, #tpu.memory_space<vmem>>, vector<256x256xbf16>
    %cst_376 = arith.constant dense<0.000000e+00> : vector<16x256xf32>
    %1033 = tpu.matmul %1031, %1032, %cst_376 {dimension_numbers = #tpu.dot_dimension_numbers<[1], [0], [0], [1], [0, 0, 1, 1], [], []>} : vector<16x256xbf16>, vector<256x256xbf16>, vector<16x256xf32> -> vector<16x256xf32>
    %1034 = vector.extract_strided_slice %1033 {offsets = [0, 0], sizes = [8, 128], strides = [1, 1]} : vector<16x256xf32> to vector<8x128xf32>
    %1035 = vector.extract_strided_slice %1033 {offsets = [0, 128], sizes = [16, 128], strides = [1, 1]} : vector<16x256xf32> to vector<16x128xf32>
    %c6_377 = arith.constant 6 : index
    %c0_378 = arith.constant 0 : index
    %1036 = vector.load %arg1[%c6_377, %c0_378] : memref<64x128xf32, #tpu.memory_space<vmem>>, vector<1x128xf32>
    %1037 = vector.broadcast %1036 : vector<1x128xf32> to vector<8x128xf32>
    %1038 = arith.addf %1034, %1037 : vector<8x128xf32>
    %c17_379 = arith.constant 17 : index
    %c0_380 = arith.constant 0 : index
    %1039 = vector.load %arg1[%c17_379, %c0_380] : memref<64x128xf32, #tpu.memory_space<vmem>>, vector<1x128xf32>
    %1040 = vector.broadcast %1039 : vector<1x128xf32> to vector<16x128xf32>
    %1041 = arith.addf %1035, %1040 : vector<16x128xf32>
    %c144_381 = arith.constant 144 : index
    %c32_382 = arith.constant 32 : index
    %1042 = vector.load %arg2[%c144_381, %c32_382] : memref<304x128xbf16, #tpu.memory_space<vmem>>, vector<32x32xbf16>
    %1043 = arith.mulf %1041, %1041 : vector<16x128xf32>
    %1044 = tpu.concatenate %1041, %1043 in 0 : vector<16x128xf32>, vector<16x128xf32> -> vector<32x128xf32>
    %1045 = arith.truncf %1044 : vector<32x128xf32> to vector<32x128xbf16>
    %cst_383 = arith.constant dense<0.000000e+00> : vector<32x128xf32>
    %1046 = tpu.matmul %1042, %1045, %cst_383 {dimension_numbers = #tpu.dot_dimension_numbers<[1], [0], [0], [1], [0, 0, 1, 1], [], []>} : vector<32x32xbf16>, vector<32x128xbf16>, vector<32x128xf32> -> vector<32x128xf32>
    %1047 = arith.mulf %1038, %1038 : vector<8x128xf32>
    %1048 = tpu.concatenate %1038, %1047, %1046 in 0 : vector<8x128xf32>, vector<8x128xf32>, vector<32x128xf32> -> vector<48x128xf32>
    %1049 = arith.truncf %1048 : vector<48x128xf32> to vector<48x128xbf16>
    %c0_384 = arith.constant 0 : index
    %c0_385 = arith.constant 0 : index
    %1050 = vector.load %arg2[%c0_384, %c0_385] : memref<304x128xbf16, #tpu.memory_space<vmem>>, vector<128x128xbf16>
    %cst_386 = arith.constant dense<0.000000e+00> : vector<48x128xf32>
    %1051 = tpu.matmul %1049, %1050, %cst_386 {dimension_numbers = #tpu.dot_dimension_numbers<[1], [0], [0], [1], [0, 0, 1, 1], [], []>} : vector<48x128xbf16>, vector<128x128xbf16>, vector<48x128xf32> -> vector<48x128xf32>
    %1052 = vector.extract_strided_slice %1051 {offsets = [0, 0], sizes = [8, 128], strides = [1, 1]} : vector<48x128xf32> to vector<8x128xf32>
    %1053 = vector.extract_strided_slice %1051 {offsets = [8, 0], sizes = [8, 128], strides = [1, 1]} : vector<48x128xf32> to vector<8x128xf32>
    %1054 = arith.mulf %1052, %1052 : vector<8x128xf32>
    %1055 = arith.subf %1053, %1054 : vector<8x128xf32>
    %cst_387 = arith.constant 0.000000e+00 : f32
    %1056 = vector.broadcast %cst_387 : f32 to vector<8x128xf32>
    %1057 = arith.maximumf %1055, %1056 : vector<8x128xf32>
    %1058 = vector.extract_strided_slice %1051 {offsets = [16, 0], sizes = [16, 128], strides = [1, 1]} : vector<48x128xf32> to vector<16x128xf32>
    %1059 = vector.extract_strided_slice %1051 {offsets = [32, 0], sizes = [16, 128], strides = [1, 1]} : vector<48x128xf32> to vector<16x128xf32>
    %1060 = arith.mulf %1058, %1058 : vector<16x128xf32>
    %1061 = arith.subf %1059, %1060 : vector<16x128xf32>
    %cst_388 = arith.constant 0.000000e+00 : f32
    %1062 = vector.broadcast %cst_388 : f32 to vector<16x128xf32>
    %1063 = arith.maximumf %1061, %1062 : vector<16x128xf32>
    %1064 = arith.subf %1038, %1052 : vector<8x128xf32>
    %cst_389 = arith.constant 9.99999974E-6 : f32
    %1065 = vector.broadcast %cst_389 : f32 to vector<8x128xf32>
    %1066 = arith.addf %1057, %1065 : vector<8x128xf32>
    %1067 = math.rsqrt %1066 : vector<8x128xf32>
    %1068 = arith.mulf %1064, %1067 : vector<8x128xf32>
    %c7_390 = arith.constant 7 : index
    %c0_391 = arith.constant 0 : index
    %1069 = vector.load %arg1[%c7_390, %c0_391] : memref<64x128xf32, #tpu.memory_space<vmem>>, vector<1x128xf32>
    %1070 = vector.broadcast %1069 : vector<1x128xf32> to vector<8x128xf32>
    %1071 = arith.mulf %1068, %1070 : vector<8x128xf32>
    %c8_392 = arith.constant 8 : index
    %c0_393 = arith.constant 0 : index
    %1072 = vector.load %arg1[%c8_392, %c0_393] : memref<64x128xf32, #tpu.memory_space<vmem>>, vector<1x128xf32>
    %1073 = vector.broadcast %1072 : vector<1x128xf32> to vector<8x128xf32>
    %1074 = arith.addf %1071, %1073 : vector<8x128xf32>
    %cst_394 = arith.constant 5.000000e-01 : f32
    %1075 = vector.broadcast %cst_394 : f32 to vector<8x128xf32>
    %1076 = arith.mulf %1075, %1074 : vector<8x128xf32>
    %cst_395 = arith.constant 4.471500e-02 : f32
    %1077 = vector.broadcast %cst_395 : f32 to vector<8x128xf32>
    %1078 = arith.mulf %1077, %1074 : vector<8x128xf32>
    %1079 = arith.mulf %1078, %1074 : vector<8x128xf32>
    %1080 = arith.mulf %1079, %1074 : vector<8x128xf32>
    %1081 = arith.addf %1074, %1080 : vector<8x128xf32>
    %cst_396 = arith.constant 0.797884583 : f32
    %1082 = vector.broadcast %cst_396 : f32 to vector<8x128xf32>
    %1083 = arith.mulf %1082, %1081 : vector<8x128xf32>
    %1084 = math.tanh %1083 : vector<8x128xf32>
    %cst_397 = arith.constant 1.000000e+00 : f32
    %1085 = vector.broadcast %cst_397 : f32 to vector<8x128xf32>
    %1086 = arith.addf %1085, %1084 : vector<8x128xf32>
    %1087 = arith.mulf %1076, %1086 : vector<8x128xf32>
    %1088 = arith.subf %1041, %1058 : vector<16x128xf32>
    %cst_398 = arith.constant 9.99999974E-6 : f32
    %1089 = vector.broadcast %cst_398 : f32 to vector<16x128xf32>
    %1090 = arith.addf %1063, %1089 : vector<16x128xf32>
    %1091 = math.rsqrt %1090 : vector<16x128xf32>
    %1092 = arith.mulf %1088, %1091 : vector<16x128xf32>
    %c18_399 = arith.constant 18 : index
    %c0_400 = arith.constant 0 : index
    %1093 = vector.load %arg1[%c18_399, %c0_400] : memref<64x128xf32, #tpu.memory_space<vmem>>, vector<1x128xf32>
    %1094 = vector.broadcast %1093 : vector<1x128xf32> to vector<16x128xf32>
    %1095 = arith.mulf %1092, %1094 : vector<16x128xf32>
    %c19_401 = arith.constant 19 : index
    %c0_402 = arith.constant 0 : index
    %1096 = vector.load %arg1[%c19_401, %c0_402] : memref<64x128xf32, #tpu.memory_space<vmem>>, vector<1x128xf32>
    %1097 = vector.broadcast %1096 : vector<1x128xf32> to vector<16x128xf32>
    %1098 = arith.addf %1095, %1097 : vector<16x128xf32>
    %cst_403 = arith.constant 5.000000e-01 : f32
    %1099 = vector.broadcast %cst_403 : f32 to vector<16x128xf32>
    %1100 = arith.mulf %1099, %1098 : vector<16x128xf32>
    %cst_404 = arith.constant 4.471500e-02 : f32
    %1101 = vector.broadcast %cst_404 : f32 to vector<16x128xf32>
    %1102 = arith.mulf %1101, %1098 : vector<16x128xf32>
    %1103 = arith.mulf %1102, %1098 : vector<16x128xf32>
    %1104 = arith.mulf %1103, %1098 : vector<16x128xf32>
    %1105 = arith.addf %1098, %1104 : vector<16x128xf32>
    %cst_405 = arith.constant 0.797884583 : f32
    %1106 = vector.broadcast %cst_405 : f32 to vector<16x128xf32>
    %1107 = arith.mulf %1106, %1105 : vector<16x128xf32>
    %1108 = math.tanh %1107 : vector<16x128xf32>
    %cst_406 = arith.constant 1.000000e+00 : f32
    %1109 = vector.broadcast %cst_406 : f32 to vector<16x128xf32>
    %1110 = arith.addf %1109, %1108 : vector<16x128xf32>
    %1111 = arith.mulf %1100, %1110 : vector<16x128xf32>
    %c128_407 = arith.constant 128 : index
    %c0_408 = arith.constant 0 : index
    %1112 = vector.load %arg2[%c128_407, %c0_408] : memref<304x128xbf16, #tpu.memory_space<vmem>>, vector<8x128xbf16>
    %1113 = arith.truncf %1087 : vector<8x128xf32> to vector<8x128xbf16>
    %cst_409 = arith.constant dense<0.000000e+00> : vector<8x8xf32>
    %1114 = tpu.matmul %1112, %1113, %cst_409 {dimension_numbers = #tpu.dot_dimension_numbers<[1], [1], [0], [0], [0, 0, 1, 0], [], []>} : vector<8x128xbf16>, vector<8x128xbf16>, vector<8x8xf32> -> vector<8x8xf32>
    %c32_410 = arith.constant 32 : index
    %c16_411 = arith.constant 16 : index
    %1115 = vector.load %arg1[%c32_410, %c16_411] : memref<64x128xf32, #tpu.memory_space<vmem>>, vector<8x8xf32>
    %1116 = arith.addf %1114, %1115 : vector<8x8xf32>
    %1117 = arith.mulf %1116, %1116 : vector<8x8xf32>
    %1118 = tpu.concatenate %1116, %1117 in 1 : vector<8x8xf32>, vector<8x8xf32> -> vector<8x16xf32>
    %cst_412 = arith.constant 1.250000e-01 : bf16
    %1119 = vector.broadcast %cst_412 : bf16 to vector<8x8xbf16>
    %1120 = arith.truncf %1118 : vector<8x16xf32> to vector<8x16xbf16>
    %cst_413 = arith.constant dense<0.000000e+00> : vector<8x16xf32>
    %1121 = tpu.matmul %1119, %1120, %cst_413 {dimension_numbers = #tpu.dot_dimension_numbers<[1], [0], [0], [1], [0, 0, 1, 1], [], []>} : vector<8x8xbf16>, vector<8x16xbf16>, vector<8x16xf32> -> vector<8x16xf32>
    %1122 = vector.extract_strided_slice %1121 {offsets = [0, 0], sizes = [8, 8], strides = [1, 1]} : vector<8x16xf32> to vector<8x8xf32>
    %1123 = vector.extract_strided_slice %1121 {offsets = [0, 8], sizes = [8, 8], strides = [1, 1]} : vector<8x16xf32> to vector<8x8xf32>
    %1124 = arith.mulf %1122, %1122 : vector<8x8xf32>
    %1125 = arith.subf %1123, %1124 : vector<8x8xf32>
    %cst_414 = arith.constant 0.000000e+00 : f32
    %1126 = vector.broadcast %cst_414 : f32 to vector<8x8xf32>
    %1127 = arith.maximumf %1125, %1126 : vector<8x8xf32>
    %1128 = arith.subf %1116, %1122 : vector<8x8xf32>
    %cst_415 = arith.constant 9.99999974E-6 : f32
    %1129 = vector.broadcast %cst_415 : f32 to vector<8x8xf32>
    %1130 = arith.addf %1127, %1129 : vector<8x8xf32>
    %1131 = math.rsqrt %1130 : vector<8x8xf32>
    %1132 = arith.mulf %1128, %1131 : vector<8x8xf32>
    %c32_416 = arith.constant 32 : index
    %c24_417 = arith.constant 24 : index
    %1133 = vector.load %arg1[%c32_416, %c24_417] : memref<64x128xf32, #tpu.memory_space<vmem>>, vector<8x8xf32>
    %1134 = arith.mulf %1132, %1133 : vector<8x8xf32>
    %c32_418 = arith.constant 32 : index
    %c32_419 = arith.constant 32 : index
    %1135 = vector.load %arg1[%c32_418, %c32_419] : memref<64x128xf32, #tpu.memory_space<vmem>>, vector<8x8xf32>
    %1136 = arith.addf %1134, %1135 : vector<8x8xf32>
    %1137 = math.exp %1136 : vector<8x8xf32>
    %1138 = arith.truncf %1111 : vector<16x128xf32> to vector<16x128xbf16>
    %c176_420 = arith.constant 176 : index
    %c0_421 = arith.constant 0 : index
    %1139 = vector.load %arg2[%c176_420, %c0_421] : memref<304x128xbf16, #tpu.memory_space<vmem>>, vector<128x16xbf16>
    %cst_422 = arith.constant dense<0.000000e+00> : vector<16x16xf32>
    %1140 = tpu.matmul %1138, %1139, %cst_422 {dimension_numbers = #tpu.dot_dimension_numbers<[1], [0], [0], [1], [0, 0, 1, 1], [], []>} : vector<16x128xbf16>, vector<128x16xbf16>, vector<16x16xf32> -> vector<16x16xf32>
    %c20_423 = arith.constant 20 : index
    %c0_424 = arith.constant 0 : index
    %1141 = vector.load %arg1[%c20_423, %c0_424] : memref<64x128xf32, #tpu.memory_space<vmem>>, vector<1x16xf32>
    %1142 = vector.broadcast %1141 : vector<1x16xf32> to vector<16x16xf32>
    %1143 = arith.addf %1140, %1142 : vector<16x16xf32>
    %c21_425 = arith.constant 21 : index
    %c0_426 = arith.constant 0 : index
    %1144 = vector.load %arg1[%c21_425, %c0_426] : memref<64x128xf32, #tpu.memory_space<vmem>>, vector<1x16xf32>
    %1145 = vector.broadcast %1144 : vector<1x16xf32> to vector<16x16xf32>
    %1146 = arith.mulf %1143, %1145 : vector<16x16xf32>
    %1147 = vector.extract_strided_slice %1137 {offsets = [0, 0], sizes = [8, 4], strides = [1, 1]} : vector<8x8xf32> to vector<8x4xf32>
    %1148 = vector.extract_strided_slice %1137 {offsets = [0, 4], sizes = [8, 4], strides = [1, 1]} : vector<8x8xf32> to vector<8x4xf32>
    %1149 = tpu.concatenate %1147, %1148 in 0 : vector<8x4xf32>, vector<8x4xf32> -> vector<16x4xf32>
    %1150 = vector.extract_strided_slice %1149 {offsets = [0, 0], sizes = [16, 1], strides = [1, 1]} : vector<16x4xf32> to vector<16x1xf32>
    %1151 = vector.shape_cast %1150 : vector<16x1xf32> to vector<16x1xf32>
    %1152 = vector.broadcast %1151 : vector<16x1xf32> to vector<16x4xf32>
    %1153 = vector.extract_strided_slice %1149 {offsets = [0, 1], sizes = [16, 1], strides = [1, 1]} : vector<16x4xf32> to vector<16x1xf32>
    %1154 = vector.shape_cast %1153 : vector<16x1xf32> to vector<16x1xf32>
    %1155 = vector.broadcast %1154 : vector<16x1xf32> to vector<16x4xf32>
    %1156 = vector.extract_strided_slice %1149 {offsets = [0, 2], sizes = [16, 1], strides = [1, 1]} : vector<16x4xf32> to vector<16x1xf32>
    %1157 = vector.shape_cast %1156 : vector<16x1xf32> to vector<16x1xf32>
    %1158 = vector.broadcast %1157 : vector<16x1xf32> to vector<16x4xf32>
    %1159 = vector.extract_strided_slice %1149 {offsets = [0, 3], sizes = [16, 1], strides = [1, 1]} : vector<16x4xf32> to vector<16x1xf32>
    %1160 = vector.shape_cast %1159 : vector<16x1xf32> to vector<16x1xf32>
    %1161 = vector.broadcast %1160 : vector<16x1xf32> to vector<16x4xf32>
    %1162 = tpu.concatenate %1152, %1155, %1158, %1161 in 1 : vector<16x4xf32>, vector<16x4xf32>, vector<16x4xf32>, vector<16x4xf32> -> vector<16x16xf32>
    %1163 = arith.mulf %1162, %1146 : vector<16x16xf32>
    %1164 = arith.addf %776, %1163 : vector<16x16xf32>
    %1165 = vector.extract_strided_slice %1164 {offsets = [0, 0], sizes = [8, 16], strides = [1, 1]} : vector<16x16xf32> to vector<8x16xf32>
    %1166 = vector.extract_strided_slice %1164 {offsets = [8, 0], sizes = [8, 16], strides = [1, 1]} : vector<16x16xf32> to vector<8x16xf32>
    %1167 = tpu.concatenate %1165, %1166 in 1 : vector<8x16xf32>, vector<8x16xf32> -> vector<8x32xf32>
    %c144_427 = arith.constant 144 : index
    %c0_428 = arith.constant 0 : index
    %1168 = vector.load %arg2[%c144_427, %c0_428] : memref<304x128xbf16, #tpu.memory_space<vmem>>, vector<32x32xbf16>
    %1169 = arith.truncf %1167 : vector<8x32xf32> to vector<8x32xbf16>
    %cst_429 = arith.constant dense<0.000000e+00> : vector<32x8xf32>
    %1170 = tpu.matmul %1168, %1169, %cst_429 {dimension_numbers = #tpu.dot_dimension_numbers<[1], [1], [0], [0], [0, 0, 1, 0], [], []>} : vector<32x32xbf16>, vector<8x32xbf16>, vector<32x8xf32> -> vector<32x8xf32>
    %cst_430 = arith.constant dense<0.000000e+00> : vector<32xf32>
    %1171 = vector.multi_reduction <add>, %1170, %cst_430 [1] : vector<32x8xf32> to vector<32xf32>
    %1172 = vector.shape_cast %1171 : vector<32xf32> to vector<32x1xf32>
    %cst_431 = arith.constant 8.000000e+00 : f32
    %1173 = vector.broadcast %cst_431 : f32 to vector<32x1xf32>
    %1174 = arith.divf %1172, %1173 : vector<32x1xf32>
    %1175 = arith.mulf %1170, %1170 : vector<32x8xf32>
    %cst_432 = arith.constant dense<0.000000e+00> : vector<32xf32>
    %1176 = vector.multi_reduction <add>, %1175, %cst_432 [1] : vector<32x8xf32> to vector<32xf32>
    %1177 = vector.shape_cast %1176 : vector<32xf32> to vector<32x1xf32>
    %cst_433 = arith.constant 8.000000e+00 : f32
    %1178 = vector.broadcast %cst_433 : f32 to vector<32x1xf32>
    %1179 = arith.divf %1177, %1178 : vector<32x1xf32>
    %1180 = arith.mulf %1174, %1174 : vector<32x1xf32>
    %1181 = arith.subf %1179, %1180 : vector<32x1xf32>
    %cst_434 = arith.constant 0.000000e+00 : f32
    %1182 = vector.broadcast %cst_434 : f32 to vector<32x1xf32>
    %1183 = arith.maximumf %1181, %1182 : vector<32x1xf32>
    %1184 = vector.broadcast %1174 : vector<32x1xf32> to vector<32x8xf32>
    %1185 = arith.subf %1170, %1184 : vector<32x8xf32>
    %cst_435 = arith.constant 9.99999974E-6 : f32
    %1186 = vector.broadcast %cst_435 : f32 to vector<32x1xf32>
    %1187 = arith.addf %1183, %1186 : vector<32x1xf32>
    %1188 = math.rsqrt %1187 : vector<32x1xf32>
    %1189 = vector.broadcast %1188 : vector<32x1xf32> to vector<32x8xf32>
    %1190 = arith.mulf %1185, %1189 : vector<32x8xf32>
    %c32_436 = arith.constant 32 : index
    %c0_437 = arith.constant 0 : index
    %1191 = vector.load %arg1[%c32_436, %c0_437] : memref<64x128xf32, #tpu.memory_space<vmem>>, vector<32x8xf32>
    %1192 = arith.mulf %1190, %1191 : vector<32x8xf32>
    %c32_438 = arith.constant 32 : index
    %c8_439 = arith.constant 8 : index
    %1193 = vector.load %arg1[%c32_438, %c8_439] : memref<64x128xf32, #tpu.memory_space<vmem>>, vector<32x8xf32>
    %1194 = arith.addf %1192, %1193 : vector<32x8xf32>
    %cst_440 = arith.constant 5.000000e-01 : f32
    %1195 = vector.broadcast %cst_440 : f32 to vector<32x8xf32>
    %1196 = arith.mulf %1195, %1194 : vector<32x8xf32>
    %cst_441 = arith.constant 4.471500e-02 : f32
    %1197 = vector.broadcast %cst_441 : f32 to vector<32x8xf32>
    %1198 = arith.mulf %1197, %1194 : vector<32x8xf32>
    %1199 = arith.mulf %1198, %1194 : vector<32x8xf32>
    %1200 = arith.mulf %1199, %1194 : vector<32x8xf32>
    %1201 = arith.addf %1194, %1200 : vector<32x8xf32>
    %cst_442 = arith.constant 0.797884583 : f32
    %1202 = vector.broadcast %cst_442 : f32 to vector<32x8xf32>
    %1203 = arith.mulf %1202, %1201 : vector<32x8xf32>
    %1204 = math.tanh %1203 : vector<32x8xf32>
    %cst_443 = arith.constant 1.000000e+00 : f32
    %1205 = vector.broadcast %cst_443 : f32 to vector<32x8xf32>
    %1206 = arith.addf %1205, %1204 : vector<32x8xf32>
    %1207 = arith.mulf %1196, %1206 : vector<32x8xf32>
    %1208 = vector.extract_strided_slice %1207 {offsets = [0, 0], sizes = [8, 8], strides = [1, 1]} : vector<32x8xf32> to vector<8x8xf32>
    %1209 = vector.extract_strided_slice %1207 {offsets = [8, 0], sizes = [8, 8], strides = [1, 1]} : vector<32x8xf32> to vector<8x8xf32>
    %1210 = vector.extract_strided_slice %1207 {offsets = [16, 0], sizes = [8, 8], strides = [1, 1]} : vector<32x8xf32> to vector<8x8xf32>
    %1211 = vector.extract_strided_slice %1207 {offsets = [24, 0], sizes = [8, 8], strides = [1, 1]} : vector<32x8xf32> to vector<8x8xf32>
    %1212 = tpu.concatenate %1208, %1209, %1210, %1211 in 1 : vector<8x8xf32>, vector<8x8xf32>, vector<8x8xf32>, vector<8x8xf32> -> vector<8x32xf32>
    %1213 = arith.mulf %1164, %1164 : vector<16x16xf32>
    %1214 = tpu.concatenate %1164, %1213 in 0 : vector<16x16xf32>, vector<16x16xf32> -> vector<32x16xf32>
    %c144_444 = arith.constant 144 : index
    %c32_445 = arith.constant 32 : index
    %1215 = vector.load %arg2[%c144_444, %c32_445] : memref<304x128xbf16, #tpu.memory_space<vmem>>, vector<32x32xbf16>
    %1216 = arith.truncf %1214 : vector<32x16xf32> to vector<32x16xbf16>
    %cst_446 = arith.constant dense<0.000000e+00> : vector<32x16xf32>
    %1217 = tpu.matmul %1215, %1216, %cst_446 {dimension_numbers = #tpu.dot_dimension_numbers<[1], [0], [0], [1], [0, 0, 1, 1], [], []>} : vector<32x32xbf16>, vector<32x16xbf16>, vector<32x16xf32> -> vector<32x16xf32>
    %1218 = arith.truncf %1217 : vector<32x16xf32> to vector<32x16xbf16>
    %c144_447 = arith.constant 144 : index
    %c64_448 = arith.constant 64 : index
    %1219 = vector.load %arg2[%c144_447, %c64_448] : memref<304x128xbf16, #tpu.memory_space<vmem>>, vector<16x16xbf16>
    %cst_449 = arith.constant dense<0.000000e+00> : vector<32x16xf32>
    %1220 = tpu.matmul %1218, %1219, %cst_449 {dimension_numbers = #tpu.dot_dimension_numbers<[1], [0], [0], [1], [0, 0, 1, 1], [], []>} : vector<32x16xbf16>, vector<16x16xbf16>, vector<32x16xf32> -> vector<32x16xf32>
    %1221 = vector.extract_strided_slice %1220 {offsets = [0, 0], sizes = [16, 16], strides = [1, 1]} : vector<32x16xf32> to vector<16x16xf32>
    %1222 = vector.extract_strided_slice %1220 {offsets = [16, 0], sizes = [16, 16], strides = [1, 1]} : vector<32x16xf32> to vector<16x16xf32>
    %1223 = arith.mulf %1221, %1221 : vector<16x16xf32>
    %1224 = arith.subf %1222, %1223 : vector<16x16xf32>
    %cst_450 = arith.constant 0.000000e+00 : f32
    %1225 = vector.broadcast %cst_450 : f32 to vector<16x16xf32>
    %1226 = arith.maximumf %1224, %1225 : vector<16x16xf32>
    %1227 = arith.subf %1164, %1221 : vector<16x16xf32>
    %cst_451 = arith.constant 9.99999974E-6 : f32
    %1228 = vector.broadcast %cst_451 : f32 to vector<16x16xf32>
    %1229 = arith.addf %1226, %1228 : vector<16x16xf32>
    %1230 = math.rsqrt %1229 : vector<16x16xf32>
    %1231 = arith.mulf %1227, %1230 : vector<16x16xf32>
    %c9_452 = arith.constant 9 : index
    %c0_453 = arith.constant 0 : index
    %1232 = vector.load %arg1[%c9_452, %c0_453] : memref<64x128xf32, #tpu.memory_space<vmem>>, vector<1x16xf32>
    %1233 = vector.broadcast %1232 : vector<1x16xf32> to vector<16x16xf32>
    %1234 = arith.mulf %1231, %1233 : vector<16x16xf32>
    %c10_454 = arith.constant 10 : index
    %c0_455 = arith.constant 0 : index
    %1235 = vector.load %arg1[%c10_454, %c0_455] : memref<64x128xf32, #tpu.memory_space<vmem>>, vector<1x16xf32>
    %1236 = vector.broadcast %1235 : vector<1x16xf32> to vector<16x16xf32>
    %1237 = arith.addf %1234, %1236 : vector<16x16xf32>
    %cst_456 = arith.constant 5.000000e-01 : f32
    %1238 = vector.broadcast %cst_456 : f32 to vector<16x16xf32>
    %1239 = arith.mulf %1238, %1237 : vector<16x16xf32>
    %cst_457 = arith.constant 4.471500e-02 : f32
    %1240 = vector.broadcast %cst_457 : f32 to vector<16x16xf32>
    %1241 = arith.mulf %1240, %1237 : vector<16x16xf32>
    %1242 = arith.mulf %1241, %1237 : vector<16x16xf32>
    %1243 = arith.mulf %1242, %1237 : vector<16x16xf32>
    %1244 = arith.addf %1237, %1243 : vector<16x16xf32>
    %cst_458 = arith.constant 0.797884583 : f32
    %1245 = vector.broadcast %cst_458 : f32 to vector<16x16xf32>
    %1246 = arith.mulf %1245, %1244 : vector<16x16xf32>
    %1247 = math.tanh %1246 : vector<16x16xf32>
    %cst_459 = arith.constant 1.000000e+00 : f32
    %1248 = vector.broadcast %cst_459 : f32 to vector<16x16xf32>
    %1249 = arith.addf %1248, %1247 : vector<16x16xf32>
    %1250 = arith.mulf %1239, %1249 : vector<16x16xf32>
    %1251 = tpu.concatenate %1212, %1212 in 0 : vector<8x32xf32>, vector<8x32xf32> -> vector<16x32xf32>
    %1252 = tpu.concatenate %1251, %1250 in 1 : vector<16x32xf32>, vector<16x16xf32> -> vector<16x48xf32>
    %1253 = arith.truncf %1252 : vector<16x48xf32> to vector<16x48xbf16>
    %c0_460 = arith.constant 0 : index
    %c0_461 = arith.constant 0 : index
    %1254 = vector.load %arg3[%c0_460, %c0_461] : memref<560x256xbf16, #tpu.memory_space<vmem>>, vector<48x256xbf16>
    %cst_462 = arith.constant dense<0.000000e+00> : vector<16x256xf32>
    %1255 = tpu.matmul %1253, %1254, %cst_462 {dimension_numbers = #tpu.dot_dimension_numbers<[1], [0], [0], [1], [0, 0, 1, 1], [], []>} : vector<16x48xbf16>, vector<48x256xbf16>, vector<16x256xf32> -> vector<16x256xf32>
    %1256 = vector.extract_strided_slice %1255 {offsets = [0, 0], sizes = [8, 128], strides = [1, 1]} : vector<16x256xf32> to vector<8x128xf32>
    %1257 = vector.extract_strided_slice %1255 {offsets = [0, 128], sizes = [16, 128], strides = [1, 1]} : vector<16x256xf32> to vector<16x128xf32>
    %c0_463 = arith.constant 0 : index
    %c0_464 = arith.constant 0 : index
    %1258 = vector.load %arg1[%c0_463, %c0_464] : memref<64x128xf32, #tpu.memory_space<vmem>>, vector<1x128xf32>
    %1259 = vector.broadcast %1258 : vector<1x128xf32> to vector<8x128xf32>
    %1260 = arith.addf %1256, %1259 : vector<8x128xf32>
    %c11_465 = arith.constant 11 : index
    %c0_466 = arith.constant 0 : index
    %1261 = vector.load %arg1[%c11_465, %c0_466] : memref<64x128xf32, #tpu.memory_space<vmem>>, vector<1x128xf32>
    %1262 = vector.broadcast %1261 : vector<1x128xf32> to vector<16x128xf32>
    %1263 = arith.addf %1257, %1262 : vector<16x128xf32>
    %c144_467 = arith.constant 144 : index
    %c32_468 = arith.constant 32 : index
    %1264 = vector.load %arg2[%c144_467, %c32_468] : memref<304x128xbf16, #tpu.memory_space<vmem>>, vector<32x32xbf16>
    %1265 = arith.mulf %1263, %1263 : vector<16x128xf32>
    %1266 = tpu.concatenate %1263, %1265 in 0 : vector<16x128xf32>, vector<16x128xf32> -> vector<32x128xf32>
    %1267 = arith.truncf %1266 : vector<32x128xf32> to vector<32x128xbf16>
    %cst_469 = arith.constant dense<0.000000e+00> : vector<32x128xf32>
    %1268 = tpu.matmul %1264, %1267, %cst_469 {dimension_numbers = #tpu.dot_dimension_numbers<[1], [0], [0], [1], [0, 0, 1, 1], [], []>} : vector<32x32xbf16>, vector<32x128xbf16>, vector<32x128xf32> -> vector<32x128xf32>
    %1269 = arith.mulf %1260, %1260 : vector<8x128xf32>
    %1270 = tpu.concatenate %1260, %1269, %1268 in 0 : vector<8x128xf32>, vector<8x128xf32>, vector<32x128xf32> -> vector<48x128xf32>
    %1271 = arith.truncf %1270 : vector<48x128xf32> to vector<48x128xbf16>
    %c0_470 = arith.constant 0 : index
    %c0_471 = arith.constant 0 : index
    %1272 = vector.load %arg2[%c0_470, %c0_471] : memref<304x128xbf16, #tpu.memory_space<vmem>>, vector<128x128xbf16>
    %cst_472 = arith.constant dense<0.000000e+00> : vector<48x128xf32>
    %1273 = tpu.matmul %1271, %1272, %cst_472 {dimension_numbers = #tpu.dot_dimension_numbers<[1], [0], [0], [1], [0, 0, 1, 1], [], []>} : vector<48x128xbf16>, vector<128x128xbf16>, vector<48x128xf32> -> vector<48x128xf32>
    %1274 = vector.extract_strided_slice %1273 {offsets = [0, 0], sizes = [8, 128], strides = [1, 1]} : vector<48x128xf32> to vector<8x128xf32>
    %1275 = vector.extract_strided_slice %1273 {offsets = [8, 0], sizes = [8, 128], strides = [1, 1]} : vector<48x128xf32> to vector<8x128xf32>
    %1276 = arith.mulf %1274, %1274 : vector<8x128xf32>
    %1277 = arith.subf %1275, %1276 : vector<8x128xf32>
    %cst_473 = arith.constant 0.000000e+00 : f32
    %1278 = vector.broadcast %cst_473 : f32 to vector<8x128xf32>
    %1279 = arith.maximumf %1277, %1278 : vector<8x128xf32>
    %1280 = vector.extract_strided_slice %1273 {offsets = [16, 0], sizes = [16, 128], strides = [1, 1]} : vector<48x128xf32> to vector<16x128xf32>
    %1281 = vector.extract_strided_slice %1273 {offsets = [32, 0], sizes = [16, 128], strides = [1, 1]} : vector<48x128xf32> to vector<16x128xf32>
    %1282 = arith.mulf %1280, %1280 : vector<16x128xf32>
    %1283 = arith.subf %1281, %1282 : vector<16x128xf32>
    %cst_474 = arith.constant 0.000000e+00 : f32
    %1284 = vector.broadcast %cst_474 : f32 to vector<16x128xf32>
    %1285 = arith.maximumf %1283, %1284 : vector<16x128xf32>
    %1286 = arith.subf %1260, %1274 : vector<8x128xf32>
    %cst_475 = arith.constant 9.99999974E-6 : f32
    %1287 = vector.broadcast %cst_475 : f32 to vector<8x128xf32>
    %1288 = arith.addf %1279, %1287 : vector<8x128xf32>
    %1289 = math.rsqrt %1288 : vector<8x128xf32>
    %1290 = arith.mulf %1286, %1289 : vector<8x128xf32>
    %c1_476 = arith.constant 1 : index
    %c0_477 = arith.constant 0 : index
    %1291 = vector.load %arg1[%c1_476, %c0_477] : memref<64x128xf32, #tpu.memory_space<vmem>>, vector<1x128xf32>
    %1292 = vector.broadcast %1291 : vector<1x128xf32> to vector<8x128xf32>
    %1293 = arith.mulf %1290, %1292 : vector<8x128xf32>
    %c2_478 = arith.constant 2 : index
    %c0_479 = arith.constant 0 : index
    %1294 = vector.load %arg1[%c2_478, %c0_479] : memref<64x128xf32, #tpu.memory_space<vmem>>, vector<1x128xf32>
    %1295 = vector.broadcast %1294 : vector<1x128xf32> to vector<8x128xf32>
    %1296 = arith.addf %1293, %1295 : vector<8x128xf32>
    %cst_480 = arith.constant 5.000000e-01 : f32
    %1297 = vector.broadcast %cst_480 : f32 to vector<8x128xf32>
    %1298 = arith.mulf %1297, %1296 : vector<8x128xf32>
    %cst_481 = arith.constant 4.471500e-02 : f32
    %1299 = vector.broadcast %cst_481 : f32 to vector<8x128xf32>
    %1300 = arith.mulf %1299, %1296 : vector<8x128xf32>
    %1301 = arith.mulf %1300, %1296 : vector<8x128xf32>
    %1302 = arith.mulf %1301, %1296 : vector<8x128xf32>
    %1303 = arith.addf %1296, %1302 : vector<8x128xf32>
    %cst_482 = arith.constant 0.797884583 : f32
    %1304 = vector.broadcast %cst_482 : f32 to vector<8x128xf32>
    %1305 = arith.mulf %1304, %1303 : vector<8x128xf32>
    %1306 = math.tanh %1305 : vector<8x128xf32>
    %cst_483 = arith.constant 1.000000e+00 : f32
    %1307 = vector.broadcast %cst_483 : f32 to vector<8x128xf32>
    %1308 = arith.addf %1307, %1306 : vector<8x128xf32>
    %1309 = arith.mulf %1298, %1308 : vector<8x128xf32>
    %1310 = arith.subf %1263, %1280 : vector<16x128xf32>
    %cst_484 = arith.constant 9.99999974E-6 : f32
    %1311 = vector.broadcast %cst_484 : f32 to vector<16x128xf32>
    %1312 = arith.addf %1285, %1311 : vector<16x128xf32>
    %1313 = math.rsqrt %1312 : vector<16x128xf32>
    %1314 = arith.mulf %1310, %1313 : vector<16x128xf32>
    %c12_485 = arith.constant 12 : index
    %c0_486 = arith.constant 0 : index
    %1315 = vector.load %arg1[%c12_485, %c0_486] : memref<64x128xf32, #tpu.memory_space<vmem>>, vector<1x128xf32>
    %1316 = vector.broadcast %1315 : vector<1x128xf32> to vector<16x128xf32>
    %1317 = arith.mulf %1314, %1316 : vector<16x128xf32>
    %c13_487 = arith.constant 13 : index
    %c0_488 = arith.constant 0 : index
    %1318 = vector.load %arg1[%c13_487, %c0_488] : memref<64x128xf32, #tpu.memory_space<vmem>>, vector<1x128xf32>
    %1319 = vector.broadcast %1318 : vector<1x128xf32> to vector<16x128xf32>
    %1320 = arith.addf %1317, %1319 : vector<16x128xf32>
    %cst_489 = arith.constant 5.000000e-01 : f32
    %1321 = vector.broadcast %cst_489 : f32 to vector<16x128xf32>
    %1322 = arith.mulf %1321, %1320 : vector<16x128xf32>
    %cst_490 = arith.constant 4.471500e-02 : f32
    %1323 = vector.broadcast %cst_490 : f32 to vector<16x128xf32>
    %1324 = arith.mulf %1323, %1320 : vector<16x128xf32>
    %1325 = arith.mulf %1324, %1320 : vector<16x128xf32>
    %1326 = arith.mulf %1325, %1320 : vector<16x128xf32>
    %1327 = arith.addf %1320, %1326 : vector<16x128xf32>
    %cst_491 = arith.constant 0.797884583 : f32
    %1328 = vector.broadcast %cst_491 : f32 to vector<16x128xf32>
    %1329 = arith.mulf %1328, %1327 : vector<16x128xf32>
    %1330 = math.tanh %1329 : vector<16x128xf32>
    %cst_492 = arith.constant 1.000000e+00 : f32
    %1331 = vector.broadcast %cst_492 : f32 to vector<16x128xf32>
    %1332 = arith.addf %1331, %1330 : vector<16x128xf32>
    %1333 = arith.mulf %1322, %1332 : vector<16x128xf32>
    %1334 = tpu.concatenate %1309, %1309 in 0 : vector<8x128xf32>, vector<8x128xf32> -> vector<16x128xf32>
    %1335 = tpu.concatenate %1334, %1333 in 1 : vector<16x128xf32>, vector<16x128xf32> -> vector<16x256xf32>
    %1336 = arith.truncf %1335 : vector<16x256xf32> to vector<16x256xbf16>
    %c48_493 = arith.constant 48 : index
    %c0_494 = arith.constant 0 : index
    %1337 = vector.load %arg3[%c48_493, %c0_494] : memref<560x256xbf16, #tpu.memory_space<vmem>>, vector<256x256xbf16>
    %cst_495 = arith.constant dense<0.000000e+00> : vector<16x256xf32>
    %1338 = tpu.matmul %1336, %1337, %cst_495 {dimension_numbers = #tpu.dot_dimension_numbers<[1], [0], [0], [1], [0, 0, 1, 1], [], []>} : vector<16x256xbf16>, vector<256x256xbf16>, vector<16x256xf32> -> vector<16x256xf32>
    %1339 = vector.extract_strided_slice %1338 {offsets = [0, 0], sizes = [8, 128], strides = [1, 1]} : vector<16x256xf32> to vector<8x128xf32>
    %1340 = vector.extract_strided_slice %1338 {offsets = [0, 128], sizes = [16, 128], strides = [1, 1]} : vector<16x256xf32> to vector<16x128xf32>
    %c3_496 = arith.constant 3 : index
    %c0_497 = arith.constant 0 : index
    %1341 = vector.load %arg1[%c3_496, %c0_497] : memref<64x128xf32, #tpu.memory_space<vmem>>, vector<1x128xf32>
    %1342 = vector.broadcast %1341 : vector<1x128xf32> to vector<8x128xf32>
    %1343 = arith.addf %1339, %1342 : vector<8x128xf32>
    %c14_498 = arith.constant 14 : index
    %c0_499 = arith.constant 0 : index
    %1344 = vector.load %arg1[%c14_498, %c0_499] : memref<64x128xf32, #tpu.memory_space<vmem>>, vector<1x128xf32>
    %1345 = vector.broadcast %1344 : vector<1x128xf32> to vector<16x128xf32>
    %1346 = arith.addf %1340, %1345 : vector<16x128xf32>
    %c144_500 = arith.constant 144 : index
    %c32_501 = arith.constant 32 : index
    %1347 = vector.load %arg2[%c144_500, %c32_501] : memref<304x128xbf16, #tpu.memory_space<vmem>>, vector<32x32xbf16>
    %1348 = arith.mulf %1346, %1346 : vector<16x128xf32>
    %1349 = tpu.concatenate %1346, %1348 in 0 : vector<16x128xf32>, vector<16x128xf32> -> vector<32x128xf32>
    %1350 = arith.truncf %1349 : vector<32x128xf32> to vector<32x128xbf16>
    %cst_502 = arith.constant dense<0.000000e+00> : vector<32x128xf32>
    %1351 = tpu.matmul %1347, %1350, %cst_502 {dimension_numbers = #tpu.dot_dimension_numbers<[1], [0], [0], [1], [0, 0, 1, 1], [], []>} : vector<32x32xbf16>, vector<32x128xbf16>, vector<32x128xf32> -> vector<32x128xf32>
    %1352 = arith.mulf %1343, %1343 : vector<8x128xf32>
    %1353 = tpu.concatenate %1343, %1352, %1351 in 0 : vector<8x128xf32>, vector<8x128xf32>, vector<32x128xf32> -> vector<48x128xf32>
    %1354 = arith.truncf %1353 : vector<48x128xf32> to vector<48x128xbf16>
    %c0_503 = arith.constant 0 : index
    %c0_504 = arith.constant 0 : index
    %1355 = vector.load %arg2[%c0_503, %c0_504] : memref<304x128xbf16, #tpu.memory_space<vmem>>, vector<128x128xbf16>
    %cst_505 = arith.constant dense<0.000000e+00> : vector<48x128xf32>
    %1356 = tpu.matmul %1354, %1355, %cst_505 {dimension_numbers = #tpu.dot_dimension_numbers<[1], [0], [0], [1], [0, 0, 1, 1], [], []>} : vector<48x128xbf16>, vector<128x128xbf16>, vector<48x128xf32> -> vector<48x128xf32>
    %1357 = vector.extract_strided_slice %1356 {offsets = [0, 0], sizes = [8, 128], strides = [1, 1]} : vector<48x128xf32> to vector<8x128xf32>
    %1358 = vector.extract_strided_slice %1356 {offsets = [8, 0], sizes = [8, 128], strides = [1, 1]} : vector<48x128xf32> to vector<8x128xf32>
    %1359 = arith.mulf %1357, %1357 : vector<8x128xf32>
    %1360 = arith.subf %1358, %1359 : vector<8x128xf32>
    %cst_506 = arith.constant 0.000000e+00 : f32
    %1361 = vector.broadcast %cst_506 : f32 to vector<8x128xf32>
    %1362 = arith.maximumf %1360, %1361 : vector<8x128xf32>
    %1363 = vector.extract_strided_slice %1356 {offsets = [16, 0], sizes = [16, 128], strides = [1, 1]} : vector<48x128xf32> to vector<16x128xf32>
    %1364 = vector.extract_strided_slice %1356 {offsets = [32, 0], sizes = [16, 128], strides = [1, 1]} : vector<48x128xf32> to vector<16x128xf32>
    %1365 = arith.mulf %1363, %1363 : vector<16x128xf32>
    %1366 = arith.subf %1364, %1365 : vector<16x128xf32>
    %cst_507 = arith.constant 0.000000e+00 : f32
    %1367 = vector.broadcast %cst_507 : f32 to vector<16x128xf32>
    %1368 = arith.maximumf %1366, %1367 : vector<16x128xf32>
    %1369 = arith.subf %1343, %1357 : vector<8x128xf32>
    %cst_508 = arith.constant 9.99999974E-6 : f32
    %1370 = vector.broadcast %cst_508 : f32 to vector<8x128xf32>
    %1371 = arith.addf %1362, %1370 : vector<8x128xf32>
    %1372 = math.rsqrt %1371 : vector<8x128xf32>
    %1373 = arith.mulf %1369, %1372 : vector<8x128xf32>
    %c4_509 = arith.constant 4 : index
    %c0_510 = arith.constant 0 : index
    %1374 = vector.load %arg1[%c4_509, %c0_510] : memref<64x128xf32, #tpu.memory_space<vmem>>, vector<1x128xf32>
    %1375 = vector.broadcast %1374 : vector<1x128xf32> to vector<8x128xf32>
    %1376 = arith.mulf %1373, %1375 : vector<8x128xf32>
    %c5_511 = arith.constant 5 : index
    %c0_512 = arith.constant 0 : index
    %1377 = vector.load %arg1[%c5_511, %c0_512] : memref<64x128xf32, #tpu.memory_space<vmem>>, vector<1x128xf32>
    %1378 = vector.broadcast %1377 : vector<1x128xf32> to vector<8x128xf32>
    %1379 = arith.addf %1376, %1378 : vector<8x128xf32>
    %cst_513 = arith.constant 5.000000e-01 : f32
    %1380 = vector.broadcast %cst_513 : f32 to vector<8x128xf32>
    %1381 = arith.mulf %1380, %1379 : vector<8x128xf32>
    %cst_514 = arith.constant 4.471500e-02 : f32
    %1382 = vector.broadcast %cst_514 : f32 to vector<8x128xf32>
    %1383 = arith.mulf %1382, %1379 : vector<8x128xf32>
    %1384 = arith.mulf %1383, %1379 : vector<8x128xf32>
    %1385 = arith.mulf %1384, %1379 : vector<8x128xf32>
    %1386 = arith.addf %1379, %1385 : vector<8x128xf32>
    %cst_515 = arith.constant 0.797884583 : f32
    %1387 = vector.broadcast %cst_515 : f32 to vector<8x128xf32>
    %1388 = arith.mulf %1387, %1386 : vector<8x128xf32>
    %1389 = math.tanh %1388 : vector<8x128xf32>
    %cst_516 = arith.constant 1.000000e+00 : f32
    %1390 = vector.broadcast %cst_516 : f32 to vector<8x128xf32>
    %1391 = arith.addf %1390, %1389 : vector<8x128xf32>
    %1392 = arith.mulf %1381, %1391 : vector<8x128xf32>
    %1393 = arith.subf %1346, %1363 : vector<16x128xf32>
    %cst_517 = arith.constant 9.99999974E-6 : f32
    %1394 = vector.broadcast %cst_517 : f32 to vector<16x128xf32>
    %1395 = arith.addf %1368, %1394 : vector<16x128xf32>
    %1396 = math.rsqrt %1395 : vector<16x128xf32>
    %1397 = arith.mulf %1393, %1396 : vector<16x128xf32>
    %c15_518 = arith.constant 15 : index
    %c0_519 = arith.constant 0 : index
    %1398 = vector.load %arg1[%c15_518, %c0_519] : memref<64x128xf32, #tpu.memory_space<vmem>>, vector<1x128xf32>
    %1399 = vector.broadcast %1398 : vector<1x128xf32> to vector<16x128xf32>
    %1400 = arith.mulf %1397, %1399 : vector<16x128xf32>
    %c16_520 = arith.constant 16 : index
    %c0_521 = arith.constant 0 : index
    %1401 = vector.load %arg1[%c16_520, %c0_521] : memref<64x128xf32, #tpu.memory_space<vmem>>, vector<1x128xf32>
    %1402 = vector.broadcast %1401 : vector<1x128xf32> to vector<16x128xf32>
    %1403 = arith.addf %1400, %1402 : vector<16x128xf32>
    %cst_522 = arith.constant 5.000000e-01 : f32
    %1404 = vector.broadcast %cst_522 : f32 to vector<16x128xf32>
    %1405 = arith.mulf %1404, %1403 : vector<16x128xf32>
    %cst_523 = arith.constant 4.471500e-02 : f32
    %1406 = vector.broadcast %cst_523 : f32 to vector<16x128xf32>
    %1407 = arith.mulf %1406, %1403 : vector<16x128xf32>
    %1408 = arith.mulf %1407, %1403 : vector<16x128xf32>
    %1409 = arith.mulf %1408, %1403 : vector<16x128xf32>
    %1410 = arith.addf %1403, %1409 : vector<16x128xf32>
    %cst_524 = arith.constant 0.797884583 : f32
    %1411 = vector.broadcast %cst_524 : f32 to vector<16x128xf32>
    %1412 = arith.mulf %1411, %1410 : vector<16x128xf32>
    %1413 = math.tanh %1412 : vector<16x128xf32>
    %cst_525 = arith.constant 1.000000e+00 : f32
    %1414 = vector.broadcast %cst_525 : f32 to vector<16x128xf32>
    %1415 = arith.addf %1414, %1413 : vector<16x128xf32>
    %1416 = arith.mulf %1405, %1415 : vector<16x128xf32>
    %1417 = tpu.concatenate %1392, %1392 in 0 : vector<8x128xf32>, vector<8x128xf32> -> vector<16x128xf32>
    %1418 = tpu.concatenate %1417, %1416 in 1 : vector<16x128xf32>, vector<16x128xf32> -> vector<16x256xf32>
    %1419 = arith.truncf %1418 : vector<16x256xf32> to vector<16x256xbf16>
    %c304_526 = arith.constant 304 : index
    %c0_527 = arith.constant 0 : index
    %1420 = vector.load %arg3[%c304_526, %c0_527] : memref<560x256xbf16, #tpu.memory_space<vmem>>, vector<256x256xbf16>
    %cst_528 = arith.constant dense<0.000000e+00> : vector<16x256xf32>
    %1421 = tpu.matmul %1419, %1420, %cst_528 {dimension_numbers = #tpu.dot_dimension_numbers<[1], [0], [0], [1], [0, 0, 1, 1], [], []>} : vector<16x256xbf16>, vector<256x256xbf16>, vector<16x256xf32> -> vector<16x256xf32>
    %1422 = vector.extract_strided_slice %1421 {offsets = [0, 0], sizes = [8, 128], strides = [1, 1]} : vector<16x256xf32> to vector<8x128xf32>
    %1423 = vector.extract_strided_slice %1421 {offsets = [0, 128], sizes = [16, 128], strides = [1, 1]} : vector<16x256xf32> to vector<16x128xf32>
    %c6_529 = arith.constant 6 : index
    %c0_530 = arith.constant 0 : index
    %1424 = vector.load %arg1[%c6_529, %c0_530] : memref<64x128xf32, #tpu.memory_space<vmem>>, vector<1x128xf32>
    %1425 = vector.broadcast %1424 : vector<1x128xf32> to vector<8x128xf32>
    %1426 = arith.addf %1422, %1425 : vector<8x128xf32>
    %c17_531 = arith.constant 17 : index
    %c0_532 = arith.constant 0 : index
    %1427 = vector.load %arg1[%c17_531, %c0_532] : memref<64x128xf32, #tpu.memory_space<vmem>>, vector<1x128xf32>
    %1428 = vector.broadcast %1427 : vector<1x128xf32> to vector<16x128xf32>
    %1429 = arith.addf %1423, %1428 : vector<16x128xf32>
    %c144_533 = arith.constant 144 : index
    %c32_534 = arith.constant 32 : index
    %1430 = vector.load %arg2[%c144_533, %c32_534] : memref<304x128xbf16, #tpu.memory_space<vmem>>, vector<32x32xbf16>
    %1431 = arith.mulf %1429, %1429 : vector<16x128xf32>
    %1432 = tpu.concatenate %1429, %1431 in 0 : vector<16x128xf32>, vector<16x128xf32> -> vector<32x128xf32>
    %1433 = arith.truncf %1432 : vector<32x128xf32> to vector<32x128xbf16>
    %cst_535 = arith.constant dense<0.000000e+00> : vector<32x128xf32>
    %1434 = tpu.matmul %1430, %1433, %cst_535 {dimension_numbers = #tpu.dot_dimension_numbers<[1], [0], [0], [1], [0, 0, 1, 1], [], []>} : vector<32x32xbf16>, vector<32x128xbf16>, vector<32x128xf32> -> vector<32x128xf32>
    %1435 = arith.mulf %1426, %1426 : vector<8x128xf32>
    %1436 = tpu.concatenate %1426, %1435, %1434 in 0 : vector<8x128xf32>, vector<8x128xf32>, vector<32x128xf32> -> vector<48x128xf32>
    %1437 = arith.truncf %1436 : vector<48x128xf32> to vector<48x128xbf16>
    %c0_536 = arith.constant 0 : index
    %c0_537 = arith.constant 0 : index
    %1438 = vector.load %arg2[%c0_536, %c0_537] : memref<304x128xbf16, #tpu.memory_space<vmem>>, vector<128x128xbf16>
    %cst_538 = arith.constant dense<0.000000e+00> : vector<48x128xf32>
    %1439 = tpu.matmul %1437, %1438, %cst_538 {dimension_numbers = #tpu.dot_dimension_numbers<[1], [0], [0], [1], [0, 0, 1, 1], [], []>} : vector<48x128xbf16>, vector<128x128xbf16>, vector<48x128xf32> -> vector<48x128xf32>
    %1440 = vector.extract_strided_slice %1439 {offsets = [0, 0], sizes = [8, 128], strides = [1, 1]} : vector<48x128xf32> to vector<8x128xf32>
    %1441 = vector.extract_strided_slice %1439 {offsets = [8, 0], sizes = [8, 128], strides = [1, 1]} : vector<48x128xf32> to vector<8x128xf32>
    %1442 = arith.mulf %1440, %1440 : vector<8x128xf32>
    %1443 = arith.subf %1441, %1442 : vector<8x128xf32>
    %cst_539 = arith.constant 0.000000e+00 : f32
    %1444 = vector.broadcast %cst_539 : f32 to vector<8x128xf32>
    %1445 = arith.maximumf %1443, %1444 : vector<8x128xf32>
    %1446 = vector.extract_strided_slice %1439 {offsets = [16, 0], sizes = [16, 128], strides = [1, 1]} : vector<48x128xf32> to vector<16x128xf32>
    %1447 = vector.extract_strided_slice %1439 {offsets = [32, 0], sizes = [16, 128], strides = [1, 1]} : vector<48x128xf32> to vector<16x128xf32>
    %1448 = arith.mulf %1446, %1446 : vector<16x128xf32>
    %1449 = arith.subf %1447, %1448 : vector<16x128xf32>
    %cst_540 = arith.constant 0.000000e+00 : f32
    %1450 = vector.broadcast %cst_540 : f32 to vector<16x128xf32>
    %1451 = arith.maximumf %1449, %1450 : vector<16x128xf32>
    %1452 = arith.subf %1426, %1440 : vector<8x128xf32>
    %cst_541 = arith.constant 9.99999974E-6 : f32
    %1453 = vector.broadcast %cst_541 : f32 to vector<8x128xf32>
    %1454 = arith.addf %1445, %1453 : vector<8x128xf32>
    %1455 = math.rsqrt %1454 : vector<8x128xf32>
    %1456 = arith.mulf %1452, %1455 : vector<8x128xf32>
    %c7_542 = arith.constant 7 : index
    %c0_543 = arith.constant 0 : index
    %1457 = vector.load %arg1[%c7_542, %c0_543] : memref<64x128xf32, #tpu.memory_space<vmem>>, vector<1x128xf32>
    %1458 = vector.broadcast %1457 : vector<1x128xf32> to vector<8x128xf32>
    %1459 = arith.mulf %1456, %1458 : vector<8x128xf32>
    %c8_544 = arith.constant 8 : index
    %c0_545 = arith.constant 0 : index
    %1460 = vector.load %arg1[%c8_544, %c0_545] : memref<64x128xf32, #tpu.memory_space<vmem>>, vector<1x128xf32>
    %1461 = vector.broadcast %1460 : vector<1x128xf32> to vector<8x128xf32>
    %1462 = arith.addf %1459, %1461 : vector<8x128xf32>
    %cst_546 = arith.constant 5.000000e-01 : f32
    %1463 = vector.broadcast %cst_546 : f32 to vector<8x128xf32>
    %1464 = arith.mulf %1463, %1462 : vector<8x128xf32>
    %cst_547 = arith.constant 4.471500e-02 : f32
    %1465 = vector.broadcast %cst_547 : f32 to vector<8x128xf32>
    %1466 = arith.mulf %1465, %1462 : vector<8x128xf32>
    %1467 = arith.mulf %1466, %1462 : vector<8x128xf32>
    %1468 = arith.mulf %1467, %1462 : vector<8x128xf32>
    %1469 = arith.addf %1462, %1468 : vector<8x128xf32>
    %cst_548 = arith.constant 0.797884583 : f32
    %1470 = vector.broadcast %cst_548 : f32 to vector<8x128xf32>
    %1471 = arith.mulf %1470, %1469 : vector<8x128xf32>
    %1472 = math.tanh %1471 : vector<8x128xf32>
    %cst_549 = arith.constant 1.000000e+00 : f32
    %1473 = vector.broadcast %cst_549 : f32 to vector<8x128xf32>
    %1474 = arith.addf %1473, %1472 : vector<8x128xf32>
    %1475 = arith.mulf %1464, %1474 : vector<8x128xf32>
    %1476 = arith.subf %1429, %1446 : vector<16x128xf32>
    %cst_550 = arith.constant 9.99999974E-6 : f32
    %1477 = vector.broadcast %cst_550 : f32 to vector<16x128xf32>
    %1478 = arith.addf %1451, %1477 : vector<16x128xf32>
    %1479 = math.rsqrt %1478 : vector<16x128xf32>
    %1480 = arith.mulf %1476, %1479 : vector<16x128xf32>
    %c18_551 = arith.constant 18 : index
    %c0_552 = arith.constant 0 : index
    %1481 = vector.load %arg1[%c18_551, %c0_552] : memref<64x128xf32, #tpu.memory_space<vmem>>, vector<1x128xf32>
    %1482 = vector.broadcast %1481 : vector<1x128xf32> to vector<16x128xf32>
    %1483 = arith.mulf %1480, %1482 : vector<16x128xf32>
    %c19_553 = arith.constant 19 : index
    %c0_554 = arith.constant 0 : index
    %1484 = vector.load %arg1[%c19_553, %c0_554] : memref<64x128xf32, #tpu.memory_space<vmem>>, vector<1x128xf32>
    %1485 = vector.broadcast %1484 : vector<1x128xf32> to vector<16x128xf32>
    %1486 = arith.addf %1483, %1485 : vector<16x128xf32>
    %cst_555 = arith.constant 5.000000e-01 : f32
    %1487 = vector.broadcast %cst_555 : f32 to vector<16x128xf32>
    %1488 = arith.mulf %1487, %1486 : vector<16x128xf32>
    %cst_556 = arith.constant 4.471500e-02 : f32
    %1489 = vector.broadcast %cst_556 : f32 to vector<16x128xf32>
    %1490 = arith.mulf %1489, %1486 : vector<16x128xf32>
    %1491 = arith.mulf %1490, %1486 : vector<16x128xf32>
    %1492 = arith.mulf %1491, %1486 : vector<16x128xf32>
    %1493 = arith.addf %1486, %1492 : vector<16x128xf32>
    %cst_557 = arith.constant 0.797884583 : f32
    %1494 = vector.broadcast %cst_557 : f32 to vector<16x128xf32>
    %1495 = arith.mulf %1494, %1493 : vector<16x128xf32>
    %1496 = math.tanh %1495 : vector<16x128xf32>
    %cst_558 = arith.constant 1.000000e+00 : f32
    %1497 = vector.broadcast %cst_558 : f32 to vector<16x128xf32>
    %1498 = arith.addf %1497, %1496 : vector<16x128xf32>
    %1499 = arith.mulf %1488, %1498 : vector<16x128xf32>
    %c128_559 = arith.constant 128 : index
    %c0_560 = arith.constant 0 : index
    %1500 = vector.load %arg2[%c128_559, %c0_560] : memref<304x128xbf16, #tpu.memory_space<vmem>>, vector<8x128xbf16>
    %1501 = arith.truncf %1475 : vector<8x128xf32> to vector<8x128xbf16>
    %cst_561 = arith.constant dense<0.000000e+00> : vector<8x8xf32>
    %1502 = tpu.matmul %1500, %1501, %cst_561 {dimension_numbers = #tpu.dot_dimension_numbers<[1], [1], [0], [0], [0, 0, 1, 0], [], []>} : vector<8x128xbf16>, vector<8x128xbf16>, vector<8x8xf32> -> vector<8x8xf32>
    %c32_562 = arith.constant 32 : index
    %c16_563 = arith.constant 16 : index
    %1503 = vector.load %arg1[%c32_562, %c16_563] : memref<64x128xf32, #tpu.memory_space<vmem>>, vector<8x8xf32>
    %1504 = arith.addf %1502, %1503 : vector<8x8xf32>
    %1505 = arith.mulf %1504, %1504 : vector<8x8xf32>
    %1506 = tpu.concatenate %1504, %1505 in 1 : vector<8x8xf32>, vector<8x8xf32> -> vector<8x16xf32>
    %cst_564 = arith.constant 1.250000e-01 : bf16
    %1507 = vector.broadcast %cst_564 : bf16 to vector<8x8xbf16>
    %1508 = arith.truncf %1506 : vector<8x16xf32> to vector<8x16xbf16>
    %cst_565 = arith.constant dense<0.000000e+00> : vector<8x16xf32>
    %1509 = tpu.matmul %1507, %1508, %cst_565 {dimension_numbers = #tpu.dot_dimension_numbers<[1], [0], [0], [1], [0, 0, 1, 1], [], []>} : vector<8x8xbf16>, vector<8x16xbf16>, vector<8x16xf32> -> vector<8x16xf32>
    %1510 = vector.extract_strided_slice %1509 {offsets = [0, 0], sizes = [8, 8], strides = [1, 1]} : vector<8x16xf32> to vector<8x8xf32>
    %1511 = vector.extract_strided_slice %1509 {offsets = [0, 8], sizes = [8, 8], strides = [1, 1]} : vector<8x16xf32> to vector<8x8xf32>
    %1512 = arith.mulf %1510, %1510 : vector<8x8xf32>
    %1513 = arith.subf %1511, %1512 : vector<8x8xf32>
    %cst_566 = arith.constant 0.000000e+00 : f32
    %1514 = vector.broadcast %cst_566 : f32 to vector<8x8xf32>
    %1515 = arith.maximumf %1513, %1514 : vector<8x8xf32>
    %1516 = arith.subf %1504, %1510 : vector<8x8xf32>
    %cst_567 = arith.constant 9.99999974E-6 : f32
    %1517 = vector.broadcast %cst_567 : f32 to vector<8x8xf32>
    %1518 = arith.addf %1515, %1517 : vector<8x8xf32>
    %1519 = math.rsqrt %1518 : vector<8x8xf32>
    %1520 = arith.mulf %1516, %1519 : vector<8x8xf32>
    %c32_568 = arith.constant 32 : index
    %c24_569 = arith.constant 24 : index
    %1521 = vector.load %arg1[%c32_568, %c24_569] : memref<64x128xf32, #tpu.memory_space<vmem>>, vector<8x8xf32>
    %1522 = arith.mulf %1520, %1521 : vector<8x8xf32>
    %c32_570 = arith.constant 32 : index
    %c32_571 = arith.constant 32 : index
    %1523 = vector.load %arg1[%c32_570, %c32_571] : memref<64x128xf32, #tpu.memory_space<vmem>>, vector<8x8xf32>
    %1524 = arith.addf %1522, %1523 : vector<8x8xf32>
    %1525 = math.exp %1524 : vector<8x8xf32>
    %1526 = arith.truncf %1499 : vector<16x128xf32> to vector<16x128xbf16>
    %c176_572 = arith.constant 176 : index
    %c0_573 = arith.constant 0 : index
    %1527 = vector.load %arg2[%c176_572, %c0_573] : memref<304x128xbf16, #tpu.memory_space<vmem>>, vector<128x16xbf16>
    %cst_574 = arith.constant dense<0.000000e+00> : vector<16x16xf32>
    %1528 = tpu.matmul %1526, %1527, %cst_574 {dimension_numbers = #tpu.dot_dimension_numbers<[1], [0], [0], [1], [0, 0, 1, 1], [], []>} : vector<16x128xbf16>, vector<128x16xbf16>, vector<16x16xf32> -> vector<16x16xf32>
    %c20_575 = arith.constant 20 : index
    %c0_576 = arith.constant 0 : index
    %1529 = vector.load %arg1[%c20_575, %c0_576] : memref<64x128xf32, #tpu.memory_space<vmem>>, vector<1x16xf32>
    %1530 = vector.broadcast %1529 : vector<1x16xf32> to vector<16x16xf32>
    %1531 = arith.addf %1528, %1530 : vector<16x16xf32>
    %c21_577 = arith.constant 21 : index
    %c0_578 = arith.constant 0 : index
    %1532 = vector.load %arg1[%c21_577, %c0_578] : memref<64x128xf32, #tpu.memory_space<vmem>>, vector<1x16xf32>
    %1533 = vector.broadcast %1532 : vector<1x16xf32> to vector<16x16xf32>
    %1534 = arith.mulf %1531, %1533 : vector<16x16xf32>
    %1535 = vector.extract_strided_slice %1525 {offsets = [0, 0], sizes = [8, 4], strides = [1, 1]} : vector<8x8xf32> to vector<8x4xf32>
    %1536 = vector.extract_strided_slice %1525 {offsets = [0, 4], sizes = [8, 4], strides = [1, 1]} : vector<8x8xf32> to vector<8x4xf32>
    %1537 = tpu.concatenate %1535, %1536 in 0 : vector<8x4xf32>, vector<8x4xf32> -> vector<16x4xf32>
    %1538 = vector.extract_strided_slice %1537 {offsets = [0, 0], sizes = [16, 1], strides = [1, 1]} : vector<16x4xf32> to vector<16x1xf32>
    %1539 = vector.shape_cast %1538 : vector<16x1xf32> to vector<16x1xf32>
    %1540 = vector.broadcast %1539 : vector<16x1xf32> to vector<16x4xf32>
    %1541 = vector.extract_strided_slice %1537 {offsets = [0, 1], sizes = [16, 1], strides = [1, 1]} : vector<16x4xf32> to vector<16x1xf32>
    %1542 = vector.shape_cast %1541 : vector<16x1xf32> to vector<16x1xf32>
    %1543 = vector.broadcast %1542 : vector<16x1xf32> to vector<16x4xf32>
    %1544 = vector.extract_strided_slice %1537 {offsets = [0, 2], sizes = [16, 1], strides = [1, 1]} : vector<16x4xf32> to vector<16x1xf32>
    %1545 = vector.shape_cast %1544 : vector<16x1xf32> to vector<16x1xf32>
    %1546 = vector.broadcast %1545 : vector<16x1xf32> to vector<16x4xf32>
    %1547 = vector.extract_strided_slice %1537 {offsets = [0, 3], sizes = [16, 1], strides = [1, 1]} : vector<16x4xf32> to vector<16x1xf32>
    %1548 = vector.shape_cast %1547 : vector<16x1xf32> to vector<16x1xf32>
    %1549 = vector.broadcast %1548 : vector<16x1xf32> to vector<16x4xf32>
    %1550 = tpu.concatenate %1540, %1543, %1546, %1549 in 1 : vector<16x4xf32>, vector<16x4xf32>, vector<16x4xf32>, vector<16x4xf32> -> vector<16x16xf32>
    %1551 = arith.mulf %1550, %1534 : vector<16x16xf32>
    %1552 = arith.addf %1164, %1551 : vector<16x16xf32>
    %c0_579 = arith.constant 0 : index
    %c0_580 = arith.constant 0 : index
    %1553 = vector.load %arg4[%c0_579, %c0_580] : memref<16x16xf32, #tpu.memory_space<vmem>>, vector<16x16xf32>
    tpu.vector_store %arg4[%c0_579, %c0_580], %1552 {strides = array<i32>} : memref<16x16xf32, #tpu.memory_space<vmem>>, vector<16x16xf32>,
    return
  }
}

</mosaic_0001>

<bundles_post_ra>
// kernel: resmixer_forward.1
= control target key start
LH: loop header
LB: loop body
LE: loop exit
PB: predicated region body
PF: predicated region fallthrough
CT: control target
= control target key end

     0   :  { %9 = vsyncpa [#allocation3], 0  ;;  %s8704_s0 = inlined_call_operand.hbm [shape: f32[16,16], index: 0, kind: input, shape index: {}]   ;;  %s8705_s1 = inlined_call_operand.hbm [shape: f32[64,128], index: 1, kind: input, shape index: {}]   ;;  %s8706_s2 = inlined_call_operand.hbm [shape: bf16[304,128], index: 2, kind: input, shape index: {}]   ;;  %s8707_s3 = inlined_call_operand.hbm [shape: bf16[560,256], index: 3, kind: input, shape index: {}]   ;;  %s8708_s4 = inlined_call_operand.hbm [shape: f32[16,16], index: 4, kind: output, shape index: {}]  }
   0x1   :  { %10 = vsyncpa [#allocation6], 0 }
   0x2   :  { %11 = vsyncpa [#allocation9], 0 }
   0x3   :  { %12 = vsyncpa [#allocation4], 0  ;;  %s7565_s15 = smov [#allocation5]   ;;  %s7566_s17 = smov [#allocation2]  }
   0x4   :  { %s30_s16 = sshll.u32 %s7565_s15, 4  ;;  %s18_s18 = sshll.u32 %s7566_s17, 4  ;;  %s31_s16 = int_to_ptr.vmem [resolvable:$true] %s30_s16  ;;  %s19_s18 = int_to_ptr.vmem [resolvable:$true] %s18_s18 }
   0x5   :  { %s7465_s19 = scalar_lea.vmem %s31_s16, 1024  ;;  %p7470_p1 = scmp.lt.s32.totalorder %s31_s16, %s31_s16 }
   0x6   :  { %p7466_p0 = scmp.ne.s32.totalorder %s31_s16, %s7465_s19  ;;  %p7471_p2 = scmp.lt.s32.totalorder %s7465_s19, %s7465_s19 }
   0x8   :  { %p7472_p3 = por %p7471_p2, %p7470_p1 }
   0xa   :  { %p7473_p4 = pnand %p7472_p3, %p7466_p0 }
   0xc   :  { %7476 = shalt.err (!%p7473_p4)
}
   0xd   :  { %s7567_s20 = smov 128   ;;  %s7568_s21 = smov 8  }
   0xe   :  { %36 = dma.hbm_to_vmem [thread:$0]  %s8705_s1, 1024, %s31_s16, [#allocation6], %s7567_s20, %s7567_s20, %s7568_s21  }
   0xf   :  { %s7485_s24 = scalar_lea.vmem %s19_s18, 256  ;;  %p7490_p6 = scmp.lt.s32.totalorder %s19_s18, %s19_s18 }
  0x10   :  { %p7486_p5 = scmp.ne.s32.totalorder %s19_s18, %s7485_s24  ;;  %p7491_p7 = scmp.lt.s32.totalorder %s7485_s24, %s7485_s24 }
  0x12   :  { %p7492_p8 = por %p7491_p7, %p7490_p6 }
  0x14   :  { %p7493_p9 = pnand %p7492_p8, %p7486_p5 }
  0x16   :  { %7496 = shalt.err (!%p7493_p9)
}
  0x17   :  { %24 = dma.hbm_to_vmem [thread:$0]  %s8704_s0, 256, %s19_s18, [#allocation3], %s7567_s20, %s7567_s20, %s7568_s21  }
  0x18   :  { %s7569_s27 = smov [#allocation7]  }
  0x19   :  { %s42_s28 = sshll.u32 %s7569_s27, 4  ;;  %s43_s28 = int_to_ptr.vmem [resolvable:$true] %s42_s28 }
  0x1a   :  { %s7505_s29 = scalar_lea.vmem %s43_s28, 2432  ;;  %p7510_p11 = scmp.lt.s32.totalorder %s43_s28, %s43_s28 }
  0x1b   :  { %p7506_p10 = scmp.ne.s32.totalorder %s43_s28, %s7505_s29  ;;  %p7511_p12 = scmp.lt.s32.totalorder %s7505_s29, %s7505_s29 }
  0x1d   :  { %p7512_p13 = por %p7511_p12, %p7510_p11 }
  0x1f   :  { %p7513_p0 = pnand %p7512_p13, %p7506_p10 }
  0x21   :  { %7516 = shalt.err (!%p7513_p0)
}
  0x22   :  { %s7570_s1 = smov 64   ;;  %s7571_s30 = smov 4  }
  0x23   :  { %48 = dma.hbm_to_vmem [thread:$0]  %s8706_s2, 2432, %s43_s28, [#allocation6], %s7570_s1, %s7570_s1, %s7571_s30  }
  0x24   :  { %s7572_s7 = smov [#allocation8]  }
  0x25   :  { %s54_s0 = sshll.u32 %s7572_s7, 4  ;;  %s55_s0 = int_to_ptr.vmem [resolvable:$true] %s54_s0 }
  0x26   :  { %s7525_s8 = scalar_lea.vmem %s55_s0, 8960  ;;  %p7530_p2 = scmp.lt.s32.totalorder %s55_s0, %s55_s0 }
  0x27   :  { %p7526_p1 = scmp.ne.s32.totalorder %s55_s0, %s7525_s8  ;;  %p7531_p3 = scmp.lt.s32.totalorder %s7525_s8, %s7525_s8 }
  0x29   :  { %p7532_p4 = por %p7531_p3, %p7530_p2 }
  0x2b   :  { %p7533_p5 = pnand %p7532_p4, %p7526_p1 }
  0x2d   :  { %7536 = shalt.err (!%p7533_p5)
}
  0x2e   :  { %60 = dma.hbm_to_vmem [thread:$0]  %s8707_s3, 8960, %s55_s0, [#allocation9], %s7567_s20, %s7567_s20, %s7568_s21  }
  0x2f   :  { %7557 = dma.done.wait [#allocation3], 256  }
  0x30   :  { %7558 = vsyncadd [#allocation3], 4294967040 }
  0x31   :  { %7559 = dma.done.wait [#allocation6], 3456  }
  0x32   :  { %7560 = vsyncadd [#allocation6], 4294963840 }
  0x33   :  { %7561 = dma.done.wait [#allocation9], 8960  }
  0x34   :  { %7562 = vsyncadd [#allocation9], 4294958336  ;;  %v7637_v0 = vld [vmem:[#allocation2 + $0x8] sm:$0xff]  ;;  %s7573_s2 = smov 16   ;;  %v6730_v1 = vld [vmem:[#allocation7 + $0x48] sm:$0xff]   ;;  %vm98_vm0 = vcmask 261120  }
  0x35   :  { %78 = vrot.lane.b32.xlu1 %v7637_v0, %s7573_s2  ;;  %v304_v2 = vmul.f32 %v7637_v0, %v7637_v0  ;;  %v6731_v3 = vld [vmem:[#allocation7 + $0x50] sm:$0xff]   ;;  %s7574_s3 = smov 96   ;;  %6013 = vmatprep.mubr.msk.bf16.mxu0 %vm98_vm0, %v6730_v1  ;;  %v6732_v6 = vld [vmem:[#allocation7 + $0x48] sm:$0xff]   ;;  %vm81_vm1 = vcmask 130048   ;;  %vm157_vm2 = vcmask 64512   ;;  %s7575_s11 = smov 120  }
  0x36   :  { %v7643_v4 = vld [vmem:[#allocation2] sm:$0xff]  ;;  %307 = vrot.lane.b32.xlu0 %v6730_v1, %s7574_s3  ;;  %v224_v35 = vld [vmem:[#allocation5 + $0x28] sm:$0xff]  ;;  %v226_v36 = vld [vmem:[#allocation5 + $0x38] sm:$0xff]  ;;  %s7576_s12 = smov 24   ;;  %s7579_s13 = smov 32   ;;  %vm301_vm3 = vcmask 195584  }
  0x37   :  { %v303_v5 = vmul.f32 %v7643_v4, %v7643_v4  ;;  %v305_v8 = vpack.c.bf16 %v7637_v0, %v7643_v4  ;;  %v225_v37 = vld [vmem:[#allocation5 + $0x30] sm:$0xff]  ;;  %v7705_v41 = vld [vmem:[#allocation5 + $0x20] sm:$0xff]  ;;  %vm526_vm4 = vcmask 392192   ;;  %vm7580_vm5 = vmmov 0   ;;  %s7581_s14 = smov 112   ;;  %s7583_s15 = smov 104  }
  0x38   :  { %vm1768_vm6 = vcmask 1043456   ;;  %s7585_s16 = smov 124   ;;  %vm1990_vm7 = vcmask 31744   ;;  %vm1995_vm8 = vcmask 97280   ;;  %s7588_s17 = smov [#allocation10]  }
  0x39   :  { %v306_v7 = vpack.c.bf16 %v304_v2, %v303_v5  ;;  %375 = vrot.lane.b32.xlu1 %v6732_v6, %s7570_s1  ;;  %s5558_s18 = sshll.u32 %s7588_s17, 4  ;;  %s5559_s18 = int_to_ptr.vmem [resolvable:$true] %s5558_s18 }
  0x3a   :  { %309 = vrot.lane.b32.xlu0 %v6731_v3, %s7574_s3  ;;  %s7537_s19 = scalar_lea.vmem %s5559_s18, 256  ;;  %p7542_p7 = scmp.lt.s32.totalorder %s5559_s18, %s5559_s18 }
  0x3b   :  { %6017 = vmatprep.subr.bf16.mxu1 %v306_v7  ;;  %p7538_p6 = scmp.ne.s32.totalorder %s5559_s18, %s7537_s19  ;;  %p7543_p8 = scmp.lt.s32.totalorder %s7537_s19, %s7537_s19 }
  0x3c   :  { %6018 = vmatpush3.bf16.msra.mxu1 %v306_v7 }
  0x3d   :  { %6019 = vmatprep.subr.bf16.mxu1 %v305_v8  ;;  %p7544_p9 = por %p7543_p8, %p7542_p7 }
  0x3f   :  { %p7545_p10 = pnand %p7544_p9, %p7538_p6 }
  0x40   :  { %6020 = vmatpush3.bf16.msra.mxu1 %v305_v8 }
  0xa7   :  { %v79_v9 = vpop.permute.xlu1 %78 }
  0xa8   :  { %v82_v10 = vsel %vm81_vm1, %v7643_v4, %v79_v9  ;;  %v7655_v11 = vpop.permute.xlu0 %307 }
  0xa9   :  { %v87_v12 = vpack.c.bf16 %v82_v10, %v82_v10  ;;  %6021 = vmatprep.mubr.msk.bf16.mxu1 %vm98_vm0, %v7655_v11 }
  0xab   :  { %6651 = vmatprep.subr.msk.bf16.mxu0 %vm98_vm0, %v87_v12  ;;  %v106_v13 = vsel %vm98_vm0, %v87_v12, 0  ;;  %v7666_v15 = vpop.permute.xlu1 %375 }
  0xac   :  { %6012 = vmatpush3.bf16.xpose.msra.mxu0 %v106_v13  ;;  %v7661_v14 = vpop.permute.xlu0 %309 }
  0xad   :  { %6022 = vmatmul.mubr.msk.bf16.vlgmr.msra.gmra.mxu1 %vm98_vm0, %v7661_v14  ;;  %6025 = vmatprep.subr.bf16.mxu0 %v7666_v15 }
  0xb3   :  { %6014 = vmatmul.mubr.msk.bf16.vlgmr.msra.gmra.mxu0 %vm98_vm0, %v6731_v3 }
  0xb4   :  { %6026 = vmatpush3.bf16.msra.mxu0 %v7666_v15 }
 0x16d   :  { %v6023_v16 = vpop.f32.mrf.mxu1 }
 0x16f   :  { %v351_v17 = vpop.f32.mrf.mxu1 }
 0x171   :  { %v6024_v18 = vpop.f32.mrf.mxu1 }
 0x172   :  { %v367_v25 = vpack.c.bf16 %v6024_v18, %v6023_v16 }
 0x173   :  { %v7670_v19 = vpop.f32.mrf.mxu0  ;;  %v354_v20 = vpop.f32.mrf.mxu1 }
 0x174   :  { %v164_v21 = vsel %vm157_vm2, %v7670_v19, 0.0  ;;  %v177_v22 = vmul.f32 %v7670_v19, %v7670_v19  ;;  %v366_v23 = vpack.c.bf16 %v354_v20, %v351_v17 }
 0x175   :  { %165 = vadd.xlane.f32.xlu1 %v164_v21  ;;  %v7676_v24 = vpop.f32.mrf.mxu0 }
 0x176   :  { %v185_v26 = vsel %vm157_vm2, %v177_v22, 0.0  ;;  %6027 = vmatprep.mubr.msk.bf16.mxu0 %vm81_vm1, %v366_v23  ;;  %v158_v38 = vsel %vm157_vm2, %v7676_v24, 0.0  ;;  %v175_v39 = vmul.f32 %v7676_v24, %v7676_v24 }
 0x177   :  { %v7679_v27 = vpop.f32.mrf.mxu0  ;;  %6028 = vmatmul.mubr.msk.bf16.vlgmr.msra.gmra.mxu0 %vm81_vm1, %v367_v25 }
 0x178   :  { %v167_v28 = vsel %vm157_vm2, %v7679_v27, 0.0  ;;  %6035 = vmatprep.mubr.msk.bf16.mxu0 %vm98_vm0, %v7655_v11  ;;  %v178_v33 = vmul.f32 %v7679_v27, %v7679_v27  ;;  %v179_v40 = vsel %vm157_vm2, %v175_v39, 0.0 }
 0x179   :  { %186 = vadd.xlane.f32.xlu1 %v185_v26  ;;  %v7687_v29 = vpop.f32.mrf.mxu0  ;;  %168 = vadd.xlane.f32.xlu0 %v167_v28 }
 0x17a   :  { %v161_v30 = vsel %vm157_vm2, %v7687_v29, 0.0  ;;  %v176_v31 = vmul.f32 %v7687_v29, %v7687_v29  ;;  %v188_v34 = vsel %vm157_vm2, %v178_v33, 0.0 }
 0x17c   :  { %v182_v32 = vsel %vm157_vm2, %v176_v31, 0.0 }
 0x17d   :  { %162 = vadd.xlane.f32.xlu0 %v161_v30 }
 0x181   :  { %183 = vadd.xlane.f32.xlu0 %v182_v32 }
 0x185   :  { %189 = vadd.xlane.f32.xlu0 %v188_v34 }
 0x18a   :  { %237 = vrot.lane.b32.xlu1 %v224_v35, %s7575_s11 }
 0x18e   :  { %241 = vrot.lane.b32.xlu1 %v226_v36, %s7575_s11 }
 0x19b   :  { %239 = vrot.lane.b32.xlu0 %v225_v37, %s7575_s11 }
 0x1b2   :  { %159 = vadd.xlane.f32.xlu1 %v158_v38 }
 0x1ba   :  { %180 = vadd.xlane.f32.xlu0 %v179_v40 }
 0x1d0   :  { %235 = vrot.lane.b32.xlu0 %v7705_v41, %s7575_s11 }
 0x1fe   :  { %v166_v42 = vpop.xlane.xlu1 %165 }
 0x1ff   :  { %v173_v43 = vmul.f32 0.125, %v166_v42 }
 0x201   :  { %v197_v44 = vmul.f32 %v173_v43, %v173_v43  ;;  %v209_v3 = vsub.f32 %v7670_v19, %v173_v43 }
 0x202   :  { %v187_v45 = vpop.xlane.xlu1 %186  ;;  %v169_v47 = vpop.xlane.xlu0 %168 }
 0x203   :  { %v193_v46 = vmul.f32 0.125, %v187_v45  ;;  %v174_v55 = vmul.f32 0.125, %v169_v47 }
 0x205   :  { %v201_v48 = vsub.f32 %v193_v46, %v197_v44  ;;  %v198_v57 = vmul.f32 %v174_v55, %v174_v55  ;;  %v210_v21 = vsub.f32 %v7679_v27, %v174_v55  ;;  %v6738_v55 = vld [vmem:[#allocation8 + $0x10] ss:$8 sps:$4 sm:$0xff]  }
 0x206   :  { %v163_v50 = vpop.xlane.xlu0 %162  ;;  %v7714_v16 = vpop.permute.xlu1 %237 }
 0x207   :  { %v205_v49 = vmax.f32 %v201_v48, 0.0  ;;  %v172_v51 = vmul.f32 0.125, %v163_v50  ;;  %v6735_v50 = vld [vmem:[#allocation8 + $0x20] ss:$8 sps:$4 sm:$0xff]  }
 0x209   :  { %v213_v52 = vadd.f32 1e-05, %v205_v49  ;;  %v196_v53 = vmul.f32 %v172_v51, %v172_v51  ;;  %v208_v12 = vsub.f32 %v7687_v29, %v172_v51  ;;  %v6733_v49 = vld [vmem:[#allocation8 + $0x24] ss:$8 sps:$4 sm:$0xff]   ;;  %v6736_v51 = vld [vmem:[#allocation8 + $0x14] ss:$8 sps:$4 sm:$0xff]  }
 0x20a   :  { %v184_v54 = vpop.xlane.xlu0 %183  ;;  %v7718_v28 = vpop.permute.xlu1 %241  ;;  %540 = vmatprep.subr.bf16.mxu1 %v6733_v49 }
 0x20b   :  { %6854 = vrsqrt.f32 %v213_v52  ;;  %v192_v56 = vmul.f32 0.125, %v184_v54  ;;  %541 = vmatpush1.bf16.msra.mxu1 %v6735_v50 }
 0x20c   :  { %542 = vmatprep.subr.bf16.mxu1 %v6736_v51 }
 0x20d   :  { %v200_v58 = vsub.f32 %v192_v56, %v196_v53 }
 0x20e   :  { %v190_v59 = vpop.xlane.xlu0 %189 }
 0x20f   :  { %v204_v60 = vmax.f32 %v200_v58, 0.0  ;;  %v194_v61 = vmul.f32 0.125, %v190_v59  ;;  %543 = vmatpush1.bf16.msra.mxu1 %v6738_v55 }
 0x211   :  { %v212_v62 = vadd.f32 1e-05, %v204_v60  ;;  %v202_v63 = vsub.f32 %v194_v61, %v198_v57 }
 0x212   :  { %v7710_v7 = vpop.permute.xlu0 %239 }
 0x213   :  { %6856 = vrsqrt.f32 %v212_v62  ;;  %v206_v1 = vmax.f32 %v202_v63, 0.0 }
 0x215   :  { %v214_v2 = vadd.f32 1e-05, %v206_v1 }
 0x217   :  { %6858 = vrsqrt.f32 %v214_v2 }
 0x218   :  { %v6855_v5 = vpop.eup %6854 }
 0x219   :  { %v221_v6 = vmul.f32 %v6855_v5, %v209_v3 }
 0x21b   :  { %v229_v8 = vmul.f32 %v225_v37, %v221_v6 }
 0x21d   :  { %v249_v9 = vadd.f32 %v7710_v7, %v229_v8 }
 0x21f   :  { %v257_v10 = vmul.f32 0.044715, %v249_v9  ;;  %v253_v44 = vmul.f32 0.5, %v249_v9 }
 0x220   :  { %v6857_v13 = vpop.eup %6856 }
 0x221   :  { %v261_v17 = vmul.f32 %v257_v10, %v249_v9  ;;  %v220_v18 = vmul.f32 %v6857_v13, %v208_v12  ;;  %v5581_v12 = vld [vmem:[#allocation5 + $0x9] ss:$0 sm:$0xff] }
 0x223   :  { %v265_v20 = vmul.f32 %v261_v17, %v249_v9  ;;  %v228_v19 = vmul.f32 %v224_v35, %v220_v18  ;;  %v5582_v17 = vld [vmem:[#allocation5 + $0xa] ss:$0 sm:$0xff] }
 0x224   :  { %v6859_v22 = vpop.eup %6858 }
 0x225   :  { %v269_v23 = vadd.f32 %v265_v20, %v249_v9  ;;  %v248_v25 = vadd.f32 %v7714_v16, %v228_v19  ;;  %v222_v26 = vmul.f32 %v6859_v22, %v210_v21 }
 0x227   :  { %v273_v30 = vmul.f32 0.7978846, %v269_v23  ;;  %v230_v31 = vmul.f32 %v226_v36, %v222_v26  ;;  %v256_v32 = vmul.f32 0.044715, %v248_v25  ;;  %v252_v59 = vmul.f32 0.5, %v248_v25 }
 0x229   :  { %6860 = vtanh.f32 %v273_v30  ;;  %v250_v29 = vadd.f32 %v7718_v28, %v230_v31  ;;  %v260_v33 = vmul.f32 %v256_v32, %v248_v25 }
 0x22b   :  { %v264_v34 = vmul.f32 %v260_v33, %v248_v25  ;;  %v258_v37 = vmul.f32 0.044715, %v250_v29  ;;  %v254_v3 = vmul.f32 0.5, %v250_v29 }
 0x22d   :  { %v268_v38 = vadd.f32 %v264_v34, %v248_v25  ;;  %v262_v39 = vmul.f32 %v258_v37, %v250_v29 }
 0x22f   :  { %v272_v27 = vmul.f32 0.7978846, %v268_v38  ;;  %v266_v35 = vmul.f32 %v262_v39, %v250_v29  ;;  %v6739_v39 = vld [vmem:[#allocation8 + $0x4] ss:$8 sps:$4 sm:$0xff]  }
 0x230   :  { %544 = vmatprep.subr.bf16.mxu1 %v6739_v39 }
 0x231   :  { %6862 = vtanh.f32 %v272_v27  ;;  %v270_v40 = vadd.f32 %v266_v35, %v250_v29  ;;  %v6741_v27 = vld [vmem:[#allocation8] ss:$8 sps:$4 sm:$0xff]   ;;  %v7577_v35 = vmov 0  }
 0x232   :  { %545 = vmatpush1.bf16.msra.mxu1 %v6741_v27  ;;  %562 = vmatprep.mubr.bf16.mxu1 %v7577_v35 }
 0x233   :  { %v274_v42 = vmul.f32 0.7978846, %v270_v40  ;;  %6684 = vset.pattern.permute.xlu1 %v7577_v35 }
 0x235   :  { %6864 = vtanh.f32 %v274_v42 }
 0x236   :  { %v6861_v43 = vpop.eup %6860 }
 0x237   :  { %v281_v45 = vadd.f32 1.0, %v6861_v43  ;;  %v6029_v46 = vpop.f32.mrf.mxu0  ;;  %v7578_v43 = vmov 0.0  }
 0x238   :  { %6039 = vmatprep.subr.bf16.mxu1 %v7578_v43 }
 0x239   :  { %v285_v36 = vmul.f32 %v281_v45, %v253_v44  ;;  %v418_v47 = vpop.f32.mrf.mxu0 }
 0x23a   :  { %v433_v48 = vmul.f32 %v418_v47, %v418_v47  ;;  %v439_v9 = vsub.f32 %v7643_v4, %v418_v47 }
 0x23b   :  { %292 = vrot.lane.b32.xlu1 %v285_v36, %s7573_s2  ;;  %v6030_v52 = vpop.f32.mrf.mxu0  ;;  %v160_v49 = vpop.xlane.xlu1 %159 }
 0x23c   :  { %v435_v53 = vsub.f32 %v6029_v46, %v433_v48  ;;  %v171_v51 = vmul.f32 0.125, %v160_v49 }
 0x23d   :  { %v421_v54 = vpop.f32.mrf.mxu0 }
 0x23e   :  { %v6863_v56 = vpop.eup %6862  ;;  %v437_v57 = vmax.f32 %v435_v53, 0.0  ;;  %v434_v58 = vmul.f32 %v421_v54, %v421_v54  ;;  %v440_v20 = vsub.f32 %v7637_v0, %v421_v54  ;;  %v195_v53 = vmul.f32 %v171_v51, %v171_v51 }
 0x23f   :  { %v280_v60 = vadd.f32 1.0, %v6863_v56 }
 0x240   :  { %v441_v61 = vadd.f32 1e-05, %v437_v57  ;;  %v436_v62 = vsub.f32 %v6030_v52, %v434_v58  ;;  %v207_v58 = vsub.f32 %v7676_v24, %v171_v51 }
 0x241   :  { %v284_v63 = vmul.f32 %v280_v60, %v252_v59 }
 0x242   :  { %v6865_v1 = vpop.eup %6864  ;;  %6866 = vrsqrt.f32 %v441_v61  ;;  %v438_v2 = vmax.f32 %v436_v62, 0.0 }
 0x243   :  { %288 = vrot.lane.b32.xlu1 %v284_v63, %s7568_s21  ;;  %v282_v5 = vadd.f32 1.0, %v6865_v1  ;;  %v181_v50 = vpop.xlane.xlu0 %180 }
 0x244   :  { %v442_v6 = vadd.f32 1e-05, %v438_v2  ;;  %v191_v52 = vmul.f32 0.125, %v181_v50 }
 0x245   :  { %v286_v8 = vmul.f32 %v282_v5, %v254_v3 }
 0x246   :  { %6868 = vrsqrt.f32 %v442_v6  ;;  %v199_v54 = vsub.f32 %v191_v52, %v195_v53 }
 0x247   :  { %296 = vrot.lane.b32.xlu0 %v286_v8, %s7576_s12  ;;  %v7732_v61 = vpop.permute.xlu0 %235 }
 0x248   :  { %v203_v55 = vmax.f32 %v199_v54, 0.0 }
 0x24a   :  { %v211_v56 = vadd.f32 1e-05, %v203_v55 }
 0x24f   :  { %v6867_v10 = vpop.eup %6866 }
 0x250   :  { %v445_v13 = vmul.f32 %v6867_v10, %v439_v9 }
 0x252   :  { %v452_v18 = vmul.f32 %v5581_v12, %v445_v13 }
 0x253   :  { %v6869_v21 = vpop.eup %6868 }
 0x254   :  { %v459_v19 = vadd.f32 %v5582_v17, %v452_v18  ;;  %v446_v22 = vmul.f32 %v6869_v21, %v440_v20 }
 0x256   :  { %v453_v23 = vmul.f32 %v5581_v12, %v446_v22  ;;  %v463_v25 = vmul.f32 0.044715, %v459_v19  ;;  %v461_v44 = vmul.f32 0.5, %v459_v19 }
 0x258   :  { %v460_v26 = vadd.f32 %v5582_v17, %v453_v23  ;;  %v465_v30 = vmul.f32 %v463_v25, %v459_v19  ;;  %v7740_v25 = vld [vmem:[#allocation7 + $0x38] sm:$0xff]  }
 0x25a   :  { %v464_v31 = vmul.f32 0.044715, %v460_v26  ;;  %v467_v32 = vmul.f32 %v465_v30, %v459_v19  ;;  %v462_v45 = vmul.f32 0.5, %v460_v26  ;;  %v7744_v30 = vld [vmem:[#allocation7 + $0x30] sm:$0xff]  }
 0x25c   :  { %v466_v29 = vmul.f32 %v464_v31, %v460_v26  ;;  %v469_v33 = vadd.f32 %v467_v32, %v459_v19  ;;  %v7748_v31 = vld [vmem:[#allocation7 + $0x28] sm:$0xff]   ;;  %v7752_v32 = vld [vmem:[#allocation7 + $0x20] sm:$0xff]  }
 0x25e   :  { %v468_v34 = vmul.f32 %v466_v29, %v460_v26  ;;  %v471_v4 = vmul.f32 0.7978846, %v469_v33  ;;  %v7756_v29 = vld [vmem:[#allocation7 + $0x18] sm:$0xff]   ;;  %v7760_v33 = vld [vmem:[#allocation7 + $0x10] sm:$0xff]  }
 0x260   :  { %v470_v37 = vadd.f32 %v468_v34, %v460_v26  ;;  %6870 = vtanh.f32 %v471_v4  ;;  %v7765_v34 = vld [vmem:[#allocation7 + $0x8] sm:$0xff]   ;;  %v7769_v4 = vld [vmem:[#allocation7] sm:$0xff]  }
 0x262   :  { %v472_v38 = vmul.f32 0.7978846, %v470_v37  ;;  %v5590_v37 = vld [vmem:[#allocation5] ss:$0 sm:$0xff] }
 0x264   :  { %6872 = vtanh.f32 %v472_v38 }
 0x265   :  { %6874 = vrsqrt.f32 %v211_v56 }
 0x26d   :  { %v6871_v0 = vpop.eup %6870 }
 0x26e   :  { %v475_v40 = vadd.f32 1.0, %v6871_v0  ;;  %v5591_v0 = vld [vmem:[#allocation5 + $0xb] ss:$0 sm:$0xff] }
 0x270   :  { %v477_v36 = vmul.f32 %v475_v40, %v461_v44 }
 0x271   :  { %v6873_v42 = vpop.eup %6872 }
 0x272   :  { %v476_v46 = vadd.f32 1.0, %v6873_v42  ;;  %v6875_v57 = vpop.eup %6874 }
 0x273   :  { %v219_v59 = vmul.f32 %v6875_v57, %v207_v58 }
 0x274   :  { %v478_v47 = vmul.f32 %v476_v46, %v462_v45 }
 0x275   :  { %v227_v60 = vmul.f32 %v7705_v41, %v219_v59 }
 0x276   :  { %v6679_v48 = vpack.i.bf16 %v478_v47, %v477_v36 }
 0x277   :  { %v247_v62 = vadd.f32 %v7732_v61, %v227_v60 }
 0x278   :  { %6680 = vrot.lane.b32.xlu1 %v6679_v48, %s7579_s13 }
 0x279   :  { %v255_v63 = vmul.f32 0.044715, %v247_v62  ;;  %v251_v10 = vmul.f32 0.5, %v247_v62 }
 0x27b   :  { %v259_v1 = vmul.f32 %v255_v63, %v247_v62 }
 0x27d   :  { %v263_v2 = vmul.f32 %v259_v1, %v247_v62 }
 0x27f   :  { %v267_v3 = vadd.f32 %v263_v2, %v247_v62 }
 0x281   :  { %v271_v5 = vmul.f32 0.7978846, %v267_v3 }
 0x283   :  { %6876 = vtanh.f32 %v271_v5 }
 0x290   :  { %v6877_v6 = vpop.eup %6876 }
 0x291   :  { %v279_v9 = vadd.f32 1.0, %v6877_v6 }
 0x293   :  { %v283_v13 = vmul.f32 %v279_v9, %v251_v10  ;;  %v6752_v9 = vld [vmem:[#allocation8 + $0xa0] ss:$8 sps:$4 sm:$0xff]   ;;  %v6753_v10 = vld [vmem:[#allocation8 + $0x94] ss:$8 sps:$4 sm:$0xff]  }
 0x2ad   :  { %v293_v8 = vpop.permute.xlu1 %292 }
 0x2b5   :  { %v289_v12 = vpop.permute.xlu1 %288 }
 0x2b6   :  { %v299_v24 = vsel %vm157_vm2, %v283_v13, %v289_v12  ;;  %v6755_v12 = vld [vmem:[#allocation8 + $0x90] ss:$8 sps:$4 sm:$0xff]   ;;  %v6756_v13 = vld [vmem:[#allocation8 + $0x84] ss:$8 sps:$4 sm:$0xff]  }
 0x2b7   :  { %v300_v18 = vsel %vm81_vm1, %v299_v24, %v293_v8  ;;  %v6750_v8 = vld [vmem:[#allocation8 + $0xa4] ss:$8 sps:$4 sm:$0xff]   ;;  %v6758_v24 = vld [vmem:[#allocation8 + $0x80] ss:$8 sps:$4 sm:$0xff]  }
 0x2b9   :  { %v297_v41 = vpop.permute.xlu0 %296 }
 0x2ba   :  { %v302_v19 = vsel %vm301_vm3, %v300_v18, %v297_v41  ;;  %v6759_v41 = vld [vmem:[#allocation8 + $0x74] ss:$8 sps:$4 sm:$0xff]   ;;  %v6762_v18 = vld [vmem:[#allocation8 + $0x64] ss:$8 sps:$4 sm:$0xff]  }
 0x2ea   :  { %v6681_v17 = vpop.permute.xlu1 %6680 }
 0x2eb   :  { %v6683_v20 = vunpack.i.h.bf16 %v6681_v17  ;;  %v6682_v21 = vunpack.i.l.bf16 %v6681_v17  ;;  %v6761_v17 = vld [vmem:[#allocation8 + $0x70] ss:$8 sps:$4 sm:$0xff]  }
 0x2ed   :  { %v487_v22 = vsel %vm98_vm0, %v302_v19, %v6682_v21  ;;  %v488_v23 = vsel %vm98_vm0, %v302_v19, %v6683_v20  ;;  %v6764_v20 = vld [vmem:[#allocation8 + $0x60] ss:$8 sps:$4 sm:$0xff]   ;;  %v6765_v21 = vld [vmem:[#allocation8 + $0x54] ss:$8 sps:$4 sm:$0xff]   ;;  %v6767_v19 = vld [vmem:[#allocation8 + $0x50] ss:$8 sps:$4 sm:$0xff]  }
 0x2ee   :  { %v489_v26 = vpack.c.bf16 %v488_v23, %v487_v22  ;;  %v6768_v22 = vld [vmem:[#allocation8 + $0x44] ss:$8 sps:$4 sm:$0xff]   ;;  %v6770_v23 = vld [vmem:[#allocation8 + $0x40] ss:$8 sps:$4 sm:$0xff]  }
 0x2f0   :  { %5589 = vmatmul.mubr.msk.bf16.vlgmr.msra.gmra.mxu1 %vm526_vm4, %v489_v26  ;;  %v6771_v26 = vld [vmem:[#allocation8 + $0x34] ss:$8 sps:$4 sm:$0xff]  }
 0x2f1   :  { %6040 = vmatpush3.bf16.msra.mxu1 %v7740_v25  ;;  %6055 = vmatprep.mubr.msk.bf16.mxu1 %vm7580_vm5, %v7578_v43 }
 0x2f2   :  { %6041 = vmatprep.subr.bf16.mxu1 %v7578_v43 }
 0x2f5   :  { %6042 = vmatpush3.bf16.msra.mxu1 %v7744_v30 }
 0x2f6   :  { %6043 = vmatprep.subr.bf16.mxu1 %v7578_v43 }
 0x2f9   :  { %6044 = vmatpush3.bf16.msra.mxu1 %v7748_v31 }
 0x2fa   :  { %6045 = vmatprep.subr.bf16.mxu1 %v7578_v43 }
 0x2fd   :  { %6046 = vmatpush3.bf16.msra.mxu1 %v7752_v32 }
 0x2fe   :  { %6047 = vmatprep.subr.bf16.mxu1 %v7578_v43 }
 0x301   :  { %6048 = vmatpush3.bf16.msra.mxu1 %v7756_v29 }
 0x302   :  { %6049 = vmatprep.subr.bf16.mxu1 %v7578_v43 }
 0x305   :  { %6050 = vmatpush3.bf16.msra.mxu1 %v7760_v33 }
 0x306   :  { %6051 = vmatprep.subr.bf16.mxu1 %v7578_v43 }
 0x309   :  { %6052 = vmatpush3.bf16.msra.mxu1 %v7765_v34 }
 0x30a   :  { %6053 = vmatprep.subr.bf16.mxu1 %v7578_v43 }
 0x30d   :  { %6054 = vmatpush3.bf16.msra.mxu1 %v7769_v4 }
 0x3b0   :  { %v564_v38 = vpop.f32.mrf.mxu1 }
 0x3b1   :  { %v577_v39 = vadd.f32 %v5590_v37, %v564_v38  ;;  %v6773_v37 = vld [vmem:[#allocation8 + $0x30] ss:$8 sps:$4 sm:$0xff]   ;;  %v6774_v38 = vld [vmem:[#allocation8 + $0x124] ss:$8 sps:$4 sm:$0xff]  }
 0x3b2   :  { %v566_v27 = vpop.f32.mrf.mxu1 }
 0x3b3   :  { %v638_v40 = vmul.f32 %v577_v39, %v577_v39  ;;  %v7774_v45 = vadd.f32 %v5591_v0, %v566_v27  ;;  %v6777_v27 = vld [vmem:[#allocation8 + $0x114] ss:$8 sps:$4 sm:$0xff]  }
 0x3b4   :  { %v568_v42 = vpop.f32.mrf.mxu1 }
 0x3b5   :  { %v639_v44 = vpack.c.bf16 %v638_v40, %v577_v39  ;;  %v585_v47 = vmul.f32 %v7774_v45, %v7774_v45  ;;  %v6780_v40 = vld [vmem:[#allocation8 + $0x104] ss:$8 sps:$4 sm:$0xff]   ;;  %v6782_v42 = vld [vmem:[#allocation8 + $0x100] ss:$8 sps:$4 sm:$0xff]  }
 0x3b6   :  { %v569_v46 = vpop.f32.mrf.mxu1 }
 0x3b7   :  { %v7776_v36 = vadd.f32 %v5591_v0, %v569_v46  ;;  %6056 = vmatmul.mubr.bf16.vlgmr.msra.gmra.mxu1 %v639_v44  ;;  %v6779_v0 = vld [vmem:[#allocation8 + $0x110] ss:$8 sps:$4 sm:$0xff]   ;;  %v6783_v44 = vld [vmem:[#allocation8 + $0xf4] ss:$8 sps:$4 sm:$0xff]  }
 0x3b8   :  { %6059 = vmatprep.mubr.msk.bf16.mxu1 %vm7580_vm5, %v7578_v43  ;;  %v6785_v46 = vld [vmem:[#allocation8 + $0xf0] ss:$8 sps:$4 sm:$0xff]  }
 0x3b9   :  { %v586_v48 = vmul.f32 %v7776_v36, %v7776_v36  ;;  %v587_v50 = vpack.c.bf16 %v7776_v36, %v7774_v45 }
 0x3bb   :  { %v588_v49 = vpack.c.bf16 %v586_v48, %v585_v47  ;;  %v6786_v47 = vld [vmem:[#allocation8 + $0xe4] ss:$8 sps:$4 sm:$0xff]   ;;  %v6788_v48 = vld [vmem:[#allocation8 + $0xe0] ss:$8 sps:$4 sm:$0xff]  }
 0x3bd   :  { %6031 = vmatprep.subr.bf16.mxu0 %v588_v49 }
 0x3be   :  { %6032 = vmatpush3.bf16.msra.mxu0 %v588_v49  ;;  %v6789_v49 = vld [vmem:[#allocation8 + $0xd4] ss:$8 sps:$4 sm:$0xff]  }
 0x3bf   :  { %6033 = vmatprep.subr.bf16.mxu0 %v587_v50 }
 0x3c2   :  { %6034 = vmatpush3.bf16.msra.mxu0 %v587_v50  ;;  %v6791_v50 = vld [vmem:[#allocation8 + $0xd0] ss:$8 sps:$4 sm:$0xff]  }
 0x3c3   :  { %1031 = vmatprep.subr.bf16.mxu0 %v6750_v8 }
 0x3c5   :  { %6036 = vmatmul.mubr.msk.bf16.vlgmr.msra.gmra.mxu0 %vm98_vm0, %v7661_v14 }
 0x3c6   :  { %1032 = vmatpush1.bf16.msra.mxu0 %v6752_v9 }
 0x3c7   :  { %1033 = vmatprep.subr.bf16.mxu0 %v6753_v10 }
 0x3ca   :  { %1034 = vmatpush1.bf16.msra.mxu0 %v6755_v12 }
 0x3cb   :  { %1035 = vmatprep.subr.bf16.mxu0 %v6756_v13 }
 0x3ce   :  { %1036 = vmatpush1.bf16.msra.mxu0 %v6758_v24  ;;  %v5603_v24 = vld [vmem:[#allocation5 + $0x2] ss:$0 sm:$0xff] }
 0x3cf   :  { %1037 = vmatprep.subr.bf16.mxu0 %v6759_v41 }
 0x3d2   :  { %1038 = vmatpush1.bf16.msra.mxu0 %v6761_v17 }
 0x3d3   :  { %1039 = vmatprep.subr.bf16.mxu0 %v6762_v18 }
 0x3d6   :  { %1040 = vmatpush1.bf16.msra.mxu0 %v6764_v20 }
 0x3d7   :  { %1041 = vmatprep.subr.bf16.mxu0 %v6765_v21 }
 0x3da   :  { %1042 = vmatpush1.bf16.msra.mxu0 %v6767_v19  ;;  %v5604_v19 = vld [vmem:[#allocation5 + $0xc] ss:$0 sm:$0xff] }
 0x3db   :  { %1043 = vmatprep.subr.bf16.mxu0 %v6768_v22 }
 0x3de   :  { %1044 = vmatpush1.bf16.msra.mxu0 %v6770_v23 }
 0x3df   :  { %1045 = vmatprep.subr.bf16.mxu0 %v6771_v26  ;;  %v5605_v26 = vld [vmem:[#allocation5 + $0xd] ss:$0 sm:$0xff] }
 0x3e2   :  { %1046 = vmatpush1.bf16.msra.mxu0 %v6773_v37 }
 0x3e3   :  { %1047 = vmatprep.subr.bf16.mxu0 %v6774_v38 }
 0x477   :  { %v740_v51 = vpop.f32.mrf.mxu1 }
 0x478   :  { %v763_v53 = vmul.f32 %v740_v51, %v740_v51  ;;  %v772_v2 = vsub.f32 %v577_v39, %v740_v51  ;;  %v6776_v39 = vld [vmem:[#allocation8 + $0x120] ss:$8 sps:$4 sm:$0xff]   ;;  %v6792_v51 = vld [vmem:[#allocation8 + $0xc4] ss:$8 sps:$4 sm:$0xff]  }
 0x479   :  { %v6057_v52 = vpop.f32.mrf.mxu1  ;;  %1048 = vmatpush2.bf16.msra.mxu0 %v6776_v39 }
 0x47a   :  { %1049 = vmatprep.subr.bf16.mxu0 %v6777_v27  ;;  %v6794_v52 = vld [vmem:[#allocation8 + $0xc0] ss:$8 sps:$4 sm:$0xff]  }
 0x47b   :  { %v743_v54 = vpop.f32.mrf.mxu1 }
 0x47c   :  { %v764_v55 = vsub.f32 %v743_v54, %v763_v53  ;;  %v6795_v53 = vld [vmem:[#allocation8 + $0xb4] ss:$8 sps:$4 sm:$0xff]   ;;  %v6797_v54 = vld [vmem:[#allocation8 + $0xb0] ss:$8 sps:$4 sm:$0xff]  }
 0x47d   :  { %v6058_v56 = vpop.f32.mrf.mxu1  ;;  %1050 = vmatpush2.bf16.msra.mxu0 %v6779_v0 }
 0x47e   :  { %v765_v57 = vmax.f32 %v764_v55, 0.0  ;;  %1051 = vmatprep.subr.bf16.mxu0 %v6780_v40 }
 0x480   :  { %v773_v58 = vadd.f32 1e-05, %v765_v57 }
 0x481   :  { %1052 = vmatpush2.bf16.msra.mxu0 %v6782_v42 }
 0x482   :  { %6878 = vrsqrt.f32 %v773_v58  ;;  %1053 = vmatprep.subr.bf16.mxu0 %v6783_v44 }
 0x485   :  { %v6037_v59 = vpop.f32.mrf.mxu0  ;;  %1054 = vmatpush2.bf16.msra.mxu0 %v6785_v46 }
 0x486   :  { %1055 = vmatprep.subr.bf16.mxu0 %v6786_v47 }
 0x487   :  { %v623_v60 = vpop.f32.mrf.mxu0 }
 0x489   :  { %v6038_v62 = vpop.f32.mrf.mxu0  ;;  %1056 = vmatpush2.bf16.msra.mxu0 %v6788_v48 }
 0x48a   :  { %v641_v6 = vpack.c.bf16 %v6038_v62, %v6037_v59  ;;  %1057 = vmatprep.subr.bf16.mxu0 %v6789_v49 }
 0x48b   :  { %v626_v63 = vpop.f32.mrf.mxu0 }
 0x48c   :  { %v640_v1 = vpack.c.bf16 %v626_v63, %v623_v60 }
 0x48d   :  { %1058 = vmatpush2.bf16.msra.mxu0 %v6791_v50 }
 0x48e   :  { %6060 = vmatmul.mubr.bf16.gmra.mxu1 %v640_v1  ;;  %1059 = vmatprep.subr.bf16.mxu0 %v6792_v51 }
 0x48f   :  { %v6879_v3 = vpop.eup %6878  ;;  %6063 = vmatprep.mubr.msk.bf16.mxu1 %vm7580_vm5, %v7578_v43 }
 0x490   :  { %v7790_v5 = vmul.f32 %v6879_v3, %v772_v2 }
 0x491   :  { %1060 = vmatpush2.bf16.msra.mxu0 %v6794_v52 }
 0x492   :  { %1061 = vmatprep.subr.bf16.mxu0 %v6795_v53 }
 0x495   :  { %1062 = vmatpush2.bf16.msra.mxu0 %v6797_v54 }
 0x496   :  { %6064 = vmatmul.mubr.bf16.gmra.mxu1 %v641_v6  ;;  %v5602_v6 = vld [vmem:[#allocation5 + $0x1] ss:$0 sm:$0xff] }
 0x497   :  { %6071 = vmatprep.mubr.msk.bf16.mxu1 %vm98_vm0, %v7655_v11  ;;  %v781_v13 = vmul.f32 %v5602_v6, %v7790_v5 }
 0x499   :  { %v787_v17 = vadd.f32 %v5603_v24, %v781_v13  ;;  %v5639_v13 = vld [vmem:[#allocation5 + $0xe] ss:$0 sm:$0xff] }
 0x49b   :  { %v789_v18 = vmul.f32 0.044715, %v787_v17 }
 0x49d   :  { %v790_v22 = vmul.f32 %v789_v18, %v787_v17 }
 0x49f   :  { %v791_v27 = vmul.f32 %v790_v22, %v787_v17 }
 0x4a1   :  { %v792_v44 = vadd.f32 %v791_v27, %v787_v17 }
 0x54e   :  { %v748_v55 = vpop.f32.mrf.mxu1 }
 0x54f   :  { %v766_v59 = vmul.f32 %v748_v55, %v748_v55  ;;  %v797_v20 = vsub.f32 %v7774_v45, %v748_v55  ;;  %v793_v45 = vmul.f32 0.7978846, %v792_v44 }
 0x550   :  { %v6061_v56 = vpop.f32.mrf.mxu1 }
 0x552   :  { %v751_v57 = vpop.f32.mrf.mxu1 }
 0x553   :  { %v767_v1 = vmul.f32 %v751_v57, %v751_v57  ;;  %v798_v37 = vsub.f32 %v7776_v36, %v751_v57 }
 0x554   :  { %v6062_v58 = vpop.f32.mrf.mxu1 }
 0x556   :  { %v756_v60 = vpop.f32.mrf.mxu1 }
 0x557   :  { %v768_v62 = vsub.f32 %v756_v60, %v766_v59  ;;  %v788_v60 = vmul.f32 0.5, %v787_v17 }
 0x558   :  { %v6065_v63 = vpop.f32.mrf.mxu1 }
 0x559   :  { %v770_v2 = vmax.f32 %v768_v62, 0.0 }
 0x55a   :  { %v759_v3 = vpop.f32.mrf.mxu1 }
 0x55b   :  { %v799_v8 = vadd.f32 1e-05, %v770_v2  ;;  %v769_v9 = vsub.f32 %v759_v3, %v767_v1 }
 0x55c   :  { %v6066_v10 = vpop.f32.mrf.mxu1 }
 0x55d   :  { %6880 = vrsqrt.f32 %v799_v8  ;;  %v771_v12 = vmax.f32 %v769_v9, 0.0 }
 0x55f   :  { %v800_v41 = vadd.f32 1e-05, %v771_v12 }
 0x561   :  { %6882 = vrsqrt.f32 %v800_v41 }
 0x562   :  { %6884 = vtanh.f32 %v793_v45 }
 0x56a   :  { %v6881_v21 = vpop.eup %6880 }
 0x56b   :  { %v803_v23 = vmul.f32 %v6881_v21, %v797_v20 }
 0x56d   :  { %v810_v38 = vmul.f32 %v5604_v19, %v803_v23  ;;  %v5638_v23 = vld [vmem:[#allocation5 + $0x3] ss:$0 sm:$0xff] }
 0x56e   :  { %v6883_v39 = vpop.eup %6882 }
 0x56f   :  { %v817_v0 = vadd.f32 %v5605_v26, %v810_v38  ;;  %v804_v40 = vmul.f32 %v6883_v39, %v798_v37  ;;  %v6885_v55 = vpop.eup %6884 }
 0x570   :  { %v795_v57 = vadd.f32 1.0, %v6885_v55  ;;  %v6800_v55 = vld [vmem:[#allocation8 + $0x1a0] ss:$8 sps:$4 sm:$0xff]  }
 0x571   :  { %v811_v5 = vmul.f32 %v5604_v19, %v804_v40  ;;  %v821_v42 = vmul.f32 0.044715, %v817_v0  ;;  %v819_v62 = vmul.f32 0.5, %v817_v0 }
 0x572   :  { %v796_v2 = vmul.f32 %v795_v57, %v788_v60  ;;  %v6803_v57 = vld [vmem:[#allocation8 + $0x190] ss:$8 sps:$4 sm:$0xff]   ;;  %v6807_v60 = vld [vmem:[#allocation8 + $0x174] ss:$8 sps:$4 sm:$0xff]  }
 0x573   :  { %v818_v46 = vadd.f32 %v5605_v26, %v811_v5  ;;  %v823_v47 = vmul.f32 %v821_v42, %v817_v0 }
 0x574   :  { %v837_v9 = vpack.c.bf16 %v796_v2, %v796_v2  ;;  %v6813_v2 = vld [vmem:[#allocation8 + $0x154] ss:$8 sps:$4 sm:$0xff]  }
 0x575   :  { %v822_v48 = vmul.f32 0.044715, %v818_v46  ;;  %v825_v49 = vmul.f32 %v823_v47, %v817_v0  ;;  %v820_v63 = vmul.f32 0.5, %v818_v46 }
 0x577   :  { %v824_v50 = vmul.f32 %v822_v48, %v818_v46  ;;  %v827_v51 = vadd.f32 %v825_v49, %v817_v0 }
 0x579   :  { %v826_v52 = vmul.f32 %v824_v50, %v818_v46  ;;  %v829_v53 = vmul.f32 0.7978846, %v827_v51 }
 0x57b   :  { %v828_v54 = vadd.f32 %v826_v52, %v818_v46  ;;  %6886 = vtanh.f32 %v829_v53 }
 0x57d   :  { %v830_v36 = vmul.f32 0.7978846, %v828_v54 }
 0x57f   :  { %6888 = vtanh.f32 %v830_v36  ;;  %v6798_v36 = vld [vmem:[#allocation8 + $0x1a4] ss:$8 sps:$4 sm:$0xff]  }
 0x580   :  { %1468 = vmatprep.subr.bf16.mxu0 %v6798_v36 }
 0x588   :  { %v6887_v56 = vpop.eup %6886 }
 0x589   :  { %v833_v58 = vadd.f32 1.0, %v6887_v56  ;;  %v6801_v56 = vld [vmem:[#allocation8 + $0x194] ss:$8 sps:$4 sm:$0xff]  }
 0x58b   :  { %v835_v3 = vmul.f32 %v833_v58, %v819_v62  ;;  %v6804_v58 = vld [vmem:[#allocation8 + $0x184] ss:$8 sps:$4 sm:$0xff]   ;;  %v6809_v62 = vld [vmem:[#allocation8 + $0x170] ss:$8 sps:$4 sm:$0xff]  }
 0x58c   :  { %v6889_v59 = vpop.eup %6888 }
 0x58d   :  { %v834_v1 = vadd.f32 1.0, %v6889_v59  ;;  %v6806_v59 = vld [vmem:[#allocation8 + $0x180] ss:$8 sps:$4 sm:$0xff]  }
 0x58f   :  { %v836_v6 = vmul.f32 %v834_v1, %v820_v63  ;;  %v6810_v63 = vld [vmem:[#allocation8 + $0x164] ss:$8 sps:$4 sm:$0xff]   ;;  %v6812_v1 = vld [vmem:[#allocation8 + $0x160] ss:$8 sps:$4 sm:$0xff]  }
 0x591   :  { %v838_v8 = vpack.c.bf16 %v836_v6, %v835_v3  ;;  %v6815_v3 = vld [vmem:[#allocation8 + $0x150] ss:$8 sps:$4 sm:$0xff]   ;;  %v6816_v6 = vld [vmem:[#allocation8 + $0x144] ss:$8 sps:$4 sm:$0xff]  }
 0x593   :  { %1063 = vmatprep.mubr.bf16.mxu0 %v838_v8  ;;  %v6818_v8 = vld [vmem:[#allocation8 + $0x140] ss:$8 sps:$4 sm:$0xff]  }
 0x594   :  { %1064 = vmatmul.mubr.bf16.vlgmr.msra.gmra.mxu0 %v837_v9  ;;  %v6819_v9 = vld [vmem:[#allocation8 + $0x134] ss:$8 sps:$4 sm:$0xff]  }
 0x595   :  { %1469 = vmatpush1.bf16.msra.mxu0 %v6800_v55 }
 0x596   :  { %1470 = vmatprep.subr.bf16.mxu0 %v6801_v56 }
 0x599   :  { %1471 = vmatpush1.bf16.msra.mxu0 %v6803_v57 }
 0x59a   :  { %1472 = vmatprep.subr.bf16.mxu0 %v6804_v58 }
 0x59d   :  { %1473 = vmatpush1.bf16.msra.mxu0 %v6806_v59  ;;  %v5643_v59 = vld [vmem:[#allocation5 + $0x5] ss:$0 sm:$0xff] }
 0x59e   :  { %1474 = vmatprep.subr.bf16.mxu0 %v6807_v60 }
 0x5a1   :  { %1475 = vmatpush1.bf16.msra.mxu0 %v6809_v62 }
 0x5a2   :  { %1476 = vmatprep.subr.bf16.mxu0 %v6810_v63 }
 0x5a5   :  { %1477 = vmatpush1.bf16.msra.mxu0 %v6812_v1 }
 0x5a6   :  { %1478 = vmatprep.subr.bf16.mxu0 %v6813_v2 }
 0x5a9   :  { %1479 = vmatpush1.bf16.msra.mxu0 %v6815_v3  ;;  %v5644_v3 = vld [vmem:[#allocation5 + $0xf] ss:$0 sm:$0xff] }
 0x5aa   :  { %1480 = vmatprep.subr.bf16.mxu0 %v6816_v6 }
 0x5ad   :  { %1481 = vmatpush1.bf16.msra.mxu0 %v6818_v8 }
 0x5ae   :  { %1482 = vmatprep.subr.bf16.mxu0 %v6819_v9  ;;  %v5645_v9 = vld [vmem:[#allocation5 + $0x10] ss:$0 sm:$0xff] }
 0x654   :  { %v1065_v10 = vpop.f32.mrf.mxu0 }
 0x655   :  { %v1078_v26 = vadd.f32 %v5638_v23, %v1065_v10  ;;  %v6821_v10 = vld [vmem:[#allocation8 + $0x130] ss:$8 sps:$4 sm:$0xff]   ;;  %v6834_v23 = vld [vmem:[#allocation8 + $0x1e4] ss:$8 sps:$4 sm:$0xff]  }
 0x656   :  { %v1067_v12 = vpop.f32.mrf.mxu0  ;;  %1483 = vmatpush1.bf16.msra.mxu0 %v6821_v10 }
 0x657   :  { %v7797_v41 = vadd.f32 %v5639_v13, %v1067_v12  ;;  %v1139_v37 = vmul.f32 %v1078_v26, %v1078_v26  ;;  %v6822_v12 = vld [vmem:[#allocation8 + $0x224] ss:$8 sps:$4 sm:$0xff]  }
 0x658   :  { %v1069_v24 = vpop.f32.mrf.mxu0  ;;  %1484 = vmatprep.subr.bf16.mxu0 %v6822_v12 }
 0x659   :  { %v1086_v17 = vmul.f32 %v7797_v41, %v7797_v41  ;;  %v1140_v38 = vpack.c.bf16 %v1139_v37, %v1078_v26  ;;  %v6825_v24 = vld [vmem:[#allocation8 + $0x214] ss:$8 sps:$4 sm:$0xff]  }
 0x65a   :  { %v1070_v18 = vpop.f32.mrf.mxu0  ;;  %v6837_v37 = vld [vmem:[#allocation8 + $0x1d4] ss:$8 sps:$4 sm:$0xff]  }
 0x65b   :  { %v7799_v20 = vadd.f32 %v5639_v13, %v1070_v18  ;;  %v6824_v13 = vld [vmem:[#allocation8 + $0x220] ss:$8 sps:$4 sm:$0xff]   ;;  %v6827_v18 = vld [vmem:[#allocation8 + $0x210] ss:$8 sps:$4 sm:$0xff]  }
 0x65c   :  { %1485 = vmatpush2.bf16.msra.mxu0 %v6824_v13 }
 0x65d   :  { %v1087_v21 = vmul.f32 %v7799_v20, %v7799_v20  ;;  %v1088_v22 = vpack.c.bf16 %v7799_v20, %v7797_v41  ;;  %1486 = vmatprep.subr.bf16.mxu0 %v6825_v24 }
 0x65f   :  { %v1089_v19 = vpack.c.bf16 %v1087_v21, %v1086_v17  ;;  %v6828_v17 = vld [vmem:[#allocation8 + $0x204] ss:$8 sps:$4 sm:$0xff]   ;;  %v6830_v21 = vld [vmem:[#allocation8 + $0x200] ss:$8 sps:$4 sm:$0xff]  }
 0x660   :  { %1487 = vmatpush2.bf16.msra.mxu0 %v6827_v18 }
 0x661   :  { %6067 = vmatprep.subr.bf16.mxu1 %v1089_v19  ;;  %1488 = vmatprep.subr.bf16.mxu0 %v6828_v17 }
 0x662   :  { %6068 = vmatpush3.bf16.msra.mxu1 %v1089_v19  ;;  %v6831_v19 = vld [vmem:[#allocation8 + $0x1f4] ss:$8 sps:$4 sm:$0xff]  }
 0x663   :  { %6069 = vmatprep.subr.bf16.mxu1 %v1088_v22 }
 0x664   :  { %1489 = vmatpush2.bf16.msra.mxu0 %v6830_v21 }
 0x665   :  { %1490 = vmatprep.subr.bf16.mxu0 %v6831_v19 }
 0x666   :  { %6070 = vmatpush3.bf16.msra.mxu1 %v1088_v22  ;;  %v6833_v22 = vld [vmem:[#allocation8 + $0x1f0] ss:$8 sps:$4 sm:$0xff]  }
 0x667   :  { %6075 = vmatprep.subr.bf16.mxu1 %v7578_v43 }
 0x668   :  { %1491 = vmatpush2.bf16.msra.mxu0 %v6833_v22 }
 0x669   :  { %6072 = vmatmul.mubr.msk.bf16.vlgmr.msra.gmra.mxu1 %vm98_vm0, %v7661_v14  ;;  %1492 = vmatprep.subr.bf16.mxu0 %v6834_v23 }
 0x66a   :  { %6076 = vmatpush3.bf16.msra.mxu1 %v7740_v25  ;;  %6091 = vmatprep.mubr.msk.bf16.mxu1 %vm7580_vm5, %v7578_v43 }
 0x66b   :  { %6077 = vmatprep.subr.bf16.mxu1 %v7578_v43 }
 0x66e   :  { %6078 = vmatpush3.bf16.msra.mxu1 %v7744_v30 }
 0x66f   :  { %6079 = vmatprep.subr.bf16.mxu1 %v7578_v43 }
 0x672   :  { %6080 = vmatpush3.bf16.msra.mxu1 %v7748_v31 }
 0x673   :  { %6081 = vmatprep.subr.bf16.mxu1 %v7578_v43 }
 0x676   :  { %6082 = vmatpush3.bf16.msra.mxu1 %v7752_v32 }
 0x677   :  { %6083 = vmatprep.subr.bf16.mxu1 %v7578_v43 }
 0x67a   :  { %6084 = vmatpush3.bf16.msra.mxu1 %v7756_v29 }
 0x67b   :  { %6085 = vmatprep.subr.bf16.mxu1 %v7578_v43 }
 0x67e   :  { %6086 = vmatpush3.bf16.msra.mxu1 %v7760_v33 }
 0x67f   :  { %6087 = vmatprep.subr.bf16.mxu1 %v7578_v43 }
 0x682   :  { %6088 = vmatpush3.bf16.msra.mxu1 %v7765_v34 }
 0x683   :  { %6089 = vmatprep.subr.bf16.mxu1 %v7578_v43 }
 0x686   :  { %6090 = vmatpush3.bf16.msra.mxu1 %v7769_v4 }
 0x689   :  { %6092 = vmatmul.mubr.bf16.vlgmr.msra.gmra.mxu1 %v1140_v38  ;;  %v6839_v38 = vld [vmem:[#allocation8 + $0x1d0] ss:$8 sps:$4 sm:$0xff]  }
 0x68a   :  { %6095 = vmatprep.mubr.msk.bf16.mxu1 %vm7580_vm5, %v7578_v43 }
 0x729   :  { %v6073_v39 = vpop.f32.mrf.mxu1 }
 0x72b   :  { %v1124_v27 = vpop.f32.mrf.mxu1 }
 0x72d   :  { %v6074_v0 = vpop.f32.mrf.mxu1 }
 0x72e   :  { %v1142_v42 = vpack.c.bf16 %v6074_v0, %v6073_v39  ;;  %v6840_v39 = vld [vmem:[#allocation8 + $0x1c4] ss:$8 sps:$4 sm:$0xff]   ;;  %v6843_v0 = vld [vmem:[#allocation8 + $0x1b4] ss:$8 sps:$4 sm:$0xff]  }
 0x72f   :  { %v1127_v40 = vpop.f32.mrf.mxu1 }
 0x730   :  { %v1141_v5 = vpack.c.bf16 %v1127_v40, %v1124_v27  ;;  %v6842_v27 = vld [vmem:[#allocation8 + $0x1c0] ss:$8 sps:$4 sm:$0xff]   ;;  %v6845_v40 = vld [vmem:[#allocation8 + $0x1b0] ss:$8 sps:$4 sm:$0xff]  }
 0x732   :  { %6096 = vmatmul.mubr.bf16.gmra.mxu1 %v1141_v5 }
 0x733   :  { %6099 = vmatprep.mubr.msk.bf16.mxu1 %vm7580_vm5, %v7578_v43 }
 0x73a   :  { %6100 = vmatmul.mubr.bf16.gmra.mxu1 %v1142_v42 }
 0x73b   :  { %6107 = vmatprep.mubr.msk.bf16.mxu1 %vm98_vm0, %v7655_v11 }
 0x749   :  { %v1177_v44 = vpop.f32.mrf.mxu1 }
 0x74a   :  { %v1200_v47 = vmul.f32 %v1177_v44, %v1177_v44  ;;  %v1209_v52 = vsub.f32 %v1078_v26, %v1177_v44  ;;  %v6836_v26 = vld [vmem:[#allocation8 + $0x1e0] ss:$8 sps:$4 sm:$0xff]  }
 0x74b   :  { %v6093_v46 = vpop.f32.mrf.mxu1  ;;  %1493 = vmatpush2.bf16.msra.mxu0 %v6836_v26 }
 0x74c   :  { %1494 = vmatprep.subr.bf16.mxu0 %v6837_v37 }
 0x74d   :  { %v1180_v48 = vpop.f32.mrf.mxu1 }
 0x74e   :  { %v1201_v49 = vsub.f32 %v1180_v48, %v1200_v47 }
 0x74f   :  { %v6094_v45 = vpop.f32.mrf.mxu1  ;;  %1495 = vmatpush2.bf16.msra.mxu0 %v6839_v38 }
 0x750   :  { %v1202_v50 = vmax.f32 %v1201_v49, 0.0  ;;  %1496 = vmatprep.subr.bf16.mxu0 %v6840_v39 }
 0x752   :  { %v1210_v51 = vadd.f32 1e-05, %v1202_v50 }
 0x753   :  { %1497 = vmatpush2.bf16.msra.mxu0 %v6842_v27 }
 0x754   :  { %6890 = vrsqrt.f32 %v1210_v51  ;;  %1498 = vmatprep.subr.bf16.mxu0 %v6843_v0 }
 0x757   :  { %1499 = vmatpush2.bf16.msra.mxu0 %v6845_v40 }
 0x758   :  { %6139 = vmatprep.subr.bf16.mxu0 %v7578_v43 }
 0x761   :  { %v6891_v53 = vpop.eup %6890 }
 0x762   :  { %v7833_v54 = vmul.f32 %v6891_v53, %v1209_v52  ;;  %v5642_v53 = vld [vmem:[#allocation5 + $0x4] ss:$0 sm:$0xff] }
 0x764   :  { %v1218_v58 = vmul.f32 %v5642_v53, %v7833_v54 }
 0x766   :  { %v1224_v62 = vadd.f32 %v5643_v59, %v1218_v58  ;;  %v5679_v58 = vld [vmem:[#allocation5 + $0x11] ss:$0 sm:$0xff] }
 0x768   :  { %v1226_v63 = vmul.f32 0.044715, %v1224_v62 }
 0x76a   :  { %v1227_v6 = vmul.f32 %v1226_v63, %v1224_v62 }
 0x76c   :  { %v1228_v24 = vmul.f32 %v1227_v6, %v1224_v62 }
 0x76e   :  { %v1229_v19 = vadd.f32 %v1228_v24, %v1224_v62 }
 0x7f2   :  { %v1185_v5 = vpop.f32.mrf.mxu1 }
 0x7f3   :  { %v1203_v47 = vmul.f32 %v1185_v5, %v1185_v5  ;;  %v1234_v1 = vsub.f32 %v7797_v41, %v1185_v5  ;;  %v1230_v41 = vmul.f32 0.7978846, %v1229_v19 }
 0x7f4   :  { %v6097_v42 = vpop.f32.mrf.mxu1 }
 0x7f6   :  { %v1188_v44 = vpop.f32.mrf.mxu1 }
 0x7f7   :  { %v1204_v50 = vmul.f32 %v1188_v44, %v1188_v44  ;;  %v1235_v10 = vsub.f32 %v7799_v20, %v1188_v44 }
 0x7f8   :  { %v6098_v46 = vpop.f32.mrf.mxu1 }
 0x7fa   :  { %v1193_v48 = vpop.f32.mrf.mxu1 }
 0x7fb   :  { %v1205_v49 = vsub.f32 %v1193_v48, %v1203_v47  ;;  %v1225_v48 = vmul.f32 0.5, %v1224_v62 }
 0x7fc   :  { %v6101_v45 = vpop.f32.mrf.mxu1 }
 0x7fd   :  { %v1207_v51 = vmax.f32 %v1205_v49, 0.0 }
 0x7fe   :  { %v1196_v52 = vpop.f32.mrf.mxu1 }
 0x7ff   :  { %v1236_v36 = vadd.f32 1e-05, %v1207_v51  ;;  %v1206_v55 = vsub.f32 %v1196_v52, %v1204_v50 }
 0x800   :  { %v6102_v56 = vpop.f32.mrf.mxu1 }
 0x801   :  { %6892 = vrsqrt.f32 %v1236_v36  ;;  %v1208_v57 = vmax.f32 %v1206_v55, 0.0 }
 0x803   :  { %v1237_v60 = vadd.f32 1e-05, %v1208_v57 }
 0x805   :  { %6894 = vrsqrt.f32 %v1237_v60 }
 0x806   :  { %6896 = vtanh.f32 %v1230_v41  ;;  %v5683_v41 = vld [vmem:[#allocation5 + $0x8] ss:$0 sm:$0xff] }
 0x80e   :  { %v6893_v2 = vpop.eup %6892 }
 0x80f   :  { %v1240_v8 = vmul.f32 %v6893_v2, %v1234_v1 }
 0x811   :  { %v1247_v12 = vmul.f32 %v5644_v3, %v1240_v8 }
 0x812   :  { %v6895_v13 = vpop.eup %6894 }
 0x813   :  { %v1254_v18 = vadd.f32 %v5645_v9, %v1247_v12  ;;  %v1241_v17 = vmul.f32 %v6895_v13, %v1235_v10  ;;  %v6897_v5 = vpop.eup %6896 }
 0x814   :  { %v1232_v44 = vadd.f32 1.0, %v6897_v5 }
 0x815   :  { %v1248_v54 = vmul.f32 %v5644_v3, %v1241_v17  ;;  %v1258_v21 = vmul.f32 0.044715, %v1254_v18  ;;  %v1256_v49 = vmul.f32 0.5, %v1254_v18 }
 0x816   :  { %v1233_v51 = vmul.f32 %v1232_v44, %v1225_v48 }
 0x817   :  { %v1255_v22 = vadd.f32 %v5645_v9, %v1248_v54  ;;  %v1260_v23 = vmul.f32 %v1258_v21, %v1254_v18 }
 0x818   :  { %v1274_v55 = vpack.c.bf16 %v1233_v51, %v1233_v51  ;;  %v6848_v51 = vld [vmem:[#allocation7 + $0x80] sm:$0xff]  }
 0x819   :  { %v1259_v26 = vmul.f32 0.044715, %v1255_v22  ;;  %v1262_v37 = vmul.f32 %v1260_v23, %v1254_v18  ;;  %v1257_v45 = vmul.f32 0.5, %v1255_v22 }
 0x81b   :  { %v1261_v38 = vmul.f32 %v1259_v26, %v1255_v22  ;;  %v1264_v39 = vadd.f32 %v1262_v37, %v1254_v18  ;;  %v5682_v26 = vld [vmem:[#allocation5 + $0x7] ss:$0 sm:$0xff] }
 0x81d   :  { %v1263_v27 = vmul.f32 %v1261_v38, %v1255_v22  ;;  %v1266_v0 = vmul.f32 0.7978846, %v1264_v39 }
 0x81f   :  { %v1265_v40 = vadd.f32 %v1263_v27, %v1255_v22  ;;  %6898 = vtanh.f32 %v1266_v0 }
 0x821   :  { %v1267_v20 = vmul.f32 0.7978846, %v1265_v40 }
 0x823   :  { %6900 = vtanh.f32 %v1267_v20 }
 0x82c   :  { %v6899_v42 = vpop.eup %6898 }
 0x82d   :  { %v1270_v46 = vadd.f32 1.0, %v6899_v42 }
 0x82f   :  { %v1272_v52 = vmul.f32 %v1270_v46, %v1256_v49  ;;  %v1711_v49 = vld [vmem:[#allocation7 + $0x40] sm:$0xf] }
 0x830   :  { %v6901_v47 = vpop.eup %6900 }
 0x831   :  { %v1271_v50 = vadd.f32 1.0, %v6901_v47 }
 0x833   :  { %v1273_v53 = vmul.f32 %v1271_v50, %v1257_v45  ;;  %v6846_v45 = vld [vmem:[#allocation7 + $0x90] sm:$0xff]   ;;  %v6847_v50 = vld [vmem:[#allocation7 + $0x88] sm:$0xff]  }
 0x835   :  { %v1275_v36 = vpack.c.bf16 %v1273_v53, %v1272_v52  ;;  %v6849_v52 = vld [vmem:[#allocation7 + $0x78] sm:$0xff]   ;;  %v6850_v53 = vld [vmem:[#allocation7 + $0x70] sm:$0xff]  }
 0x837   :  { %1500 = vmatprep.mubr.bf16.mxu0 %v1275_v36  ;;  %v6851_v36 = vld [vmem:[#allocation7 + $0x68] sm:$0xff]  }
 0x838   :  { %1501 = vmatmul.mubr.bf16.vlgmr.msra.gmra.mxu0 %v1274_v55  ;;  %v6852_v55 = vld [vmem:[#allocation7 + $0x60] sm:$0xff]  }
 0x839   :  { %6141 = vmatprep.mubr.msk.bf16.mxu0 %vm7580_vm5, %v7578_v43 }
 0x8f8   :  { %v1502_v56 = vpop.f32.mrf.mxu0 }
 0x8fa   :  { %v1504_v57 = vpop.f32.mrf.mxu0 }
 0x8fb   :  { %v7841_v60 = vadd.f32 %v5679_v58, %v1504_v57 }
 0x8fc   :  { %v1506_v59 = vpop.f32.mrf.mxu0 }
 0x8fd   :  { %v1523_v1 = vmul.f32 %v7841_v60, %v7841_v60 }
 0x8fe   :  { %v1507_v62 = vpop.f32.mrf.mxu0 }
 0x8ff   :  { %v7843_v63 = vadd.f32 %v5679_v58, %v1507_v62 }
 0x901   :  { %v1524_v2 = vmul.f32 %v7843_v63, %v7843_v63  ;;  %v1525_v6 = vpack.c.bf16 %v7843_v63, %v7841_v60 }
 0x903   :  { %v1526_v3 = vpack.c.bf16 %v1524_v2, %v1523_v1 }
 0x905   :  { %6103 = vmatprep.subr.bf16.mxu1 %v1526_v3 }
 0x906   :  { %6104 = vmatpush3.bf16.msra.mxu1 %v1526_v3 }
 0x907   :  { %6105 = vmatprep.subr.bf16.mxu1 %v1525_v6 }
 0x90a   :  { %6106 = vmatpush3.bf16.msra.mxu1 %v1525_v6 }
 0x90b   :  { %6111 = vmatprep.subr.bf16.mxu1 %v7578_v43 }
 0x90d   :  { %6108 = vmatmul.mubr.msk.bf16.vlgmr.msra.gmra.mxu1 %vm98_vm0, %v7661_v14 }
 0x90e   :  { %6112 = vmatpush3.bf16.msra.mxu1 %v7740_v25  ;;  %6127 = vmatprep.mubr.msk.bf16.mxu1 %vm7580_vm5, %v7578_v43  ;;  %v5678_v25 = vld [vmem:[#allocation5 + $0x6] ss:$0 sm:$0xff] }
 0x90f   :  { %6113 = vmatprep.subr.bf16.mxu1 %v7578_v43  ;;  %v1515_v8 = vadd.f32 %v5678_v25, %v1502_v56  ;;  %v6853_v56 = vld [vmem:[#allocation7 + $0x58] sm:$0xff]  }
 0x912   :  { %6114 = vmatpush3.bf16.msra.mxu1 %v7744_v30  ;;  %v1576_v30 = vmul.f32 %v1515_v8, %v1515_v8 }
 0x913   :  { %6115 = vmatprep.subr.bf16.mxu1 %v7578_v43 }
 0x916   :  { %6116 = vmatpush3.bf16.msra.mxu1 %v7748_v31  ;;  %v1577_v31 = vpack.c.bf16 %v1576_v30, %v1515_v8 }
 0x917   :  { %6117 = vmatprep.subr.bf16.mxu1 %v7578_v43 }
 0x91a   :  { %6118 = vmatpush3.bf16.msra.mxu1 %v7752_v32  ;;  %v7874_v32 = vld [vmem:[#allocation5 + $0x20] sm:$0xff] }
 0x91b   :  { %6119 = vmatprep.subr.bf16.mxu1 %v7578_v43  ;;  %1715 = vrot.lane.b32.xlu0 %v7874_v32, %s7581_s14 }
 0x91e   :  { %6120 = vmatpush3.bf16.msra.mxu1 %v7756_v29 }
 0x91f   :  { %6121 = vmatprep.subr.bf16.mxu1 %v7578_v43 }
 0x922   :  { %6122 = vmatpush3.bf16.msra.mxu1 %v7760_v33 }
 0x923   :  { %6123 = vmatprep.subr.bf16.mxu1 %v7578_v43 }
 0x926   :  { %6124 = vmatpush3.bf16.msra.mxu1 %v7765_v34 }
 0x927   :  { %6125 = vmatprep.subr.bf16.mxu1 %v7578_v43 }
 0x92a   :  { %6126 = vmatpush3.bf16.msra.mxu1 %v7769_v4 }
 0x92b   :  { %6151 = vmatprep.subr.bf16.mxu1 %v7578_v43 }
 0x92d   :  { %6128 = vmatmul.mubr.bf16.vlgmr.msra.gmra.mxu1 %v1577_v31 }
 0x92e   :  { %6131 = vmatprep.mubr.msk.bf16.mxu1 %vm7580_vm5, %v7578_v43  ;;  %6152 = vmatpush3.bf16.msra.mxu1 %v6846_v45 }
 0x92f   :  { %6153 = vmatprep.subr.bf16.mxu1 %v7578_v43 }
 0x932   :  { %6154 = vmatpush3.bf16.msra.mxu1 %v6847_v50 }
 0x933   :  { %6155 = vmatprep.subr.bf16.mxu1 %v7578_v43 }
 0x936   :  { %6156 = vmatpush3.bf16.msra.mxu1 %v6848_v51 }
 0x937   :  { %6157 = vmatprep.subr.bf16.mxu1 %v7578_v43 }
 0x93a   :  { %6158 = vmatpush3.bf16.msra.mxu1 %v6849_v52 }
 0x93b   :  { %6159 = vmatprep.subr.bf16.mxu1 %v7578_v43 }
 0x93e   :  { %6160 = vmatpush3.bf16.msra.mxu1 %v6850_v53 }
 0x93f   :  { %6161 = vmatprep.subr.bf16.mxu1 %v7578_v43 }
 0x942   :  { %6162 = vmatpush3.bf16.msra.mxu1 %v6851_v36 }
 0x943   :  { %6163 = vmatprep.subr.bf16.mxu1 %v7578_v43 }
 0x946   :  { %6164 = vmatpush3.bf16.msra.mxu1 %v6852_v55 }
 0x947   :  { %6165 = vmatprep.subr.bf16.mxu1 %v7578_v43 }
 0x94a   :  { %6166 = vmatpush3.bf16.msra.mxu1 %v6853_v56 }
 0x98d   :  { %v7895_v50 = vpop.permute.xlu0 %1715 }
 0x9cd   :  { %v6109_v29 = vpop.f32.mrf.mxu1 }
 0x9cf   :  { %v1561_v33 = vpop.f32.mrf.mxu1 }
 0x9d1   :  { %v6110_v34 = vpop.f32.mrf.mxu1 }
 0x9d2   :  { %v1579_v4 = vpack.c.bf16 %v6110_v34, %v6109_v29 }
 0x9d3   :  { %v1564_v9 = vpop.f32.mrf.mxu1 }
 0x9d4   :  { %v1578_v10 = vpack.c.bf16 %v1564_v9, %v1561_v33 }
 0x9d6   :  { %6132 = vmatmul.mubr.bf16.gmra.mxu1 %v1578_v10 }
 0x9d7   :  { %6135 = vmatprep.mubr.msk.bf16.mxu1 %vm7580_vm5, %v7578_v43 }
 0x9de   :  { %6136 = vmatmul.mubr.bf16.gmra.mxu1 %v1579_v4 }
 0x9df   :  { %6167 = vmatprep.mubr.msk.bf16.mxu1 %vm7580_vm5, %v7578_v43 }
 0x9ed   :  { %v1614_v12 = vpop.f32.mrf.mxu1 }
 0x9ee   :  { %v1637_v24 = vmul.f32 %v1614_v12, %v1614_v12  ;;  %v1646_v22 = vsub.f32 %v1515_v8, %v1614_v12  ;;  %v5684_v12 = vld [vmem:[#allocation5 + $0x12] ss:$0 sm:$0xff] }
 0x9ef   :  { %v6129_v13 = vpop.f32.mrf.mxu1 }
 0x9f1   :  { %v1617_v18 = vpop.f32.mrf.mxu1 }
 0x9f2   :  { %v1638_v17 = vsub.f32 %v1617_v18, %v1637_v24  ;;  %v5685_v24 = vld [vmem:[#allocation5 + $0x13] ss:$0 sm:$0xff] }
 0x9f3   :  { %v6130_v54 = vpop.f32.mrf.mxu1 }
 0x9f4   :  { %v1639_v21 = vmax.f32 %v1638_v17, 0.0 }
 0x9f6   :  { %v1647_v19 = vadd.f32 1e-05, %v1639_v21 }
 0x9f8   :  { %6902 = vrsqrt.f32 %v1647_v19 }
 0xa05   :  { %v6903_v23 = vpop.eup %6902 }
 0xa06   :  { %v1649_v37 = vmul.f32 %v6903_v23, %v1646_v22 }
 0xa08   :  { %v1655_v38 = vmul.f32 %v5682_v26, %v1649_v37 }
 0xa0a   :  { %v1661_v39 = vadd.f32 %v5683_v41, %v1655_v38 }
 0xa0c   :  { %v1663_v27 = vmul.f32 0.044715, %v1661_v39  ;;  %v1662_v44 = vmul.f32 0.5, %v1661_v39 }
 0xa0e   :  { %v1664_v0 = vmul.f32 %v1663_v27, %v1661_v39 }
 0xa10   :  { %v1665_v40 = vmul.f32 %v1664_v0, %v1661_v39 }
 0xa12   :  { %v1666_v20 = vadd.f32 %v1665_v40, %v1661_v39 }
 0xa14   :  { %v1667_v5 = vmul.f32 0.7978846, %v1666_v20 }
 0xa16   :  { %6904 = vtanh.f32 %v1667_v5 }
 0xa23   :  { %v6905_v42 = vpop.eup %6904 }
 0xa24   :  { %v1669_v46 = vadd.f32 1.0, %v6905_v42 }
 0xa26   :  { %v1670_v47 = vmul.f32 %v1669_v46, %v1662_v44 }
 0xa28   :  { %v1712_v48 = vpack.c.bf16 %v1670_v47, %v1670_v47 }
 0xa2a   :  { %6140 = vmatpush3.bf16.xpose.msra.mxu0 %v1712_v48 }
 0xa2b   :  { %6145 = vmatprep.subr.bf16.mxu0 %v7578_v43 }
 0xa31   :  { %6142 = vmatmul.mubr.bf16.vlgmr.msra.gmra.mxu0 %v1711_v49 }
 0xa32   :  { %6147 = vmatprep.mubr.msk.bf16.mxu0 %vm7580_vm5, %v7578_v43 }
 0xa96   :  { %v1622_v57 = vpop.f32.mrf.mxu1 }
 0xa97   :  { %v1640_v1 = vmul.f32 %v1622_v57, %v1622_v57  ;;  %v1671_v10 = vsub.f32 %v7841_v60, %v1622_v57 }
 0xa98   :  { %v6133_v58 = vpop.f32.mrf.mxu1 }
 0xa9a   :  { %v1625_v59 = vpop.f32.mrf.mxu1 }
 0xa9b   :  { %v1641_v25 = vmul.f32 %v1625_v59, %v1625_v59  ;;  %v1672_v18 = vsub.f32 %v7843_v63, %v1625_v59 }
 0xa9c   :  { %v6134_v62 = vpop.f32.mrf.mxu1 }
 0xa9e   :  { %v1630_v2 = vpop.f32.mrf.mxu1 }
 0xa9f   :  { %v1642_v3 = vsub.f32 %v1630_v2, %v1640_v1  ;;  %v7582_v1 = vmov 1040203264   ;;  %v7110_v2 = vld [vmem:[#allocation7 + $0x48] sm:$0xff]  }
 0xaa0   :  { %v6137_v6 = vpop.f32.mrf.mxu1 }
 0xaa1   :  { %v1644_v8 = vmax.f32 %v1642_v3, 0.0 }
 0xaa2   :  { %v1633_v30 = vpop.f32.mrf.mxu1 }
 0xaa3   :  { %v1673_v31 = vadd.f32 1e-05, %v1644_v8  ;;  %v1643_v29 = vsub.f32 %v1633_v30, %v1641_v25 }
 0xaa4   :  { %v6138_v33 = vpop.f32.mrf.mxu1 }
 0xaa5   :  { %6906 = vrsqrt.f32 %v1673_v31  ;;  %v1645_v34 = vmax.f32 %v1643_v29, 0.0 }
 0xaa7   :  { %v1674_v9 = vadd.f32 1e-05, %v1645_v34 }
 0xaa9   :  { %6908 = vrsqrt.f32 %v1674_v9 }
 0xab2   :  { %v6907_v4 = vpop.eup %6906 }
 0xab3   :  { %v1677_v13 = vmul.f32 %v6907_v4, %v1671_v10 }
 0xab5   :  { %v1684_v17 = vmul.f32 %v5684_v12, %v1677_v13 }
 0xab6   :  { %v6909_v54 = vpop.eup %6908 }
 0xab7   :  { %v1691_v21 = vadd.f32 %v5685_v24, %v1684_v17  ;;  %v1678_v19 = vmul.f32 %v6909_v54, %v1672_v18 }
 0xab9   :  { %v1685_v22 = vmul.f32 %v5684_v12, %v1678_v19  ;;  %v1695_v23 = vmul.f32 0.044715, %v1691_v21  ;;  %v1693_v44 = vmul.f32 0.5, %v1691_v21 }
 0xabb   :  { %v1692_v26 = vadd.f32 %v5685_v24, %v1685_v22  ;;  %v1697_v37 = vmul.f32 %v1695_v23, %v1691_v21  ;;  %v7584_v24 = vmov 1  }
 0xabc   :  { %6685 = vset.pattern.permute.xlu0 %v7584_v24 }
 0xabd   :  { %v1696_v41 = vmul.f32 0.044715, %v1692_v26  ;;  %v1699_v38 = vmul.f32 %v1697_v37, %v1691_v21  ;;  %v1694_v46 = vmul.f32 0.5, %v1692_v26 }
 0xabf   :  { %v1698_v39 = vmul.f32 %v1696_v41, %v1692_v26  ;;  %v1701_v27 = vadd.f32 %v1699_v38, %v1691_v21  ;;  %v7586_v41 = vmov 2   ;;  %v7587_v38 = vmov 3  }
 0xac1   :  { %v1700_v0 = vmul.f32 %v1698_v39, %v1692_v26  ;;  %v1703_v60 = vmul.f32 0.7978846, %v1701_v27  ;;  %v5687_v27 = vld [vmem:[#allocation5 + $0x14] ss:$0 sm:$0xff] }
 0xac3   :  { %v1702_v40 = vadd.f32 %v1700_v0, %v1692_v26  ;;  %6910 = vtanh.f32 %v1703_v60 }
 0xac5   :  { %v1704_v20 = vmul.f32 0.7978846, %v1702_v40 }
 0xac7   :  { %6912 = vtanh.f32 %v1704_v20  ;;  %v5696_v20 = vld [vmem:[#allocation5 + $0x15] ss:$0 sm:$0xff] }
 0xad0   :  { %v6911_v5 = vpop.eup %6910 }
 0xad1   :  { %v1707_v63 = vadd.f32 1.0, %v6911_v5 }
 0xad3   :  { %v1709_v48 = vmul.f32 %v1707_v63, %v1693_v44 }
 0xad4   :  { %v6913_v42 = vpop.eup %6912 }
 0xad5   :  { %v1708_v47 = vadd.f32 1.0, %v6913_v42 }
 0xad7   :  { %v1710_v49 = vmul.f32 %v1708_v47, %v1694_v46 }
 0xad9   :  { %v1837_v45 = vpack.c.bf16 %v1710_v49, %v1709_v48  ;;  %v7111_v48 = vld [vmem:[#allocation2 + $0x8] sm:$0xff] }
 0xadb   :  { %6168 = vmatmul.mubr.bf16.vlgmr.msra.gmra.mxu1 %v1837_v45 }
 0xadc   :  { %6195 = vmatprep.mubr.msk.bf16.mxu1 %vm98_vm0, %v7655_v11 }
 0xaf1   :  { %v1752_v51 = vpop.f32.mrf.mxu0 }
 0xaf2   :  { %v1753_v52 = vadd.f32 %v1752_v51, %v7895_v50 }
 0xaf3   :  { %v6143_v53 = vpop.f32.mrf.mxu0 }
 0xaf4   :  { %v1758_v36 = vmul.f32 %v1753_v52, %v1753_v52 }
 0xaf5   :  { %v1755_v55 = vpop.f32.mrf.mxu0 }
 0xaf6   :  { %1760 = vrot.lane.b32.xlu1 %v1758_v36, %s7568_s21 }
 0xaf7   :  { %v6144_v56 = vpop.f32.mrf.mxu0 }
 0xb68   :  { %v1761_v57 = vpop.permute.xlu1 %1760 }
 0xb69   :  { %v1763_v58 = vsel %vm157_vm2, %v1753_v52, %v1761_v57 }
 0xb6a   :  { %v1764_v59 = vpack.c.bf16 %v1763_v58, %v1763_v58 }
 0xb6c   :  { %v1770_v62 = vsel %vm1768_vm6, %v1764_v59, 0 }
 0xb6d   :  { %6146 = vmatpush3.bf16.msra.mxu0 %v1770_v62  ;;  %v7112_v62 = vld [vmem:[#allocation2] sm:$0xff] }
 0xb70   :  { %6148 = vmatmul.mubr.msk.bf16.vlgmr.msra.gmra.mxu0 %vm157_vm2, %v7582_v1 }
 0xb71   :  { %6173 = vmatprep.mubr.msk.bf16.mxu0 %vm98_vm0, %v7110_v2 }
 0xb9b   :  { %v7904_v3 = vpop.f32.mrf.mxu1 }
 0xb9c   :  { %v1942_v36 = vadd.f32 %v5687_v27, %v7904_v3 }
 0xb9d   :  { %v6169_v6 = vpop.f32.mrf.mxu1 }
 0xb9e   :  { %v1953_v58 = vmul.f32 %v5696_v20, %v1942_v36 }
 0xb9f   :  { %v1944_v25 = vpop.f32.mrf.mxu1 }
 0xba0   :  { %v1945_v60 = vadd.f32 %v5687_v27, %v1944_v25 }
 0xba1   :  { %v6170_v8 = vpop.f32.mrf.mxu1 }
 0xba2   :  { %v1954_v63 = vmul.f32 %v5696_v20, %v1945_v60 }
 0xc30   :  { %v1806_v30 = vpop.f32.mrf.mxu0 }
 0xc31   :  { %v1812_v31 = vmul.f32 %v1806_v30, %v1806_v30  ;;  %v1819_v18 = vsub.f32 %v1753_v52, %v1806_v30 }
 0xc32   :  { %v6149_v29 = vpop.f32.mrf.mxu0 }
 0xc33   :  { %1814 = vrot.lane.b32.xlu0 %v1812_v31, %s7568_s21 }
 0xc34   :  { %v1809_v33 = vpop.f32.mrf.mxu0 }
 0xc35   :  { %v7113_v33 = vld [vmem:[#allocation7 + $0x50] sm:$0xff]  }
 0xc36   :  { %v6150_v34 = vpop.f32.mrf.mxu0 }
 0xc37   :  { %1827 = vrot.lane.b32.xlu0 %v7874_v32, %s7583_s15 }
 0xca5   :  { %v1815_v9 = vpop.permute.xlu0 %1814 }
 0xca6   :  { %v1817_v10 = vsub.f32 %v1806_v30, %v1815_v9  ;;  %v7114_v9 = vld [vmem:[#allocation8 + $0x24] ss:$8 sps:$4 sm:$0xff]  }
 0xca8   :  { %v1818_v4 = vmax.f32 %v1817_v10, 0.0 }
 0xca9   :  { %v7912_v54 = vpop.permute.xlu0 %1827 }
 0xcaa   :  { %v1820_v12 = vadd.f32 1e-05, %v1818_v4 }
 0xcac   :  { %6914 = vrsqrt.f32 %v1820_v12 }
 0xcb9   :  { %v6915_v13 = vpop.eup %6914 }
 0xcba   :  { %1823 = vrot.lane.b32.xlu1 %v6915_v13, %s7575_s11 }
 0xcbe   :  { %1831 = vrot.lane.b32.xlu1 %v7874_v32, %s7574_s3 }
 0xd2c   :  { %v1824_v17 = vpop.permute.xlu1 %1823 }
 0xd2d   :  { %v1826_v21 = vmul.f32 %v1824_v17, %v1819_v18 }
 0xd2f   :  { %v1830_v19 = vmul.f32 %v7912_v54, %v1826_v21 }
 0xd30   :  { %v7915_v22 = vpop.permute.xlu1 %1831 }
 0xd31   :  { %v1834_v23 = vadd.f32 %v7915_v22, %v1830_v19 }
 0xd33   :  { %v1835_v26 = vmul.f32 1.442695, %v1834_v23 }
 0xd35   :  { %6916 = vpow2.f32 %v1835_v26 }
 0xd42   :  { %v6917_v37 = vpop.eup %6916 }
 0xd43   :  { %1956 = vrot.lane.b32.xlu0 %v6917_v37, %s7585_s16 }
 0xdb5   :  { %v1957_v32 = vpop.permute.xlu0 %1956 }
 0xdb6   :  { %1971 = vperm.xlu0 %6685, %v1957_v32   ;;  %1963 = vperm.xlu1 %6684, %v1957_v32  }
 0xdba   :  { %6688 = vset.pattern.permute.xlu0 %v7577_v35  ;;  %6686 = vset.pattern.permute.xlu1 %v7586_v41 }
 0xdbb   :  { %1959 = vperm.xlu0 %6688, %v6917_v37   ;;  %1979 = vperm.xlu1 %6686, %v1957_v32  }
 0xdbf   :  { %6691 = vset.pattern.permute.xlu0 %v7587_v38  ;;  %6687 = vset.pattern.permute.xlu1 %v7587_v38 }
 0xdc0   :  { %1983 = vperm.xlu0 %6691, %v6917_v37   ;;  %1987 = vperm.xlu1 %6687, %v1957_v32  }
 0xdc4   :  { %6689 = vset.pattern.permute.xlu1 %v7584_v24  ;;  %6698 = vset.pattern.permute.xlu0 %v7584_v24 }
 0xdc5   :  { %1967 = vperm.xlu1 %6689, %v6917_v37  }
 0xdc9   :  { %6690 = vset.pattern.permute.xlu1 %v7586_v41 }
 0xdca   :  { %1975 = vperm.xlu1 %6690, %v6917_v37  }
 0xdce   :  { %6697 = vset.pattern.permute.xlu1 %v7577_v35 }
 0xe31   :  { %v1964_v39 = vpop.permute.xlu1 %1963  ;;  %v1972_v40 = vpop.permute.xlu0 %1971 }
 0xe32   :  { %v1992_v5 = vsel %vm1990_vm7, %v1964_v39, %v1972_v40 }
 0xe36   :  { %v1980_v0 = vpop.permute.xlu1 %1979  ;;  %v1960_v51 = vpop.permute.xlu0 %1959 }
 0xe37   :  { %v1994_v42 = vsel %vm157_vm2, %v1992_v5, %v1980_v0 }
 0xe3b   :  { %v1988_v44 = vpop.permute.xlu1 %1987  ;;  %v1984_v56 = vpop.permute.xlu0 %1983 }
 0xe3c   :  { %v1997_v46 = vsel %vm1995_vm8, %v1994_v42, %v1988_v44 }
 0xe3d   :  { %v1999_v47 = vmul.f32 %v1997_v46, %v1954_v63  ;;  %v7115_v46 = vld [vmem:[#allocation8 + $0x20] ss:$8 sps:$4 sm:$0xff]  }
 0xe3f   :  { %v7930_v49 = vadd.f32 %v7111_v48, %v1999_v47  ;;  %v7116_v47 = vld [vmem:[#allocation8 + $0x14] ss:$8 sps:$4 sm:$0xff]   ;;  %v7117_v48 = vld [vmem:[#allocation8 + $0x10] ss:$8 sps:$4 sm:$0xff]  }
 0xe40   :  { %v1968_v45 = vpop.permute.xlu1 %1967 }
 0xe41   :  { %2003 = vrot.lane.b32.xlu1 %v7930_v49, %s7573_s2  ;;  %v1991_v53 = vsel %vm1990_vm7, %v1960_v51, %v1968_v45  ;;  %v2184_v3 = vmul.f32 %v7930_v49, %v7930_v49  ;;  %v7118_v45 = vld [vmem:[#allocation8 + $0x4] ss:$8 sps:$4 sm:$0xff]   ;;  %v7119_v51 = vld [vmem:[#allocation8] ss:$8 sps:$4 sm:$0xff]  }
 0xe45   :  { %v1976_v52 = vpop.permute.xlu1 %1975 }
 0xe46   :  { %v1993_v55 = vsel %vm157_vm2, %v1991_v53, %v1976_v52 }
 0xe47   :  { %v1996_v57 = vsel %vm1995_vm8, %v1993_v55, %v1984_v56 }
 0xe48   :  { %v1998_v59 = vmul.f32 %v1996_v57, %v1953_v58 }
 0xe4a   :  { %v7938_v2 = vadd.f32 %v7112_v62, %v1998_v59 }
 0xe4c   :  { %v2183_v25 = vmul.f32 %v7938_v2, %v7938_v2  ;;  %v2185_v34 = vpack.c.bf16 %v7930_v49, %v7938_v2 }
 0xe4e   :  { %v2186_v29 = vpack.c.bf16 %v2184_v3, %v2183_v25 }
 0xeb3   :  { %v2004_v6 = vpop.permute.xlu1 %2003 }
 0xeb4   :  { %v2006_v8 = vsel %vm81_vm1, %v7938_v2, %v2004_v6 }
 0xeb5   :  { %v2007_v30 = vpack.c.bf16 %v2006_v8, %v2006_v8 }
 0xeb7   :  { %6652 = vmatprep.subr.msk.bf16.mxu0 %vm98_vm0, %v2007_v30  ;;  %v2009_v31 = vsel %vm98_vm0, %v2007_v30, 0 }
 0xeb8   :  { %6172 = vmatpush3.bf16.xpose.msra.mxu0 %v2009_v31 }
 0xeb9   :  { %6177 = vmatprep.subr.bf16.mxu0 %v2186_v29 }
 0xebf   :  { %6174 = vmatmul.mubr.msk.bf16.vlgmr.msra.gmra.mxu0 %vm98_vm0, %v7113_v33 }
 0xec0   :  { %6178 = vmatpush3.bf16.msra.mxu0 %v2186_v29  ;;  %6181 = vmatprep.mubr.msk.bf16.mxu0 %vm98_vm0, %v7655_v11 }
 0xec1   :  { %6179 = vmatprep.subr.bf16.mxu0 %v2185_v34 }
 0xec4   :  { %6180 = vmatpush3.bf16.msra.mxu0 %v2185_v34 }
 0xec5   :  { %6185 = vmatprep.subr.bf16.mxu0 %v7666_v15 }
 0xec7   :  { %6182 = vmatmul.mubr.msk.bf16.vlgmr.msra.gmra.mxu0 %vm98_vm0, %v7661_v14 }
 0xec8   :  { %6186 = vmatpush3.bf16.msra.mxu0 %v7666_v15 }
 0xec9   :  { %2353 = vmatprep.subr.bf16.mxu0 %v7114_v9 }
 0xf7f   :  { %v7957_v10 = vpop.f32.mrf.mxu0 }
 0xf80   :  { %v2066_v4 = vsel %vm157_vm2, %v7957_v10, 0.0  ;;  %v2078_v17 = vmul.f32 %v7957_v10, %v7957_v10 }
 0xf81   :  { %2067 = vadd.xlane.f32.xlu0 %v2066_v4  ;;  %v7961_v12 = vpop.f32.mrf.mxu0 }
 0xf82   :  { %v2086_v37 = vsel %vm157_vm2, %v2078_v17, 0.0  ;;  %v2060_v60 = vsel %vm157_vm2, %v7961_v12, 0.0  ;;  %v2076_v63 = vmul.f32 %v7961_v12, %v7961_v12 }
 0xf83   :  { %v7963_v13 = vpop.f32.mrf.mxu0 }
 0xf84   :  { %v2069_v18 = vsel %vm157_vm2, %v7963_v13, 0.0  ;;  %v2079_v27 = vmul.f32 %v7963_v13, %v7963_v13  ;;  %v2080_v44 = vsel %vm157_vm2, %v2076_v63, 0.0 }
 0xf85   :  { %2070 = vadd.xlane.f32.xlu0 %v2069_v18  ;;  %v7969_v21 = vpop.f32.mrf.mxu0 }
 0xf86   :  { %v2063_v19 = vsel %vm157_vm2, %v7969_v21, 0.0  ;;  %v2077_v23 = vmul.f32 %v7969_v21, %v7969_v21  ;;  %v2089_v5 = vsel %vm157_vm2, %v2079_v27, 0.0 }
 0xf87   :  { %v6183_v26 = vpop.f32.mrf.mxu0  ;;  %2064 = vadd.xlane.f32.xlu1 %v2063_v19 }
 0xf88   :  { %v2083_v39 = vsel %vm157_vm2, %v2077_v23, 0.0 }
 0xf89   :  { %2087 = vadd.xlane.f32.xlu0 %v2086_v37  ;;  %v2221_v32 = vpop.f32.mrf.mxu0 }
 0xf8b   :  { %v6184_v0 = vpop.f32.mrf.mxu0  ;;  %2084 = vadd.xlane.f32.xlu1 %v2083_v39 }
 0xf8c   :  { %v2237_v42 = vpack.c.bf16 %v6184_v0, %v6183_v26  ;;  %v7120_v0 = vld [vmem:[#allocation5 + $0x30] sm:$0xff] }
 0xf8d   :  { %2061 = vadd.xlane.f32.xlu0 %v2060_v60  ;;  %v2224_v40 = vpop.f32.mrf.mxu0 }
 0xf8e   :  { %v2236_v20 = vpack.c.bf16 %v2224_v40, %v2221_v32 }
 0xf8f   :  { %2090 = vadd.xlane.f32.xlu1 %v2089_v5  ;;  %v7121_v5 = vld [vmem:[#allocation5 + $0x28] sm:$0xff] }
 0xf90   :  { %6187 = vmatprep.mubr.msk.bf16.mxu0 %vm81_vm1, %v2236_v20 }
 0xf91   :  { %6188 = vmatmul.mubr.msk.bf16.vlgmr.msra.gmra.mxu0 %vm81_vm1, %v2237_v42 }
 0xf92   :  { %2354 = vmatpush1.bf16.msra.mxu0 %v7115_v46  ;;  %2375 = vmatprep.mubr.bf16.mxu0 %v7577_v35 }
 0xf93   :  { %2081 = vadd.xlane.f32.xlu1 %v2080_v44  ;;  %2355 = vmatprep.subr.bf16.mxu0 %v7116_v47 }
 0xf96   :  { %2356 = vmatpush1.bf16.msra.mxu0 %v7117_v48 }
 0xf97   :  { %2357 = vmatprep.subr.bf16.mxu0 %v7118_v45 }
 0xf9a   :  { %2358 = vmatpush1.bf16.msra.mxu0 %v7119_v51  ;;  %v7122_v51 = vld [vmem:[#allocation5 + $0x38] sm:$0xff] }
 0xf9b   :  { %6199 = vmatprep.subr.bf16.mxu0 %v7578_v43 }
0x100a   :  { %v2068_v52 = vpop.xlane.xlu0 %2067 }
0x100b   :  { %v2074_v36 = vmul.f32 0.125, %v2068_v52 }
0x100d   :  { %v2098_v58 = vmul.f32 %v2074_v36, %v2074_v36  ;;  %v2110_v26 = vsub.f32 %v7957_v10, %v2074_v36 }
0x100e   :  { %v2071_v53 = vpop.xlane.xlu0 %2070 }
0x100f   :  { %v2075_v30 = vmul.f32 0.125, %v2071_v53 }
0x1010   :  { %v2065_v55 = vpop.xlane.xlu1 %2064 }
0x1011   :  { %v2073_v56 = vmul.f32 0.125, %v2065_v55  ;;  %v2099_v9 = vmul.f32 %v2075_v30, %v2075_v30  ;;  %v2111_v42 = vsub.f32 %v7963_v13, %v2075_v30 }
0x1012   :  { %v2088_v57 = vpop.xlane.xlu0 %2087 }
0x1013   :  { %v2094_v59 = vmul.f32 0.125, %v2088_v57  ;;  %v2097_v6 = vmul.f32 %v2073_v56, %v2073_v56  ;;  %v2109_v32 = vsub.f32 %v7969_v21, %v2073_v56 }
0x1014   :  { %v2085_v62 = vpop.xlane.xlu1 %2084 }
0x1015   :  { %v2102_v25 = vsub.f32 %v2094_v59, %v2098_v58  ;;  %v2093_v8 = vmul.f32 0.125, %v2085_v62 }
0x1017   :  { %v2106_v3 = vmax.f32 %v2102_v25, 0.0  ;;  %v2101_v31 = vsub.f32 %v2093_v8, %v2097_v6 }
0x1018   :  { %v2091_v29 = vpop.xlane.xlu1 %2090 }
0x1019   :  { %v2114_v33 = vadd.f32 1e-05, %v2106_v3  ;;  %v2105_v34 = vmax.f32 %v2101_v31, 0.0  ;;  %v2095_v4 = vmul.f32 0.125, %v2091_v29 }
0x101b   :  { %6918 = vrsqrt.f32 %v2114_v33  ;;  %v2113_v18 = vadd.f32 1e-05, %v2105_v34  ;;  %v2103_v17 = vsub.f32 %v2095_v4, %v2099_v9 }
0x101d   :  { %6920 = vrsqrt.f32 %v2113_v18  ;;  %v2107_v19 = vmax.f32 %v2103_v17, 0.0 }
0x101f   :  { %v2115_v23 = vadd.f32 1e-05, %v2107_v19 }
0x1021   :  { %6922 = vrsqrt.f32 %v2115_v23 }
0x1028   :  { %v6919_v37 = vpop.eup %6918 }
0x1029   :  { %v2122_v39 = vmul.f32 %v6919_v37, %v2110_v26 }
0x102a   :  { %v6921_v27 = vpop.eup %6920 }
0x102b   :  { %v2126_v60 = vmul.f32 %v7120_v0, %v2122_v39  ;;  %v2121_v40 = vmul.f32 %v6921_v27, %v2109_v32 }
0x102d   :  { %v2130_v20 = vadd.f32 %v2126_v60, %v7710_v7  ;;  %v2125_v63 = vmul.f32 %v7121_v5, %v2121_v40 }
0x102e   :  { %v6923_v44 = vpop.eup %6922 }
0x102f   :  { %v2138_v46 = vmul.f32 0.044715, %v2130_v20  ;;  %v2129_v47 = vadd.f32 %v2125_v63, %v7714_v16  ;;  %v2123_v48 = vmul.f32 %v6923_v44, %v2111_v42  ;;  %v2134_v3 = vmul.f32 0.5, %v2130_v20 }
0x1031   :  { %v2142_v10 = vmul.f32 %v2138_v46, %v2130_v20  ;;  %v2137_v45 = vmul.f32 0.044715, %v2129_v47  ;;  %v2127_v21 = vmul.f32 %v7122_v51, %v2123_v48  ;;  %v2133_v34 = vmul.f32 0.5, %v2129_v47  ;;  %v7123_v48 = vld [vmem:[#allocation5 + $0x9] ss:$0 sm:$0xff] }
0x1033   :  { %v2146_v52 = vmul.f32 %v2142_v10, %v2130_v20  ;;  %v2141_v53 = vmul.f32 %v2137_v45, %v2129_v47  ;;  %v2131_v36 = vadd.f32 %v2127_v21, %v7718_v28  ;;  %v7124_v21 = vld [vmem:[#allocation5 + $0xa] ss:$0 sm:$0xff] }
0x1035   :  { %v2150_v55 = vadd.f32 %v2146_v52, %v2130_v20  ;;  %v2145_v56 = vmul.f32 %v2141_v53, %v2129_v47  ;;  %v2139_v57 = vmul.f32 0.044715, %v2131_v36  ;;  %v2135_v17 = vmul.f32 0.5, %v2131_v36 }
0x1037   :  { %v2154_v58 = vmul.f32 0.7978846, %v2150_v55  ;;  %v2149_v59 = vadd.f32 %v2145_v56, %v2129_v47  ;;  %v2143_v62 = vmul.f32 %v2139_v57, %v2131_v36 }
0x1039   :  { %6924 = vtanh.f32 %v2154_v58  ;;  %v2153_v13 = vmul.f32 0.7978846, %v2149_v59  ;;  %v2147_v6 = vmul.f32 %v2143_v62, %v2131_v36 }
0x103b   :  { %6926 = vtanh.f32 %v2153_v13  ;;  %v2151_v25 = vadd.f32 %v2147_v6, %v2131_v36 }
0x103d   :  { %v2155_v8 = vmul.f32 0.7978846, %v2151_v25 }
0x103f   :  { %6928 = vtanh.f32 %v2155_v8 }
0x1046   :  { %v6925_v30 = vpop.eup %6924 }
0x1047   :  { %v2162_v31 = vadd.f32 1.0, %v6925_v30 }
0x1048   :  { %v6927_v29 = vpop.eup %6926 }
0x1049   :  { %v2166_v33 = vmul.f32 %v2162_v31, %v2134_v3  ;;  %v2161_v9 = vadd.f32 1.0, %v6927_v29 }
0x104b   :  { %2173 = vrot.lane.b32.xlu1 %v2166_v33, %s7573_s2  ;;  %v2165_v4 = vmul.f32 %v2161_v9, %v2133_v34 }
0x104c   :  { %v6929_v18 = vpop.eup %6928 }
0x104d   :  { %2169 = vrot.lane.b32.xlu0 %v2165_v4, %s7568_s21  ;;  %v2163_v19 = vadd.f32 1.0, %v6929_v18 }
0x104f   :  { %v2167_v23 = vmul.f32 %v2163_v19, %v2135_v17  ;;  %v2062_v19 = vpop.xlane.xlu0 %2061 }
0x1051   :  { %v6189_v26 = vpop.f32.mrf.mxu0  ;;  %2177 = vrot.lane.b32.xlu1 %v2167_v23, %s7576_s12  ;;  %v2082_v23 = vpop.xlane.xlu1 %2081 }
0x1053   :  { %v2278_v37 = vpop.f32.mrf.mxu0 }
0x1054   :  { %v2293_v32 = vmul.f32 %v2278_v37, %v2278_v37  ;;  %v2299_v44 = vsub.f32 %v7938_v2, %v2278_v37  ;;  %v2092_v37 = vmul.f32 0.125, %v2082_v23 }
0x1055   :  { %v6190_v39 = vpop.f32.mrf.mxu0 }
0x1056   :  { %v2295_v27 = vsub.f32 %v6189_v26, %v2293_v32  ;;  %v2072_v26 = vmul.f32 0.125, %v2062_v19 }
0x1057   :  { %v2281_v0 = vpop.f32.mrf.mxu0 }
0x1058   :  { %v2297_v60 = vmax.f32 %v2295_v27, 0.0  ;;  %v2294_v40 = vmul.f32 %v2281_v0, %v2281_v0  ;;  %v2300_v45 = vsub.f32 %v7930_v49, %v2281_v0  ;;  %v2096_v32 = vmul.f32 %v2072_v26, %v2072_v26 }
0x105a   :  { %v2301_v20 = vadd.f32 1e-05, %v2297_v60  ;;  %v2296_v5 = vsub.f32 %v6190_v39, %v2294_v40  ;;  %v2100_v39 = vsub.f32 %v2092_v37, %v2096_v32  ;;  %v2108_v40 = vsub.f32 %v7961_v12, %v2072_v26  ;;  %v7135_v32 = vld [vmem:[#allocation5 + $0xb] ss:$0 sm:$0xff] }
0x105c   :  { %6930 = vrsqrt.f32 %v2301_v20  ;;  %v2298_v63 = vmax.f32 %v2296_v5, 0.0  ;;  %v2104_v27 = vmax.f32 %v2100_v39, 0.0  ;;  %v7125_v5 = vld [vmem:[#allocation5 + $0x20] sm:$0xff] }
0x105e   :  { %v2302_v42 = vadd.f32 1e-05, %v2298_v63  ;;  %v2112_v0 = vadd.f32 1e-05, %v2104_v27 }
0x1060   :  { %6932 = vrsqrt.f32 %v2302_v42 }
0x1069   :  { %v6931_v46 = vpop.eup %6930 }
0x106a   :  { %v2305_v47 = vmul.f32 %v6931_v46, %v2299_v44 }
0x106c   :  { %v2307_v10 = vmul.f32 %v7123_v48, %v2305_v47 }
0x106d   :  { %v6933_v51 = vpop.eup %6932 }
0x106e   :  { %v2309_v52 = vadd.f32 %v7124_v21, %v2307_v10  ;;  %v2306_v53 = vmul.f32 %v6933_v51, %v2300_v45 }
0x1070   :  { %v2308_v36 = vmul.f32 %v7123_v48, %v2306_v53  ;;  %v2313_v55 = vmul.f32 0.044715, %v2309_v52  ;;  %v2311_v33 = vmul.f32 0.5, %v2309_v52 }
0x1072   :  { %v2310_v56 = vadd.f32 %v7124_v21, %v2308_v36  ;;  %v2315_v57 = vmul.f32 %v2313_v55, %v2309_v52 }
0x1074   :  { %v2314_v58 = vmul.f32 0.044715, %v2310_v56  ;;  %v2317_v59 = vmul.f32 %v2315_v57, %v2309_v52  ;;  %v2312_v34 = vmul.f32 0.5, %v2310_v56 }
0x1076   :  { %v2316_v62 = vmul.f32 %v2314_v58, %v2310_v56  ;;  %v2319_v13 = vadd.f32 %v2317_v59, %v2309_v52 }
0x1078   :  { %v2318_v6 = vmul.f32 %v2316_v62, %v2310_v56  ;;  %v2321_v25 = vmul.f32 0.7978846, %v2319_v13 }
0x107a   :  { %v2320_v8 = vadd.f32 %v2318_v6, %v2310_v56  ;;  %6934 = vtanh.f32 %v2321_v25 }
0x107c   :  { %v2322_v30 = vmul.f32 0.7978846, %v2320_v8  ;;  %v8009_v8 = vld [vmem:[#allocation7 + $0x38] sm:$0xff]  }
0x107e   :  { %6936 = vtanh.f32 %v2322_v30  ;;  %v8015_v30 = vld [vmem:[#allocation7 + $0x30] sm:$0xff]  }
0x107f   :  { %6938 = vrsqrt.f32 %v2112_v0 }
0x1087   :  { %v6935_v3 = vpop.eup %6934 }
0x1088   :  { %v2325_v31 = vadd.f32 1.0, %v6935_v3  ;;  %v8019_v3 = vld [vmem:[#allocation7 + $0x28] sm:$0xff]  }
0x108a   :  { %v2327_v4 = vmul.f32 %v2325_v31, %v2311_v33  ;;  %v8023_v31 = vld [vmem:[#allocation7 + $0x20] sm:$0xff]   ;;  %v8031_v33 = vld [vmem:[#allocation7 + $0x10] sm:$0xff]  }
0x108b   :  { %v6937_v29 = vpop.eup %6936 }
0x108c   :  { %v2326_v9 = vadd.f32 1.0, %v6937_v29  ;;  %v6939_v60 = vpop.eup %6938  ;;  %v8027_v29 = vld [vmem:[#allocation7 + $0x18] sm:$0xff]  }
0x108d   :  { %v2120_v20 = vmul.f32 %v6939_v60, %v2108_v40 }
0x108e   :  { %v2328_v18 = vmul.f32 %v2326_v9, %v2312_v34  ;;  %v8035_v34 = vld [vmem:[#allocation7 + $0x8] sm:$0xff]   ;;  %v8039_v9 = vld [vmem:[#allocation7] sm:$0xff]  }
0x108f   :  { %v2124_v63 = vmul.f32 %v7125_v5, %v2120_v20 }
0x1090   :  { %v6692_v17 = vpack.i.bf16 %v2328_v18, %v2327_v4  ;;  %v7134_v18 = vld [vmem:[#allocation5] ss:$0 sm:$0xff] }
0x1091   :  { %v2128_v42 = vadd.f32 %v2124_v63, %v7732_v61  ;;  %v7136_v63 = vld [vmem:[#allocation8 + $0xa4] ss:$8 sps:$4 sm:$0xff]  }
0x1092   :  { %6693 = vrot.lane.b32.xlu0 %v6692_v17, %s7579_s13 }
0x1093   :  { %v2136_v44 = vmul.f32 0.044715, %v2128_v42  ;;  %v2132_v21 = vmul.f32 0.5, %v2128_v42 }
0x1095   :  { %v2140_v46 = vmul.f32 %v2136_v44, %v2128_v42  ;;  %v7138_v44 = vld [vmem:[#allocation8 + $0x94] ss:$8 sps:$4 sm:$0xff]  }
0x1097   :  { %v2144_v47 = vmul.f32 %v2140_v46, %v2128_v42  ;;  %v7139_v46 = vld [vmem:[#allocation8 + $0x90] ss:$8 sps:$4 sm:$0xff]  }
0x1099   :  { %v2148_v48 = vadd.f32 %v2144_v47, %v2128_v42  ;;  %v7137_v42 = vld [vmem:[#allocation8 + $0xa0] ss:$8 sps:$4 sm:$0xff]   ;;  %v7140_v47 = vld [vmem:[#allocation8 + $0x84] ss:$8 sps:$4 sm:$0xff]  }
0x109b   :  { %v2152_v10 = vmul.f32 0.7978846, %v2148_v48  ;;  %v7141_v48 = vld [vmem:[#allocation8 + $0x80] ss:$8 sps:$4 sm:$0xff]  }
0x109d   :  { %6940 = vtanh.f32 %v2152_v10  ;;  %v7142_v10 = vld [vmem:[#allocation8 + $0x74] ss:$8 sps:$4 sm:$0xff]  }
0x10aa   :  { %v6941_v45 = vpop.eup %6940 }
0x10ab   :  { %v2160_v51 = vadd.f32 1.0, %v6941_v45  ;;  %v7143_v45 = vld [vmem:[#allocation8 + $0x70] ss:$8 sps:$4 sm:$0xff]  }
0x10ad   :  { %v2164_v36 = vmul.f32 %v2160_v51, %v2132_v21  ;;  %v7144_v51 = vld [vmem:[#allocation8 + $0x64] ss:$8 sps:$4 sm:$0xff]   ;;  %v7145_v21 = vld [vmem:[#allocation8 + $0x60] ss:$8 sps:$4 sm:$0xff]  }
0x10bd   :  { %v2174_v52 = vpop.permute.xlu1 %2173 }
0x10bf   :  { %v2170_v53 = vpop.permute.xlu0 %2169 }
0x10c0   :  { %v2180_v55 = vsel %vm157_vm2, %v2164_v36, %v2170_v53  ;;  %v7147_v53 = vld [vmem:[#allocation8 + $0x50] ss:$8 sps:$4 sm:$0xff]   ;;  %v7148_v36 = vld [vmem:[#allocation8 + $0x44] ss:$8 sps:$4 sm:$0xff]  }
0x10c1   :  { %v2181_v57 = vsel %vm81_vm1, %v2180_v55, %v2174_v52  ;;  %v7146_v52 = vld [vmem:[#allocation8 + $0x54] ss:$8 sps:$4 sm:$0xff]   ;;  %v7149_v55 = vld [vmem:[#allocation8 + $0x40] ss:$8 sps:$4 sm:$0xff]  }
0x10c3   :  { %v2178_v12 = vpop.permute.xlu1 %2177 }
0x10c4   :  { %v2182_v62 = vsel %vm301_vm3, %v2181_v57, %v2178_v12  ;;  %v7150_v12 = vld [vmem:[#allocation8 + $0x34] ss:$8 sps:$4 sm:$0xff]   ;;  %v7152_v57 = vld [vmem:[#allocation8 + $0x124] ss:$8 sps:$4 sm:$0xff]  }
0x1104   :  { %v6694_v56 = vpop.permute.xlu0 %6693 }
0x1105   :  { %v6696_v58 = vunpack.i.h.bf16 %v6694_v56  ;;  %v6695_v59 = vunpack.i.l.bf16 %v6694_v56  ;;  %v7151_v56 = vld [vmem:[#allocation8 + $0x30] ss:$8 sps:$4 sm:$0xff]  }
0x1107   :  { %v2337_v13 = vsel %vm98_vm0, %v2182_v62, %v6695_v59  ;;  %v2338_v6 = vsel %vm98_vm0, %v2182_v62, %v6696_v58  ;;  %v7153_v58 = vld [vmem:[#allocation8 + $0x120] ss:$8 sps:$4 sm:$0xff]   ;;  %v7154_v59 = vld [vmem:[#allocation8 + $0x114] ss:$8 sps:$4 sm:$0xff]   ;;  %v7155_v62 = vld [vmem:[#allocation8 + $0x110] ss:$8 sps:$4 sm:$0xff]  }
0x1108   :  { %v2339_v25 = vpack.c.bf16 %v2338_v6, %v2337_v13  ;;  %v7156_v13 = vld [vmem:[#allocation8 + $0x104] ss:$8 sps:$4 sm:$0xff]   ;;  %v7157_v6 = vld [vmem:[#allocation8 + $0x100] ss:$8 sps:$4 sm:$0xff]  }
0x110a   :  { %5703 = vmatmul.mubr.msk.bf16.vlgmr.msra.gmra.mxu0 %vm526_vm4, %v2339_v25  ;;  %v7158_v25 = vld [vmem:[#allocation8 + $0xf4] ss:$8 sps:$4 sm:$0xff]  }
0x110b   :  { %6200 = vmatpush3.bf16.msra.mxu0 %v8009_v8  ;;  %6215 = vmatprep.mubr.msk.bf16.mxu0 %vm7580_vm5, %v7578_v43 }
0x110c   :  { %6201 = vmatprep.subr.bf16.mxu0 %v7578_v43 }
0x110f   :  { %6202 = vmatpush3.bf16.msra.mxu0 %v8015_v30 }
0x1110   :  { %6203 = vmatprep.subr.bf16.mxu0 %v7578_v43 }
0x1113   :  { %6204 = vmatpush3.bf16.msra.mxu0 %v8019_v3 }
0x1114   :  { %6205 = vmatprep.subr.bf16.mxu0 %v7578_v43 }
0x1117   :  { %6206 = vmatpush3.bf16.msra.mxu0 %v8023_v31 }
0x1118   :  { %6207 = vmatprep.subr.bf16.mxu0 %v7578_v43 }
0x111b   :  { %6208 = vmatpush3.bf16.msra.mxu0 %v8027_v29 }
0x111c   :  { %6209 = vmatprep.subr.bf16.mxu0 %v7578_v43 }
0x111f   :  { %6210 = vmatpush3.bf16.msra.mxu0 %v8031_v33 }
0x1120   :  { %6211 = vmatprep.subr.bf16.mxu0 %v7578_v43 }
0x1123   :  { %6212 = vmatpush3.bf16.msra.mxu0 %v8035_v34 }
0x1124   :  { %6213 = vmatprep.subr.bf16.mxu0 %v7578_v43 }
0x1127   :  { %6214 = vmatpush3.bf16.msra.mxu0 %v8039_v9 }
0x1128   :  { %6235 = vmatprep.subr.bf16.mxu0 %v7578_v43 }
0x11ca   :  { %v2377_v4 = vpop.f32.mrf.mxu0 }
0x11cb   :  { %v8043_v17 = vadd.f32 %v7134_v18, %v2377_v4  ;;  %v7159_v4 = vld [vmem:[#allocation8 + $0xf0] ss:$8 sps:$4 sm:$0xff]   ;;  %v7160_v18 = vld [vmem:[#allocation8 + $0xe4] ss:$8 sps:$4 sm:$0xff]  }
0x11cc   :  { %v2379_v19 = vpop.f32.mrf.mxu0 }
0x11cd   :  { %v2441_v23 = vmul.f32 %v8043_v17, %v8043_v17  ;;  %v8048_v39 = vadd.f32 %v7135_v32, %v2379_v19  ;;  %v7161_v19 = vld [vmem:[#allocation8 + $0xe0] ss:$8 sps:$4 sm:$0xff]  }
0x11ce   :  { %v2381_v26 = vpop.f32.mrf.mxu0 }
0x11cf   :  { %v2442_v37 = vpack.c.bf16 %v2441_v23, %v8043_v17  ;;  %v2388_v60 = vmul.f32 %v8048_v39, %v8048_v39  ;;  %v7162_v23 = vld [vmem:[#allocation8 + $0xd4] ss:$8 sps:$4 sm:$0xff]   ;;  %v7163_v26 = vld [vmem:[#allocation8 + $0xd0] ss:$8 sps:$4 sm:$0xff]  }
0x11d0   :  { %v2382_v27 = vpop.f32.mrf.mxu0 }
0x11d1   :  { %v8050_v0 = vadd.f32 %v7135_v32, %v2382_v27  ;;  %6216 = vmatmul.mubr.bf16.vlgmr.msra.gmra.mxu0 %v2442_v37  ;;  %v7164_v37 = vld [vmem:[#allocation8 + $0xc4] ss:$8 sps:$4 sm:$0xff]   ;;  %v7165_v32 = vld [vmem:[#allocation8 + $0xc0] ss:$8 sps:$4 sm:$0xff]   ;;  %v7166_v27 = vld [vmem:[#allocation8 + $0xb4] ss:$8 sps:$4 sm:$0xff]  }
0x11d2   :  { %6219 = vmatprep.mubr.msk.bf16.mxu0 %vm7580_vm5, %v7578_v43  ;;  %6236 = vmatpush3.bf16.msra.mxu0 %v8009_v8 }
0x11d3   :  { %v2389_v40 = vmul.f32 %v8050_v0, %v8050_v0  ;;  %6237 = vmatprep.subr.bf16.mxu0 %v7578_v43  ;;  %v2390_v5 = vpack.c.bf16 %v8050_v0, %v8048_v39 }
0x11d5   :  { %v2391_v20 = vpack.c.bf16 %v2389_v40, %v2388_v60  ;;  %v7167_v60 = vld [vmem:[#allocation8 + $0xb0] ss:$8 sps:$4 sm:$0xff]  }
0x11d6   :  { %6238 = vmatpush3.bf16.msra.mxu0 %v8015_v30 }
0x11d7   :  { %6191 = vmatprep.subr.bf16.mxu1 %v2391_v20  ;;  %6239 = vmatprep.subr.bf16.mxu0 %v7578_v43 }
0x11d8   :  { %6192 = vmatpush3.bf16.msra.mxu1 %v2391_v20 }
0x11d9   :  { %6193 = vmatprep.subr.bf16.mxu1 %v2390_v5 }
0x11da   :  { %6240 = vmatpush3.bf16.msra.mxu0 %v8019_v3 }
0x11db   :  { %6241 = vmatprep.subr.bf16.mxu0 %v7578_v43 }
0x11dc   :  { %6194 = vmatpush3.bf16.msra.mxu1 %v2390_v5 }
0x11dd   :  { %2558 = vmatprep.subr.bf16.mxu1 %v7136_v63 }
0x11de   :  { %6242 = vmatpush3.bf16.msra.mxu0 %v8023_v31 }
0x11df   :  { %6196 = vmatmul.mubr.msk.bf16.vlgmr.msra.gmra.mxu1 %vm98_vm0, %v7661_v14  ;;  %6243 = vmatprep.subr.bf16.mxu0 %v7578_v43 }
0x11e0   :  { %2559 = vmatpush1.bf16.msra.mxu1 %v7137_v42 }
0x11e1   :  { %2560 = vmatprep.subr.bf16.mxu1 %v7138_v44 }
0x11e2   :  { %6244 = vmatpush3.bf16.msra.mxu0 %v8027_v29 }
0x11e3   :  { %6245 = vmatprep.subr.bf16.mxu0 %v7578_v43 }
0x11e4   :  { %2561 = vmatpush1.bf16.msra.mxu1 %v7139_v46 }
0x11e5   :  { %2562 = vmatprep.subr.bf16.mxu1 %v7140_v47 }
0x11e6   :  { %6246 = vmatpush3.bf16.msra.mxu0 %v8031_v33 }
0x11e7   :  { %6247 = vmatprep.subr.bf16.mxu0 %v7578_v43 }
0x11e8   :  { %2563 = vmatpush1.bf16.msra.mxu1 %v7141_v48 }
0x11e9   :  { %2564 = vmatprep.subr.bf16.mxu1 %v7142_v10 }
0x11ea   :  { %6248 = vmatpush3.bf16.msra.mxu0 %v8035_v34 }
0x11eb   :  { %6249 = vmatprep.subr.bf16.mxu0 %v7578_v43 }
0x11ec   :  { %2565 = vmatpush1.bf16.msra.mxu1 %v7143_v45 }
0x11ed   :  { %2566 = vmatprep.subr.bf16.mxu1 %v7144_v51 }
0x11ee   :  { %6250 = vmatpush3.bf16.msra.mxu0 %v8039_v9 }
0x11f0   :  { %2567 = vmatpush1.bf16.msra.mxu1 %v7145_v21 }
0x11f1   :  { %2568 = vmatprep.subr.bf16.mxu1 %v7146_v52 }
0x11f4   :  { %2569 = vmatpush1.bf16.msra.mxu1 %v7147_v53 }
0x11f5   :  { %2570 = vmatprep.subr.bf16.mxu1 %v7148_v36 }
0x11f8   :  { %2571 = vmatpush1.bf16.msra.mxu1 %v7149_v55 }
0x11f9   :  { %2572 = vmatprep.subr.bf16.mxu1 %v7150_v12 }
0x11fc   :  { %2573 = vmatpush1.bf16.msra.mxu1 %v7151_v56 }
0x11fd   :  { %2574 = vmatprep.subr.bf16.mxu1 %v7152_v57 }
0x1200   :  { %2575 = vmatpush2.bf16.msra.mxu1 %v7153_v58 }
0x1201   :  { %2576 = vmatprep.subr.bf16.mxu1 %v7154_v59 }
0x1204   :  { %2577 = vmatpush2.bf16.msra.mxu1 %v7155_v62 }
0x1205   :  { %2578 = vmatprep.subr.bf16.mxu1 %v7156_v13 }
0x1208   :  { %2579 = vmatpush2.bf16.msra.mxu1 %v7157_v6 }
0x1209   :  { %2580 = vmatprep.subr.bf16.mxu1 %v7158_v25 }
0x120c   :  { %2581 = vmatpush2.bf16.msra.mxu1 %v7159_v4 }
0x120d   :  { %2582 = vmatprep.subr.bf16.mxu1 %v7160_v18 }
0x1210   :  { %2583 = vmatpush2.bf16.msra.mxu1 %v7161_v19 }
0x1211   :  { %2584 = vmatprep.subr.bf16.mxu1 %v7162_v23 }
0x1214   :  { %2585 = vmatpush2.bf16.msra.mxu1 %v7163_v26 }
0x1215   :  { %2586 = vmatprep.subr.bf16.mxu1 %v7164_v37  ;;  %v7168_v37 = vld [vmem:[#allocation5 + $0x1] ss:$0 sm:$0xff] }
0x1218   :  { %2587 = vmatpush2.bf16.msra.mxu1 %v7165_v32 }
0x1219   :  { %2588 = vmatprep.subr.bf16.mxu1 %v7166_v27 }
0x121c   :  { %2589 = vmatpush2.bf16.msra.mxu1 %v7167_v60  ;;  %v7169_v60 = vld [vmem:[#allocation5 + $0x2] ss:$0 sm:$0xff] }
0x1291   :  { %v2479_v40 = vpop.f32.mrf.mxu0 }
0x1292   :  { %v2502_v5 = vmul.f32 %v2479_v40, %v2479_v40  ;;  %v2511_v52 = vsub.f32 %v8043_v17, %v2479_v40 }
0x1293   :  { %v6217_v20 = vpop.f32.mrf.mxu0 }
0x1295   :  { %v2482_v63 = vpop.f32.mrf.mxu0 }
0x1296   :  { %v2503_v42 = vsub.f32 %v2482_v63, %v2502_v5 }
0x1297   :  { %v6218_v44 = vpop.f32.mrf.mxu0 }
0x1298   :  { %v2504_v46 = vmax.f32 %v2503_v42, 0.0 }
0x129a   :  { %v2512_v47 = vadd.f32 1e-05, %v2504_v46 }
0x129c   :  { %6942 = vrsqrt.f32 %v2512_v47  ;;  %v7170_v47 = vld [vmem:[#allocation5 + $0xc] ss:$0 sm:$0xff] }
0x129f   :  { %v6197_v48 = vpop.f32.mrf.mxu1 }
0x12a1   :  { %v2426_v10 = vpop.f32.mrf.mxu1 }
0x12a3   :  { %v6198_v45 = vpop.f32.mrf.mxu1 }
0x12a4   :  { %v2444_v55 = vpack.c.bf16 %v6198_v45, %v6197_v48 }
0x12a5   :  { %v2429_v51 = vpop.f32.mrf.mxu1 }
0x12a6   :  { %v2443_v21 = vpack.c.bf16 %v2429_v51, %v2426_v10  ;;  %v7171_v51 = vld [vmem:[#allocation5 + $0xd] ss:$0 sm:$0xff] }
0x12a8   :  { %6220 = vmatmul.mubr.bf16.gmra.mxu0 %v2443_v21 }
0x12a9   :  { %v6943_v53 = vpop.eup %6942  ;;  %6223 = vmatprep.mubr.msk.bf16.mxu0 %vm7580_vm5, %v7578_v43 }
0x12aa   :  { %v2514_v36 = vmul.f32 %v6943_v53, %v2511_v52 }
0x12ac   :  { %v2515_v32 = vmul.f32 %v7168_v37, %v2514_v36 }
0x12ae   :  { %v2516_v40 = vadd.f32 %v7169_v60, %v2515_v32 }
0x12b0   :  { %6224 = vmatmul.mubr.bf16.gmra.mxu0 %v2444_v55  ;;  %v2518_v20 = vmul.f32 0.044715, %v2516_v40 }
0x12b1   :  { %6251 = vmatprep.mubr.msk.bf16.mxu0 %vm7580_vm5, %v7578_v43 }
0x12b2   :  { %v2519_v42 = vmul.f32 %v2518_v20, %v2516_v40 }
0x12b4   :  { %v2520_v45 = vmul.f32 %v2519_v42, %v2516_v40 }
0x12b6   :  { %v2521_v55 = vadd.f32 %v2520_v45, %v2516_v40 }
0x1368   :  { %v2487_v12 = vpop.f32.mrf.mxu0 }
0x1369   :  { %v2505_v59 = vmul.f32 %v2487_v12, %v2487_v12  ;;  %v2526_v5 = vsub.f32 %v8048_v39, %v2487_v12  ;;  %v2522_v39 = vmul.f32 0.7978846, %v2521_v55 }
0x136a   :  { %v6221_v56 = vpop.f32.mrf.mxu0 }
0x136c   :  { %v2490_v57 = vpop.f32.mrf.mxu0 }
0x136d   :  { %v2506_v17 = vmul.f32 %v2490_v57, %v2490_v57  ;;  %v2527_v46 = vsub.f32 %v8050_v0, %v2490_v57 }
0x136e   :  { %v6222_v58 = vpop.f32.mrf.mxu0 }
0x1370   :  { %v2495_v62 = vpop.f32.mrf.mxu0 }
0x1371   :  { %v2507_v13 = vsub.f32 %v2495_v62, %v2505_v59 }
0x1372   :  { %v6225_v6 = vpop.f32.mrf.mxu0 }
0x1373   :  { %v2509_v25 = vmax.f32 %v2507_v13, 0.0 }
0x1374   :  { %v2498_v4 = vpop.f32.mrf.mxu0 }
0x1375   :  { %v2528_v18 = vadd.f32 1e-05, %v2509_v25  ;;  %v2508_v19 = vsub.f32 %v2498_v4, %v2506_v17 }
0x1376   :  { %v6226_v23 = vpop.f32.mrf.mxu0 }
0x1377   :  { %6944 = vrsqrt.f32 %v2528_v18  ;;  %v2510_v26 = vmax.f32 %v2508_v19, 0.0 }
0x1379   :  { %v2529_v27 = vadd.f32 1e-05, %v2510_v26  ;;  %v2517_v26 = vmul.f32 0.5, %v2516_v40 }
0x137b   :  { %6946 = vrsqrt.f32 %v2529_v27 }
0x137c   :  { %6948 = vtanh.f32 %v2522_v39  ;;  %v7176_v39 = vld [vmem:[#allocation8 + $0x194] ss:$8 sps:$4 sm:$0xff]  }
0x1384   :  { %v6945_v63 = vpop.eup %6944 }
0x1385   :  { %v2532_v44 = vmul.f32 %v6945_v63, %v2526_v5 }
0x1387   :  { %v2534_v48 = vmul.f32 %v7170_v47, %v2532_v44 }
0x1388   :  { %v6947_v10 = vpop.eup %6946 }
0x1389   :  { %v2536_v21 = vadd.f32 %v7171_v51, %v2534_v48  ;;  %v2533_v52 = vmul.f32 %v6947_v10, %v2527_v46  ;;  %v6949_v25 = vpop.eup %6948  ;;  %v7172_v46 = vld [vmem:[#allocation5 + $0x3] ss:$0 sm:$0xff] }
0x138a   :  { %v2524_v18 = vadd.f32 1.0, %v6949_v25  ;;  %v7183_v25 = vld [vmem:[#allocation8 + $0x160] ss:$8 sps:$4 sm:$0xff]  }
0x138b   :  { %v2535_v53 = vmul.f32 %v7170_v47, %v2533_v52  ;;  %v2540_v36 = vmul.f32 0.044715, %v2536_v21  ;;  %v2538_v37 = vmul.f32 0.5, %v2536_v21 }
0x138c   :  { %v2525_v60 = vmul.f32 %v2524_v18, %v2517_v26  ;;  %v7185_v18 = vld [vmem:[#allocation8 + $0x150] ss:$8 sps:$4 sm:$0xff]   ;;  %v7188_v26 = vld [vmem:[#allocation8 + $0x134] ss:$8 sps:$4 sm:$0xff]  }
0x138d   :  { %v2537_v56 = vadd.f32 %v7171_v51, %v2535_v53  ;;  %v2542_v58 = vmul.f32 %v2540_v36, %v2536_v21  ;;  %v7173_v51 = vld [vmem:[#allocation5 + $0xe] ss:$0 sm:$0xff] }
0x138e   :  { %v2556_v42 = vpack.c.bf16 %v2525_v60, %v2525_v60  ;;  %v7192_v60 = vld [vmem:[#allocation8 + $0x214] ss:$8 sps:$4 sm:$0xff]  }
0x138f   :  { %v2541_v59 = vmul.f32 0.044715, %v2537_v56  ;;  %v2544_v62 = vmul.f32 %v2542_v58, %v2536_v21  ;;  %v2539_v32 = vmul.f32 0.5, %v2537_v56 }
0x1391   :  { %v2543_v12 = vmul.f32 %v2541_v59, %v2537_v56  ;;  %v2546_v13 = vadd.f32 %v2544_v62, %v2536_v21  ;;  %v7174_v59 = vld [vmem:[#allocation8 + $0x1a4] ss:$8 sps:$4 sm:$0xff]   ;;  %v7175_v62 = vld [vmem:[#allocation8 + $0x1a0] ss:$8 sps:$4 sm:$0xff]  }
0x1393   :  { %v2545_v6 = vmul.f32 %v2543_v12, %v2537_v56  ;;  %v2548_v17 = vmul.f32 0.7978846, %v2546_v13  ;;  %v7177_v12 = vld [vmem:[#allocation8 + $0x190] ss:$8 sps:$4 sm:$0xff]   ;;  %v7178_v13 = vld [vmem:[#allocation8 + $0x184] ss:$8 sps:$4 sm:$0xff]  }
0x1395   :  { %v2547_v0 = vadd.f32 %v2545_v6, %v2537_v56  ;;  %6950 = vtanh.f32 %v2548_v17  ;;  %v7179_v6 = vld [vmem:[#allocation8 + $0x180] ss:$8 sps:$4 sm:$0xff]   ;;  %v7180_v17 = vld [vmem:[#allocation8 + $0x174] ss:$8 sps:$4 sm:$0xff]  }
0x1397   :  { %v2549_v57 = vmul.f32 0.7978846, %v2547_v0  ;;  %v7181_v0 = vld [vmem:[#allocation8 + $0x170] ss:$8 sps:$4 sm:$0xff]  }
0x1399   :  { %6952 = vtanh.f32 %v2549_v57  ;;  %v7182_v57 = vld [vmem:[#allocation8 + $0x164] ss:$8 sps:$4 sm:$0xff]  }
0x13a2   :  { %v6951_v4 = vpop.eup %6950 }
0x13a3   :  { %v2552_v19 = vadd.f32 1.0, %v6951_v4  ;;  %v7184_v4 = vld [vmem:[#allocation8 + $0x154] ss:$8 sps:$4 sm:$0xff]  }
0x13a5   :  { %v2554_v20 = vmul.f32 %v2552_v19, %v2538_v37  ;;  %v7186_v19 = vld [vmem:[#allocation8 + $0x144] ss:$8 sps:$4 sm:$0xff]   ;;  %v7189_v37 = vld [vmem:[#allocation8 + $0x130] ss:$8 sps:$4 sm:$0xff]  }
0x13a6   :  { %v6953_v23 = vpop.eup %6952 }
0x13a7   :  { %v2553_v27 = vadd.f32 1.0, %v6953_v23  ;;  %v7187_v23 = vld [vmem:[#allocation8 + $0x140] ss:$8 sps:$4 sm:$0xff]  }
0x13a9   :  { %v2555_v5 = vmul.f32 %v2553_v27, %v2539_v32  ;;  %v7190_v32 = vld [vmem:[#allocation8 + $0x224] ss:$8 sps:$4 sm:$0xff]   ;;  %v7191_v27 = vld [vmem:[#allocation8 + $0x220] ss:$8 sps:$4 sm:$0xff]  }
0x13ab   :  { %v2557_v63 = vpack.c.bf16 %v2555_v5, %v2554_v20  ;;  %v7193_v20 = vld [vmem:[#allocation8 + $0x210] ss:$8 sps:$4 sm:$0xff]   ;;  %v7194_v5 = vld [vmem:[#allocation8 + $0x204] ss:$8 sps:$4 sm:$0xff]  }
0x13ad   :  { %2590 = vmatprep.mubr.bf16.mxu1 %v2557_v63  ;;  %v7195_v63 = vld [vmem:[#allocation8 + $0x200] ss:$8 sps:$4 sm:$0xff]  }
0x13ae   :  { %2591 = vmatmul.mubr.bf16.vlgmr.msra.gmra.mxu1 %v2556_v42  ;;  %v7196_v42 = vld [vmem:[#allocation8 + $0x1f4] ss:$8 sps:$4 sm:$0xff]  }
0x13af   :  { %6231 = vmatprep.mubr.msk.bf16.mxu1 %vm98_vm0, %v7655_v11 }
0x146e   :  { %v2592_v44 = vpop.f32.mrf.mxu1 }
0x146f   :  { %v8086_v47 = vadd.f32 %v7172_v46, %v2592_v44  ;;  %v7197_v44 = vld [vmem:[#allocation8 + $0x1f0] ss:$8 sps:$4 sm:$0xff]   ;;  %v7198_v46 = vld [vmem:[#allocation8 + $0x1e4] ss:$8 sps:$4 sm:$0xff]  }
0x1470   :  { %v2594_v48 = vpop.f32.mrf.mxu1 }
0x1471   :  { %v2656_v40 = vmul.f32 %v8086_v47, %v8086_v47  ;;  %v8091_v21 = vadd.f32 %v7173_v51, %v2594_v48  ;;  %v7199_v48 = vld [vmem:[#allocation8 + $0x1e0] ss:$8 sps:$4 sm:$0xff]  }
0x1472   :  { %v2596_v10 = vpop.f32.mrf.mxu1 }
0x1473   :  { %v2657_v45 = vpack.c.bf16 %v2656_v40, %v8086_v47  ;;  %v2603_v36 = vmul.f32 %v8091_v21, %v8091_v21  ;;  %v7200_v40 = vld [vmem:[#allocation8 + $0x1d4] ss:$8 sps:$4 sm:$0xff]   ;;  %v7201_v10 = vld [vmem:[#allocation8 + $0x1d0] ss:$8 sps:$4 sm:$0xff]  }
0x1474   :  { %v2597_v52 = vpop.f32.mrf.mxu1 }
0x1475   :  { %v8093_v53 = vadd.f32 %v7173_v51, %v2597_v52  ;;  %6252 = vmatmul.mubr.bf16.vlgmr.msra.gmra.mxu0 %v2657_v45  ;;  %v7202_v45 = vld [vmem:[#allocation8 + $0x1c4] ss:$8 sps:$4 sm:$0xff]   ;;  %v7203_v51 = vld [vmem:[#allocation8 + $0x1c0] ss:$8 sps:$4 sm:$0xff]   ;;  %v7204_v52 = vld [vmem:[#allocation8 + $0x1b4] ss:$8 sps:$4 sm:$0xff]  }
0x1476   :  { %6255 = vmatprep.mubr.msk.bf16.mxu0 %vm7580_vm5, %v7578_v43 }
0x1477   :  { %v2604_v55 = vmul.f32 %v8093_v53, %v8093_v53  ;;  %v2605_v58 = vpack.c.bf16 %v8093_v53, %v8091_v21 }
0x1479   :  { %v2606_v56 = vpack.c.bf16 %v2604_v55, %v2603_v36  ;;  %v7205_v36 = vld [vmem:[#allocation8 + $0x1b0] ss:$8 sps:$4 sm:$0xff]  }
0x147b   :  { %6227 = vmatprep.subr.bf16.mxu1 %v2606_v56 }
0x147c   :  { %6228 = vmatpush3.bf16.msra.mxu1 %v2606_v56 }
0x147d   :  { %6229 = vmatprep.subr.bf16.mxu1 %v2605_v58 }
0x1480   :  { %6230 = vmatpush3.bf16.msra.mxu1 %v2605_v58 }
0x1481   :  { %2773 = vmatprep.subr.bf16.mxu1 %v7174_v59 }
0x1483   :  { %6232 = vmatmul.mubr.msk.bf16.vlgmr.msra.gmra.mxu1 %vm98_vm0, %v7661_v14 }
0x1484   :  { %2774 = vmatpush1.bf16.msra.mxu1 %v7175_v62 }
0x1485   :  { %2775 = vmatprep.subr.bf16.mxu1 %v7176_v39 }
0x1488   :  { %2776 = vmatpush1.bf16.msra.mxu1 %v7177_v12 }
0x1489   :  { %2777 = vmatprep.subr.bf16.mxu1 %v7178_v13 }
0x148c   :  { %2778 = vmatpush1.bf16.msra.mxu1 %v7179_v6 }
0x148d   :  { %2779 = vmatprep.subr.bf16.mxu1 %v7180_v17 }
0x1490   :  { %2780 = vmatpush1.bf16.msra.mxu1 %v7181_v0 }
0x1491   :  { %2781 = vmatprep.subr.bf16.mxu1 %v7182_v57 }
0x1494   :  { %2782 = vmatpush1.bf16.msra.mxu1 %v7183_v25 }
0x1495   :  { %2783 = vmatprep.subr.bf16.mxu1 %v7184_v4 }
0x1498   :  { %2784 = vmatpush1.bf16.msra.mxu1 %v7185_v18 }
0x1499   :  { %2785 = vmatprep.subr.bf16.mxu1 %v7186_v19 }
0x149c   :  { %2786 = vmatpush1.bf16.msra.mxu1 %v7187_v23 }
0x149d   :  { %2787 = vmatprep.subr.bf16.mxu1 %v7188_v26 }
0x14a0   :  { %2788 = vmatpush1.bf16.msra.mxu1 %v7189_v37 }
0x14a1   :  { %2789 = vmatprep.subr.bf16.mxu1 %v7190_v32 }
0x14a4   :  { %2790 = vmatpush2.bf16.msra.mxu1 %v7191_v27 }
0x14a5   :  { %2791 = vmatprep.subr.bf16.mxu1 %v7192_v60 }
0x14a8   :  { %2792 = vmatpush2.bf16.msra.mxu1 %v7193_v20 }
0x14a9   :  { %2793 = vmatprep.subr.bf16.mxu1 %v7194_v5 }
0x14ac   :  { %2794 = vmatpush2.bf16.msra.mxu1 %v7195_v63 }
0x14ad   :  { %2795 = vmatprep.subr.bf16.mxu1 %v7196_v42 }
0x14b0   :  { %2796 = vmatpush2.bf16.msra.mxu1 %v7197_v44 }
0x14b1   :  { %2797 = vmatprep.subr.bf16.mxu1 %v7198_v46 }
0x14b4   :  { %2798 = vmatpush2.bf16.msra.mxu1 %v7199_v48 }
0x14b5   :  { %2799 = vmatprep.subr.bf16.mxu1 %v7200_v40 }
0x14b8   :  { %2800 = vmatpush2.bf16.msra.mxu1 %v7201_v10 }
0x14b9   :  { %2801 = vmatprep.subr.bf16.mxu1 %v7202_v45  ;;  %v7206_v45 = vld [vmem:[#allocation5 + $0x4] ss:$0 sm:$0xff] }
0x14bc   :  { %2802 = vmatpush2.bf16.msra.mxu1 %v7203_v51 }
0x14bd   :  { %2803 = vmatprep.subr.bf16.mxu1 %v7204_v52 }
0x14c0   :  { %2804 = vmatpush2.bf16.msra.mxu1 %v7205_v36  ;;  %v7207_v36 = vld [vmem:[#allocation5 + $0x5] ss:$0 sm:$0xff] }
0x14c1   :  { %6299 = vmatprep.subr.bf16.mxu1 %v7578_v43 }
0x1535   :  { %v2694_v55 = vpop.f32.mrf.mxu0 }
0x1536   :  { %v2717_v58 = vmul.f32 %v2694_v55, %v2694_v55  ;;  %v2726_v4 = vsub.f32 %v8086_v47, %v2694_v55 }
0x1537   :  { %v6253_v56 = vpop.f32.mrf.mxu0 }
0x1539   :  { %v2697_v59 = vpop.f32.mrf.mxu0 }
0x153a   :  { %v2718_v62 = vsub.f32 %v2697_v59, %v2717_v58 }
0x153b   :  { %v6254_v39 = vpop.f32.mrf.mxu0 }
0x153c   :  { %v2719_v12 = vmax.f32 %v2718_v62, 0.0 }
0x153e   :  { %v2727_v13 = vadd.f32 1e-05, %v2719_v12 }
0x1540   :  { %6954 = vrsqrt.f32 %v2727_v13  ;;  %v7208_v13 = vld [vmem:[#allocation5 + $0xf] ss:$0 sm:$0xff] }
0x1543   :  { %v6233_v6 = vpop.f32.mrf.mxu1 }
0x1545   :  { %v2641_v17 = vpop.f32.mrf.mxu1 }
0x1547   :  { %v6234_v0 = vpop.f32.mrf.mxu1 }
0x1548   :  { %v2659_v23 = vpack.c.bf16 %v6234_v0, %v6233_v6 }
0x1549   :  { %v2644_v57 = vpop.f32.mrf.mxu1 }
0x154a   :  { %v2658_v25 = vpack.c.bf16 %v2644_v57, %v2641_v17  ;;  %v7209_v57 = vld [vmem:[#allocation5 + $0x10] ss:$0 sm:$0xff] }
0x154c   :  { %6256 = vmatmul.mubr.bf16.gmra.mxu0 %v2658_v25 }
0x154d   :  { %v6955_v18 = vpop.eup %6954  ;;  %6259 = vmatprep.mubr.msk.bf16.mxu0 %vm7580_vm5, %v7578_v43 }
0x154e   :  { %v2729_v19 = vmul.f32 %v6955_v18, %v2726_v4 }
0x1550   :  { %v2730_v51 = vmul.f32 %v7206_v45, %v2729_v19 }
0x1552   :  { %v2731_v55 = vadd.f32 %v7207_v36, %v2730_v51 }
0x1554   :  { %6260 = vmatmul.mubr.bf16.gmra.mxu0 %v2659_v23  ;;  %v2733_v56 = vmul.f32 0.044715, %v2731_v55 }
0x1555   :  { %6267 = vmatprep.mubr.msk.bf16.mxu0 %vm98_vm0, %v7655_v11 }
0x1556   :  { %v2734_v62 = vmul.f32 %v2733_v56, %v2731_v55 }
0x1558   :  { %v2735_v0 = vmul.f32 %v2734_v62, %v2731_v55 }
0x155a   :  { %v2736_v23 = vadd.f32 %v2735_v0, %v2731_v55 }
0x160c   :  { %v2702_v26 = vpop.f32.mrf.mxu0 }
0x160d   :  { %v2720_v60 = vmul.f32 %v2702_v26, %v2702_v26  ;;  %v2741_v58 = vsub.f32 %v8091_v21, %v2702_v26  ;;  %v2737_v21 = vmul.f32 0.7978846, %v2736_v23  ;;  %v7217_v23 = vld [vmem:[#allocation7 + $0x68] sm:$0xff]  }
0x160e   :  { %v6257_v37 = vpop.f32.mrf.mxu0 }
0x1610   :  { %v2705_v32 = vpop.f32.mrf.mxu0 }
0x1611   :  { %v2721_v47 = vmul.f32 %v2705_v32, %v2705_v32  ;;  %v2742_v12 = vsub.f32 %v8093_v53, %v2705_v32 }
0x1612   :  { %v6258_v27 = vpop.f32.mrf.mxu0 }
0x1614   :  { %v2710_v20 = vpop.f32.mrf.mxu0 }
0x1615   :  { %v2722_v5 = vsub.f32 %v2710_v20, %v2720_v60 }
0x1616   :  { %v6261_v63 = vpop.f32.mrf.mxu0 }
0x1617   :  { %v2724_v42 = vmax.f32 %v2722_v5, 0.0 }
0x1618   :  { %v2713_v44 = vpop.f32.mrf.mxu0 }
0x1619   :  { %v2743_v46 = vadd.f32 1e-05, %v2724_v42  ;;  %v2723_v48 = vsub.f32 %v2713_v44, %v2721_v47 }
0x161a   :  { %v6262_v40 = vpop.f32.mrf.mxu0 }
0x161b   :  { %6956 = vrsqrt.f32 %v2743_v46  ;;  %v2725_v10 = vmax.f32 %v2723_v48, 0.0 }
0x161d   :  { %v2744_v52 = vadd.f32 1e-05, %v2725_v10  ;;  %v2732_v10 = vmul.f32 0.5, %v2731_v55 }
0x161f   :  { %6958 = vrsqrt.f32 %v2744_v52 }
0x1620   :  { %6960 = vtanh.f32 %v2737_v21 }
0x1628   :  { %v6957_v59 = vpop.eup %6956 }
0x1629   :  { %v2747_v39 = vmul.f32 %v6957_v59, %v2741_v58 }
0x162b   :  { %v2749_v6 = vmul.f32 %v7208_v13, %v2747_v39 }
0x162c   :  { %v6959_v17 = vpop.eup %6958 }
0x162d   :  { %v2751_v25 = vadd.f32 %v7209_v57, %v2749_v6  ;;  %v2748_v4 = vmul.f32 %v6959_v17, %v2742_v12  ;;  %v6961_v42 = vpop.eup %6960  ;;  %v7210_v6 = vld [vmem:[#allocation5 + $0x11] ss:$0 sm:$0xff] }
0x162e   :  { %v2739_v46 = vadd.f32 1.0, %v6961_v42 }
0x162f   :  { %v2750_v18 = vmul.f32 %v7208_v13, %v2748_v4  ;;  %v2755_v19 = vmul.f32 0.044715, %v2751_v25  ;;  %v2753_v45 = vmul.f32 0.5, %v2751_v25 }
0x1630   :  { %v2740_v36 = vmul.f32 %v2739_v46, %v2732_v10 }
0x1631   :  { %v2752_v37 = vadd.f32 %v7209_v57, %v2750_v18  ;;  %v2757_v27 = vmul.f32 %v2755_v19, %v2751_v25 }
0x1632   :  { %v2771_v62 = vpack.c.bf16 %v2740_v36, %v2740_v36 }
0x1633   :  { %v2756_v60 = vmul.f32 0.044715, %v2752_v37  ;;  %v2759_v20 = vmul.f32 %v2757_v27, %v2751_v25  ;;  %v2754_v51 = vmul.f32 0.5, %v2752_v37  ;;  %v7219_v27 = vld [vmem:[#allocation7 + $0x58] sm:$0xff]  }
0x1635   :  { %v2758_v26 = vmul.f32 %v2756_v60, %v2752_v37  ;;  %v2761_v5 = vadd.f32 %v2759_v20, %v2751_v25 }
0x1637   :  { %v2760_v63 = vmul.f32 %v2758_v26, %v2752_v37  ;;  %v2763_v47 = vmul.f32 0.7978846, %v2761_v5 }
0x1639   :  { %v2762_v53 = vadd.f32 %v2760_v63, %v2752_v37  ;;  %6962 = vtanh.f32 %v2763_v47  ;;  %v7218_v37 = vld [vmem:[#allocation7 + $0x60] sm:$0xff]  }
0x163b   :  { %v2764_v32 = vmul.f32 0.7978846, %v2762_v53 }
0x163d   :  { %6964 = vtanh.f32 %v2764_v32 }
0x1646   :  { %v6963_v44 = vpop.eup %6962 }
0x1647   :  { %v2767_v48 = vadd.f32 1.0, %v6963_v44 }
0x1649   :  { %v2769_v56 = vmul.f32 %v2767_v48, %v2753_v45 }
0x164a   :  { %v6965_v40 = vpop.eup %6964 }
0x164b   :  { %v2768_v52 = vadd.f32 1.0, %v6965_v40 }
0x164d   :  { %v2770_v58 = vmul.f32 %v2768_v52, %v2754_v51  ;;  %v7220_v52 = vld [vmem:[#allocation5 + $0x7] ss:$0 sm:$0xff] }
0x164f   :  { %v2772_v59 = vpack.c.bf16 %v2770_v58, %v2769_v56  ;;  %v7221_v56 = vld [vmem:[#allocation5 + $0x8] ss:$0 sm:$0xff] }
0x1651   :  { %2805 = vmatprep.mubr.bf16.mxu1 %v2772_v59 }
0x1652   :  { %2806 = vmatmul.mubr.bf16.vlgmr.msra.gmra.mxu1 %v2771_v62 }
0x1653   :  { %6301 = vmatprep.mubr.msk.bf16.mxu1 %vm7580_vm5, %v7578_v43 }
0x1712   :  { %v2807_v39 = vpop.f32.mrf.mxu1 }
0x1714   :  { %v2809_v12 = vpop.f32.mrf.mxu1 }
0x1715   :  { %v8115_v17 = vadd.f32 %v7210_v6, %v2809_v12 }
0x1716   :  { %v2811_v13 = vpop.f32.mrf.mxu1 }
0x1717   :  { %v2818_v57 = vmul.f32 %v8115_v17, %v8115_v17 }
0x1718   :  { %v2812_v55 = vpop.f32.mrf.mxu1 }
0x1719   :  { %v8117_v0 = vadd.f32 %v7210_v6, %v2812_v55 }
0x171b   :  { %v2819_v25 = vmul.f32 %v8117_v0, %v8117_v0  ;;  %v2820_v18 = vpack.c.bf16 %v8117_v0, %v8115_v17 }
0x171d   :  { %v2821_v4 = vpack.c.bf16 %v2819_v25, %v2818_v57 }
0x171f   :  { %6263 = vmatprep.subr.bf16.mxu0 %v2821_v4 }
0x1720   :  { %6264 = vmatpush3.bf16.msra.mxu0 %v2821_v4 }
0x1721   :  { %6265 = vmatprep.subr.bf16.mxu0 %v2820_v18 }
0x1724   :  { %6266 = vmatpush3.bf16.msra.mxu0 %v2820_v18  ;;  %v7222_v18 = vld [vmem:[#allocation7 + $0x40] sm:$0xf] }
0x1725   :  { %6271 = vmatprep.subr.bf16.mxu0 %v7578_v43 }
0x1727   :  { %6268 = vmatmul.mubr.msk.bf16.vlgmr.msra.gmra.mxu0 %vm98_vm0, %v7661_v14 }
0x1728   :  { %6272 = vmatpush3.bf16.msra.mxu0 %v8009_v8  ;;  %6287 = vmatprep.mubr.msk.bf16.mxu0 %vm7580_vm5, %v7578_v43  ;;  %v7211_v8 = vld [vmem:[#allocation5 + $0x6] ss:$0 sm:$0xff] }
0x1729   :  { %6273 = vmatprep.subr.bf16.mxu0 %v7578_v43  ;;  %v2815_v19 = vadd.f32 %v7211_v8, %v2807_v39 }
0x172c   :  { %6274 = vmatpush3.bf16.msra.mxu0 %v8015_v30  ;;  %v2871_v30 = vmul.f32 %v2815_v19, %v2815_v19 }
0x172d   :  { %6275 = vmatprep.subr.bf16.mxu0 %v7578_v43 }
0x1730   :  { %6276 = vmatpush3.bf16.msra.mxu0 %v8019_v3  ;;  %v2872_v3 = vpack.c.bf16 %v2871_v30, %v2815_v19 }
0x1731   :  { %6277 = vmatprep.subr.bf16.mxu0 %v7578_v43 }
0x1734   :  { %6278 = vmatpush3.bf16.msra.mxu0 %v8023_v31  ;;  %v7212_v31 = vld [vmem:[#allocation7 + $0x90] sm:$0xff]  }
0x1735   :  { %6279 = vmatprep.subr.bf16.mxu0 %v7578_v43 }
0x1738   :  { %6280 = vmatpush3.bf16.msra.mxu0 %v8027_v29  ;;  %v7213_v29 = vld [vmem:[#allocation7 + $0x88] sm:$0xff]  }
0x1739   :  { %6281 = vmatprep.subr.bf16.mxu0 %v7578_v43 }
0x173c   :  { %6282 = vmatpush3.bf16.msra.mxu0 %v8031_v33  ;;  %v7214_v33 = vld [vmem:[#allocation7 + $0x80] sm:$0xff]  }
0x173d   :  { %6283 = vmatprep.subr.bf16.mxu0 %v7578_v43 }
0x1740   :  { %6284 = vmatpush3.bf16.msra.mxu0 %v8035_v34  ;;  %v7215_v34 = vld [vmem:[#allocation7 + $0x78] sm:$0xff]  }
0x1741   :  { %6285 = vmatprep.subr.bf16.mxu0 %v7578_v43 }
0x1744   :  { %6286 = vmatpush3.bf16.msra.mxu0 %v8039_v9  ;;  %v7216_v9 = vld [vmem:[#allocation7 + $0x70] sm:$0xff]  }
0x1745   :  { %6311 = vmatprep.subr.bf16.mxu0 %v7578_v43 }
0x1747   :  { %6288 = vmatmul.mubr.bf16.vlgmr.msra.gmra.mxu0 %v2872_v3 }
0x1748   :  { %6291 = vmatprep.mubr.msk.bf16.mxu0 %vm7580_vm5, %v7578_v43  ;;  %6312 = vmatpush3.bf16.msra.mxu0 %v7212_v31 }
0x1749   :  { %6313 = vmatprep.subr.bf16.mxu0 %v7578_v43 }
0x174c   :  { %6314 = vmatpush3.bf16.msra.mxu0 %v7213_v29 }
0x174d   :  { %6315 = vmatprep.subr.bf16.mxu0 %v7578_v43 }
0x1750   :  { %6316 = vmatpush3.bf16.msra.mxu0 %v7214_v33 }
0x1751   :  { %6317 = vmatprep.subr.bf16.mxu0 %v7578_v43 }
0x1754   :  { %6318 = vmatpush3.bf16.msra.mxu0 %v7215_v34 }
0x1755   :  { %6319 = vmatprep.subr.bf16.mxu0 %v7578_v43 }
0x1758   :  { %6320 = vmatpush3.bf16.msra.mxu0 %v7216_v9 }
0x1759   :  { %6321 = vmatprep.subr.bf16.mxu0 %v7578_v43 }
0x175c   :  { %6322 = vmatpush3.bf16.msra.mxu0 %v7217_v23 }
0x175d   :  { %6323 = vmatprep.subr.bf16.mxu0 %v7578_v43 }
0x1760   :  { %6324 = vmatpush3.bf16.msra.mxu0 %v7218_v37 }
0x1761   :  { %6325 = vmatprep.subr.bf16.mxu0 %v7578_v43 }
0x1764   :  { %6326 = vmatpush3.bf16.msra.mxu0 %v7219_v27 }
0x17e7   :  { %v6269_v60 = vpop.f32.mrf.mxu0 }
0x17e9   :  { %v2856_v20 = vpop.f32.mrf.mxu0 }
0x17eb   :  { %v6270_v21 = vpop.f32.mrf.mxu0 }
0x17ec   :  { %v2874_v63 = vpack.c.bf16 %v6270_v21, %v6269_v60 }
0x17ed   :  { %v2859_v26 = vpop.f32.mrf.mxu0 }
0x17ee   :  { %v2873_v5 = vpack.c.bf16 %v2859_v26, %v2856_v20 }
0x17f0   :  { %6292 = vmatmul.mubr.bf16.gmra.mxu0 %v2873_v5 }
0x17f1   :  { %6295 = vmatprep.mubr.msk.bf16.mxu0 %vm7580_vm5, %v7578_v43 }
0x17f8   :  { %6296 = vmatmul.mubr.bf16.gmra.mxu0 %v2874_v63 }
0x17f9   :  { %6327 = vmatprep.mubr.msk.bf16.mxu0 %vm7580_vm5, %v7578_v43 }
0x1807   :  { %v2909_v47 = vpop.f32.mrf.mxu0 }
0x1808   :  { %v2932_v32 = vmul.f32 %v2909_v47, %v2909_v47  ;;  %v2941_v10 = vsub.f32 %v2815_v19, %v2909_v47 }
0x1809   :  { %v6289_v53 = vpop.f32.mrf.mxu0 }
0x180b   :  { %v2912_v42 = vpop.f32.mrf.mxu0 }
0x180c   :  { %v2933_v44 = vsub.f32 %v2912_v42, %v2932_v32  ;;  %v7223_v32 = vld [vmem:[#allocation5 + $0x12] ss:$0 sm:$0xff] }
0x180d   :  { %v6290_v46 = vpop.f32.mrf.mxu0 }
0x180e   :  { %v2934_v48 = vmax.f32 %v2933_v44, 0.0  ;;  %v7224_v46 = vld [vmem:[#allocation5 + $0x13] ss:$0 sm:$0xff] }
0x1810   :  { %v2942_v40 = vadd.f32 1e-05, %v2934_v48 }
0x1812   :  { %6966 = vrsqrt.f32 %v2942_v40 }
0x181f   :  { %v6967_v45 = vpop.eup %6966 }
0x1820   :  { %v2944_v51 = vmul.f32 %v6967_v45, %v2941_v10 }
0x1822   :  { %v2945_v36 = vmul.f32 %v7220_v52, %v2944_v51 }
0x1824   :  { %v2946_v58 = vadd.f32 %v7221_v56, %v2945_v36 }
0x1826   :  { %v2948_v59 = vmul.f32 0.044715, %v2946_v58  ;;  %v2947_v55 = vmul.f32 0.5, %v2946_v58 }
0x1828   :  { %v2949_v62 = vmul.f32 %v2948_v59, %v2946_v58 }
0x182a   :  { %v2950_v39 = vmul.f32 %v2949_v62, %v2946_v58 }
0x182c   :  { %v2951_v12 = vadd.f32 %v2950_v39, %v2946_v58 }
0x182e   :  { %v2952_v13 = vmul.f32 0.7978846, %v2951_v12 }
0x1830   :  { %6968 = vtanh.f32 %v2952_v13 }
0x183d   :  { %v6969_v6 = vpop.eup %6968 }
0x183e   :  { %v2954_v57 = vadd.f32 1.0, %v6969_v6 }
0x1840   :  { %v2955_v25 = vmul.f32 %v2954_v57, %v2947_v55 }
0x1842   :  { %v2986_v4 = vpack.c.bf16 %v2955_v25, %v2955_v25 }
0x1844   :  { %6300 = vmatpush3.bf16.xpose.msra.mxu1 %v2986_v4 }
0x1845   :  { %6305 = vmatprep.subr.bf16.mxu1 %v7578_v43 }
0x184b   :  { %6302 = vmatmul.mubr.bf16.vlgmr.msra.gmra.mxu1 %v7222_v18 }
0x184c   :  { %6307 = vmatprep.mubr.msk.bf16.mxu1 %vm7580_vm5, %v7578_v43 }
0x18b0   :  { %v2917_v8 = vpop.f32.mrf.mxu0 }
0x18b1   :  { %v2935_v31 = vmul.f32 %v2917_v8, %v2917_v8  ;;  %v2956_v5 = vsub.f32 %v8115_v17, %v2917_v8 }
0x18b2   :  { %v6293_v19 = vpop.f32.mrf.mxu0 }
0x18b4   :  { %v2920_v30 = vpop.f32.mrf.mxu0 }
0x18b5   :  { %v2936_v9 = vmul.f32 %v2920_v30, %v2920_v30  ;;  %v2957_v53 = vsub.f32 %v8117_v0, %v2920_v30 }
0x18b6   :  { %v6294_v3 = vpop.f32.mrf.mxu0 }
0x18b8   :  { %v2925_v29 = vpop.f32.mrf.mxu0 }
0x18b9   :  { %v2937_v33 = vsub.f32 %v2925_v29, %v2935_v31 }
0x18ba   :  { %v6297_v34 = vpop.f32.mrf.mxu0 }
0x18bb   :  { %v2939_v23 = vmax.f32 %v2937_v33, 0.0 }
0x18bc   :  { %v2928_v37 = vpop.f32.mrf.mxu0 }
0x18bd   :  { %v2958_v27 = vadd.f32 1e-05, %v2939_v23  ;;  %v2938_v60 = vsub.f32 %v2928_v37, %v2936_v9 }
0x18be   :  { %v6298_v20 = vpop.f32.mrf.mxu0 }
0x18bf   :  { %6970 = vrsqrt.f32 %v2958_v27  ;;  %v2940_v21 = vmax.f32 %v2938_v60, 0.0  ;;  %v7225_v27 = vld [vmem:[#allocation7 + $0x48] sm:$0xff]  }
0x18c1   :  { %v2959_v26 = vadd.f32 1e-05, %v2940_v21 }
0x18c3   :  { %6972 = vrsqrt.f32 %v2959_v26 }
0x18cc   :  { %v6971_v63 = vpop.eup %6970 }
0x18cd   :  { %v2962_v47 = vmul.f32 %v6971_v63, %v2956_v5 }
0x18cf   :  { %v2964_v42 = vmul.f32 %v7223_v32, %v2962_v47 }
0x18d0   :  { %v6973_v44 = vpop.eup %6972 }
0x18d1   :  { %v2966_v48 = vadd.f32 %v7224_v46, %v2964_v42  ;;  %v2963_v40 = vmul.f32 %v6973_v44, %v2957_v53 }
0x18d3   :  { %v2965_v10 = vmul.f32 %v7223_v32, %v2963_v40  ;;  %v2970_v45 = vmul.f32 0.044715, %v2966_v48  ;;  %v2968_v55 = vmul.f32 0.5, %v2966_v48 }
0x18d5   :  { %v2967_v51 = vadd.f32 %v7224_v46, %v2965_v10  ;;  %v2972_v52 = vmul.f32 %v2970_v45, %v2966_v48 }
0x18d7   :  { %v2971_v36 = vmul.f32 0.044715, %v2967_v51  ;;  %v2974_v56 = vmul.f32 %v2972_v52, %v2966_v48  ;;  %v2969_v57 = vmul.f32 0.5, %v2967_v51 }
0x18d9   :  { %v2973_v58 = vmul.f32 %v2971_v36, %v2967_v51  ;;  %v2976_v59 = vadd.f32 %v2974_v56, %v2966_v48 }
0x18db   :  { %v2975_v62 = vmul.f32 %v2973_v58, %v2967_v51  ;;  %v2978_v17 = vmul.f32 0.7978846, %v2976_v59 }
0x18dd   :  { %v2977_v39 = vadd.f32 %v2975_v62, %v2967_v51  ;;  %6974 = vtanh.f32 %v2978_v17 }
0x18df   :  { %v2979_v12 = vmul.f32 0.7978846, %v2977_v39  ;;  %v7226_v39 = vld [vmem:[#allocation5 + $0x14] ss:$0 sm:$0xff] }
0x18e1   :  { %6976 = vtanh.f32 %v2979_v12 }
0x18ea   :  { %v6975_v0 = vpop.eup %6974 }
0x18eb   :  { %v2982_v13 = vadd.f32 1.0, %v6975_v0 }
0x18ed   :  { %v2984_v4 = vmul.f32 %v2982_v13, %v2968_v55 }
0x18ee   :  { %v6977_v6 = vpop.eup %6976 }
0x18ef   :  { %v2983_v25 = vadd.f32 1.0, %v6977_v6  ;;  %v7227_v6 = vld [vmem:[#allocation5 + $0x15] ss:$0 sm:$0xff] }
0x18f1   :  { %v2985_v18 = vmul.f32 %v2983_v25, %v2969_v57 }
0x18f3   :  { %v3096_v8 = vpack.c.bf16 %v2985_v18, %v2984_v4 }
0x18f5   :  { %6328 = vmatmul.mubr.bf16.vlgmr.msra.gmra.mxu0 %v3096_v8 }
0x18f6   :  { %6355 = vmatprep.mubr.msk.bf16.mxu0 %vm98_vm0, %v7655_v11 }
0x190b   :  { %v3021_v19 = vpop.f32.mrf.mxu1 }
0x190c   :  { %v3022_v30 = vadd.f32 %v3021_v19, %v7895_v50 }
0x190d   :  { %v6303_v3 = vpop.f32.mrf.mxu1 }
0x190e   :  { %v3027_v31 = vmul.f32 %v3022_v30, %v3022_v30 }
0x190f   :  { %v3024_v29 = vpop.f32.mrf.mxu1 }
0x1910   :  { %3029 = vrot.lane.b32.xlu1 %v3027_v31, %s7568_s21 }
0x1911   :  { %v6304_v33 = vpop.f32.mrf.mxu1 }
0x1982   :  { %v3030_v34 = vpop.permute.xlu1 %3029 }
0x1983   :  { %v3032_v9 = vsel %vm157_vm2, %v3022_v30, %v3030_v34 }
0x1984   :  { %v3033_v23 = vpack.c.bf16 %v3032_v9, %v3032_v9 }
0x1986   :  { %v3035_v37 = vsel %vm1768_vm6, %v3033_v23, 0 }
0x1987   :  { %6306 = vmatpush3.bf16.msra.mxu1 %v3035_v37 }
0x198a   :  { %6308 = vmatmul.mubr.msk.bf16.vlgmr.msra.gmra.mxu1 %vm157_vm2, %v7582_v1 }
0x198b   :  { %6333 = vmatprep.mubr.msk.bf16.mxu1 %vm98_vm0, %v7225_v27 }
0x19b5   :  { %v3131_v60 = vpop.f32.mrf.mxu0 }
0x19b6   :  { %v3132_v29 = vadd.f32 %v7226_v39, %v3131_v60 }
0x19b7   :  { %v6329_v20 = vpop.f32.mrf.mxu0 }
0x19b8   :  { %v3138_v23 = vmul.f32 %v7227_v6, %v3132_v29 }
0x19b9   :  { %v3134_v21 = vpop.f32.mrf.mxu0 }
0x19ba   :  { %v3135_v12 = vadd.f32 %v7226_v39, %v3134_v21 }
0x19bb   :  { %v6330_v26 = vpop.f32.mrf.mxu0 }
0x19bc   :  { %v3139_v55 = vmul.f32 %v7227_v6, %v3135_v12 }
0x1a4a   :  { %v3071_v5 = vpop.f32.mrf.mxu1 }
0x1a4b   :  { %v3077_v63 = vmul.f32 %v3071_v5, %v3071_v5  ;;  %v3084_v10 = vsub.f32 %v3022_v30, %v3071_v5 }
0x1a4c   :  { %v6309_v47 = vpop.f32.mrf.mxu1 }
0x1a4d   :  { %3079 = vrot.lane.b32.xlu0 %v3077_v63, %s7568_s21 }
0x1a4e   :  { %v3074_v53 = vpop.f32.mrf.mxu1 }
0x1a4f   :  { %v7229_v53 = vld [vmem:[#allocation8 + $0x24] ss:$8 sps:$4 sm:$0xff]  }
0x1a50   :  { %v6310_v32 = vpop.f32.mrf.mxu1 }
0x1abf   :  { %v3080_v42 = vpop.permute.xlu0 %3079 }
0x1ac0   :  { %v3082_v44 = vsub.f32 %v3071_v5, %v3080_v42 }
0x1ac2   :  { %v3083_v46 = vmax.f32 %v3082_v44, 0.0 }
0x1ac4   :  { %v3085_v48 = vadd.f32 1e-05, %v3083_v46 }
0x1ac6   :  { %6978 = vrsqrt.f32 %v3085_v48 }
0x1ad3   :  { %v6979_v40 = vpop.eup %6978 }
0x1ad4   :  { %3088 = vrot.lane.b32.xlu1 %v6979_v40, %s7575_s11 }
0x1b46   :  { %v3089_v45 = vpop.permute.xlu1 %3088 }
0x1b47   :  { %v3091_v51 = vmul.f32 %v3089_v45, %v3084_v10 }
0x1b49   :  { %v3092_v52 = vmul.f32 %v3091_v51, %v7912_v54 }
0x1b4b   :  { %v3093_v36 = vadd.f32 %v3092_v52, %v7915_v22 }
0x1b4d   :  { %v3094_v56 = vmul.f32 1.442695, %v3093_v36 }
0x1b4f   :  { %6980 = vpow2.f32 %v3094_v56 }
0x1b5c   :  { %v6981_v58 = vpop.eup %6980 }
0x1b5d   :  { %3141 = vrot.lane.b32.xlu0 %v6981_v58, %s7585_s16 }
0x1bcf   :  { %v3142_v59 = vpop.permute.xlu0 %3141 }
0x1bd0   :  { %3156 = vperm.xlu0 %6698, %v3142_v59   ;;  %3148 = vperm.xlu1 %6697, %v3142_v59  }
0x1bd4   :  { %6701 = vset.pattern.permute.xlu0 %v7577_v35  ;;  %6699 = vset.pattern.permute.xlu1 %v7586_v41 }
0x1bd5   :  { %3144 = vperm.xlu0 %6701, %v6981_v58   ;;  %3164 = vperm.xlu1 %6699, %v3142_v59  }
0x1bd9   :  { %6704 = vset.pattern.permute.xlu0 %v7587_v38  ;;  %6700 = vset.pattern.permute.xlu1 %v7587_v38 }
0x1bda   :  { %3168 = vperm.xlu0 %6704, %v6981_v58   ;;  %3172 = vperm.xlu1 %6700, %v3142_v59  }
0x1bde   :  { %6702 = vset.pattern.permute.xlu1 %v7584_v24  ;;  %6711 = vset.pattern.permute.xlu0 %v7584_v24 }
0x1bdf   :  { %3152 = vperm.xlu1 %6702, %v6981_v58  }
0x1be3   :  { %6703 = vset.pattern.permute.xlu1 %v7586_v41 }
0x1be4   :  { %3160 = vperm.xlu1 %6703, %v6981_v58  }
0x1be8   :  { %6710 = vset.pattern.permute.xlu1 %v7577_v35 }
0x1c4b   :  { %v3149_v62 = vpop.permute.xlu1 %3148  ;;  %v3157_v0 = vpop.permute.xlu0 %3156 }
0x1c4c   :  { %v3176_v13 = vsel %vm1990_vm7, %v3149_v62, %v3157_v0 }
0x1c50   :  { %v3165_v17 = vpop.permute.xlu1 %3164  ;;  %v3145_v30 = vpop.permute.xlu0 %3144 }
0x1c51   :  { %v3178_v57 = vsel %vm157_vm2, %v3176_v13, %v3165_v17 }
0x1c55   :  { %v3173_v25 = vpop.permute.xlu1 %3172  ;;  %v3169_v34 = vpop.permute.xlu0 %3168 }
0x1c56   :  { %v3180_v4 = vsel %vm1995_vm8, %v3178_v57, %v3173_v25  ;;  %v7230_v57 = vld [vmem:[#allocation8 + $0x20] ss:$8 sps:$4 sm:$0xff]   ;;  %v7231_v25 = vld [vmem:[#allocation8 + $0x14] ss:$8 sps:$4 sm:$0xff]  }
0x1c57   :  { %v3182_v18 = vmul.f32 %v3180_v4, %v3139_v55  ;;  %v7232_v4 = vld [vmem:[#allocation8 + $0x10] ss:$8 sps:$4 sm:$0xff]  }
0x1c59   :  { %v8190_v8 = vadd.f32 %v3182_v18, %v7930_v49  ;;  %v7233_v18 = vld [vmem:[#allocation8 + $0x4] ss:$8 sps:$4 sm:$0xff]  }
0x1c5a   :  { %v3153_v19 = vpop.permute.xlu1 %3152 }
0x1c5b   :  { %3186 = vrot.lane.b32.xlu1 %v8190_v8, %s7573_s2  ;;  %v3175_v31 = vsel %vm1990_vm7, %v3145_v30, %v3153_v19  ;;  %v3367_v60 = vmul.f32 %v8190_v8, %v8190_v8  ;;  %v7234_v19 = vld [vmem:[#allocation8] ss:$8 sps:$4 sm:$0xff]  }
0x1c5f   :  { %v3161_v3 = vpop.permute.xlu1 %3160 }
0x1c60   :  { %v3177_v33 = vsel %vm157_vm2, %v3175_v31, %v3161_v3 }
0x1c61   :  { %v3179_v9 = vsel %vm1995_vm8, %v3177_v33, %v3169_v34 }
0x1c62   :  { %v3181_v37 = vmul.f32 %v3179_v9, %v3138_v23 }
0x1c64   :  { %v8198_v27 = vadd.f32 %v3181_v37, %v7938_v2  ;;  %v7228_v2 = vld [vmem:[#allocation7 + $0x50] sm:$0xff]  }
0x1c66   :  { %v3366_v20 = vmul.f32 %v8198_v27, %v8198_v27  ;;  %v3368_v47 = vpack.c.bf16 %v8190_v8, %v8198_v27 }
0x1c68   :  { %v3369_v63 = vpack.c.bf16 %v3367_v60, %v3366_v20 }
0x1ccd   :  { %v3187_v49 = vpop.permute.xlu1 %3186 }
0x1cce   :  { %v3189_v21 = vsel %vm81_vm1, %v8198_v27, %v3187_v49 }
0x1ccf   :  { %v3190_v26 = vpack.c.bf16 %v3189_v21, %v3189_v21 }
0x1cd1   :  { %6653 = vmatprep.subr.msk.bf16.mxu1 %vm98_vm0, %v3190_v26  ;;  %v3192_v5 = vsel %vm98_vm0, %v3190_v26, 0 }
0x1cd2   :  { %6332 = vmatpush3.bf16.xpose.msra.mxu1 %v3192_v5 }
0x1cd3   :  { %6337 = vmatprep.subr.bf16.mxu1 %v3369_v63 }
0x1cd9   :  { %6334 = vmatmul.mubr.msk.bf16.vlgmr.msra.gmra.mxu1 %vm98_vm0, %v7228_v2 }
0x1cda   :  { %6338 = vmatpush3.bf16.msra.mxu1 %v3369_v63  ;;  %6341 = vmatprep.mubr.msk.bf16.mxu1 %vm98_vm0, %v7655_v11 }
0x1cdb   :  { %6339 = vmatprep.subr.bf16.mxu1 %v3368_v47 }
0x1cde   :  { %6340 = vmatpush3.bf16.msra.mxu1 %v3368_v47 }
0x1cdf   :  { %6345 = vmatprep.subr.bf16.mxu1 %v7666_v15 }
0x1ce1   :  { %6342 = vmatmul.mubr.msk.bf16.vlgmr.msra.gmra.mxu1 %vm98_vm0, %v7661_v14 }
0x1ce2   :  { %6346 = vmatpush3.bf16.msra.mxu1 %v7666_v15 }
0x1ce3   :  { %3536 = vmatprep.subr.bf16.mxu1 %v7229_v53 }
0x1d99   :  { %v8217_v32 = vpop.f32.mrf.mxu1 }
0x1d9a   :  { %v3249_v42 = vsel %vm157_vm2, %v8217_v32, 0.0  ;;  %v3261_v40 = vmul.f32 %v8217_v32, %v8217_v32 }
0x1d9b   :  { %3250 = vadd.xlane.f32.xlu0 %v3249_v42  ;;  %v8221_v44 = vpop.f32.mrf.mxu1 }
0x1d9c   :  { %v3269_v36 = vsel %vm157_vm2, %v3261_v40, 0.0  ;;  %v3243_v17 = vsel %vm157_vm2, %v8221_v44, 0.0  ;;  %v3259_v13 = vmul.f32 %v8221_v44, %v8221_v44 }
0x1d9d   :  { %v8223_v46 = vpop.f32.mrf.mxu1 }
0x1d9e   :  { %v3252_v48 = vsel %vm157_vm2, %v8223_v46, 0.0  ;;  %v3262_v59 = vmul.f32 %v8223_v46, %v8223_v46  ;;  %v3263_v55 = vsel %vm157_vm2, %v3259_v13, 0.0 }
0x1d9f   :  { %3253 = vadd.xlane.f32.xlu0 %v3252_v48  ;;  %v8229_v10 = vpop.f32.mrf.mxu1 }
0x1da0   :  { %v3246_v45 = vsel %vm157_vm2, %v8229_v10, 0.0  ;;  %v3260_v51 = vmul.f32 %v8229_v10, %v8229_v10  ;;  %v3272_v0 = vsel %vm157_vm2, %v3262_v59, 0.0 }
0x1da1   :  { %3247 = vadd.xlane.f32.xlu1 %v3246_v45  ;;  %v6343_v52 = vpop.f32.mrf.mxu1 }
0x1da2   :  { %v3266_v58 = vsel %vm157_vm2, %v3260_v51, 0.0 }
0x1da3   :  { %3270 = vadd.xlane.f32.xlu0 %v3269_v36  ;;  %v3404_v56 = vpop.f32.mrf.mxu1 }
0x1da5   :  { %3267 = vadd.xlane.f32.xlu1 %v3266_v58  ;;  %v6344_v62 = vpop.f32.mrf.mxu1 }
0x1da6   :  { %v3420_v6 = vpack.c.bf16 %v6344_v62, %v6343_v52  ;;  %v7235_v62 = vld [vmem:[#allocation5 + $0x30] sm:$0xff] }
0x1da7   :  { %3244 = vadd.xlane.f32.xlu0 %v3243_v17  ;;  %v3407_v39 = vpop.f32.mrf.mxu1 }
0x1da8   :  { %v3419_v12 = vpack.c.bf16 %v3407_v39, %v3404_v56 }
0x1da9   :  { %3273 = vadd.xlane.f32.xlu1 %v3272_v0  ;;  %v7236_v0 = vld [vmem:[#allocation5 + $0x28] sm:$0xff] }
0x1daa   :  { %6347 = vmatprep.mubr.msk.bf16.mxu1 %vm81_vm1, %v3419_v12 }
0x1dab   :  { %6348 = vmatmul.mubr.msk.bf16.vlgmr.msra.gmra.mxu1 %vm81_vm1, %v3420_v6 }
0x1dac   :  { %3537 = vmatpush1.bf16.msra.mxu1 %v7230_v57  ;;  %3558 = vmatprep.mubr.bf16.mxu1 %v7577_v35 }
0x1dad   :  { %3264 = vadd.xlane.f32.xlu1 %v3263_v55  ;;  %3538 = vmatprep.subr.bf16.mxu1 %v7231_v25 }
0x1db0   :  { %3539 = vmatpush1.bf16.msra.mxu1 %v7232_v4 }
0x1db1   :  { %3540 = vmatprep.subr.bf16.mxu1 %v7233_v18 }
0x1db4   :  { %3541 = vmatpush1.bf16.msra.mxu1 %v7234_v19  ;;  %v7237_v19 = vld [vmem:[#allocation5 + $0x38] sm:$0xff] }
0x1db5   :  { %6359 = vmatprep.subr.bf16.mxu1 %v7578_v43 }
0x1e24   :  { %v3251_v30 = vpop.xlane.xlu0 %3250 }
0x1e25   :  { %v3257_v31 = vmul.f32 0.125, %v3251_v30 }
0x1e27   :  { %v3281_v9 = vmul.f32 %v3257_v31, %v3257_v31  ;;  %v3293_v52 = vsub.f32 %v8217_v32, %v3257_v31 }
0x1e28   :  { %v3254_v3 = vpop.xlane.xlu0 %3253 }
0x1e29   :  { %v3258_v26 = vmul.f32 0.125, %v3254_v3 }
0x1e2a   :  { %v3248_v29 = vpop.xlane.xlu1 %3247 }
0x1e2b   :  { %v3256_v33 = vmul.f32 0.125, %v3248_v29  ;;  %v3282_v53 = vmul.f32 %v3258_v26, %v3258_v26  ;;  %v3294_v6 = vsub.f32 %v8223_v46, %v3258_v26 }
0x1e2c   :  { %v3271_v34 = vpop.xlane.xlu0 %3270 }
0x1e2d   :  { %v3277_v23 = vmul.f32 0.125, %v3271_v34  ;;  %v3280_v49 = vmul.f32 %v3256_v33, %v3256_v33  ;;  %v3292_v56 = vsub.f32 %v8229_v10, %v3256_v33 }
0x1e2e   :  { %v3268_v37 = vpop.xlane.xlu1 %3267 }
0x1e2f   :  { %v3285_v20 = vsub.f32 %v3277_v23, %v3281_v9  ;;  %v3276_v21 = vmul.f32 0.125, %v3268_v37 }
0x1e31   :  { %v3289_v60 = vmax.f32 %v3285_v20, 0.0  ;;  %v3284_v5 = vsub.f32 %v3276_v21, %v3280_v49 }
0x1e32   :  { %v3274_v63 = vpop.xlane.xlu1 %3273 }
0x1e33   :  { %v3297_v2 = vadd.f32 1e-05, %v3289_v60  ;;  %v3288_v47 = vmax.f32 %v3284_v5, 0.0  ;;  %v3278_v42 = vmul.f32 0.125, %v3274_v63 }
0x1e35   :  { %6982 = vrsqrt.f32 %v3297_v2  ;;  %v3296_v48 = vadd.f32 1e-05, %v3288_v47  ;;  %v3286_v40 = vsub.f32 %v3278_v42, %v3282_v53 }
0x1e37   :  { %6984 = vrsqrt.f32 %v3296_v48  ;;  %v3290_v45 = vmax.f32 %v3286_v40, 0.0 }
0x1e39   :  { %v3298_v51 = vadd.f32 1e-05, %v3290_v45 }
0x1e3b   :  { %6986 = vrsqrt.f32 %v3298_v51 }
0x1e42   :  { %v6983_v36 = vpop.eup %6982 }
0x1e43   :  { %v3305_v58 = vmul.f32 %v6983_v36, %v3293_v52 }
0x1e44   :  { %v6985_v59 = vpop.eup %6984 }
0x1e45   :  { %v3309_v17 = vmul.f32 %v7235_v62, %v3305_v58  ;;  %v3304_v39 = vmul.f32 %v6985_v59, %v3292_v56 }
0x1e47   :  { %v3313_v12 = vadd.f32 %v3309_v17, %v7710_v7  ;;  %v3308_v13 = vmul.f32 %v7236_v0, %v3304_v39 }
0x1e48   :  { %v6987_v55 = vpop.eup %6986 }
0x1e49   :  { %v3321_v57 = vmul.f32 0.044715, %v3313_v12  ;;  %v3312_v25 = vadd.f32 %v3308_v13, %v7714_v16  ;;  %v3306_v4 = vmul.f32 %v6987_v55, %v3294_v6  ;;  %v3317_v60 = vmul.f32 0.5, %v3313_v12 }
0x1e4b   :  { %v3325_v32 = vmul.f32 %v3321_v57, %v3313_v12  ;;  %v3320_v18 = vmul.f32 0.044715, %v3312_v25  ;;  %v3310_v10 = vmul.f32 %v7237_v19, %v3306_v4  ;;  %v3316_v47 = vmul.f32 0.5, %v3312_v25  ;;  %v7238_v4 = vld [vmem:[#allocation5 + $0x9] ss:$0 sm:$0xff] }
0x1e4d   :  { %v3329_v30 = vmul.f32 %v3325_v32, %v3313_v12  ;;  %v3324_v3 = vmul.f32 %v3320_v18, %v3312_v25  ;;  %v3314_v31 = vadd.f32 %v3310_v10, %v7718_v28  ;;  %v7239_v10 = vld [vmem:[#allocation5 + $0xa] ss:$0 sm:$0xff] }
0x1e4f   :  { %v3333_v29 = vadd.f32 %v3329_v30, %v3313_v12  ;;  %v3328_v33 = vmul.f32 %v3324_v3, %v3312_v25  ;;  %v3322_v34 = vmul.f32 0.044715, %v3314_v31  ;;  %v3318_v40 = vmul.f32 0.5, %v3314_v31 }
0x1e51   :  { %v3337_v9 = vmul.f32 0.7978846, %v3333_v29  ;;  %v3332_v23 = vadd.f32 %v3328_v33, %v3312_v25  ;;  %v3326_v37 = vmul.f32 %v3322_v34, %v3314_v31 }
0x1e53   :  { %6988 = vtanh.f32 %v3337_v9  ;;  %v3336_v46 = vmul.f32 0.7978846, %v3332_v23  ;;  %v3330_v49 = vmul.f32 %v3326_v37, %v3314_v31 }
0x1e55   :  { %6990 = vtanh.f32 %v3336_v46  ;;  %v3334_v20 = vadd.f32 %v3330_v49, %v3314_v31 }
0x1e57   :  { %v3338_v21 = vmul.f32 0.7978846, %v3334_v20 }
0x1e59   :  { %6992 = vtanh.f32 %v3338_v21 }
0x1e60   :  { %v6989_v26 = vpop.eup %6988 }
0x1e61   :  { %v3345_v5 = vadd.f32 1.0, %v6989_v26 }
0x1e62   :  { %v6991_v63 = vpop.eup %6990 }
0x1e63   :  { %v3349_v2 = vmul.f32 %v3345_v5, %v3317_v60  ;;  %v3344_v53 = vadd.f32 1.0, %v6991_v63 }
0x1e65   :  { %3356 = vrot.lane.b32.xlu1 %v3349_v2, %s7573_s2  ;;  %v3348_v42 = vmul.f32 %v3344_v53, %v3316_v47 }
0x1e66   :  { %v6993_v48 = vpop.eup %6992 }
0x1e67   :  { %3352 = vrot.lane.b32.xlu0 %v3348_v42, %s7568_s21  ;;  %v3346_v45 = vadd.f32 1.0, %v6993_v48 }
0x1e69   :  { %v3350_v51 = vmul.f32 %v3346_v45, %v3318_v40  ;;  %v3245_v45 = vpop.xlane.xlu0 %3244 }
0x1e6b   :  { %v6349_v52 = vpop.f32.mrf.mxu1  ;;  %3360 = vrot.lane.b32.xlu1 %v3350_v51, %s7576_s12  ;;  %v3265_v51 = vpop.xlane.xlu1 %3264 }
0x1e6d   :  { %v3461_v36 = vpop.f32.mrf.mxu1 }
0x1e6e   :  { %v3476_v56 = vmul.f32 %v3461_v36, %v3461_v36  ;;  %v3482_v55 = vsub.f32 %v8198_v27, %v3461_v36  ;;  %v3275_v36 = vmul.f32 0.125, %v3265_v51 }
0x1e6f   :  { %v6350_v58 = vpop.f32.mrf.mxu1 }
0x1e70   :  { %v3478_v59 = vsub.f32 %v6349_v52, %v3476_v56  ;;  %v3255_v52 = vmul.f32 0.125, %v3245_v45 }
0x1e71   :  { %v3464_v62 = vpop.f32.mrf.mxu1 }
0x1e72   :  { %v3480_v17 = vmax.f32 %v3478_v59, 0.0  ;;  %v3477_v39 = vmul.f32 %v3464_v62, %v3464_v62  ;;  %v3483_v18 = vsub.f32 %v8190_v8, %v3464_v62  ;;  %v3279_v56 = vmul.f32 %v3255_v52, %v3255_v52 }
0x1e74   :  { %v3484_v12 = vadd.f32 1e-05, %v3480_v17  ;;  %v3479_v0 = vsub.f32 %v6350_v58, %v3477_v39  ;;  %v3283_v58 = vsub.f32 %v3275_v36, %v3279_v56  ;;  %v3291_v39 = vsub.f32 %v8221_v44, %v3255_v52  ;;  %v7250_v56 = vld [vmem:[#allocation5 + $0xb] ss:$0 sm:$0xff] }
0x1e76   :  { %6994 = vrsqrt.f32 %v3484_v12  ;;  %v3481_v13 = vmax.f32 %v3479_v0, 0.0  ;;  %v3287_v59 = vmax.f32 %v3283_v58, 0.0  ;;  %v7240_v0 = vld [vmem:[#allocation5 + $0x20] sm:$0xff] }
0x1e78   :  { %v3485_v6 = vadd.f32 1e-05, %v3481_v13  ;;  %v3295_v62 = vadd.f32 1e-05, %v3287_v59 }
0x1e7a   :  { %6996 = vrsqrt.f32 %v3485_v6 }
0x1e83   :  { %v6995_v57 = vpop.eup %6994 }
0x1e84   :  { %v3488_v25 = vmul.f32 %v6995_v57, %v3482_v55 }
0x1e86   :  { %v3490_v32 = vmul.f32 %v7238_v4, %v3488_v25 }
0x1e87   :  { %v6997_v19 = vpop.eup %6996 }
0x1e88   :  { %v3492_v30 = vadd.f32 %v7239_v10, %v3490_v32  ;;  %v3489_v3 = vmul.f32 %v6997_v19, %v3483_v18 }
0x1e8a   :  { %v3491_v31 = vmul.f32 %v7238_v4, %v3489_v3  ;;  %v3496_v29 = vmul.f32 0.044715, %v3492_v30  ;;  %v3494_v2 = vmul.f32 0.5, %v3492_v30 }
0x1e8c   :  { %v3493_v33 = vadd.f32 %v7239_v10, %v3491_v31  ;;  %v3498_v34 = vmul.f32 %v3496_v29, %v3492_v30 }
0x1e8e   :  { %v3497_v9 = vmul.f32 0.044715, %v3493_v33  ;;  %v3500_v23 = vmul.f32 %v3498_v34, %v3492_v30  ;;  %v3495_v47 = vmul.f32 0.5, %v3493_v33 }
0x1e90   :  { %v3499_v37 = vmul.f32 %v3497_v9, %v3493_v33  ;;  %v3502_v46 = vadd.f32 %v3500_v23, %v3492_v30 }
0x1e92   :  { %v3501_v49 = vmul.f32 %v3499_v37, %v3493_v33  ;;  %v3504_v20 = vmul.f32 0.7978846, %v3502_v46 }
0x1e94   :  { %v3503_v21 = vadd.f32 %v3501_v49, %v3493_v33  ;;  %6998 = vtanh.f32 %v3504_v20 }
0x1e96   :  { %v3505_v26 = vmul.f32 0.7978846, %v3503_v21  ;;  %v8269_v21 = vld [vmem:[#allocation7 + $0x38] sm:$0xff]  }
0x1e98   :  { %7000 = vtanh.f32 %v3505_v26  ;;  %v8275_v26 = vld [vmem:[#allocation7 + $0x30] sm:$0xff]  }
0x1e99   :  { %7002 = vrsqrt.f32 %v3295_v62 }
0x1ea1   :  { %v6999_v60 = vpop.eup %6998 }
0x1ea2   :  { %v3508_v5 = vadd.f32 1.0, %v6999_v60  ;;  %v8279_v60 = vld [vmem:[#allocation7 + $0x28] sm:$0xff]  }
0x1ea4   :  { %v3510_v42 = vmul.f32 %v3508_v5, %v3494_v2  ;;  %v8283_v5 = vld [vmem:[#allocation7 + $0x20] sm:$0xff]   ;;  %v8291_v2 = vld [vmem:[#allocation7 + $0x10] sm:$0xff]  }
0x1ea5   :  { %v7001_v63 = vpop.eup %7000 }
0x1ea6   :  { %v3509_v53 = vadd.f32 1.0, %v7001_v63  ;;  %v7003_v17 = vpop.eup %7002  ;;  %v8287_v63 = vld [vmem:[#allocation7 + $0x18] sm:$0xff]  }
0x1ea7   :  { %v3303_v12 = vmul.f32 %v7003_v17, %v3291_v39 }
0x1ea8   :  { %v3511_v48 = vmul.f32 %v3509_v53, %v3495_v47  ;;  %v8295_v47 = vld [vmem:[#allocation7 + $0x8] sm:$0xff]   ;;  %v8299_v53 = vld [vmem:[#allocation7] sm:$0xff]  }
0x1ea9   :  { %v3307_v13 = vmul.f32 %v7240_v0, %v3303_v12 }
0x1eaa   :  { %v6705_v40 = vpack.i.bf16 %v3511_v48, %v3510_v42  ;;  %v7249_v48 = vld [vmem:[#allocation5] ss:$0 sm:$0xff] }
0x1eab   :  { %v3311_v6 = vadd.f32 %v3307_v13, %v7732_v61  ;;  %v7251_v13 = vld [vmem:[#allocation8 + $0xa4] ss:$8 sps:$4 sm:$0xff]  }
0x1eac   :  { %6706 = vrot.lane.b32.xlu0 %v6705_v40, %s7579_s13 }
0x1ead   :  { %v3319_v55 = vmul.f32 0.044715, %v3311_v6  ;;  %v3315_v10 = vmul.f32 0.5, %v3311_v6 }
0x1eaf   :  { %v3323_v57 = vmul.f32 %v3319_v55, %v3311_v6  ;;  %v7253_v55 = vld [vmem:[#allocation8 + $0x94] ss:$8 sps:$4 sm:$0xff]  }
0x1eb1   :  { %v3327_v25 = vmul.f32 %v3323_v57, %v3311_v6  ;;  %v7254_v57 = vld [vmem:[#allocation8 + $0x90] ss:$8 sps:$4 sm:$0xff]  }
0x1eb3   :  { %v3331_v4 = vadd.f32 %v3327_v25, %v3311_v6  ;;  %v7252_v6 = vld [vmem:[#allocation8 + $0xa0] ss:$8 sps:$4 sm:$0xff]   ;;  %v7255_v25 = vld [vmem:[#allocation8 + $0x84] ss:$8 sps:$4 sm:$0xff]  }
0x1eb5   :  { %v3335_v32 = vmul.f32 0.7978846, %v3331_v4  ;;  %v7256_v4 = vld [vmem:[#allocation8 + $0x80] ss:$8 sps:$4 sm:$0xff]  }
0x1eb7   :  { %7004 = vtanh.f32 %v3335_v32  ;;  %v7257_v32 = vld [vmem:[#allocation8 + $0x74] ss:$8 sps:$4 sm:$0xff]  }
0x1ec4   :  { %v7005_v18 = vpop.eup %7004 }
0x1ec5   :  { %v3343_v19 = vadd.f32 1.0, %v7005_v18  ;;  %v7258_v18 = vld [vmem:[#allocation8 + $0x70] ss:$8 sps:$4 sm:$0xff]  }
0x1ec7   :  { %v3347_v31 = vmul.f32 %v3343_v19, %v3315_v10  ;;  %v7259_v19 = vld [vmem:[#allocation8 + $0x64] ss:$8 sps:$4 sm:$0xff]   ;;  %v7260_v10 = vld [vmem:[#allocation8 + $0x60] ss:$8 sps:$4 sm:$0xff]  }
0x1ed7   :  { %v3357_v30 = vpop.permute.xlu1 %3356 }
0x1ed9   :  { %v3353_v3 = vpop.permute.xlu0 %3352 }
0x1eda   :  { %v3363_v29 = vsel %vm157_vm2, %v3347_v31, %v3353_v3  ;;  %v7262_v3 = vld [vmem:[#allocation8 + $0x50] ss:$8 sps:$4 sm:$0xff]   ;;  %v7263_v31 = vld [vmem:[#allocation8 + $0x44] ss:$8 sps:$4 sm:$0xff]  }
0x1edb   :  { %v3364_v34 = vsel %vm81_vm1, %v3363_v29, %v3357_v30  ;;  %v7261_v30 = vld [vmem:[#allocation8 + $0x54] ss:$8 sps:$4 sm:$0xff]   ;;  %v7264_v29 = vld [vmem:[#allocation8 + $0x40] ss:$8 sps:$4 sm:$0xff]  }
0x1edd   :  { %v3361_v44 = vpop.permute.xlu1 %3360 }
0x1ede   :  { %v3365_v37 = vsel %vm301_vm3, %v3364_v34, %v3361_v44  ;;  %v7265_v44 = vld [vmem:[#allocation8 + $0x34] ss:$8 sps:$4 sm:$0xff]   ;;  %v7267_v34 = vld [vmem:[#allocation8 + $0x124] ss:$8 sps:$4 sm:$0xff]  }
0x1f1e   :  { %v6707_v33 = vpop.permute.xlu0 %6706 }
0x1f1f   :  { %v6709_v9 = vunpack.i.h.bf16 %v6707_v33  ;;  %v6708_v23 = vunpack.i.l.bf16 %v6707_v33  ;;  %v7266_v33 = vld [vmem:[#allocation8 + $0x30] ss:$8 sps:$4 sm:$0xff]  }
0x1f21   :  { %v3521_v46 = vsel %vm98_vm0, %v3365_v37, %v6709_v9  ;;  %v3520_v49 = vsel %vm98_vm0, %v3365_v37, %v6708_v23  ;;  %v7268_v9 = vld [vmem:[#allocation8 + $0x120] ss:$8 sps:$4 sm:$0xff]   ;;  %v7269_v23 = vld [vmem:[#allocation8 + $0x114] ss:$8 sps:$4 sm:$0xff]   ;;  %v7270_v37 = vld [vmem:[#allocation8 + $0x110] ss:$8 sps:$4 sm:$0xff]  }
0x1f22   :  { %v3522_v20 = vpack.c.bf16 %v3521_v46, %v3520_v49  ;;  %v7271_v46 = vld [vmem:[#allocation8 + $0x104] ss:$8 sps:$4 sm:$0xff]   ;;  %v7272_v49 = vld [vmem:[#allocation8 + $0x100] ss:$8 sps:$4 sm:$0xff]  }
0x1f24   :  { %5717 = vmatmul.mubr.msk.bf16.vlgmr.msra.gmra.mxu1 %vm526_vm4, %v3522_v20  ;;  %v7273_v20 = vld [vmem:[#allocation8 + $0xf4] ss:$8 sps:$4 sm:$0xff]  }
0x1f25   :  { %6360 = vmatpush3.bf16.msra.mxu1 %v8269_v21  ;;  %6375 = vmatprep.mubr.msk.bf16.mxu1 %vm7580_vm5, %v7578_v43 }
0x1f26   :  { %6361 = vmatprep.subr.bf16.mxu1 %v7578_v43 }
0x1f29   :  { %6362 = vmatpush3.bf16.msra.mxu1 %v8275_v26 }
0x1f2a   :  { %6363 = vmatprep.subr.bf16.mxu1 %v7578_v43 }
0x1f2d   :  { %6364 = vmatpush3.bf16.msra.mxu1 %v8279_v60 }
0x1f2e   :  { %6365 = vmatprep.subr.bf16.mxu1 %v7578_v43 }
0x1f31   :  { %6366 = vmatpush3.bf16.msra.mxu1 %v8283_v5 }
0x1f32   :  { %6367 = vmatprep.subr.bf16.mxu1 %v7578_v43 }
0x1f35   :  { %6368 = vmatpush3.bf16.msra.mxu1 %v8287_v63 }
0x1f36   :  { %6369 = vmatprep.subr.bf16.mxu1 %v7578_v43 }
0x1f39   :  { %6370 = vmatpush3.bf16.msra.mxu1 %v8291_v2 }
0x1f3a   :  { %6371 = vmatprep.subr.bf16.mxu1 %v7578_v43 }
0x1f3d   :  { %6372 = vmatpush3.bf16.msra.mxu1 %v8295_v47 }
0x1f3e   :  { %6373 = vmatprep.subr.bf16.mxu1 %v7578_v43 }
0x1f41   :  { %6374 = vmatpush3.bf16.msra.mxu1 %v8299_v53 }
0x1fe4   :  { %v3560_v42 = vpop.f32.mrf.mxu1 }
0x1fe5   :  { %v8302_v40 = vadd.f32 %v7249_v48, %v3560_v42  ;;  %v7274_v42 = vld [vmem:[#allocation8 + $0xf0] ss:$8 sps:$4 sm:$0xff]   ;;  %v7275_v48 = vld [vmem:[#allocation8 + $0xe4] ss:$8 sps:$4 sm:$0xff]  }
0x1fe6   :  { %v3562_v45 = vpop.f32.mrf.mxu1 }
0x1fe7   :  { %v3624_v51 = vmul.f32 %v8302_v40, %v8302_v40  ;;  %v8307_v58 = vadd.f32 %v7250_v56, %v3562_v45  ;;  %v7276_v45 = vld [vmem:[#allocation8 + $0xe0] ss:$8 sps:$4 sm:$0xff]  }
0x1fe8   :  { %v3564_v52 = vpop.f32.mrf.mxu1 }
0x1fe9   :  { %v3625_v36 = vpack.c.bf16 %v3624_v51, %v8302_v40  ;;  %v3571_v17 = vmul.f32 %v8307_v58, %v8307_v58  ;;  %v7277_v51 = vld [vmem:[#allocation8 + $0xd4] ss:$8 sps:$4 sm:$0xff]   ;;  %v7278_v52 = vld [vmem:[#allocation8 + $0xd0] ss:$8 sps:$4 sm:$0xff]  }
0x1fea   :  { %v3565_v59 = vpop.f32.mrf.mxu1 }
0x1feb   :  { %v8309_v62 = vadd.f32 %v7250_v56, %v3565_v59  ;;  %6376 = vmatmul.mubr.bf16.vlgmr.msra.gmra.mxu1 %v3625_v36  ;;  %v7279_v36 = vld [vmem:[#allocation8 + $0xc4] ss:$8 sps:$4 sm:$0xff]   ;;  %v7280_v56 = vld [vmem:[#allocation8 + $0xc0] ss:$8 sps:$4 sm:$0xff]   ;;  %v7281_v59 = vld [vmem:[#allocation8 + $0xb4] ss:$8 sps:$4 sm:$0xff]  }
0x1fec   :  { %6379 = vmatprep.mubr.msk.bf16.mxu1 %vm7580_vm5, %v7578_v43 }
0x1fed   :  { %v3572_v39 = vmul.f32 %v8309_v62, %v8309_v62  ;;  %v3573_v0 = vpack.c.bf16 %v8309_v62, %v8307_v58 }
0x1fef   :  { %v3574_v12 = vpack.c.bf16 %v3572_v39, %v3571_v17  ;;  %v7282_v17 = vld [vmem:[#allocation8 + $0xb0] ss:$8 sps:$4 sm:$0xff]   ;;  %v7283_v39 = vld [vmem:[#allocation8 + $0x1a4] ss:$8 sps:$4 sm:$0xff]  }
0x1ff1   :  { %6351 = vmatprep.subr.bf16.mxu0 %v3574_v12 }
0x1ff2   :  { %6352 = vmatpush3.bf16.msra.mxu0 %v3574_v12 }
0x1ff3   :  { %6353 = vmatprep.subr.bf16.mxu0 %v3573_v0 }
0x1ff6   :  { %6354 = vmatpush3.bf16.msra.mxu0 %v3573_v0 }
0x1ff7   :  { %3741 = vmatprep.subr.bf16.mxu0 %v7251_v13 }
0x1ff9   :  { %6356 = vmatmul.mubr.msk.bf16.vlgmr.msra.gmra.mxu0 %vm98_vm0, %v7661_v14 }
0x1ffa   :  { %3742 = vmatpush1.bf16.msra.mxu0 %v7252_v6 }
0x1ffb   :  { %3743 = vmatprep.subr.bf16.mxu0 %v7253_v55 }
0x1ffe   :  { %3744 = vmatpush1.bf16.msra.mxu0 %v7254_v57 }
0x1fff   :  { %3745 = vmatprep.subr.bf16.mxu0 %v7255_v25 }
0x2002   :  { %3746 = vmatpush1.bf16.msra.mxu0 %v7256_v4 }
0x2003   :  { %3747 = vmatprep.subr.bf16.mxu0 %v7257_v32 }
0x2006   :  { %3748 = vmatpush1.bf16.msra.mxu0 %v7258_v18 }
0x2007   :  { %3749 = vmatprep.subr.bf16.mxu0 %v7259_v19 }
0x200a   :  { %3750 = vmatpush1.bf16.msra.mxu0 %v7260_v10 }
0x200b   :  { %3751 = vmatprep.subr.bf16.mxu0 %v7261_v30 }
0x200e   :  { %3752 = vmatpush1.bf16.msra.mxu0 %v7262_v3 }
0x200f   :  { %3753 = vmatprep.subr.bf16.mxu0 %v7263_v31 }
0x2012   :  { %3754 = vmatpush1.bf16.msra.mxu0 %v7264_v29 }
0x2013   :  { %3755 = vmatprep.subr.bf16.mxu0 %v7265_v44 }
0x2016   :  { %3756 = vmatpush1.bf16.msra.mxu0 %v7266_v33 }
0x2017   :  { %3757 = vmatprep.subr.bf16.mxu0 %v7267_v34 }
0x201a   :  { %3758 = vmatpush2.bf16.msra.mxu0 %v7268_v9 }
0x201b   :  { %3759 = vmatprep.subr.bf16.mxu0 %v7269_v23 }
0x201e   :  { %3760 = vmatpush2.bf16.msra.mxu0 %v7270_v37 }
0x201f   :  { %3761 = vmatprep.subr.bf16.mxu0 %v7271_v46 }
0x2022   :  { %3762 = vmatpush2.bf16.msra.mxu0 %v7272_v49 }
0x2023   :  { %3763 = vmatprep.subr.bf16.mxu0 %v7273_v20 }
0x2026   :  { %3764 = vmatpush2.bf16.msra.mxu0 %v7274_v42 }
0x2027   :  { %3765 = vmatprep.subr.bf16.mxu0 %v7275_v48 }
0x202a   :  { %3766 = vmatpush2.bf16.msra.mxu0 %v7276_v45 }
0x202b   :  { %3767 = vmatprep.subr.bf16.mxu0 %v7277_v51 }
0x202e   :  { %3768 = vmatpush2.bf16.msra.mxu0 %v7278_v52 }
0x202f   :  { %3769 = vmatprep.subr.bf16.mxu0 %v7279_v36 }
0x2032   :  { %3770 = vmatpush2.bf16.msra.mxu0 %v7280_v56  ;;  %v7284_v56 = vld [vmem:[#allocation5 + $0x1] ss:$0 sm:$0xff] }
0x2033   :  { %3771 = vmatprep.subr.bf16.mxu0 %v7281_v59 }
0x2036   :  { %3772 = vmatpush2.bf16.msra.mxu0 %v7282_v17 }
0x2037   :  { %3956 = vmatprep.subr.bf16.mxu0 %v7283_v39  ;;  %v7285_v39 = vld [vmem:[#allocation5 + $0x2] ss:$0 sm:$0xff] }
0x20ab   :  { %v3662_v12 = vpop.f32.mrf.mxu1 }
0x20ac   :  { %v3685_v13 = vmul.f32 %v3662_v12, %v3662_v12  ;;  %v3694_v3 = vsub.f32 %v8302_v40, %v3662_v12 }
0x20ad   :  { %v6377_v0 = vpop.f32.mrf.mxu1 }
0x20af   :  { %v3665_v6 = vpop.f32.mrf.mxu1 }
0x20b0   :  { %v3686_v55 = vsub.f32 %v3665_v6, %v3685_v13 }
0x20b1   :  { %v6378_v57 = vpop.f32.mrf.mxu1 }
0x20b2   :  { %v3687_v25 = vmax.f32 %v3686_v55, 0.0 }
0x20b4   :  { %v3695_v4 = vadd.f32 1e-05, %v3687_v25 }
0x20b6   :  { %7006 = vrsqrt.f32 %v3695_v4  ;;  %v7286_v4 = vld [vmem:[#allocation5 + $0xc] ss:$0 sm:$0xff] }
0x20b9   :  { %v6357_v32 = vpop.f32.mrf.mxu0 }
0x20bb   :  { %v3609_v18 = vpop.f32.mrf.mxu0 }
0x20bd   :  { %v6358_v19 = vpop.f32.mrf.mxu0 }
0x20be   :  { %v3627_v44 = vpack.c.bf16 %v6358_v19, %v6357_v32 }
0x20bf   :  { %v3612_v10 = vpop.f32.mrf.mxu0 }
0x20c0   :  { %v3626_v30 = vpack.c.bf16 %v3612_v10, %v3609_v18  ;;  %v7287_v10 = vld [vmem:[#allocation5 + $0xd] ss:$0 sm:$0xff] }
0x20c2   :  { %6380 = vmatmul.mubr.bf16.gmra.mxu1 %v3626_v30 }
0x20c3   :  { %v7007_v31 = vpop.eup %7006  ;;  %6383 = vmatprep.mubr.msk.bf16.mxu1 %vm7580_vm5, %v7578_v43 }
0x20c4   :  { %v3697_v29 = vmul.f32 %v7007_v31, %v3694_v3 }
0x20c6   :  { %v3698_v59 = vmul.f32 %v7284_v56, %v3697_v29 }
0x20c8   :  { %v3699_v12 = vadd.f32 %v7285_v39, %v3698_v59 }
0x20ca   :  { %6384 = vmatmul.mubr.bf16.gmra.mxu1 %v3627_v44  ;;  %v3701_v0 = vmul.f32 0.044715, %v3699_v12 }
0x20cb   :  { %6391 = vmatprep.mubr.msk.bf16.mxu1 %vm98_vm0, %v7655_v11 }
0x20cc   :  { %v3702_v55 = vmul.f32 %v3701_v0, %v3699_v12 }
0x20ce   :  { %v3703_v19 = vmul.f32 %v3702_v55, %v3699_v12 }
0x20d0   :  { %v3704_v44 = vadd.f32 %v3703_v19, %v3699_v12  ;;  %v7294_v19 = vld [vmem:[#allocation8 + $0x170] ss:$8 sps:$4 sm:$0xff]  }
0x2182   :  { %v3670_v33 = vpop.f32.mrf.mxu1 }
0x2183   :  { %v3688_v37 = vmul.f32 %v3670_v33, %v3670_v33  ;;  %v3709_v13 = vsub.f32 %v8307_v58, %v3670_v33  ;;  %v3705_v58 = vmul.f32 0.7978846, %v3704_v44  ;;  %v7300_v44 = vld [vmem:[#allocation8 + $0x140] ss:$8 sps:$4 sm:$0xff]  }
0x2184   :  { %v6381_v34 = vpop.f32.mrf.mxu1 }
0x2186   :  { %v3673_v9 = vpop.f32.mrf.mxu1 }
0x2187   :  { %v3689_v40 = vmul.f32 %v3673_v9, %v3673_v9  ;;  %v3710_v25 = vsub.f32 %v8309_v62, %v3673_v9 }
0x2188   :  { %v6382_v23 = vpop.f32.mrf.mxu1 }
0x218a   :  { %v3678_v46 = vpop.f32.mrf.mxu1 }
0x218b   :  { %v3690_v49 = vsub.f32 %v3678_v46, %v3688_v37 }
0x218c   :  { %v6385_v20 = vpop.f32.mrf.mxu1 }
0x218d   :  { %v3692_v42 = vmax.f32 %v3690_v49, 0.0 }
0x218e   :  { %v3681_v48 = vpop.f32.mrf.mxu1 }
0x218f   :  { %v3711_v45 = vadd.f32 1e-05, %v3692_v42  ;;  %v3691_v51 = vsub.f32 %v3681_v48, %v3689_v40 }
0x2190   :  { %v6386_v52 = vpop.f32.mrf.mxu1 }
0x2191   :  { %7008 = vrsqrt.f32 %v3711_v45  ;;  %v3693_v36 = vmax.f32 %v3691_v51, 0.0 }
0x2193   :  { %v3712_v17 = vadd.f32 1e-05, %v3693_v36  ;;  %v3700_v36 = vmul.f32 0.5, %v3699_v12  ;;  %v7293_v12 = vld [vmem:[#allocation8 + $0x174] ss:$8 sps:$4 sm:$0xff]  }
0x2195   :  { %7010 = vrsqrt.f32 %v3712_v17 }
0x2196   :  { %7012 = vtanh.f32 %v3705_v58  ;;  %v7305_v58 = vld [vmem:[#allocation8 + $0x214] ss:$8 sps:$4 sm:$0xff]  }
0x219e   :  { %v7009_v6 = vpop.eup %7008 }
0x219f   :  { %v3715_v57 = vmul.f32 %v7009_v6, %v3709_v13 }
0x21a1   :  { %v3717_v32 = vmul.f32 %v7286_v4, %v3715_v57  ;;  %v7288_v57 = vld [vmem:[#allocation8 + $0x1a0] ss:$8 sps:$4 sm:$0xff]  }
0x21a2   :  { %v7011_v18 = vpop.eup %7010 }
0x21a3   :  { %v3719_v30 = vadd.f32 %v7287_v10, %v3717_v32  ;;  %v3716_v3 = vmul.f32 %v7011_v18, %v3710_v25  ;;  %v7013_v42 = vpop.eup %7012  ;;  %v7289_v25 = vld [vmem:[#allocation8 + $0x194] ss:$8 sps:$4 sm:$0xff]   ;;  %v7291_v32 = vld [vmem:[#allocation8 + $0x184] ss:$8 sps:$4 sm:$0xff]   ;;  %v7292_v18 = vld [vmem:[#allocation8 + $0x180] ss:$8 sps:$4 sm:$0xff]  }
0x21a4   :  { %v3707_v45 = vadd.f32 1.0, %v7013_v42  ;;  %v7312_v42 = vld [vmem:[#allocation8 + $0x1e0] ss:$8 sps:$4 sm:$0xff]  }
0x21a5   :  { %v3718_v31 = vmul.f32 %v7286_v4, %v3716_v3  ;;  %v3723_v29 = vmul.f32 0.044715, %v3719_v30  ;;  %v3721_v56 = vmul.f32 0.5, %v3719_v30  ;;  %v7290_v4 = vld [vmem:[#allocation8 + $0x190] ss:$8 sps:$4 sm:$0xff]  }
0x21a6   :  { %v3708_v39 = vmul.f32 %v3707_v45, %v3700_v36  ;;  %v7297_v3 = vld [vmem:[#allocation8 + $0x154] ss:$8 sps:$4 sm:$0xff]   ;;  %v7314_v45 = vld [vmem:[#allocation8 + $0x1d0] ss:$8 sps:$4 sm:$0xff]  }
0x21a7   :  { %v3720_v34 = vadd.f32 %v7287_v10, %v3718_v31  ;;  %v3725_v23 = vmul.f32 %v3723_v29, %v3719_v30  ;;  %v7295_v10 = vld [vmem:[#allocation8 + $0x164] ss:$8 sps:$4 sm:$0xff]   ;;  %v7298_v31 = vld [vmem:[#allocation8 + $0x150] ss:$8 sps:$4 sm:$0xff]   ;;  %v7317_v36 = vld [vmem:[#allocation8 + $0x1b4] ss:$8 sps:$4 sm:$0xff]  }
0x21a8   :  { %v3739_v55 = vpack.c.bf16 %v3708_v39, %v3708_v39  ;;  %v7299_v29 = vld [vmem:[#allocation8 + $0x144] ss:$8 sps:$4 sm:$0xff]  }
0x21a9   :  { %v3724_v37 = vmul.f32 0.044715, %v3720_v34  ;;  %v3727_v46 = vmul.f32 %v3725_v23, %v3719_v30  ;;  %v3722_v59 = vmul.f32 0.5, %v3720_v34  ;;  %v7302_v23 = vld [vmem:[#allocation8 + $0x130] ss:$8 sps:$4 sm:$0xff]  }
0x21ab   :  { %v3726_v33 = vmul.f32 %v3724_v37, %v3720_v34  ;;  %v3729_v49 = vadd.f32 %v3727_v46, %v3719_v30  ;;  %v7296_v30 = vld [vmem:[#allocation8 + $0x160] ss:$8 sps:$4 sm:$0xff]   ;;  %v7303_v37 = vld [vmem:[#allocation8 + $0x224] ss:$8 sps:$4 sm:$0xff]  }
0x21ac   :  { %v7304_v46 = vld [vmem:[#allocation8 + $0x220] ss:$8 sps:$4 sm:$0xff]  }
0x21ad   :  { %v3728_v20 = vmul.f32 %v3726_v33, %v3720_v34  ;;  %v3731_v40 = vmul.f32 0.7978846, %v3729_v49  ;;  %v7306_v33 = vld [vmem:[#allocation8 + $0x210] ss:$8 sps:$4 sm:$0xff]   ;;  %v7307_v49 = vld [vmem:[#allocation8 + $0x204] ss:$8 sps:$4 sm:$0xff]  }
0x21af   :  { %v3730_v62 = vadd.f32 %v3728_v20, %v3720_v34  ;;  %7014 = vtanh.f32 %v3731_v40  ;;  %v7301_v34 = vld [vmem:[#allocation8 + $0x134] ss:$8 sps:$4 sm:$0xff]   ;;  %v7308_v20 = vld [vmem:[#allocation8 + $0x200] ss:$8 sps:$4 sm:$0xff]  }
0x21b0   :  { %v7309_v40 = vld [vmem:[#allocation8 + $0x1f4] ss:$8 sps:$4 sm:$0xff]  }
0x21b1   :  { %v3732_v9 = vmul.f32 0.7978846, %v3730_v62  ;;  %v7310_v62 = vld [vmem:[#allocation8 + $0x1f0] ss:$8 sps:$4 sm:$0xff]  }
0x21b3   :  { %7016 = vtanh.f32 %v3732_v9  ;;  %v7311_v9 = vld [vmem:[#allocation8 + $0x1e4] ss:$8 sps:$4 sm:$0xff]  }
0x21bc   :  { %v7015_v48 = vpop.eup %7014 }
0x21bd   :  { %v3735_v51 = vadd.f32 1.0, %v7015_v48  ;;  %v7313_v48 = vld [vmem:[#allocation8 + $0x1d4] ss:$8 sps:$4 sm:$0xff]  }
0x21bf   :  { %v3737_v0 = vmul.f32 %v3735_v51, %v3721_v56  ;;  %v7315_v51 = vld [vmem:[#allocation8 + $0x1c4] ss:$8 sps:$4 sm:$0xff]   ;;  %v7318_v56 = vld [vmem:[#allocation8 + $0x1b0] ss:$8 sps:$4 sm:$0xff]  }
0x21c0   :  { %v7017_v52 = vpop.eup %7016 }
0x21c1   :  { %v3736_v17 = vadd.f32 1.0, %v7017_v52  ;;  %v7316_v52 = vld [vmem:[#allocation8 + $0x1c0] ss:$8 sps:$4 sm:$0xff]  }
0x21c3   :  { %v3738_v13 = vmul.f32 %v3736_v17, %v3722_v59 }
0x21c5   :  { %v3740_v6 = vpack.c.bf16 %v3738_v13, %v3737_v0  ;;  %v7319_v0 = vld [vmem:[#allocation5 + $0xe] ss:$0 sm:$0xff] }
0x21c7   :  { %3773 = vmatprep.mubr.bf16.mxu0 %v3740_v6 }
0x21c8   :  { %3774 = vmatmul.mubr.bf16.vlgmr.msra.gmra.mxu0 %v3739_v55 }
0x21c9   :  { %3957 = vmatpush1.bf16.msra.mxu0 %v7288_v57 }
0x21ca   :  { %3958 = vmatprep.subr.bf16.mxu0 %v7289_v25 }
0x21cd   :  { %3959 = vmatpush1.bf16.msra.mxu0 %v7290_v4 }
0x21ce   :  { %3960 = vmatprep.subr.bf16.mxu0 %v7291_v32 }
0x21d1   :  { %3961 = vmatpush1.bf16.msra.mxu0 %v7292_v18  ;;  %v7320_v18 = vld [vmem:[#allocation5 + $0x3] ss:$0 sm:$0xff] }
0x21d2   :  { %3962 = vmatprep.subr.bf16.mxu0 %v7293_v12 }
0x21d5   :  { %3963 = vmatpush1.bf16.msra.mxu0 %v7294_v19 }
0x21d6   :  { %3964 = vmatprep.subr.bf16.mxu0 %v7295_v10 }
0x21d9   :  { %3965 = vmatpush1.bf16.msra.mxu0 %v7296_v30 }
0x21da   :  { %3966 = vmatprep.subr.bf16.mxu0 %v7297_v3 }
0x21dd   :  { %3967 = vmatpush1.bf16.msra.mxu0 %v7298_v31 }
0x21de   :  { %3968 = vmatprep.subr.bf16.mxu0 %v7299_v29 }
0x21e1   :  { %3969 = vmatpush1.bf16.msra.mxu0 %v7300_v44 }
0x21e2   :  { %3970 = vmatprep.subr.bf16.mxu0 %v7301_v34 }
0x21e5   :  { %3971 = vmatpush1.bf16.msra.mxu0 %v7302_v23 }
0x21e6   :  { %3972 = vmatprep.subr.bf16.mxu0 %v7303_v37 }
0x21e9   :  { %3973 = vmatpush2.bf16.msra.mxu0 %v7304_v46 }
0x21ea   :  { %3974 = vmatprep.subr.bf16.mxu0 %v7305_v58 }
0x21ed   :  { %3975 = vmatpush2.bf16.msra.mxu0 %v7306_v33 }
0x21ee   :  { %3976 = vmatprep.subr.bf16.mxu0 %v7307_v49 }
0x21f1   :  { %3977 = vmatpush2.bf16.msra.mxu0 %v7308_v20 }
0x21f2   :  { %3978 = vmatprep.subr.bf16.mxu0 %v7309_v40 }
0x21f5   :  { %3979 = vmatpush2.bf16.msra.mxu0 %v7310_v62 }
0x21f6   :  { %3980 = vmatprep.subr.bf16.mxu0 %v7311_v9 }
0x21f9   :  { %3981 = vmatpush2.bf16.msra.mxu0 %v7312_v42 }
0x21fa   :  { %3982 = vmatprep.subr.bf16.mxu0 %v7313_v48 }
0x21fd   :  { %3983 = vmatpush2.bf16.msra.mxu0 %v7314_v45 }
0x21fe   :  { %3984 = vmatprep.subr.bf16.mxu0 %v7315_v51 }
0x2201   :  { %3985 = vmatpush2.bf16.msra.mxu0 %v7316_v52 }
0x2202   :  { %3986 = vmatprep.subr.bf16.mxu0 %v7317_v36 }
0x2205   :  { %3987 = vmatpush2.bf16.msra.mxu0 %v7318_v56 }
0x2206   :  { %6459 = vmatprep.subr.bf16.mxu0 %v7578_v43 }
0x2288   :  { %v3775_v59 = vpop.f32.mrf.mxu0 }
0x2289   :  { %v3783_v12 = vadd.f32 %v7320_v18, %v3775_v59  ;;  %v7321_v18 = vld [vmem:[#allocation5 + $0x4] ss:$0 sm:$0xff] }
0x228a   :  { %v3777_v17 = vpop.f32.mrf.mxu0 }
0x228b   :  { %v8329_v13 = vadd.f32 %v7319_v0, %v3777_v17  ;;  %v3839_v19 = vmul.f32 %v3783_v12, %v3783_v12 }
0x228c   :  { %v3779_v39 = vpop.f32.mrf.mxu0 }
0x228d   :  { %v3786_v57 = vmul.f32 %v8329_v13, %v8329_v13  ;;  %v3840_v10 = vpack.c.bf16 %v3839_v19, %v3783_v12 }
0x228e   :  { %v3780_v6 = vpop.f32.mrf.mxu0 }
0x228f   :  { %v8331_v55 = vadd.f32 %v7319_v0, %v3780_v6 }
0x2291   :  { %v3787_v25 = vmul.f32 %v8331_v55, %v8331_v55  ;;  %v3788_v32 = vpack.c.bf16 %v8331_v55, %v8329_v13 }
0x2293   :  { %v3789_v4 = vpack.c.bf16 %v3787_v25, %v3786_v57 }
0x2295   :  { %6387 = vmatprep.subr.bf16.mxu1 %v3789_v4 }
0x2296   :  { %6388 = vmatpush3.bf16.msra.mxu1 %v3789_v4 }
0x2297   :  { %6389 = vmatprep.subr.bf16.mxu1 %v3788_v32 }
0x229a   :  { %6390 = vmatpush3.bf16.msra.mxu1 %v3788_v32 }
0x229b   :  { %6395 = vmatprep.subr.bf16.mxu1 %v7578_v43 }
0x229d   :  { %6392 = vmatmul.mubr.msk.bf16.vlgmr.msra.gmra.mxu1 %vm98_vm0, %v7661_v14 }
0x229e   :  { %6396 = vmatpush3.bf16.msra.mxu1 %v8269_v21  ;;  %6411 = vmatprep.mubr.msk.bf16.mxu1 %vm7580_vm5, %v7578_v43 }
0x229f   :  { %6397 = vmatprep.subr.bf16.mxu1 %v7578_v43 }
0x22a2   :  { %6398 = vmatpush3.bf16.msra.mxu1 %v8275_v26 }
0x22a3   :  { %6399 = vmatprep.subr.bf16.mxu1 %v7578_v43 }
0x22a6   :  { %6400 = vmatpush3.bf16.msra.mxu1 %v8279_v60 }
0x22a7   :  { %6401 = vmatprep.subr.bf16.mxu1 %v7578_v43 }
0x22aa   :  { %6402 = vmatpush3.bf16.msra.mxu1 %v8283_v5 }
0x22ab   :  { %6403 = vmatprep.subr.bf16.mxu1 %v7578_v43 }
0x22ae   :  { %6404 = vmatpush3.bf16.msra.mxu1 %v8287_v63 }
0x22af   :  { %6405 = vmatprep.subr.bf16.mxu1 %v7578_v43 }
0x22b2   :  { %6406 = vmatpush3.bf16.msra.mxu1 %v8291_v2 }
0x22b3   :  { %6407 = vmatprep.subr.bf16.mxu1 %v7578_v43 }
0x22b6   :  { %6408 = vmatpush3.bf16.msra.mxu1 %v8295_v47 }
0x22b7   :  { %6409 = vmatprep.subr.bf16.mxu1 %v7578_v43 }
0x22ba   :  { %6410 = vmatpush3.bf16.msra.mxu1 %v8299_v53 }
0x22bd   :  { %6412 = vmatmul.mubr.bf16.vlgmr.msra.gmra.mxu1 %v3840_v10  ;;  %v7322_v10 = vld [vmem:[#allocation5 + $0x5] ss:$0 sm:$0xff] }
0x22be   :  { %6415 = vmatprep.mubr.msk.bf16.mxu1 %vm7580_vm5, %v7578_v43 }
0x235d   :  { %v6393_v30 = vpop.f32.mrf.mxu1 }
0x235f   :  { %v3824_v3 = vpop.f32.mrf.mxu1 }
0x2361   :  { %v6394_v31 = vpop.f32.mrf.mxu1 }
0x2362   :  { %v3842_v34 = vpack.c.bf16 %v6394_v31, %v6393_v30 }
0x2363   :  { %v3827_v29 = vpop.f32.mrf.mxu1 }
0x2364   :  { %v3841_v44 = vpack.c.bf16 %v3827_v29, %v3824_v3 }
0x2366   :  { %6416 = vmatmul.mubr.bf16.gmra.mxu1 %v3841_v44 }
0x2367   :  { %6419 = vmatprep.mubr.msk.bf16.mxu1 %vm7580_vm5, %v7578_v43 }
0x236e   :  { %6420 = vmatmul.mubr.bf16.gmra.mxu1 %v3842_v34 }
0x236f   :  { %6427 = vmatprep.mubr.msk.bf16.mxu1 %vm98_vm0, %v7655_v11 }
0x237d   :  { %v3877_v23 = vpop.f32.mrf.mxu1 }
0x237e   :  { %v3900_v46 = vmul.f32 %v3877_v23, %v3877_v23  ;;  %v3909_v62 = vsub.f32 %v3783_v12, %v3877_v23 }
0x237f   :  { %v6413_v37 = vpop.f32.mrf.mxu1 }
0x2380   :  { %v7323_v37 = vld [vmem:[#allocation5 + $0xf] ss:$0 sm:$0xff] }
0x2381   :  { %v3880_v58 = vpop.f32.mrf.mxu1 }
0x2382   :  { %v3901_v33 = vsub.f32 %v3880_v58, %v3900_v46 }
0x2383   :  { %v6414_v49 = vpop.f32.mrf.mxu1 }
0x2384   :  { %v3902_v20 = vmax.f32 %v3901_v33, 0.0  ;;  %v7324_v49 = vld [vmem:[#allocation5 + $0x10] ss:$0 sm:$0xff] }
0x2386   :  { %v3910_v40 = vadd.f32 1e-05, %v3902_v20 }
0x2388   :  { %7018 = vrsqrt.f32 %v3910_v40 }
0x2395   :  { %v7019_v9 = vpop.eup %7018 }
0x2396   :  { %v3912_v42 = vmul.f32 %v7019_v9, %v3909_v62 }
0x2398   :  { %v3913_v12 = vmul.f32 %v7321_v18, %v3912_v42 }
0x239a   :  { %v3914_v30 = vadd.f32 %v7322_v10, %v3913_v12 }
0x239c   :  { %v3916_v3 = vmul.f32 0.044715, %v3914_v30 }
0x239e   :  { %v3917_v44 = vmul.f32 %v3916_v3, %v3914_v30 }
0x23a0   :  { %v3918_v33 = vmul.f32 %v3917_v44, %v3914_v30 }
0x23a2   :  { %v3919_v42 = vadd.f32 %v3918_v33, %v3914_v30 }
0x2426   :  { %v3885_v48 = vpop.f32.mrf.mxu1 }
0x2427   :  { %v3903_v36 = vmul.f32 %v3885_v48, %v3885_v48  ;;  %v3924_v31 = vsub.f32 %v8329_v13, %v3885_v48  ;;  %v3920_v13 = vmul.f32 0.7978846, %v3919_v42  ;;  %v7332_v42 = vld [vmem:[#allocation7 + $0x68] sm:$0xff]  }
0x2428   :  { %v6417_v45 = vpop.f32.mrf.mxu1 }
0x242a   :  { %v3888_v51 = vpop.f32.mrf.mxu1 }
0x242b   :  { %v3904_v39 = vmul.f32 %v3888_v51, %v3888_v51  ;;  %v3925_v23 = vsub.f32 %v8331_v55, %v3888_v51 }
0x242c   :  { %v6418_v52 = vpop.f32.mrf.mxu1 }
0x242e   :  { %v3893_v56 = vpop.f32.mrf.mxu1 }
0x242f   :  { %v3905_v59 = vsub.f32 %v3893_v56, %v3903_v36 }
0x2430   :  { %v6421_v17 = vpop.f32.mrf.mxu1 }
0x2431   :  { %v3907_v0 = vmax.f32 %v3905_v59, 0.0 }
0x2432   :  { %v3896_v6 = vpop.f32.mrf.mxu1 }
0x2433   :  { %v3926_v57 = vadd.f32 1e-05, %v3907_v0  ;;  %v3906_v25 = vsub.f32 %v3896_v6, %v3904_v39 }
0x2434   :  { %v6422_v4 = vpop.f32.mrf.mxu1 }
0x2435   :  { %7020 = vrsqrt.f32 %v3926_v57  ;;  %v3908_v32 = vmax.f32 %v3906_v25, 0.0 }
0x2437   :  { %v3927_v19 = vadd.f32 1e-05, %v3908_v32  ;;  %v3915_v32 = vmul.f32 0.5, %v3914_v30 }
0x2439   :  { %7022 = vrsqrt.f32 %v3927_v19 }
0x243a   :  { %7024 = vtanh.f32 %v3920_v13 }
0x2442   :  { %v7021_v29 = vpop.eup %7020 }
0x2443   :  { %v3930_v34 = vmul.f32 %v7021_v29, %v3924_v31 }
0x2445   :  { %v3932_v46 = vmul.f32 %v7323_v37, %v3930_v34 }
0x2446   :  { %v7023_v58 = vpop.eup %7022 }
0x2447   :  { %v3934_v20 = vadd.f32 %v7324_v49, %v3932_v46  ;;  %v3931_v40 = vmul.f32 %v7023_v58, %v3925_v23  ;;  %v7025_v0 = vpop.eup %7024  ;;  %v7325_v46 = vld [vmem:[#allocation5 + $0x11] ss:$0 sm:$0xff] }
0x2448   :  { %v3922_v57 = vadd.f32 1.0, %v7025_v0 }
0x2449   :  { %v3933_v62 = vmul.f32 %v7323_v37, %v3931_v40  ;;  %v3938_v9 = vmul.f32 0.044715, %v3934_v20  ;;  %v3936_v18 = vmul.f32 0.5, %v3934_v20 }
0x244a   :  { %v3923_v10 = vmul.f32 %v3922_v57, %v3915_v32 }
0x244b   :  { %v3935_v45 = vadd.f32 %v7324_v49, %v3933_v62  ;;  %v3940_v52 = vmul.f32 %v3938_v9, %v3934_v20 }
0x244c   :  { %v3954_v44 = vpack.c.bf16 %v3923_v10, %v3923_v10 }
0x244d   :  { %v3939_v36 = vmul.f32 0.044715, %v3935_v45  ;;  %v3942_v56 = vmul.f32 %v3940_v52, %v3934_v20  ;;  %v3937_v12 = vmul.f32 0.5, %v3935_v45  ;;  %v7334_v52 = vld [vmem:[#allocation7 + $0x58] sm:$0xff]  }
0x244f   :  { %v3941_v48 = vmul.f32 %v3939_v36, %v3935_v45  ;;  %v3944_v59 = vadd.f32 %v3942_v56, %v3934_v20 }
0x2451   :  { %v3943_v17 = vmul.f32 %v3941_v48, %v3935_v45  ;;  %v3946_v39 = vmul.f32 0.7978846, %v3944_v59 }
0x2453   :  { %v3945_v55 = vadd.f32 %v3943_v17, %v3935_v45  ;;  %7026 = vtanh.f32 %v3946_v39  ;;  %v7333_v45 = vld [vmem:[#allocation7 + $0x60] sm:$0xff]  }
0x2455   :  { %v3947_v51 = vmul.f32 0.7978846, %v3945_v55 }
0x2457   :  { %7028 = vtanh.f32 %v3947_v51 }
0x2460   :  { %v7027_v6 = vpop.eup %7026 }
0x2461   :  { %v3950_v25 = vadd.f32 1.0, %v7027_v6 }
0x2463   :  { %v3952_v3 = vmul.f32 %v3950_v25, %v3936_v18 }
0x2464   :  { %v7029_v4 = vpop.eup %7028 }
0x2465   :  { %v3951_v19 = vadd.f32 1.0, %v7029_v4 }
0x2467   :  { %v3953_v31 = vmul.f32 %v3951_v19, %v3937_v12  ;;  %v7335_v19 = vld [vmem:[#allocation5 + $0x7] ss:$0 sm:$0xff] }
0x2469   :  { %v3955_v29 = vpack.c.bf16 %v3953_v31, %v3952_v3  ;;  %v7336_v3 = vld [vmem:[#allocation5 + $0x8] ss:$0 sm:$0xff] }
0x246b   :  { %3988 = vmatprep.mubr.bf16.mxu0 %v3955_v29 }
0x246c   :  { %3989 = vmatmul.mubr.bf16.vlgmr.msra.gmra.mxu0 %v3954_v44 }
0x246d   :  { %6461 = vmatprep.mubr.msk.bf16.mxu0 %vm7580_vm5, %v7578_v43 }
0x252c   :  { %v3990_v34 = vpop.f32.mrf.mxu0 }
0x252e   :  { %v3992_v23 = vpop.f32.mrf.mxu0 }
0x252f   :  { %v8369_v58 = vadd.f32 %v7325_v46, %v3992_v23 }
0x2530   :  { %v3994_v37 = vpop.f32.mrf.mxu0 }
0x2531   :  { %v4001_v49 = vmul.f32 %v8369_v58, %v8369_v58 }
0x2532   :  { %v3995_v30 = vpop.f32.mrf.mxu0 }
0x2533   :  { %v8371_v33 = vadd.f32 %v7325_v46, %v3995_v30 }
0x2535   :  { %v4002_v20 = vmul.f32 %v8371_v33, %v8371_v33  ;;  %v4003_v62 = vpack.c.bf16 %v8371_v33, %v8369_v58 }
0x2537   :  { %v4004_v40 = vpack.c.bf16 %v4002_v20, %v4001_v49 }
0x2539   :  { %6423 = vmatprep.subr.bf16.mxu1 %v4004_v40 }
0x253a   :  { %6424 = vmatpush3.bf16.msra.mxu1 %v4004_v40 }
0x253b   :  { %6425 = vmatprep.subr.bf16.mxu1 %v4003_v62 }
0x253e   :  { %6426 = vmatpush3.bf16.msra.mxu1 %v4003_v62  ;;  %v7337_v62 = vld [vmem:[#allocation7 + $0x40] sm:$0xf] }
0x253f   :  { %6431 = vmatprep.subr.bf16.mxu1 %v7578_v43 }
0x2541   :  { %6428 = vmatmul.mubr.msk.bf16.vlgmr.msra.gmra.mxu1 %vm98_vm0, %v7661_v14 }
0x2542   :  { %6432 = vmatpush3.bf16.msra.mxu1 %v8269_v21  ;;  %6447 = vmatprep.mubr.msk.bf16.mxu1 %vm7580_vm5, %v7578_v43  ;;  %v7326_v21 = vld [vmem:[#allocation5 + $0x6] ss:$0 sm:$0xff] }
0x2543   :  { %6433 = vmatprep.subr.bf16.mxu1 %v7578_v43  ;;  %v3998_v9 = vadd.f32 %v7326_v21, %v3990_v34 }
0x2546   :  { %6434 = vmatpush3.bf16.msra.mxu1 %v8275_v26  ;;  %v4054_v26 = vmul.f32 %v3998_v9, %v3998_v9 }
0x2547   :  { %6435 = vmatprep.subr.bf16.mxu1 %v7578_v43 }
0x254a   :  { %6436 = vmatpush3.bf16.msra.mxu1 %v8279_v60  ;;  %v4055_v60 = vpack.c.bf16 %v4054_v26, %v3998_v9 }
0x254b   :  { %6437 = vmatprep.subr.bf16.mxu1 %v7578_v43 }
0x254e   :  { %6438 = vmatpush3.bf16.msra.mxu1 %v8283_v5  ;;  %v7327_v5 = vld [vmem:[#allocation7 + $0x90] sm:$0xff]  }
0x254f   :  { %6439 = vmatprep.subr.bf16.mxu1 %v7578_v43 }
0x2552   :  { %6440 = vmatpush3.bf16.msra.mxu1 %v8287_v63  ;;  %v7328_v63 = vld [vmem:[#allocation7 + $0x88] sm:$0xff]  }
0x2553   :  { %6441 = vmatprep.subr.bf16.mxu1 %v7578_v43 }
0x2556   :  { %6442 = vmatpush3.bf16.msra.mxu1 %v8291_v2  ;;  %v7329_v2 = vld [vmem:[#allocation7 + $0x80] sm:$0xff]  }
0x2557   :  { %6443 = vmatprep.subr.bf16.mxu1 %v7578_v43 }
0x255a   :  { %6444 = vmatpush3.bf16.msra.mxu1 %v8295_v47  ;;  %v7330_v47 = vld [vmem:[#allocation7 + $0x78] sm:$0xff]  }
0x255b   :  { %6445 = vmatprep.subr.bf16.mxu1 %v7578_v43 }
0x255e   :  { %6446 = vmatpush3.bf16.msra.mxu1 %v8299_v53  ;;  %v7331_v53 = vld [vmem:[#allocation7 + $0x70] sm:$0xff]  }
0x255f   :  { %6471 = vmatprep.subr.bf16.mxu1 %v7578_v43 }
0x2561   :  { %6448 = vmatmul.mubr.bf16.vlgmr.msra.gmra.mxu1 %v4055_v60 }
0x2562   :  { %6451 = vmatprep.mubr.msk.bf16.mxu1 %vm7580_vm5, %v7578_v43  ;;  %6472 = vmatpush3.bf16.msra.mxu1 %v7327_v5 }
0x2563   :  { %6473 = vmatprep.subr.bf16.mxu1 %v7578_v43 }
0x2566   :  { %6474 = vmatpush3.bf16.msra.mxu1 %v7328_v63 }
0x2567   :  { %6475 = vmatprep.subr.bf16.mxu1 %v7578_v43 }
0x256a   :  { %6476 = vmatpush3.bf16.msra.mxu1 %v7329_v2 }
0x256b   :  { %6477 = vmatprep.subr.bf16.mxu1 %v7578_v43 }
0x256e   :  { %6478 = vmatpush3.bf16.msra.mxu1 %v7330_v47 }
0x256f   :  { %6479 = vmatprep.subr.bf16.mxu1 %v7578_v43 }
0x2572   :  { %6480 = vmatpush3.bf16.msra.mxu1 %v7331_v53 }
0x2573   :  { %6481 = vmatprep.subr.bf16.mxu1 %v7578_v43 }
0x2576   :  { %6482 = vmatpush3.bf16.msra.mxu1 %v7332_v42 }
0x2577   :  { %6483 = vmatprep.subr.bf16.mxu1 %v7578_v43 }
0x257a   :  { %6484 = vmatpush3.bf16.msra.mxu1 %v7333_v45 }
0x257b   :  { %6485 = vmatprep.subr.bf16.mxu1 %v7578_v43 }
0x257e   :  { %6486 = vmatpush3.bf16.msra.mxu1 %v7334_v52 }
0x2601   :  { %v6429_v36 = vpop.f32.mrf.mxu1 }
0x2603   :  { %v4039_v56 = vpop.f32.mrf.mxu1 }
0x2605   :  { %v6430_v13 = vpop.f32.mrf.mxu1 }
0x2606   :  { %v4057_v17 = vpack.c.bf16 %v6430_v13, %v6429_v36 }
0x2607   :  { %v4042_v48 = vpop.f32.mrf.mxu1 }
0x2608   :  { %v4056_v59 = vpack.c.bf16 %v4042_v48, %v4039_v56 }
0x260a   :  { %6452 = vmatmul.mubr.bf16.gmra.mxu1 %v4056_v59 }
0x260b   :  { %6455 = vmatprep.mubr.msk.bf16.mxu1 %vm7580_vm5, %v7578_v43 }
0x2612   :  { %6456 = vmatmul.mubr.bf16.gmra.mxu1 %v4057_v17 }
0x2613   :  { %6487 = vmatprep.mubr.msk.bf16.mxu1 %vm7580_vm5, %v7578_v43 }
0x2621   :  { %v4092_v39 = vpop.f32.mrf.mxu1 }
0x2622   :  { %v4115_v51 = vmul.f32 %v4092_v39, %v4092_v39  ;;  %v4124_v32 = vsub.f32 %v3998_v9, %v4092_v39 }
0x2623   :  { %v6449_v55 = vpop.f32.mrf.mxu1 }
0x2625   :  { %v4095_v0 = vpop.f32.mrf.mxu1 }
0x2626   :  { %v4116_v6 = vsub.f32 %v4095_v0, %v4115_v51  ;;  %v7338_v51 = vld [vmem:[#allocation5 + $0x12] ss:$0 sm:$0xff] }
0x2627   :  { %v6450_v57 = vpop.f32.mrf.mxu1 }
0x2628   :  { %v4117_v25 = vmax.f32 %v4116_v6, 0.0  ;;  %v7339_v57 = vld [vmem:[#allocation5 + $0x13] ss:$0 sm:$0xff] }
0x262a   :  { %v4125_v4 = vadd.f32 1e-05, %v4117_v25 }
0x262c   :  { %7030 = vrsqrt.f32 %v4125_v4 }
0x2639   :  { %v7031_v18 = vpop.eup %7030 }
0x263a   :  { %v4127_v12 = vmul.f32 %v7031_v18, %v4124_v32 }
0x263c   :  { %v4128_v10 = vmul.f32 %v7335_v19, %v4127_v12 }
0x263e   :  { %v4129_v31 = vadd.f32 %v7336_v3, %v4128_v10 }
0x2640   :  { %v4131_v29 = vmul.f32 0.044715, %v4129_v31  ;;  %v4130_v30 = vmul.f32 0.5, %v4129_v31 }
0x2642   :  { %v4132_v44 = vmul.f32 %v4131_v29, %v4129_v31 }
0x2644   :  { %v4133_v34 = vmul.f32 %v4132_v44, %v4129_v31 }
0x2646   :  { %v4134_v23 = vadd.f32 %v4133_v34, %v4129_v31 }
0x2648   :  { %v4135_v37 = vmul.f32 0.7978846, %v4134_v23 }
0x264a   :  { %7032 = vtanh.f32 %v4135_v37 }
0x2657   :  { %v7033_v46 = vpop.eup %7032 }
0x2658   :  { %v4137_v49 = vadd.f32 1.0, %v7033_v46 }
0x265a   :  { %v4138_v20 = vmul.f32 %v4137_v49, %v4130_v30 }
0x265c   :  { %v4169_v40 = vpack.c.bf16 %v4138_v20, %v4138_v20 }
0x265e   :  { %6460 = vmatpush3.bf16.xpose.msra.mxu0 %v4169_v40 }
0x265f   :  { %6465 = vmatprep.subr.bf16.mxu0 %v7578_v43 }
0x2665   :  { %6462 = vmatmul.mubr.bf16.vlgmr.msra.gmra.mxu0 %v7337_v62 }
0x2666   :  { %6467 = vmatprep.mubr.msk.bf16.mxu0 %vm7580_vm5, %v7578_v43 }
0x26ca   :  { %v4100_v21 = vpop.f32.mrf.mxu1 }
0x26cb   :  { %v4118_v5 = vmul.f32 %v4100_v21, %v4100_v21  ;;  %v4139_v59 = vsub.f32 %v8369_v58, %v4100_v21 }
0x26cc   :  { %v6453_v9 = vpop.f32.mrf.mxu1 }
0x26ce   :  { %v4103_v26 = vpop.f32.mrf.mxu1 }
0x26cf   :  { %v4119_v53 = vmul.f32 %v4103_v26, %v4103_v26  ;;  %v4140_v55 = vsub.f32 %v8371_v33, %v4103_v26 }
0x26d0   :  { %v6454_v60 = vpop.f32.mrf.mxu1 }
0x26d2   :  { %v4108_v63 = vpop.f32.mrf.mxu1 }
0x26d3   :  { %v4120_v2 = vsub.f32 %v4108_v63, %v4118_v5 }
0x26d4   :  { %v6457_v47 = vpop.f32.mrf.mxu1 }
0x26d5   :  { %v4122_v42 = vmax.f32 %v4120_v2, 0.0 }
0x26d6   :  { %v4111_v45 = vpop.f32.mrf.mxu1 }
0x26d7   :  { %v4141_v52 = vadd.f32 1e-05, %v4122_v42  ;;  %v4121_v36 = vsub.f32 %v4111_v45, %v4119_v53 }
0x26d8   :  { %v6458_v56 = vpop.f32.mrf.mxu1 }
0x26d9   :  { %7034 = vrsqrt.f32 %v4141_v52  ;;  %v4123_v13 = vmax.f32 %v4121_v36, 0.0  ;;  %v7340_v52 = vld [vmem:[#allocation7 + $0x48] sm:$0xff]  }
0x26db   :  { %v4142_v48 = vadd.f32 1e-05, %v4123_v13 }
0x26dd   :  { %7036 = vrsqrt.f32 %v4142_v48 }
0x26e6   :  { %v7035_v17 = vpop.eup %7034 }
0x26e7   :  { %v4145_v39 = vmul.f32 %v7035_v17, %v4139_v59 }
0x26e9   :  { %v4147_v0 = vmul.f32 %v7338_v51, %v4145_v39 }
0x26ea   :  { %v7037_v6 = vpop.eup %7036 }
0x26eb   :  { %v4149_v25 = vadd.f32 %v7339_v57, %v4147_v0  ;;  %v4146_v4 = vmul.f32 %v7037_v6, %v4140_v55 }
0x26ed   :  { %v4148_v32 = vmul.f32 %v7338_v51, %v4146_v4  ;;  %v4153_v18 = vmul.f32 0.044715, %v4149_v25  ;;  %v4151_v30 = vmul.f32 0.5, %v4149_v25 }
0x26ef   :  { %v4150_v12 = vadd.f32 %v7339_v57, %v4148_v32  ;;  %v4155_v19 = vmul.f32 %v4153_v18, %v4149_v25 }
0x26f1   :  { %v4154_v10 = vmul.f32 0.044715, %v4150_v12  ;;  %v4157_v3 = vmul.f32 %v4155_v19, %v4149_v25  ;;  %v4152_v49 = vmul.f32 0.5, %v4150_v12 }
0x26f3   :  { %v4156_v31 = vmul.f32 %v4154_v10, %v4150_v12  ;;  %v4159_v29 = vadd.f32 %v4157_v3, %v4149_v25 }
0x26f5   :  { %v4158_v44 = vmul.f32 %v4156_v31, %v4150_v12  ;;  %v4161_v58 = vmul.f32 0.7978846, %v4159_v29 }
0x26f7   :  { %v4160_v34 = vadd.f32 %v4158_v44, %v4150_v12  ;;  %7038 = vtanh.f32 %v4161_v58 }
0x26f9   :  { %v4162_v23 = vmul.f32 0.7978846, %v4160_v34  ;;  %v7341_v34 = vld [vmem:[#allocation5 + $0x14] ss:$0 sm:$0xff] }
0x26fb   :  { %7040 = vtanh.f32 %v4162_v23 }
0x2704   :  { %v7039_v33 = vpop.eup %7038 }
0x2705   :  { %v4165_v37 = vadd.f32 1.0, %v7039_v33 }
0x2707   :  { %v4167_v40 = vmul.f32 %v4165_v37, %v4151_v30 }
0x2708   :  { %v7041_v46 = vpop.eup %7040 }
0x2709   :  { %v4166_v20 = vadd.f32 1.0, %v7041_v46  ;;  %v7342_v46 = vld [vmem:[#allocation5 + $0x15] ss:$0 sm:$0xff] }
0x270b   :  { %v4168_v62 = vmul.f32 %v4166_v20, %v4152_v49 }
0x270d   :  { %v4279_v21 = vpack.c.bf16 %v4168_v62, %v4167_v40 }
0x270f   :  { %6488 = vmatmul.mubr.bf16.vlgmr.msra.gmra.mxu1 %v4279_v21 }
0x2710   :  { %6515 = vmatprep.mubr.msk.bf16.mxu1 %vm98_vm0, %v7655_v11 }
0x2725   :  { %v4204_v9 = vpop.f32.mrf.mxu0 }
0x2726   :  { %v4205_v26 = vadd.f32 %v4204_v9, %v7895_v50 }
0x2727   :  { %v6463_v60 = vpop.f32.mrf.mxu0 }
0x2728   :  { %v4210_v5 = vmul.f32 %v4205_v26, %v4205_v26 }
0x2729   :  { %v4207_v63 = vpop.f32.mrf.mxu0 }
0x272a   :  { %4212 = vrot.lane.b32.xlu1 %v4210_v5, %s7568_s21 }
0x272b   :  { %v6464_v2 = vpop.f32.mrf.mxu0 }
0x279c   :  { %v4213_v47 = vpop.permute.xlu1 %4212 }
0x279d   :  { %v4215_v53 = vsel %vm157_vm2, %v4205_v26, %v4213_v47 }
0x279e   :  { %v4216_v42 = vpack.c.bf16 %v4215_v53, %v4215_v53 }
0x27a0   :  { %v4218_v45 = vsel %vm1768_vm6, %v4216_v42, 0 }
0x27a1   :  { %6466 = vmatpush3.bf16.msra.mxu0 %v4218_v45 }
0x27a4   :  { %6468 = vmatmul.mubr.msk.bf16.vlgmr.msra.gmra.mxu0 %vm157_vm2, %v7582_v1 }
0x27a5   :  { %6493 = vmatprep.mubr.msk.bf16.mxu0 %vm98_vm0, %v7340_v52 }
0x27cf   :  { %v4314_v36 = vpop.f32.mrf.mxu1 }
0x27d0   :  { %v4315_v63 = vadd.f32 %v7341_v34, %v4314_v36 }
0x27d1   :  { %v6489_v56 = vpop.f32.mrf.mxu1 }
0x27d2   :  { %v4321_v42 = vmul.f32 %v7342_v46, %v4315_v63 }
0x27d3   :  { %v4317_v13 = vpop.f32.mrf.mxu1 }
0x27d4   :  { %v4318_v23 = vadd.f32 %v7341_v34, %v4317_v13 }
0x27d5   :  { %v6490_v48 = vpop.f32.mrf.mxu1 }
0x27d6   :  { %v4322_v30 = vmul.f32 %v7342_v46, %v4318_v23 }
0x2864   :  { %v4254_v59 = vpop.f32.mrf.mxu0 }
0x2865   :  { %v4260_v17 = vmul.f32 %v4254_v59, %v4254_v59  ;;  %v4267_v32 = vsub.f32 %v4205_v26, %v4254_v59 }
0x2866   :  { %v6469_v39 = vpop.f32.mrf.mxu0 }
0x2867   :  { %4262 = vrot.lane.b32.xlu0 %v4260_v17, %s7568_s21 }
0x2868   :  { %v4257_v55 = vpop.f32.mrf.mxu0 }
0x2869   :  { %v7344_v55 = vld [vmem:[#allocation8 + $0x24] ss:$8 sps:$4 sm:$0xff]  }
0x286a   :  { %v6470_v51 = vpop.f32.mrf.mxu0 }
0x28d9   :  { %v4263_v0 = vpop.permute.xlu0 %4262 }
0x28da   :  { %v4265_v6 = vsub.f32 %v4254_v59, %v4263_v0 }
0x28dc   :  { %v4266_v57 = vmax.f32 %v4265_v6, 0.0 }
0x28de   :  { %v4268_v25 = vadd.f32 1e-05, %v4266_v57 }
0x28e0   :  { %7042 = vrsqrt.f32 %v4268_v25 }
0x28ed   :  { %v7043_v4 = vpop.eup %7042 }
0x28ee   :  { %4271 = vrot.lane.b32.xlu1 %v7043_v4, %s7575_s11 }
0x2960   :  { %v4272_v18 = vpop.permute.xlu1 %4271 }
0x2961   :  { %v4274_v12 = vmul.f32 %v4272_v18, %v4267_v32 }
0x2963   :  { %v4275_v19 = vmul.f32 %v4274_v12, %v7912_v54 }
0x2965   :  { %v4276_v10 = vadd.f32 %v4275_v19, %v7915_v22 }
0x2967   :  { %v4277_v3 = vmul.f32 1.442695, %v4276_v10 }
0x2969   :  { %7044 = vpow2.f32 %v4277_v3 }
0x2976   :  { %v7045_v31 = vpop.eup %7044 }
0x2977   :  { %4324 = vrot.lane.b32.xlu0 %v7045_v31, %s7585_s16 }
0x29e9   :  { %v4325_v29 = vpop.permute.xlu0 %4324 }
0x29ea   :  { %4339 = vperm.xlu0 %6711, %v4325_v29   ;;  %4331 = vperm.xlu1 %6710, %v4325_v29  }
0x29ee   :  { %6714 = vset.pattern.permute.xlu0 %v7577_v35  ;;  %6712 = vset.pattern.permute.xlu1 %v7586_v41 }
0x29ef   :  { %4327 = vperm.xlu0 %6714, %v7045_v31   ;;  %4347 = vperm.xlu1 %6712, %v4325_v29  }
0x29f3   :  { %6717 = vset.pattern.permute.xlu0 %v7587_v38  ;;  %6713 = vset.pattern.permute.xlu1 %v7587_v38 }
0x29f4   :  { %4351 = vperm.xlu0 %6717, %v7045_v31   ;;  %4355 = vperm.xlu1 %6713, %v4325_v29  }
0x29f8   :  { %6715 = vset.pattern.permute.xlu1 %v7584_v24  ;;  %6725 = vset.pattern.permute.xlu0 %v7586_v41 }
0x29f9   :  { %4335 = vperm.xlu1 %6715, %v7045_v31  }
0x29fd   :  { %6716 = vset.pattern.permute.xlu1 %v7586_v41 }
0x29fe   :  { %4343 = vperm.xlu1 %6716, %v7045_v31  }
0x2a02   :  { %6723 = vset.pattern.permute.xlu1 %v7577_v35 }
0x2a65   :  { %v4332_v44 = vpop.permute.xlu1 %4331  ;;  %v4340_v33 = vpop.permute.xlu0 %4339 }
0x2a66   :  { %v4359_v37 = vsel %vm1990_vm7, %v4332_v44, %v4340_v33 }
0x2a6a   :  { %v4348_v58 = vpop.permute.xlu1 %4347  ;;  %v4328_v26 = vpop.permute.xlu0 %4327 }
0x2a6b   :  { %v4361_v49 = vsel %vm157_vm2, %v4359_v37, %v4348_v58 }
0x2a6f   :  { %v4356_v20 = vpop.permute.xlu1 %4355  ;;  %v4352_v47 = vpop.permute.xlu0 %4351 }
0x2a70   :  { %v4363_v40 = vsel %vm1995_vm8, %v4361_v49, %v4356_v20  ;;  %v7346_v49 = vld [vmem:[#allocation8 + $0x14] ss:$8 sps:$4 sm:$0xff]   ;;  %v7347_v20 = vld [vmem:[#allocation8 + $0x10] ss:$8 sps:$4 sm:$0xff]  }
0x2a71   :  { %v4365_v62 = vmul.f32 %v4363_v40, %v4322_v30  ;;  %v7345_v30 = vld [vmem:[#allocation8 + $0x20] ss:$8 sps:$4 sm:$0xff]   ;;  %v7348_v40 = vld [vmem:[#allocation8 + $0x4] ss:$8 sps:$4 sm:$0xff]  }
0x2a73   :  { %v8444_v21 = vadd.f32 %v4365_v62, %v8190_v8  ;;  %v7349_v62 = vld [vmem:[#allocation8] ss:$8 sps:$4 sm:$0xff]  }
0x2a74   :  { %v4336_v9 = vpop.permute.xlu1 %4335 }
0x2a75   :  { %4369 = vrot.lane.b32.xlu1 %v8444_v21, %s7573_s2  ;;  %v4358_v5 = vsel %vm1990_vm7, %v4328_v26, %v4336_v9  ;;  %v4550_v36 = vmul.f32 %v8444_v21, %v8444_v21 }
0x2a79   :  { %v4344_v60 = vpop.permute.xlu1 %4343 }
0x2a7a   :  { %v4360_v2 = vsel %vm157_vm2, %v4358_v5, %v4344_v60 }
0x2a7b   :  { %v4362_v53 = vsel %vm1995_vm8, %v4360_v2, %v4352_v47 }
0x2a7c   :  { %v4364_v45 = vmul.f32 %v4362_v53, %v4321_v42 }
0x2a7e   :  { %v8452_v52 = vadd.f32 %v4364_v45, %v8198_v27  ;;  %v7343_v27 = vld [vmem:[#allocation7 + $0x50] sm:$0xff]  }
0x2a80   :  { %v4549_v56 = vmul.f32 %v8452_v52, %v8452_v52  ;;  %v4551_v39 = vpack.c.bf16 %v8444_v21, %v8452_v52 }
0x2a82   :  { %v4552_v17 = vpack.c.bf16 %v4550_v36, %v4549_v56 }
0x2ae7   :  { %v4370_v8 = vpop.permute.xlu1 %4369 }
0x2ae8   :  { %v4372_v13 = vsel %vm81_vm1, %v8452_v52, %v4370_v8 }
0x2ae9   :  { %v4373_v48 = vpack.c.bf16 %v4372_v13, %v4372_v13 }
0x2aeb   :  { %6654 = vmatprep.subr.msk.bf16.mxu0 %vm98_vm0, %v4373_v48  ;;  %v4375_v59 = vsel %vm98_vm0, %v4373_v48, 0 }
0x2aec   :  { %6492 = vmatpush3.bf16.xpose.msra.mxu0 %v4375_v59 }
0x2aed   :  { %6497 = vmatprep.subr.bf16.mxu0 %v4552_v17 }
0x2af3   :  { %6494 = vmatmul.mubr.msk.bf16.vlgmr.msra.gmra.mxu0 %vm98_vm0, %v7343_v27 }
0x2af4   :  { %6498 = vmatpush3.bf16.msra.mxu0 %v4552_v17  ;;  %6501 = vmatprep.mubr.msk.bf16.mxu0 %vm98_vm0, %v7655_v11 }
0x2af5   :  { %6499 = vmatprep.subr.bf16.mxu0 %v4551_v39 }
0x2af8   :  { %6500 = vmatpush3.bf16.msra.mxu0 %v4551_v39 }
0x2af9   :  { %6505 = vmatprep.subr.bf16.mxu0 %v7666_v15 }
0x2afb   :  { %6502 = vmatmul.mubr.msk.bf16.vlgmr.msra.gmra.mxu0 %vm98_vm0, %v7661_v14 }
0x2afc   :  { %6506 = vmatpush3.bf16.msra.mxu0 %v7666_v15 }
0x2afd   :  { %4719 = vmatprep.subr.bf16.mxu0 %v7344_v55 }
0x2bb3   :  { %v8471_v51 = vpop.f32.mrf.mxu0 }
0x2bb4   :  { %v4432_v0 = vsel %vm157_vm2, %v8471_v51, 0.0  ;;  %v4444_v4 = vmul.f32 %v8471_v51, %v8471_v51 }
0x2bb5   :  { %4433 = vadd.xlane.f32.xlu0 %v4432_v0  ;;  %v8475_v6 = vpop.f32.mrf.mxu0 }
0x2bb6   :  { %v4452_v19 = vsel %vm157_vm2, %v4444_v4, 0.0  ;;  %v4426_v44 = vsel %vm157_vm2, %v8475_v6, 0.0  ;;  %v4442_v34 = vmul.f32 %v8475_v6, %v8475_v6 }
0x2bb7   :  { %v8477_v57 = vpop.f32.mrf.mxu0 }
0x2bb8   :  { %v4435_v25 = vsel %vm157_vm2, %v8477_v57, 0.0  ;;  %v4445_v3 = vmul.f32 %v8477_v57, %v8477_v57  ;;  %v4446_v46 = vsel %vm157_vm2, %v4442_v34, 0.0  ;;  %v7351_v34 = vld [vmem:[#allocation5 + $0x28] sm:$0xff] }
0x2bb9   :  { %4436 = vadd.xlane.f32.xlu0 %v4435_v25  ;;  %v8483_v15 = vpop.f32.mrf.mxu0 }
0x2bba   :  { %v4429_v32 = vsel %vm157_vm2, %v8483_v15, 0.0  ;;  %v4443_v18 = vmul.f32 %v8483_v15, %v8483_v15  ;;  %v4455_v33 = vsel %vm157_vm2, %v4445_v3, 0.0 }
0x2bbb   :  { %4430 = vadd.xlane.f32.xlu1 %v4429_v32  ;;  %v6503_v12 = vpop.f32.mrf.mxu0 }
0x2bbc   :  { %v4449_v31 = vsel %vm157_vm2, %v4443_v18, 0.0 }
0x2bbd   :  { %4453 = vadd.xlane.f32.xlu0 %v4452_v19  ;;  %v4587_v10 = vpop.f32.mrf.mxu0 }
0x2bbf   :  { %4450 = vadd.xlane.f32.xlu1 %v4449_v31  ;;  %v6504_v29 = vpop.f32.mrf.mxu0  ;;  %v7350_v31 = vld [vmem:[#allocation5 + $0x30] sm:$0xff] }
0x2bc0   :  { %v4603_v37 = vpack.c.bf16 %v6504_v29, %v6503_v12 }
0x2bc1   :  { %4427 = vadd.xlane.f32.xlu0 %v4426_v44  ;;  %v4590_v58 = vpop.f32.mrf.mxu0 }
0x2bc2   :  { %v4602_v23 = vpack.c.bf16 %v4590_v58, %v4587_v10 }
0x2bc3   :  { %4456 = vadd.xlane.f32.xlu1 %v4455_v33 }
0x2bc4   :  { %6507 = vmatprep.mubr.msk.bf16.mxu0 %vm81_vm1, %v4602_v23 }
0x2bc5   :  { %6508 = vmatmul.mubr.msk.bf16.vlgmr.msra.gmra.mxu0 %vm81_vm1, %v4603_v37 }
0x2bc6   :  { %4720 = vmatpush1.bf16.msra.mxu0 %v7345_v30  ;;  %4741 = vmatprep.mubr.bf16.mxu0 %v7577_v35 }
0x2bc7   :  { %4447 = vadd.xlane.f32.xlu1 %v4446_v46  ;;  %4721 = vmatprep.subr.bf16.mxu0 %v7346_v49 }
0x2bca   :  { %4722 = vmatpush1.bf16.msra.mxu0 %v7347_v20 }
0x2bcb   :  { %4723 = vmatprep.subr.bf16.mxu0 %v7348_v40  ;;  %v7352_v40 = vld [vmem:[#allocation5 + $0x38] sm:$0xff] }
0x2bce   :  { %4724 = vmatpush1.bf16.msra.mxu0 %v7349_v62 }
0x2bcf   :  { %6519 = vmatprep.subr.bf16.mxu0 %v7578_v43 }
0x2c3e   :  { %v4434_v9 = vpop.xlane.xlu0 %4433 }
0x2c3f   :  { %v4440_v60 = vmul.f32 0.125, %v4434_v9 }
0x2c41   :  { %v4464_v47 = vmul.f32 %v4440_v60, %v4440_v60  ;;  %v4476_v18 = vsub.f32 %v8471_v51, %v4440_v60 }
0x2c42   :  { %v4437_v26 = vpop.xlane.xlu0 %4436 }
0x2c43   :  { %v4441_v13 = vmul.f32 0.125, %v4437_v26 }
0x2c44   :  { %v4431_v5 = vpop.xlane.xlu1 %4430 }
0x2c45   :  { %v4439_v63 = vmul.f32 0.125, %v4431_v5  ;;  %v4465_v39 = vmul.f32 %v4441_v13, %v4441_v13  ;;  %v4477_v33 = vsub.f32 %v8477_v57, %v4441_v13 }
0x2c46   :  { %v4454_v2 = vpop.xlane.xlu0 %4453 }
0x2c47   :  { %v4460_v53 = vmul.f32 0.125, %v4454_v2  ;;  %v4463_v45 = vmul.f32 %v4439_v63, %v4439_v63  ;;  %v4475_v19 = vsub.f32 %v8483_v15, %v4439_v63 }
0x2c48   :  { %v4451_v42 = vpop.xlane.xlu1 %4450 }
0x2c49   :  { %v4468_v8 = vsub.f32 %v4460_v53, %v4464_v47  ;;  %v4459_v56 = vmul.f32 0.125, %v4451_v42 }
0x2c4b   :  { %v4472_v48 = vmax.f32 %v4468_v8, 0.0  ;;  %v4467_v36 = vsub.f32 %v4459_v56, %v4463_v45 }
0x2c4c   :  { %v4457_v59 = vpop.xlane.xlu1 %4456 }
0x2c4d   :  { %v4480_v17 = vadd.f32 1e-05, %v4472_v48  ;;  %v4471_v27 = vmax.f32 %v4467_v36, 0.0  ;;  %v4461_v55 = vmul.f32 0.125, %v4457_v59 }
0x2c4f   :  { %7046 = vrsqrt.f32 %v4480_v17  ;;  %v4479_v0 = vadd.f32 1e-05, %v4471_v27  ;;  %v4469_v25 = vsub.f32 %v4461_v55, %v4465_v39 }
0x2c51   :  { %7048 = vrsqrt.f32 %v4479_v0  ;;  %v4473_v4 = vmax.f32 %v4469_v25, 0.0 }
0x2c53   :  { %v4481_v32 = vadd.f32 1e-05, %v4473_v4 }
0x2c55   :  { %7050 = vrsqrt.f32 %v4481_v32 }
0x2c5c   :  { %v7047_v12 = vpop.eup %7046 }
0x2c5d   :  { %v4488_v10 = vmul.f32 %v7047_v12, %v4476_v18 }
0x2c5e   :  { %v7049_v3 = vpop.eup %7048 }
0x2c5f   :  { %v4492_v29 = vmul.f32 %v7350_v31, %v4488_v10  ;;  %v4487_v44 = vmul.f32 %v7049_v3, %v4475_v19 }
0x2c61   :  { %v4496_v58 = vadd.f32 %v4492_v29, %v7710_v7  ;;  %v4491_v23 = vmul.f32 %v7351_v34, %v4487_v44 }
0x2c62   :  { %v7051_v37 = vpop.eup %7050 }
0x2c63   :  { %v4504_v46 = vmul.f32 0.044715, %v4496_v58  ;;  %v4495_v30 = vadd.f32 %v4491_v23, %v7714_v16  ;;  %v4489_v49 = vmul.f32 %v7051_v37, %v4477_v33  ;;  %v4500_v8 = vmul.f32 0.5, %v4496_v58  ;;  %v7353_v33 = vld [vmem:[#allocation5 + $0x9] ss:$0 sm:$0xff] }
0x2c65   :  { %v4508_v51 = vmul.f32 %v4504_v46, %v4496_v58  ;;  %v4503_v20 = vmul.f32 0.044715, %v4495_v30  ;;  %v4493_v15 = vmul.f32 %v7352_v40, %v4489_v49  ;;  %v4499_v36 = vmul.f32 0.5, %v4495_v30  ;;  %v7354_v49 = vld [vmem:[#allocation5 + $0xa] ss:$0 sm:$0xff] }
0x2c67   :  { %v4512_v62 = vmul.f32 %v4508_v51, %v4496_v58  ;;  %v4507_v9 = vmul.f32 %v4503_v20, %v4495_v30  ;;  %v4497_v26 = vadd.f32 %v4493_v15, %v7718_v28 }
0x2c69   :  { %v4516_v60 = vadd.f32 %v4512_v62, %v4496_v58  ;;  %v4511_v5 = vmul.f32 %v4507_v9, %v4495_v30  ;;  %v4505_v7 = vmul.f32 0.044715, %v4497_v26  ;;  %v4501_v27 = vmul.f32 0.5, %v4497_v26 }
0x2c6b   :  { %v4520_v63 = vmul.f32 0.7978846, %v4516_v60  ;;  %v4515_v2 = vadd.f32 %v4511_v5, %v4495_v30  ;;  %v4509_v47 = vmul.f32 %v4505_v7, %v4497_v26 }
0x2c6d   :  { %7052 = vtanh.f32 %v4520_v63  ;;  %v4519_v57 = vmul.f32 0.7978846, %v4515_v2  ;;  %v4513_v53 = vmul.f32 %v4509_v47, %v4497_v26 }
0x2c6f   :  { %7054 = vtanh.f32 %v4519_v57  ;;  %v4517_v16 = vadd.f32 %v4513_v53, %v4497_v26 }
0x2c71   :  { %v4521_v42 = vmul.f32 0.7978846, %v4517_v16 }
0x2c73   :  { %7056 = vtanh.f32 %v4521_v42 }
0x2c7a   :  { %v7053_v45 = vpop.eup %7052 }
0x2c7b   :  { %v4528_v56 = vadd.f32 1.0, %v7053_v45 }
0x2c7c   :  { %v7055_v13 = vpop.eup %7054 }
0x2c7d   :  { %v4532_v48 = vmul.f32 %v4528_v56, %v4500_v8  ;;  %v4527_v28 = vadd.f32 1.0, %v7055_v13 }
0x2c7f   :  { %4539 = vrot.lane.b32.xlu1 %v4532_v48, %s7573_s2  ;;  %v4531_v59 = vmul.f32 %v4527_v28, %v4499_v36  ;;  %v4428_v28 = vpop.xlane.xlu0 %4427 }
0x2c80   :  { %v7057_v17 = vpop.eup %7056 }
0x2c81   :  { %4535 = vrot.lane.b32.xlu0 %v4531_v59, %s7568_s21  ;;  %v4529_v39 = vadd.f32 1.0, %v7057_v17  ;;  %v4448_v59 = vpop.xlane.xlu1 %4447  ;;  %v4438_v17 = vmul.f32 0.125, %v4428_v28 }
0x2c83   :  { %v4533_v55 = vmul.f32 %v4529_v39, %v4501_v27  ;;  %v4458_v27 = vmul.f32 0.125, %v4448_v59  ;;  %v4462_v39 = vmul.f32 %v4438_v17, %v4438_v17 }
0x2c85   :  { %v6509_v0 = vpop.f32.mrf.mxu0  ;;  %4543 = vrot.lane.b32.xlu1 %v4533_v55, %s7576_s12  ;;  %v4466_v55 = vsub.f32 %v4458_v27, %v4462_v39 }
0x2c87   :  { %v4644_v25 = vpop.f32.mrf.mxu0 }
0x2c88   :  { %v4659_v4 = vmul.f32 %v4644_v25, %v4644_v25  ;;  %v4665_v58 = vsub.f32 %v8452_v52, %v4644_v25 }
0x2c89   :  { %v6510_v32 = vpop.f32.mrf.mxu0 }
0x2c8a   :  { %v4661_v18 = vsub.f32 %v6509_v0, %v4659_v4  ;;  %v4470_v0 = vmax.f32 %v4466_v55, 0.0 }
0x2c8b   :  { %v4647_v12 = vpop.f32.mrf.mxu0 }
0x2c8c   :  { %v4663_v19 = vmax.f32 %v4661_v18, 0.0  ;;  %v4660_v10 = vmul.f32 %v4647_v12, %v4647_v12  ;;  %v4666_v46 = vsub.f32 %v8444_v21, %v4647_v12  ;;  %v4478_v25 = vadd.f32 1e-05, %v4470_v0  ;;  %v7355_v12 = vld [vmem:[#allocation5 + $0x20] sm:$0xff] }
0x2c8e   :  { %v4667_v3 = vadd.f32 1e-05, %v4663_v19  ;;  %v4662_v31 = vsub.f32 %v6510_v32, %v4660_v10  ;;  %v4474_v32 = vsub.f32 %v8475_v6, %v4438_v17 }
0x2c90   :  { %7058 = vrsqrt.f32 %v4667_v3  ;;  %v4664_v29 = vmax.f32 %v4662_v31, 0.0 }
0x2c92   :  { %v4668_v44 = vadd.f32 1e-05, %v4664_v29 }
0x2c94   :  { %7060 = vrsqrt.f32 %v4668_v44 }
0x2c9d   :  { %v7059_v34 = vpop.eup %7058 }
0x2c9e   :  { %v4671_v23 = vmul.f32 %v7059_v34, %v4665_v58 }
0x2ca0   :  { %v4673_v37 = vmul.f32 %v7353_v33, %v4671_v23 }
0x2ca1   :  { %v7061_v30 = vpop.eup %7060 }
0x2ca2   :  { %v4675_v51 = vadd.f32 %v7354_v49, %v4673_v37  ;;  %v4672_v20 = vmul.f32 %v7061_v30, %v4666_v46 }
0x2ca4   :  { %v4674_v40 = vmul.f32 %v7353_v33, %v4672_v20  ;;  %v4679_v15 = vmul.f32 0.044715, %v4675_v51  ;;  %v4677_v45 = vmul.f32 0.5, %v4675_v51 }
0x2ca6   :  { %v4676_v62 = vadd.f32 %v7354_v49, %v4674_v40  ;;  %v4681_v9 = vmul.f32 %v4679_v15, %v4675_v51 }
0x2ca8   :  { %v4680_v26 = vmul.f32 0.044715, %v4676_v62  ;;  %v4683_v60 = vmul.f32 %v4681_v9, %v4675_v51  ;;  %v4678_v8 = vmul.f32 0.5, %v4676_v62 }
0x2caa   :  { %v4682_v5 = vmul.f32 %v4680_v26, %v4676_v62  ;;  %v4685_v7 = vadd.f32 %v4683_v60, %v4675_v51  ;;  %v8523_v60 = vld [vmem:[#allocation7 + $0x38] sm:$0xff]  }
0x2cac   :  { %v4684_v63 = vmul.f32 %v4682_v5, %v4676_v62  ;;  %v4687_v2 = vmul.f32 0.7978846, %v4685_v7  ;;  %v8529_v5 = vld [vmem:[#allocation7 + $0x30] sm:$0xff]   ;;  %v8533_v7 = vld [vmem:[#allocation7 + $0x28] sm:$0xff]  }
0x2cae   :  { %v4686_v47 = vadd.f32 %v4684_v63, %v4676_v62  ;;  %7062 = vtanh.f32 %v4687_v2  ;;  %v8537_v63 = vld [vmem:[#allocation7 + $0x20] sm:$0xff]   ;;  %v8541_v2 = vld [vmem:[#allocation7 + $0x18] sm:$0xff]  }
0x2cb0   :  { %v4688_v57 = vmul.f32 0.7978846, %v4686_v47  ;;  %v8545_v47 = vld [vmem:[#allocation7 + $0x10] sm:$0xff]  }
0x2cb2   :  { %7064 = vtanh.f32 %v4688_v57  ;;  %v8549_v57 = vld [vmem:[#allocation7 + $0x8] sm:$0xff]  }
0x2cb3   :  { %7066 = vrsqrt.f32 %v4478_v25  ;;  %v7366_v25 = vld [vmem:[#allocation8 + $0xa4] ss:$8 sps:$4 sm:$0xff]  }
0x2cbb   :  { %v7063_v53 = vpop.eup %7062 }
0x2cbc   :  { %v4691_v16 = vadd.f32 1.0, %v7063_v53  ;;  %v8553_v53 = vld [vmem:[#allocation7] sm:$0xff]  }
0x2cbe   :  { %v4693_v13 = vmul.f32 %v4691_v16, %v4677_v45 }
0x2cbf   :  { %v7065_v42 = vpop.eup %7064 }
0x2cc0   :  { %v4692_v56 = vadd.f32 1.0, %v7065_v42  ;;  %v7067_v4 = vpop.eup %7066  ;;  %v7364_v42 = vld [vmem:[#allocation5] ss:$0 sm:$0xff] }
0x2cc1   :  { %v4486_v18 = vmul.f32 %v7067_v4, %v4474_v32  ;;  %v7367_v4 = vld [vmem:[#allocation8 + $0xa0] ss:$8 sps:$4 sm:$0xff]   ;;  %v7368_v32 = vld [vmem:[#allocation8 + $0x94] ss:$8 sps:$4 sm:$0xff]  }
0x2cc2   :  { %v4694_v48 = vmul.f32 %v4692_v56, %v4678_v8 }
0x2cc3   :  { %v4490_v19 = vmul.f32 %v7355_v12, %v4486_v18  ;;  %v7369_v18 = vld [vmem:[#allocation8 + $0x90] ss:$8 sps:$4 sm:$0xff]   ;;  %v7370_v12 = vld [vmem:[#allocation8 + $0x84] ss:$8 sps:$4 sm:$0xff]  }
0x2cc4   :  { %v6718_v36 = vpack.i.bf16 %v4694_v48, %v4693_v13 }
0x2cc5   :  { %v4494_v10 = vadd.f32 %v4490_v19, %v7732_v61  ;;  %v7371_v19 = vld [vmem:[#allocation8 + $0x80] ss:$8 sps:$4 sm:$0xff]  }
0x2cc6   :  { %6719 = vrot.lane.b32.xlu0 %v6718_v36, %s7579_s13  ;;  %v7365_v36 = vld [vmem:[#allocation5 + $0xb] ss:$0 sm:$0xff] }
0x2cc7   :  { %v4502_v3 = vmul.f32 0.044715, %v4494_v10  ;;  %v4498_v33 = vmul.f32 0.5, %v4494_v10 }
0x2cc9   :  { %v4506_v31 = vmul.f32 %v4502_v3, %v4494_v10  ;;  %v7373_v3 = vld [vmem:[#allocation8 + $0x70] ss:$8 sps:$4 sm:$0xff]  }
0x2ccb   :  { %v4510_v29 = vmul.f32 %v4506_v31, %v4494_v10  ;;  %v7374_v31 = vld [vmem:[#allocation8 + $0x64] ss:$8 sps:$4 sm:$0xff]  }
0x2ccd   :  { %v4514_v44 = vadd.f32 %v4510_v29, %v4494_v10  ;;  %v7372_v10 = vld [vmem:[#allocation8 + $0x74] ss:$8 sps:$4 sm:$0xff]   ;;  %v7375_v29 = vld [vmem:[#allocation8 + $0x60] ss:$8 sps:$4 sm:$0xff]  }
0x2ccf   :  { %v4518_v58 = vmul.f32 0.7978846, %v4514_v44  ;;  %v7376_v44 = vld [vmem:[#allocation8 + $0x54] ss:$8 sps:$4 sm:$0xff]  }
0x2cd1   :  { %7068 = vtanh.f32 %v4518_v58  ;;  %v7377_v58 = vld [vmem:[#allocation8 + $0x50] ss:$8 sps:$4 sm:$0xff]  }
0x2cde   :  { %v7069_v34 = vpop.eup %7068 }
0x2cdf   :  { %v4526_v23 = vadd.f32 1.0, %v7069_v34  ;;  %v7378_v34 = vld [vmem:[#allocation8 + $0x44] ss:$8 sps:$4 sm:$0xff]  }
0x2ce1   :  { %v4530_v30 = vmul.f32 %v4526_v23, %v4498_v33  ;;  %v7379_v23 = vld [vmem:[#allocation8 + $0x40] ss:$8 sps:$4 sm:$0xff]   ;;  %v7380_v33 = vld [vmem:[#allocation8 + $0x34] ss:$8 sps:$4 sm:$0xff]  }
0x2cf1   :  { %v4540_v37 = vpop.permute.xlu1 %4539 }
0x2cf3   :  { %v4536_v46 = vpop.permute.xlu0 %4535 }
0x2cf4   :  { %v4546_v49 = vsel %vm157_vm2, %v4530_v30, %v4536_v46  ;;  %v7382_v46 = vld [vmem:[#allocation8 + $0x124] ss:$8 sps:$4 sm:$0xff]   ;;  %v7383_v30 = vld [vmem:[#allocation8 + $0x120] ss:$8 sps:$4 sm:$0xff]  }
0x2cf5   :  { %v4547_v20 = vsel %vm81_vm1, %v4546_v49, %v4540_v37  ;;  %v7381_v37 = vld [vmem:[#allocation8 + $0x30] ss:$8 sps:$4 sm:$0xff]   ;;  %v7384_v49 = vld [vmem:[#allocation8 + $0x114] ss:$8 sps:$4 sm:$0xff]  }
0x2cf7   :  { %v4544_v6 = vpop.permute.xlu1 %4543 }
0x2cf8   :  { %v4548_v15 = vsel %vm301_vm3, %v4547_v20, %v4544_v6  ;;  %v7385_v6 = vld [vmem:[#allocation8 + $0x110] ss:$8 sps:$4 sm:$0xff]   ;;  %v7387_v20 = vld [vmem:[#allocation8 + $0x100] ss:$8 sps:$4 sm:$0xff]  }
0x2d38   :  { %v6720_v51 = vpop.permute.xlu0 %6719 }
0x2d39   :  { %v6722_v40 = vunpack.i.h.bf16 %v6720_v51  ;;  %v6721_v61 = vunpack.i.l.bf16 %v6720_v51  ;;  %v7386_v51 = vld [vmem:[#allocation8 + $0x104] ss:$8 sps:$4 sm:$0xff]  }
0x2d3b   :  { %v4704_v62 = vsel %vm98_vm0, %v4548_v15, %v6722_v40  ;;  %v4703_v9 = vsel %vm98_vm0, %v4548_v15, %v6721_v61  ;;  %v7388_v40 = vld [vmem:[#allocation8 + $0xf4] ss:$8 sps:$4 sm:$0xff]   ;;  %v7389_v61 = vld [vmem:[#allocation8 + $0xf0] ss:$8 sps:$4 sm:$0xff]   ;;  %v7390_v15 = vld [vmem:[#allocation8 + $0xe4] ss:$8 sps:$4 sm:$0xff]  }
0x2d3c   :  { %v4705_v26 = vpack.c.bf16 %v4704_v62, %v4703_v9  ;;  %v7391_v62 = vld [vmem:[#allocation8 + $0xe0] ss:$8 sps:$4 sm:$0xff]   ;;  %v7392_v9 = vld [vmem:[#allocation8 + $0xd4] ss:$8 sps:$4 sm:$0xff]  }
0x2d3e   :  { %5731 = vmatmul.mubr.msk.bf16.vlgmr.msra.gmra.mxu0 %vm526_vm4, %v4705_v26  ;;  %v7393_v26 = vld [vmem:[#allocation8 + $0xd0] ss:$8 sps:$4 sm:$0xff]  }
0x2d3f   :  { %6520 = vmatpush3.bf16.msra.mxu0 %v8523_v60  ;;  %6535 = vmatprep.mubr.msk.bf16.mxu0 %vm7580_vm5, %v7578_v43 }
0x2d40   :  { %6521 = vmatprep.subr.bf16.mxu0 %v7578_v43 }
0x2d43   :  { %6522 = vmatpush3.bf16.msra.mxu0 %v8529_v5 }
0x2d44   :  { %6523 = vmatprep.subr.bf16.mxu0 %v7578_v43 }
0x2d47   :  { %6524 = vmatpush3.bf16.msra.mxu0 %v8533_v7 }
0x2d48   :  { %6525 = vmatprep.subr.bf16.mxu0 %v7578_v43 }
0x2d4b   :  { %6526 = vmatpush3.bf16.msra.mxu0 %v8537_v63 }
0x2d4c   :  { %6527 = vmatprep.subr.bf16.mxu0 %v7578_v43 }
0x2d4f   :  { %6528 = vmatpush3.bf16.msra.mxu0 %v8541_v2 }
0x2d50   :  { %6529 = vmatprep.subr.bf16.mxu0 %v7578_v43 }
0x2d53   :  { %6530 = vmatpush3.bf16.msra.mxu0 %v8545_v47 }
0x2d54   :  { %6531 = vmatprep.subr.bf16.mxu0 %v7578_v43 }
0x2d57   :  { %6532 = vmatpush3.bf16.msra.mxu0 %v8549_v57 }
0x2d58   :  { %6533 = vmatprep.subr.bf16.mxu0 %v7578_v43 }
0x2d5b   :  { %6534 = vmatpush3.bf16.msra.mxu0 %v8553_v53 }
0x2dfe   :  { %v4743_v16 = vpop.f32.mrf.mxu0 }
0x2dff   :  { %v8556_v45 = vadd.f32 %v7364_v42, %v4743_v16  ;;  %v7394_v16 = vld [vmem:[#allocation8 + $0xc4] ss:$8 sps:$4 sm:$0xff]   ;;  %v7395_v42 = vld [vmem:[#allocation8 + $0xc0] ss:$8 sps:$4 sm:$0xff]  }
0x2e00   :  { %v4745_v8 = vpop.f32.mrf.mxu0 }
0x2e01   :  { %v4807_v56 = vmul.f32 %v8556_v45, %v8556_v45  ;;  %v8561_v28 = vadd.f32 %v7365_v36, %v4745_v8  ;;  %v7396_v8 = vld [vmem:[#allocation8 + $0xb4] ss:$8 sps:$4 sm:$0xff]  }
0x2e02   :  { %v4747_v13 = vpop.f32.mrf.mxu0 }
0x2e03   :  { %v4808_v48 = vpack.c.bf16 %v4807_v56, %v8556_v45  ;;  %v4754_v27 = vmul.f32 %v8561_v28, %v8561_v28  ;;  %v7397_v56 = vld [vmem:[#allocation8 + $0xb0] ss:$8 sps:$4 sm:$0xff]   ;;  %v7398_v13 = vld [vmem:[#allocation8 + $0x1a4] ss:$8 sps:$4 sm:$0xff]  }
0x2e04   :  { %v4748_v59 = vpop.f32.mrf.mxu0 }
0x2e05   :  { %v8563_v17 = vadd.f32 %v7365_v36, %v4748_v59  ;;  %6536 = vmatmul.mubr.bf16.vlgmr.msra.gmra.mxu0 %v4808_v48 }
0x2e06   :  { %6539 = vmatprep.mubr.msk.bf16.mxu0 %vm7580_vm5, %v7578_v43 }
0x2e07   :  { %v4755_v39 = vmul.f32 %v8563_v17, %v8563_v17  ;;  %v4756_v0 = vpack.c.bf16 %v8563_v17, %v8561_v28 }
0x2e09   :  { %v4757_v55 = vpack.c.bf16 %v4755_v39, %v4754_v27 }
0x2e0b   :  { %6511 = vmatprep.subr.bf16.mxu1 %v4757_v55 }
0x2e0c   :  { %6512 = vmatpush3.bf16.msra.mxu1 %v4757_v55 }
0x2e0d   :  { %6513 = vmatprep.subr.bf16.mxu1 %v4756_v0 }
0x2e10   :  { %6514 = vmatpush3.bf16.msra.mxu1 %v4756_v0 }
0x2e11   :  { %4924 = vmatprep.subr.bf16.mxu1 %v7366_v25 }
0x2e13   :  { %6516 = vmatmul.mubr.msk.bf16.vlgmr.msra.gmra.mxu1 %vm98_vm0, %v7661_v14 }
0x2e14   :  { %4925 = vmatpush1.bf16.msra.mxu1 %v7367_v4 }
0x2e15   :  { %4926 = vmatprep.subr.bf16.mxu1 %v7368_v32 }
0x2e18   :  { %4927 = vmatpush1.bf16.msra.mxu1 %v7369_v18 }
0x2e19   :  { %4928 = vmatprep.subr.bf16.mxu1 %v7370_v12 }
0x2e1c   :  { %4929 = vmatpush1.bf16.msra.mxu1 %v7371_v19 }
0x2e1d   :  { %4930 = vmatprep.subr.bf16.mxu1 %v7372_v10 }
0x2e20   :  { %4931 = vmatpush1.bf16.msra.mxu1 %v7373_v3 }
0x2e21   :  { %4932 = vmatprep.subr.bf16.mxu1 %v7374_v31 }
0x2e24   :  { %4933 = vmatpush1.bf16.msra.mxu1 %v7375_v29 }
0x2e25   :  { %4934 = vmatprep.subr.bf16.mxu1 %v7376_v44 }
0x2e28   :  { %4935 = vmatpush1.bf16.msra.mxu1 %v7377_v58 }
0x2e29   :  { %4936 = vmatprep.subr.bf16.mxu1 %v7378_v34 }
0x2e2c   :  { %4937 = vmatpush1.bf16.msra.mxu1 %v7379_v23 }
0x2e2d   :  { %4938 = vmatprep.subr.bf16.mxu1 %v7380_v33 }
0x2e30   :  { %4939 = vmatpush1.bf16.msra.mxu1 %v7381_v37 }
0x2e31   :  { %4940 = vmatprep.subr.bf16.mxu1 %v7382_v46 }
0x2e34   :  { %4941 = vmatpush2.bf16.msra.mxu1 %v7383_v30 }
0x2e35   :  { %4942 = vmatprep.subr.bf16.mxu1 %v7384_v49 }
0x2e38   :  { %4943 = vmatpush2.bf16.msra.mxu1 %v7385_v6 }
0x2e39   :  { %4944 = vmatprep.subr.bf16.mxu1 %v7386_v51 }
0x2e3c   :  { %4945 = vmatpush2.bf16.msra.mxu1 %v7387_v20 }
0x2e3d   :  { %4946 = vmatprep.subr.bf16.mxu1 %v7388_v40 }
0x2e40   :  { %4947 = vmatpush2.bf16.msra.mxu1 %v7389_v61 }
0x2e41   :  { %4948 = vmatprep.subr.bf16.mxu1 %v7390_v15  ;;  %v7399_v15 = vld [vmem:[#allocation5 + $0x1] ss:$0 sm:$0xff] }
0x2e44   :  { %4949 = vmatpush2.bf16.msra.mxu1 %v7391_v62 }
0x2e45   :  { %4950 = vmatprep.subr.bf16.mxu1 %v7392_v9 }
0x2e48   :  { %4951 = vmatpush2.bf16.msra.mxu1 %v7393_v26  ;;  %v7400_v26 = vld [vmem:[#allocation5 + $0x2] ss:$0 sm:$0xff] }
0x2e49   :  { %4952 = vmatprep.subr.bf16.mxu1 %v7394_v16 }
0x2e4c   :  { %4953 = vmatpush2.bf16.msra.mxu1 %v7395_v42 }
0x2e4d   :  { %4954 = vmatprep.subr.bf16.mxu1 %v7396_v8 }
0x2e50   :  { %4955 = vmatpush2.bf16.msra.mxu1 %v7397_v56 }
0x2e51   :  { %5139 = vmatprep.subr.bf16.mxu1 %v7398_v13 }
0x2ec5   :  { %v4845_v48 = vpop.f32.mrf.mxu0 }
0x2ec6   :  { %v4868_v59 = vmul.f32 %v4845_v48, %v4845_v48  ;;  %v4877_v10 = vsub.f32 %v8556_v45, %v4845_v48 }
0x2ec7   :  { %v6537_v36 = vpop.f32.mrf.mxu0 }
0x2ec9   :  { %v4848_v27 = vpop.f32.mrf.mxu0 }
0x2eca   :  { %v4869_v39 = vsub.f32 %v4848_v27, %v4868_v59  ;;  %v7401_v59 = vld [vmem:[#allocation5 + $0xc] ss:$0 sm:$0xff] }
0x2ecb   :  { %v6538_v55 = vpop.f32.mrf.mxu0 }
0x2ecc   :  { %v4870_v0 = vmax.f32 %v4869_v39, 0.0 }
0x2ece   :  { %v4878_v25 = vadd.f32 1e-05, %v4870_v0  ;;  %v7402_v0 = vld [vmem:[#allocation5 + $0xd] ss:$0 sm:$0xff] }
0x2ed0   :  { %7070 = vrsqrt.f32 %v4878_v25 }
0x2ed3   :  { %v6517_v4 = vpop.f32.mrf.mxu1 }
0x2ed5   :  { %v4792_v32 = vpop.f32.mrf.mxu1 }
0x2ed7   :  { %v6518_v18 = vpop.f32.mrf.mxu1 }
0x2ed8   :  { %v4810_v29 = vpack.c.bf16 %v6518_v18, %v6517_v4 }
0x2ed9   :  { %v4795_v12 = vpop.f32.mrf.mxu1 }
0x2eda   :  { %v4809_v19 = vpack.c.bf16 %v4795_v12, %v4792_v32 }
0x2edc   :  { %6540 = vmatmul.mubr.bf16.gmra.mxu0 %v4809_v19 }
0x2edd   :  { %v7071_v3 = vpop.eup %7070  ;;  %6543 = vmatprep.mubr.msk.bf16.mxu0 %vm7580_vm5, %v7578_v43 }
0x2ede   :  { %v4880_v31 = vmul.f32 %v7071_v3, %v4877_v10 }
0x2ee0   :  { %v4881_v62 = vmul.f32 %v7399_v15, %v4880_v31 }
0x2ee2   :  { %v4882_v16 = vadd.f32 %v7400_v26, %v4881_v62  ;;  %v7403_v26 = vld [vmem:[#allocation8 + $0x1a0] ss:$8 sps:$4 sm:$0xff]  }
0x2ee4   :  { %6544 = vmatmul.mubr.bf16.gmra.mxu0 %v4810_v29  ;;  %v4884_v42 = vmul.f32 0.044715, %v4882_v16 }
0x2ee5   :  { %6551 = vmatprep.mubr.msk.bf16.mxu0 %vm98_vm0, %v7655_v11 }
0x2ee6   :  { %v4885_v13 = vmul.f32 %v4884_v42, %v4882_v16  ;;  %v7404_v42 = vld [vmem:[#allocation8 + $0x194] ss:$8 sps:$4 sm:$0xff]  }
0x2ee8   :  { %v4886_v55 = vmul.f32 %v4885_v13, %v4882_v16  ;;  %v7407_v13 = vld [vmem:[#allocation8 + $0x180] ss:$8 sps:$4 sm:$0xff]  }
0x2eea   :  { %v4887_v12 = vadd.f32 %v4886_v55, %v4882_v16  ;;  %v7414_v55 = vld [vmem:[#allocation8 + $0x144] ss:$8 sps:$4 sm:$0xff]  }
0x2f9c   :  { %v4853_v44 = vpop.f32.mrf.mxu0 }
0x2f9d   :  { %v4871_v33 = vmul.f32 %v4853_v44, %v4853_v44  ;;  %v4892_v8 = vsub.f32 %v8561_v28, %v4853_v44  ;;  %v4888_v28 = vmul.f32 0.7978846, %v4887_v12  ;;  %v7420_v12 = vld [vmem:[#allocation8 + $0x214] ss:$8 sps:$4 sm:$0xff]  }
0x2f9e   :  { %v6541_v58 = vpop.f32.mrf.mxu0 }
0x2fa0   :  { %v4856_v34 = vpop.f32.mrf.mxu0 }
0x2fa1   :  { %v4872_v45 = vmul.f32 %v4856_v34, %v4856_v34  ;;  %v4893_v36 = vsub.f32 %v8563_v17, %v4856_v34 }
0x2fa2   :  { %v6542_v23 = vpop.f32.mrf.mxu0 }
0x2fa4   :  { %v4861_v37 = vpop.f32.mrf.mxu0 }
0x2fa5   :  { %v4873_v46 = vsub.f32 %v4861_v37, %v4871_v33 }
0x2fa6   :  { %v6545_v30 = vpop.f32.mrf.mxu0 }
0x2fa7   :  { %v4875_v49 = vmax.f32 %v4873_v46, 0.0 }
0x2fa8   :  { %v4864_v6 = vpop.f32.mrf.mxu0 }
0x2fa9   :  { %v4894_v51 = vadd.f32 1e-05, %v4875_v49  ;;  %v4874_v20 = vsub.f32 %v4864_v6, %v4872_v45  ;;  %v4883_v49 = vmul.f32 0.5, %v4882_v16  ;;  %v7408_v16 = vld [vmem:[#allocation8 + $0x174] ss:$8 sps:$4 sm:$0xff]  }
0x2faa   :  { %v6546_v40 = vpop.f32.mrf.mxu0 }
0x2fab   :  { %7072 = vrsqrt.f32 %v4894_v51  ;;  %v4876_v61 = vmax.f32 %v4874_v20, 0.0 }
0x2fad   :  { %v4895_v9 = vadd.f32 1e-05, %v4876_v61 }
0x2faf   :  { %7074 = vrsqrt.f32 %v4895_v9 }
0x2fb0   :  { %7076 = vtanh.f32 %v4888_v28  ;;  %v7425_v28 = vld [vmem:[#allocation8 + $0x1f0] ss:$8 sps:$4 sm:$0xff]  }
0x2fb8   :  { %v7073_v56 = vpop.eup %7072 }
0x2fb9   :  { %v4898_v48 = vmul.f32 %v7073_v56, %v4892_v8  ;;  %v7405_v8 = vld [vmem:[#allocation8 + $0x190] ss:$8 sps:$4 sm:$0xff]   ;;  %v7406_v56 = vld [vmem:[#allocation8 + $0x184] ss:$8 sps:$4 sm:$0xff]  }
0x2fbb   :  { %v4900_v27 = vmul.f32 %v7401_v59, %v4898_v48  ;;  %v7409_v48 = vld [vmem:[#allocation8 + $0x170] ss:$8 sps:$4 sm:$0xff]  }
0x2fbc   :  { %v7075_v39 = vpop.eup %7074 }
0x2fbd   :  { %v4902_v25 = vadd.f32 %v7402_v0, %v4900_v27  ;;  %v4899_v4 = vmul.f32 %v7075_v39, %v4893_v36  ;;  %v7077_v33 = vpop.eup %7076  ;;  %v7410_v36 = vld [vmem:[#allocation8 + $0x164] ss:$8 sps:$4 sm:$0xff]   ;;  %v7412_v27 = vld [vmem:[#allocation8 + $0x154] ss:$8 sps:$4 sm:$0xff]   ;;  %v7413_v39 = vld [vmem:[#allocation8 + $0x150] ss:$8 sps:$4 sm:$0xff]  }
0x2fbe   :  { %v4890_v46 = vadd.f32 1.0, %v7077_v33  ;;  %v7432_v33 = vld [vmem:[#allocation8 + $0x1b4] ss:$8 sps:$4 sm:$0xff]  }
0x2fbf   :  { %v4901_v32 = vmul.f32 %v7401_v59, %v4899_v4  ;;  %v4906_v18 = vmul.f32 0.044715, %v4902_v25  ;;  %v4904_v6 = vmul.f32 0.5, %v4902_v25  ;;  %v7411_v59 = vld [vmem:[#allocation8 + $0x160] ss:$8 sps:$4 sm:$0xff]  }
0x2fc0   :  { %v4891_v40 = vmul.f32 %v4890_v46, %v4883_v49  ;;  %v7417_v4 = vld [vmem:[#allocation8 + $0x130] ss:$8 sps:$4 sm:$0xff]   ;;  %v7434_v49 = vld [vmem:[#allocation5 + $0xe] ss:$0 sm:$0xff] }
0x2fc1   :  { %v4903_v19 = vadd.f32 %v7402_v0, %v4901_v32  ;;  %v4908_v10 = vmul.f32 %v4906_v18, %v4902_v25  ;;  %v7415_v0 = vld [vmem:[#allocation8 + $0x140] ss:$8 sps:$4 sm:$0xff]   ;;  %v7418_v32 = vld [vmem:[#allocation8 + $0x224] ss:$8 sps:$4 sm:$0xff]  }
0x2fc2   :  { %v4922_v9 = vpack.c.bf16 %v4891_v40, %v4891_v40  ;;  %v7419_v18 = vld [vmem:[#allocation8 + $0x220] ss:$8 sps:$4 sm:$0xff]  }
0x2fc3   :  { %v4907_v3 = vmul.f32 0.044715, %v4903_v19  ;;  %v4910_v31 = vmul.f32 %v4908_v10, %v4902_v25  ;;  %v4905_v51 = vmul.f32 0.5, %v4903_v19  ;;  %v7422_v10 = vld [vmem:[#allocation8 + $0x204] ss:$8 sps:$4 sm:$0xff]  }
0x2fc5   :  { %v4909_v29 = vmul.f32 %v4907_v3, %v4903_v19  ;;  %v4912_v44 = vadd.f32 %v4910_v31, %v4902_v25  ;;  %v7416_v25 = vld [vmem:[#allocation8 + $0x134] ss:$8 sps:$4 sm:$0xff]   ;;  %v7423_v3 = vld [vmem:[#allocation8 + $0x200] ss:$8 sps:$4 sm:$0xff]  }
0x2fc6   :  { %v7424_v31 = vld [vmem:[#allocation8 + $0x1f4] ss:$8 sps:$4 sm:$0xff]  }
0x2fc7   :  { %v4911_v58 = vmul.f32 %v4909_v29, %v4903_v19  ;;  %v4914_v23 = vmul.f32 0.7978846, %v4912_v44  ;;  %v7426_v29 = vld [vmem:[#allocation8 + $0x1e4] ss:$8 sps:$4 sm:$0xff]   ;;  %v7427_v44 = vld [vmem:[#allocation8 + $0x1e0] ss:$8 sps:$4 sm:$0xff]  }
0x2fc9   :  { %v4913_v17 = vadd.f32 %v4911_v58, %v4903_v19  ;;  %7078 = vtanh.f32 %v4914_v23  ;;  %v7421_v19 = vld [vmem:[#allocation8 + $0x210] ss:$8 sps:$4 sm:$0xff]   ;;  %v7428_v58 = vld [vmem:[#allocation8 + $0x1d4] ss:$8 sps:$4 sm:$0xff]  }
0x2fca   :  { %v7429_v23 = vld [vmem:[#allocation8 + $0x1d0] ss:$8 sps:$4 sm:$0xff]  }
0x2fcb   :  { %v4915_v34 = vmul.f32 0.7978846, %v4913_v17  ;;  %v7430_v17 = vld [vmem:[#allocation8 + $0x1c4] ss:$8 sps:$4 sm:$0xff]  }
0x2fcd   :  { %7080 = vtanh.f32 %v4915_v34  ;;  %v7431_v34 = vld [vmem:[#allocation8 + $0x1c0] ss:$8 sps:$4 sm:$0xff]  }
0x2fd6   :  { %v7079_v37 = vpop.eup %7078 }
0x2fd7   :  { %v4918_v30 = vadd.f32 1.0, %v7079_v37  ;;  %v7433_v37 = vld [vmem:[#allocation8 + $0x1b0] ss:$8 sps:$4 sm:$0xff]  }
0x2fd9   :  { %v4920_v61 = vmul.f32 %v4918_v30, %v4904_v6 }
0x2fda   :  { %v7081_v45 = vpop.eup %7080 }
0x2fdb   :  { %v4919_v20 = vadd.f32 1.0, %v7081_v45 }
0x2fdd   :  { %v4921_v15 = vmul.f32 %v4919_v20, %v4905_v51 }
0x2fdf   :  { %v4923_v62 = vpack.c.bf16 %v4921_v15, %v4920_v61 }
0x2fe1   :  { %4956 = vmatprep.mubr.bf16.mxu1 %v4923_v62 }
0x2fe2   :  { %4957 = vmatmul.mubr.bf16.vlgmr.msra.gmra.mxu1 %v4922_v9  ;;  %v7435_v9 = vld [vmem:[#allocation5 + $0x3] ss:$0 sm:$0xff] }
0x2fe3   :  { %5140 = vmatpush1.bf16.msra.mxu1 %v7403_v26 }
0x2fe4   :  { %5141 = vmatprep.subr.bf16.mxu1 %v7404_v42 }
0x2fe7   :  { %5142 = vmatpush1.bf16.msra.mxu1 %v7405_v8 }
0x2fe8   :  { %5143 = vmatprep.subr.bf16.mxu1 %v7406_v56 }
0x2feb   :  { %5144 = vmatpush1.bf16.msra.mxu1 %v7407_v13 }
0x2fec   :  { %5145 = vmatprep.subr.bf16.mxu1 %v7408_v16 }
0x2fef   :  { %5146 = vmatpush1.bf16.msra.mxu1 %v7409_v48 }
0x2ff0   :  { %5147 = vmatprep.subr.bf16.mxu1 %v7410_v36 }
0x2ff3   :  { %5148 = vmatpush1.bf16.msra.mxu1 %v7411_v59 }
0x2ff4   :  { %5149 = vmatprep.subr.bf16.mxu1 %v7412_v27 }
0x2ff7   :  { %5150 = vmatpush1.bf16.msra.mxu1 %v7413_v39 }
0x2ff8   :  { %5151 = vmatprep.subr.bf16.mxu1 %v7414_v55 }
0x2ffb   :  { %5152 = vmatpush1.bf16.msra.mxu1 %v7415_v0 }
0x2ffc   :  { %5153 = vmatprep.subr.bf16.mxu1 %v7416_v25 }
0x2fff   :  { %5154 = vmatpush1.bf16.msra.mxu1 %v7417_v4 }
0x3000   :  { %5155 = vmatprep.subr.bf16.mxu1 %v7418_v32 }
0x3003   :  { %5156 = vmatpush2.bf16.msra.mxu1 %v7419_v18 }
0x3004   :  { %5157 = vmatprep.subr.bf16.mxu1 %v7420_v12 }
0x3007   :  { %5158 = vmatpush2.bf16.msra.mxu1 %v7421_v19 }
0x3008   :  { %5159 = vmatprep.subr.bf16.mxu1 %v7422_v10 }
0x300b   :  { %5160 = vmatpush2.bf16.msra.mxu1 %v7423_v3 }
0x300c   :  { %5161 = vmatprep.subr.bf16.mxu1 %v7424_v31 }
0x300f   :  { %5162 = vmatpush2.bf16.msra.mxu1 %v7425_v28 }
0x3010   :  { %5163 = vmatprep.subr.bf16.mxu1 %v7426_v29 }
0x3013   :  { %5164 = vmatpush2.bf16.msra.mxu1 %v7427_v44 }
0x3014   :  { %5165 = vmatprep.subr.bf16.mxu1 %v7428_v58 }
0x3017   :  { %5166 = vmatpush2.bf16.msra.mxu1 %v7429_v23 }
0x3018   :  { %5167 = vmatprep.subr.bf16.mxu1 %v7430_v17 }
0x301b   :  { %5168 = vmatpush2.bf16.msra.mxu1 %v7431_v34 }
0x301c   :  { %5169 = vmatprep.subr.bf16.mxu1 %v7432_v33 }
0x301f   :  { %5170 = vmatpush2.bf16.msra.mxu1 %v7433_v37 }
0x3020   :  { %6619 = vmatprep.subr.bf16.mxu1 %v7578_v43 }
0x30a2   :  { %v4958_v46 = vpop.f32.mrf.mxu1 }
0x30a3   :  { %v4966_v26 = vadd.f32 %v7435_v9, %v4958_v46 }
0x30a4   :  { %v4960_v30 = vpop.f32.mrf.mxu1 }
0x30a5   :  { %v8583_v6 = vadd.f32 %v7434_v49, %v4960_v30  ;;  %v5022_v42 = vmul.f32 %v4966_v26, %v4966_v26 }
0x30a6   :  { %v4962_v45 = vpop.f32.mrf.mxu1 }
0x30a7   :  { %v4969_v40 = vmul.f32 %v8583_v6, %v8583_v6  ;;  %v5023_v8 = vpack.c.bf16 %v5022_v42, %v4966_v26 }
0x30a8   :  { %v4963_v51 = vpop.f32.mrf.mxu1 }
0x30a9   :  { %v8585_v20 = vadd.f32 %v7434_v49, %v4963_v51  ;;  %v7436_v49 = vld [vmem:[#allocation5 + $0x4] ss:$0 sm:$0xff] }
0x30ab   :  { %v4970_v61 = vmul.f32 %v8585_v20, %v8585_v20  ;;  %v4971_v62 = vpack.c.bf16 %v8585_v20, %v8583_v6 }
0x30ad   :  { %v4972_v15 = vpack.c.bf16 %v4970_v61, %v4969_v40  ;;  %v7437_v61 = vld [vmem:[#allocation5 + $0x5] ss:$0 sm:$0xff] }
0x30af   :  { %6547 = vmatprep.subr.bf16.mxu0 %v4972_v15 }
0x30b0   :  { %6548 = vmatpush3.bf16.msra.mxu0 %v4972_v15 }
0x30b1   :  { %6549 = vmatprep.subr.bf16.mxu0 %v4971_v62 }
0x30b4   :  { %6550 = vmatpush3.bf16.msra.mxu0 %v4971_v62 }
0x30b5   :  { %6555 = vmatprep.subr.bf16.mxu0 %v7578_v43 }
0x30b7   :  { %6552 = vmatmul.mubr.msk.bf16.vlgmr.msra.gmra.mxu0 %vm98_vm0, %v7661_v14 }
0x30b8   :  { %6556 = vmatpush3.bf16.msra.mxu0 %v8523_v60  ;;  %6571 = vmatprep.mubr.msk.bf16.mxu0 %vm7580_vm5, %v7578_v43 }
0x30b9   :  { %6557 = vmatprep.subr.bf16.mxu0 %v7578_v43 }
0x30bc   :  { %6558 = vmatpush3.bf16.msra.mxu0 %v8529_v5 }
0x30bd   :  { %6559 = vmatprep.subr.bf16.mxu0 %v7578_v43 }
0x30c0   :  { %6560 = vmatpush3.bf16.msra.mxu0 %v8533_v7 }
0x30c1   :  { %6561 = vmatprep.subr.bf16.mxu0 %v7578_v43 }
0x30c4   :  { %6562 = vmatpush3.bf16.msra.mxu0 %v8537_v63 }
0x30c5   :  { %6563 = vmatprep.subr.bf16.mxu0 %v7578_v43 }
0x30c8   :  { %6564 = vmatpush3.bf16.msra.mxu0 %v8541_v2 }
0x30c9   :  { %6565 = vmatprep.subr.bf16.mxu0 %v7578_v43 }
0x30cc   :  { %6566 = vmatpush3.bf16.msra.mxu0 %v8545_v47 }
0x30cd   :  { %6567 = vmatprep.subr.bf16.mxu0 %v7578_v43 }
0x30d0   :  { %6568 = vmatpush3.bf16.msra.mxu0 %v8549_v57 }
0x30d1   :  { %6569 = vmatprep.subr.bf16.mxu0 %v7578_v43 }
0x30d4   :  { %6570 = vmatpush3.bf16.msra.mxu0 %v8553_v53 }
0x30d7   :  { %6572 = vmatmul.mubr.bf16.vlgmr.msra.gmra.mxu0 %v5023_v8 }
0x30d8   :  { %6575 = vmatprep.mubr.msk.bf16.mxu0 %vm7580_vm5, %v7578_v43 }
0x3177   :  { %v6553_v56 = vpop.f32.mrf.mxu0 }
0x3179   :  { %v5007_v13 = vpop.f32.mrf.mxu0 }
0x317b   :  { %v6554_v16 = vpop.f32.mrf.mxu0 }
0x317c   :  { %v5025_v59 = vpack.c.bf16 %v6554_v16, %v6553_v56 }
0x317d   :  { %v5010_v48 = vpop.f32.mrf.mxu0 }
0x317e   :  { %v5024_v36 = vpack.c.bf16 %v5010_v48, %v5007_v13  ;;  %v7438_v13 = vld [vmem:[#allocation5 + $0xf] ss:$0 sm:$0xff] }
0x3180   :  { %6576 = vmatmul.mubr.bf16.gmra.mxu0 %v5024_v36 }
0x3181   :  { %6579 = vmatprep.mubr.msk.bf16.mxu0 %vm7580_vm5, %v7578_v43 }
0x3188   :  { %6580 = vmatmul.mubr.bf16.gmra.mxu0 %v5025_v59  ;;  %v7439_v59 = vld [vmem:[#allocation5 + $0x10] ss:$0 sm:$0xff] }
0x3189   :  { %6587 = vmatprep.mubr.msk.bf16.mxu0 %vm98_vm0, %v7655_v11 }
0x3197   :  { %v5060_v27 = vpop.f32.mrf.mxu0 }
0x3198   :  { %v5083_v55 = vmul.f32 %v5060_v27, %v5060_v27  ;;  %v5092_v12 = vsub.f32 %v4966_v26, %v5060_v27 }
0x3199   :  { %v6573_v39 = vpop.f32.mrf.mxu0 }
0x319b   :  { %v5063_v0 = vpop.f32.mrf.mxu0 }
0x319c   :  { %v5084_v25 = vsub.f32 %v5063_v0, %v5083_v55 }
0x319d   :  { %v6574_v4 = vpop.f32.mrf.mxu0 }
0x319e   :  { %v5085_v32 = vmax.f32 %v5084_v25, 0.0 }
0x31a0   :  { %v5093_v18 = vadd.f32 1e-05, %v5085_v32 }
0x31a2   :  { %7082 = vrsqrt.f32 %v5093_v18 }
0x31af   :  { %v7083_v19 = vpop.eup %7082 }
0x31b0   :  { %v5095_v10 = vmul.f32 %v7083_v19, %v5092_v12 }
0x31b2   :  { %v5096_v51 = vmul.f32 %v7436_v49, %v5095_v10 }
0x31b4   :  { %v5097_v15 = vadd.f32 %v7437_v61, %v5096_v51 }
0x31b6   :  { %v5099_v62 = vmul.f32 0.044715, %v5097_v15 }
0x31b8   :  { %v5100_v42 = vmul.f32 %v5099_v62, %v5097_v15 }
0x31ba   :  { %v5101_v36 = vmul.f32 %v5100_v42, %v5097_v15 }
0x31bc   :  { %v5102_v25 = vadd.f32 %v5101_v36, %v5097_v15  ;;  %v7448_v36 = vld [vmem:[#allocation7 + $0x60] sm:$0xff]  }
0x3240   :  { %v5068_v3 = vpop.f32.mrf.mxu0 }
0x3241   :  { %v5086_v44 = vmul.f32 %v5068_v3, %v5068_v3  ;;  %v5107_v9 = vsub.f32 %v8583_v6, %v5068_v3  ;;  %v5103_v6 = vmul.f32 0.7978846, %v5102_v25 }
0x3242   :  { %v6577_v31 = vpop.f32.mrf.mxu0 }
0x3244   :  { %v5071_v28 = vpop.f32.mrf.mxu0 }
0x3245   :  { %v5087_v17 = vmul.f32 %v5071_v28, %v5071_v28  ;;  %v5108_v56 = vsub.f32 %v8585_v20, %v5071_v28 }
0x3246   :  { %v6578_v29 = vpop.f32.mrf.mxu0 }
0x3248   :  { %v5076_v58 = vpop.f32.mrf.mxu0 }
0x3249   :  { %v5088_v23 = vsub.f32 %v5076_v58, %v5086_v44 }
0x324a   :  { %v6581_v11 = vpop.f32.mrf.mxu0 }
0x324b   :  { %v5090_v34 = vmax.f32 %v5088_v23, 0.0 }
0x324c   :  { %v5079_v33 = vpop.f32.mrf.mxu0 }
0x324d   :  { %v5109_v37 = vadd.f32 1e-05, %v5090_v34  ;;  %v5089_v46 = vsub.f32 %v5079_v33, %v5087_v17  ;;  %v5098_v17 = vmul.f32 0.5, %v5097_v15 }
0x324e   :  { %v6582_v30 = vpop.f32.mrf.mxu0 }
0x324f   :  { %7084 = vrsqrt.f32 %v5109_v37  ;;  %v5091_v45 = vmax.f32 %v5089_v46, 0.0 }
0x3251   :  { %v5110_v40 = vadd.f32 1e-05, %v5091_v45 }
0x3253   :  { %7086 = vrsqrt.f32 %v5110_v40 }
0x3254   :  { %7088 = vtanh.f32 %v5103_v6 }
0x325c   :  { %v7085_v26 = vpop.eup %7084 }
0x325d   :  { %v5113_v8 = vmul.f32 %v7085_v26, %v5107_v9  ;;  %v7440_v9 = vld [vmem:[#allocation5 + $0x11] ss:$0 sm:$0xff] }
0x325f   :  { %v5115_v16 = vmul.f32 %v7438_v13, %v5113_v8 }
0x3260   :  { %v7087_v48 = vpop.eup %7086 }
0x3261   :  { %v5117_v27 = vadd.f32 %v7439_v59, %v5115_v16  ;;  %v5114_v39 = vmul.f32 %v7087_v48, %v5108_v56  ;;  %v7089_v29 = vpop.eup %7088  ;;  %v7447_v48 = vld [vmem:[#allocation7 + $0x68] sm:$0xff]  }
0x3262   :  { %v5105_v58 = vadd.f32 1.0, %v7089_v29 }
0x3263   :  { %v5116_v55 = vmul.f32 %v7438_v13, %v5114_v39  ;;  %v5121_v0 = vmul.f32 0.044715, %v5117_v27  ;;  %v5119_v34 = vmul.f32 0.5, %v5117_v27 }
0x3264   :  { %v5106_v46 = vmul.f32 %v5105_v58, %v5098_v17 }
0x3265   :  { %v5118_v4 = vadd.f32 %v7439_v59, %v5116_v55  ;;  %v5123_v32 = vmul.f32 %v5121_v0, %v5117_v27  ;;  %v7449_v59 = vld [vmem:[#allocation7 + $0x58] sm:$0xff]  }
0x3266   :  { %v5137_v51 = vpack.c.bf16 %v5106_v46, %v5106_v46 }
0x3267   :  { %v5122_v18 = vmul.f32 0.044715, %v5118_v4  ;;  %v5125_v12 = vmul.f32 %v5123_v32, %v5117_v27  ;;  %v5120_v33 = vmul.f32 0.5, %v5118_v4 }
0x3269   :  { %v5124_v19 = vmul.f32 %v5122_v18, %v5118_v4  ;;  %v5127_v10 = vadd.f32 %v5125_v12, %v5117_v27 }
0x326b   :  { %v5126_v3 = vmul.f32 %v5124_v19, %v5118_v4  ;;  %v5129_v31 = vmul.f32 0.7978846, %v5127_v10 }
0x326d   :  { %v5128_v20 = vadd.f32 %v5126_v3, %v5118_v4  ;;  %7090 = vtanh.f32 %v5129_v31 }
0x326f   :  { %v5130_v28 = vmul.f32 0.7978846, %v5128_v20 }
0x3271   :  { %7092 = vtanh.f32 %v5130_v28 }
0x327a   :  { %v7091_v44 = vpop.eup %7090 }
0x327b   :  { %v5133_v23 = vadd.f32 1.0, %v7091_v44  ;;  %v7450_v44 = vld [vmem:[#allocation5 + $0x7] ss:$0 sm:$0xff] }
0x327d   :  { %v5135_v30 = vmul.f32 %v5133_v23, %v5119_v34  ;;  %v7451_v23 = vld [vmem:[#allocation5 + $0x8] ss:$0 sm:$0xff] }
0x327e   :  { %v7093_v11 = vpop.eup %7092 }
0x327f   :  { %v5134_v37 = vadd.f32 1.0, %v7093_v11 }
0x3281   :  { %v5136_v45 = vmul.f32 %v5134_v37, %v5120_v33 }
0x3283   :  { %v5138_v49 = vpack.c.bf16 %v5136_v45, %v5135_v30 }
0x3285   :  { %5171 = vmatprep.mubr.bf16.mxu1 %v5138_v49 }
0x3286   :  { %5172 = vmatmul.mubr.bf16.vlgmr.msra.gmra.mxu1 %v5137_v51 }
0x3287   :  { %6621 = vmatprep.mubr.msk.bf16.mxu1 %vm7580_vm5, %v7578_v43 }
0x3346   :  { %v5173_v40 = vpop.f32.mrf.mxu1 }
0x3348   :  { %v5175_v61 = vpop.f32.mrf.mxu1 }
0x3349   :  { %v8623_v26 = vadd.f32 %v7440_v9, %v5175_v61  ;;  %v7452_v61 = vld [vmem:[#allocation7 + $0x40] sm:$0xf] }
0x334a   :  { %v5177_v62 = vpop.f32.mrf.mxu1 }
0x334b   :  { %v5184_v8 = vmul.f32 %v8623_v26, %v8623_v26 }
0x334c   :  { %v5178_v15 = vpop.f32.mrf.mxu1 }
0x334d   :  { %v8625_v42 = vadd.f32 %v7440_v9, %v5178_v15 }
0x334f   :  { %v5185_v56 = vmul.f32 %v8625_v42, %v8625_v42  ;;  %v5186_v16 = vpack.c.bf16 %v8625_v42, %v8623_v26 }
0x3351   :  { %v5187_v13 = vpack.c.bf16 %v5185_v56, %v5184_v8 }
0x3353   :  { %6583 = vmatprep.subr.bf16.mxu0 %v5187_v13 }
0x3354   :  { %6584 = vmatpush3.bf16.msra.mxu0 %v5187_v13 }
0x3355   :  { %6585 = vmatprep.subr.bf16.mxu0 %v5186_v16 }
0x3358   :  { %6586 = vmatpush3.bf16.msra.mxu0 %v5186_v16 }
0x3359   :  { %6591 = vmatprep.subr.bf16.mxu0 %v7578_v43 }
0x335b   :  { %6588 = vmatmul.mubr.msk.bf16.vlgmr.msra.gmra.mxu0 %vm98_vm0, %v7661_v14  ;;  %v7441_v14 = vld [vmem:[#allocation5 + $0x6] ss:$0 sm:$0xff] }
0x335c   :  { %6592 = vmatpush3.bf16.msra.mxu0 %v8523_v60  ;;  %6607 = vmatprep.mubr.msk.bf16.mxu0 %vm7580_vm5, %v7578_v43  ;;  %v5181_v60 = vadd.f32 %v7441_v14, %v5173_v40 }
0x335d   :  { %6593 = vmatprep.subr.bf16.mxu0 %v7578_v43 }
0x3360   :  { %6594 = vmatpush3.bf16.msra.mxu0 %v8529_v5  ;;  %v5237_v5 = vmul.f32 %v5181_v60, %v5181_v60 }
0x3361   :  { %6595 = vmatprep.subr.bf16.mxu0 %v7578_v43 }
0x3364   :  { %6596 = vmatpush3.bf16.msra.mxu0 %v8533_v7  ;;  %v5238_v7 = vpack.c.bf16 %v5237_v5, %v5181_v60 }
0x3365   :  { %6597 = vmatprep.subr.bf16.mxu0 %v7578_v43 }
0x3368   :  { %6598 = vmatpush3.bf16.msra.mxu0 %v8537_v63  ;;  %v7442_v63 = vld [vmem:[#allocation7 + $0x90] sm:$0xff]  }
0x3369   :  { %6599 = vmatprep.subr.bf16.mxu0 %v7578_v43 }
0x336c   :  { %6600 = vmatpush3.bf16.msra.mxu0 %v8541_v2  ;;  %v7443_v2 = vld [vmem:[#allocation7 + $0x88] sm:$0xff]  }
0x336d   :  { %6601 = vmatprep.subr.bf16.mxu0 %v7578_v43 }
0x3370   :  { %6602 = vmatpush3.bf16.msra.mxu0 %v8545_v47  ;;  %v7444_v47 = vld [vmem:[#allocation7 + $0x80] sm:$0xff]  }
0x3371   :  { %6603 = vmatprep.subr.bf16.mxu0 %v7578_v43 }
0x3374   :  { %6604 = vmatpush3.bf16.msra.mxu0 %v8549_v57  ;;  %v7445_v57 = vld [vmem:[#allocation7 + $0x78] sm:$0xff]  }
0x3375   :  { %6605 = vmatprep.subr.bf16.mxu0 %v7578_v43 }
0x3378   :  { %6606 = vmatpush3.bf16.msra.mxu0 %v8553_v53  ;;  %v7446_v53 = vld [vmem:[#allocation7 + $0x70] sm:$0xff]  }
0x3379   :  { %6631 = vmatprep.subr.bf16.mxu0 %v7578_v43 }
0x337b   :  { %6608 = vmatmul.mubr.bf16.vlgmr.msra.gmra.mxu0 %v5238_v7 }
0x337c   :  { %6611 = vmatprep.mubr.msk.bf16.mxu0 %vm7580_vm5, %v7578_v43  ;;  %6632 = vmatpush3.bf16.msra.mxu0 %v7442_v63 }
0x337d   :  { %6633 = vmatprep.subr.bf16.mxu0 %v7578_v43 }
0x3380   :  { %6634 = vmatpush3.bf16.msra.mxu0 %v7443_v2 }
0x3381   :  { %6635 = vmatprep.subr.bf16.mxu0 %v7578_v43 }
0x3384   :  { %6636 = vmatpush3.bf16.msra.mxu0 %v7444_v47 }
0x3385   :  { %6637 = vmatprep.subr.bf16.mxu0 %v7578_v43 }
0x3388   :  { %6638 = vmatpush3.bf16.msra.mxu0 %v7445_v57 }
0x3389   :  { %6639 = vmatprep.subr.bf16.mxu0 %v7578_v43 }
0x338c   :  { %6640 = vmatpush3.bf16.msra.mxu0 %v7446_v53 }
0x338d   :  { %6641 = vmatprep.subr.bf16.mxu0 %v7578_v43 }
0x3390   :  { %6642 = vmatpush3.bf16.msra.mxu0 %v7447_v48 }
0x3391   :  { %6643 = vmatprep.subr.bf16.mxu0 %v7578_v43 }
0x3394   :  { %6644 = vmatpush3.bf16.msra.mxu0 %v7448_v36 }
0x3395   :  { %6645 = vmatprep.subr.bf16.mxu0 %v7578_v43 }
0x3398   :  { %6646 = vmatpush3.bf16.msra.mxu0 %v7449_v59 }
0x341b   :  { %v6589_v27 = vpop.f32.mrf.mxu0 }
0x341d   :  { %v5222_v39 = vpop.f32.mrf.mxu0 }
0x341f   :  { %v6590_v55 = vpop.f32.mrf.mxu0 }
0x3420   :  { %v5240_v4 = vpack.c.bf16 %v6590_v55, %v6589_v27  ;;  %v7453_v27 = vld [vmem:[#allocation5 + $0x12] ss:$0 sm:$0xff] }
0x3421   :  { %v5225_v0 = vpop.f32.mrf.mxu0 }
0x3422   :  { %v5239_v25 = vpack.c.bf16 %v5225_v0, %v5222_v39  ;;  %v7454_v0 = vld [vmem:[#allocation5 + $0x13] ss:$0 sm:$0xff] }
0x3424   :  { %6612 = vmatmul.mubr.bf16.gmra.mxu0 %v5239_v25 }
0x3425   :  { %6615 = vmatprep.mubr.msk.bf16.mxu0 %vm7580_vm5, %v7578_v43 }
0x342c   :  { %6616 = vmatmul.mubr.bf16.gmra.mxu0 %v5240_v4 }
0x342d   :  { %6647 = vmatprep.mubr.msk.bf16.mxu0 %vm7580_vm5, %v7578_v43 }
0x343b   :  { %v5275_v32 = vpop.f32.mrf.mxu0 }
0x343c   :  { %v5298_v12 = vmul.f32 %v5275_v32, %v5275_v32  ;;  %v5307_v20 = vsub.f32 %v5181_v60, %v5275_v32 }
0x343d   :  { %v6609_v18 = vpop.f32.mrf.mxu0 }
0x343f   :  { %v5278_v6 = vpop.f32.mrf.mxu0 }
0x3440   :  { %v5299_v19 = vsub.f32 %v5278_v6, %v5298_v12 }
0x3441   :  { %v6610_v10 = vpop.f32.mrf.mxu0 }
0x3442   :  { %v5300_v3 = vmax.f32 %v5299_v19, 0.0 }
0x3444   :  { %v5308_v31 = vadd.f32 1e-05, %v5300_v3 }
0x3446   :  { %7094 = vrsqrt.f32 %v5308_v31 }
0x3453   :  { %v7095_v28 = vpop.eup %7094 }
0x3454   :  { %v5310_v29 = vmul.f32 %v7095_v28, %v5307_v20 }
0x3456   :  { %v5311_v58 = vmul.f32 %v7450_v44, %v5310_v29 }
0x3458   :  { %v5312_v11 = vadd.f32 %v7451_v23, %v5311_v58 }
0x345a   :  { %v5314_v17 = vmul.f32 0.044715, %v5312_v11  ;;  %v5313_v45 = vmul.f32 0.5, %v5312_v11 }
0x345c   :  { %v5315_v34 = vmul.f32 %v5314_v17, %v5312_v11 }
0x345e   :  { %v5316_v33 = vmul.f32 %v5315_v34, %v5312_v11 }
0x3460   :  { %v5317_v37 = vadd.f32 %v5316_v33, %v5312_v11 }
0x3462   :  { %v5318_v46 = vmul.f32 0.7978846, %v5317_v37 }
0x3464   :  { %7096 = vtanh.f32 %v5318_v46 }
0x3471   :  { %v7097_v30 = vpop.eup %7096 }
0x3472   :  { %v5320_v49 = vadd.f32 1.0, %v7097_v30 }
0x3474   :  { %v5321_v51 = vmul.f32 %v5320_v49, %v5313_v45 }
0x3476   :  { %v5352_v40 = vpack.c.bf16 %v5321_v51, %v5321_v51 }
0x3478   :  { %6620 = vmatpush3.bf16.xpose.msra.mxu1 %v5352_v40 }
0x3479   :  { %6625 = vmatprep.subr.bf16.mxu1 %v7578_v43 }
0x347f   :  { %6622 = vmatmul.mubr.bf16.vlgmr.msra.gmra.mxu1 %v7452_v61 }
0x3480   :  { %6627 = vmatprep.mubr.msk.bf16.mxu1 %vm7580_vm5, %v7578_v43 }
0x34e4   :  { %v5283_v62 = vpop.f32.mrf.mxu0 }
0x34e5   :  { %v5301_v56 = vmul.f32 %v5283_v62, %v5283_v62  ;;  %v5322_v43 = vsub.f32 %v8623_v26, %v5283_v62 }
0x34e6   :  { %v6613_v9 = vpop.f32.mrf.mxu0 }
0x34e8   :  { %v5286_v15 = vpop.f32.mrf.mxu0 }
0x34e9   :  { %v5302_v60 = vmul.f32 %v5286_v15, %v5286_v15  ;;  %v5323_v59 = vsub.f32 %v8625_v42, %v5286_v15 }
0x34ea   :  { %v6614_v8 = vpop.f32.mrf.mxu0 }
0x34ec   :  { %v5291_v13 = vpop.f32.mrf.mxu0 }
0x34ed   :  { %v5303_v16 = vsub.f32 %v5291_v13, %v5301_v56 }
0x34ee   :  { %v6617_v14 = vpop.f32.mrf.mxu0 }
0x34ef   :  { %v5305_v5 = vmax.f32 %v5303_v16, 0.0 }
0x34f0   :  { %v5294_v7 = vpop.f32.mrf.mxu0 }
0x34f1   :  { %v5324_v63 = vadd.f32 1e-05, %v5305_v5  ;;  %v5304_v2 = vsub.f32 %v5294_v7, %v5302_v60 }
0x34f2   :  { %v6618_v47 = vpop.f32.mrf.mxu0 }
0x34f3   :  { %7098 = vrsqrt.f32 %v5324_v63  ;;  %v5306_v57 = vmax.f32 %v5304_v2, 0.0 }
0x34f5   :  { %v5325_v53 = vadd.f32 1e-05, %v5306_v57 }
0x34f7   :  { %7100 = vrsqrt.f32 %v5325_v53 }
0x3500   :  { %v7099_v48 = vpop.eup %7098 }
0x3501   :  { %v5328_v36 = vmul.f32 %v7099_v48, %v5322_v43 }
0x3503   :  { %v5330_v39 = vmul.f32 %v7453_v27, %v5328_v36 }
0x3504   :  { %v7101_v55 = vpop.eup %7100 }
0x3505   :  { %v5332_v25 = vadd.f32 %v7454_v0, %v5330_v39  ;;  %v5329_v4 = vmul.f32 %v7101_v55, %v5323_v59 }
0x3507   :  { %v5331_v32 = vmul.f32 %v7453_v27, %v5329_v4  ;;  %v5336_v18 = vmul.f32 0.044715, %v5332_v25  ;;  %v5334_v23 = vmul.f32 0.5, %v5332_v25  ;;  %v7455_v4 = vld [vmem:[#allocation5 + $0x14] ss:$0 sm:$0xff] }
0x3509   :  { %v5333_v12 = vadd.f32 %v7454_v0, %v5331_v32  ;;  %v5338_v6 = vmul.f32 %v5336_v18, %v5332_v25 }
0x350b   :  { %v5337_v19 = vmul.f32 0.044715, %v5333_v12  ;;  %v5340_v10 = vmul.f32 %v5338_v6, %v5332_v25  ;;  %v5335_v11 = vmul.f32 0.5, %v5333_v12 }
0x350d   :  { %v5339_v3 = vmul.f32 %v5337_v19, %v5333_v12  ;;  %v5342_v31 = vadd.f32 %v5340_v10, %v5332_v25 }
0x350f   :  { %v5341_v20 = vmul.f32 %v5339_v3, %v5333_v12  ;;  %v5344_v26 = vmul.f32 0.7978846, %v5342_v31 }
0x3511   :  { %v5343_v28 = vadd.f32 %v5341_v20, %v5333_v12  ;;  %7102 = vtanh.f32 %v5344_v26 }
0x3513   :  { %v5345_v29 = vmul.f32 0.7978846, %v5343_v28 }
0x3515   :  { %7104 = vtanh.f32 %v5345_v29 }
0x351e   :  { %v7103_v42 = vpop.eup %7102 }
0x351f   :  { %v5348_v44 = vadd.f32 1.0, %v7103_v42 }
0x3521   :  { %v5350_v34 = vmul.f32 %v5348_v44, %v5334_v23 }
0x3522   :  { %v7105_v58 = vpop.eup %7104 }
0x3523   :  { %v5349_v17 = vadd.f32 1.0, %v7105_v58 }
0x3525   :  { %v5351_v33 = vmul.f32 %v5349_v17, %v5335_v11 }
0x3527   :  { %v5462_v37 = vpack.c.bf16 %v5351_v33, %v5350_v34 }
0x3529   :  { %6648 = vmatmul.mubr.bf16.vlgmr.msra.gmra.mxu0 %v5462_v37 }
0x353f   :  { %v5387_v46 = vpop.f32.mrf.mxu1 }
0x3540   :  { %v5388_v30 = vadd.f32 %v5387_v46, %v7895_v50 }
0x3541   :  { %v6623_v45 = vpop.f32.mrf.mxu1 }
0x3542   :  { %v5393_v49 = vmul.f32 %v5388_v30, %v5388_v30 }
0x3543   :  { %v5390_v51 = vpop.f32.mrf.mxu1 }
0x3544   :  { %5395 = vrot.lane.b32.xlu1 %v5393_v49, %s7568_s21 }
0x3545   :  { %v6624_v40 = vpop.f32.mrf.mxu1 }
0x35b6   :  { %v5396_v61 = vpop.permute.xlu1 %5395 }
0x35b7   :  { %v5398_v62 = vsel %vm157_vm2, %v5388_v30, %v5396_v61 }
0x35b8   :  { %v5399_v9 = vpack.c.bf16 %v5398_v62, %v5398_v62 }
0x35ba   :  { %v5401_v15 = vsel %vm1768_vm6, %v5399_v9, 0 }
0x35bb   :  { %6626 = vmatpush3.bf16.msra.mxu1 %v5401_v15 }
0x35be   :  { %6628 = vmatmul.mubr.msk.bf16.vlgmr.msra.gmra.mxu1 %vm157_vm2, %v7582_v1 }
0x35e9   :  { %v5497_v8 = vpop.f32.mrf.mxu0 }
0x35ea   :  { %v5498_v6 = vadd.f32 %v7455_v4, %v5497_v8 }
0x35eb   :  { %v6649_v56 = vpop.f32.mrf.mxu0 }
0x35ed   :  { %v5500_v13 = vpop.f32.mrf.mxu0 }
0x35ee   :  { %v5501_v32 = vadd.f32 %v7455_v4, %v5500_v13 }
0x35ef   :  { %v6650_v50 = vpop.f32.mrf.mxu0 }
0x367e   :  { %v5437_v16 = vpop.f32.mrf.mxu1 }
0x367f   :  { %v5443_v14 = vmul.f32 %v5437_v16, %v5437_v16  ;;  %v5450_v1 = vsub.f32 %v5388_v30, %v5437_v16 }
0x3680   :  { %v6629_v60 = vpop.f32.mrf.mxu1 }
0x3681   :  { %5445 = vrot.lane.b32.xlu0 %v5443_v14, %s7568_s21 }
0x3682   :  { %v5440_v5 = vpop.f32.mrf.mxu1 }
0x3684   :  { %v6630_v7 = vpop.f32.mrf.mxu1 }
0x36f3   :  { %v5446_v63 = vpop.permute.xlu0 %5445 }
0x36f4   :  { %v5448_v2 = vsub.f32 %v5437_v16, %v5446_v63 }
0x36f6   :  { %v5449_v47 = vmax.f32 %v5448_v2, 0.0 }
0x36f8   :  { %v5451_v57 = vadd.f32 1e-05, %v5449_v47 }
0x36fa   :  { %7106 = vrsqrt.f32 %v5451_v57 }
0x3707   :  { %v7107_v53 = vpop.eup %7106 }
0x3708   :  { %5454 = vrot.lane.b32.xlu1 %v7107_v53, %s7575_s11 }
0x377a   :  { %v5455_v43 = vpop.permute.xlu1 %5454 }
0x377b   :  { %v5457_v48 = vmul.f32 %v5455_v43, %v5450_v1 }
0x377d   :  { %v5458_v36 = vmul.f32 %v5457_v48, %v7912_v54 }
0x377f   :  { %v5459_v59 = vadd.f32 %v5458_v36, %v7915_v22 }
0x3781   :  { %v5460_v27 = vmul.f32 1.442695, %v5459_v59 }
0x3783   :  { %7108 = vpow2.f32 %v5460_v27 }
0x3790   :  { %v7109_v39 = vpop.eup %7108 }
0x3791   :  { %5510 = vperm.xlu1 %6723, %v7109_v39   ;;  %5507 = vrot.lane.b32.xlu0 %v7109_v39, %s7585_s16 }
0x3795   :  { %6724 = vset.pattern.permute.xlu1 %v7584_v24  ;;  %5526 = vperm.xlu0 %6725, %v7109_v39  }
0x3796   :  { %5518 = vperm.xlu1 %6724, %v7109_v39  }
0x3799   :  { %6726 = vset.pattern.permute.xlu0 %v7577_v35 }
0x3803   :  { %v5508_v55 = vpop.permute.xlu0 %5507 }
0x3804   :  { %5522 = vperm.xlu1 %6724, %v5508_v55   ;;  %5514 = vperm.xlu0 %6726, %v5508_v55  }
0x3808   :  { %6727 = vset.pattern.permute.xlu1 %v7586_v41  ;;  %6729 = vset.pattern.permute.xlu0 %v7587_v38  ;;  %v7456_v41 = vld [vmem:[#allocation5 + $0x15] ss:$0 sm:$0xff] }
0x3809   :  { %5530 = vperm.xlu1 %6727, %v5508_v55   ;;  %5538 = vperm.xlu0 %6729, %v5508_v55   ;;  %v5505_v19 = vmul.f32 %v7456_v41, %v5501_v32  ;;  %v5504_v20 = vmul.f32 %v7456_v41, %v5498_v6 }
0x380c   :  { %v5511_v54 = vpop.permute.xlu1 %5510 }
0x380d   :  { %6728 = vset.pattern.permute.xlu1 %v7587_v38 }
0x380e   :  { %5534 = vperm.xlu1 %6728, %v7109_v39  }
0x3810   :  { %v5527_v22 = vpop.permute.xlu0 %5526 }
0x3811   :  { %v5519_v0 = vpop.permute.xlu1 %5518 }
0x3812   :  { %v5541_v3 = vsel %vm1990_vm7, %v5511_v54, %v5519_v0 }
0x3813   :  { %v5543_v29 = vsel %vm157_vm2, %v5541_v3, %v5527_v22 }
0x387f   :  { %v5523_v24 = vpop.permute.xlu1 %5522  ;;  %v5515_v25 = vpop.permute.xlu0 %5514 }
0x3880   :  { %v5542_v35 = vsel %vm1990_vm7, %v5515_v25, %v5523_v24 }
0x3884   :  { %v5531_v18 = vpop.permute.xlu1 %5530  ;;  %v5539_v12 = vpop.permute.xlu0 %5538 }
0x3885   :  { %v5544_v10 = vsel %vm157_vm2, %v5542_v35, %v5531_v18 }
0x3886   :  { %v5546_v38 = vsel %vm1995_vm8, %v5544_v10, %v5539_v12 }
0x3887   :  { %v5548_v31 = vmul.f32 %v5546_v38, %v5505_v19 }
0x3889   :  { %v5550_v26 = vadd.f32 %v5548_v31, %v8444_v21  ;;  %v5535_v28 = vpop.permute.xlu1 %5534 }
0x388a   :  { %v5545_v42 = vsel %vm1995_vm8, %v5543_v29, %v5535_v28 }
0x388b   :  { %5552 = vst.msk [vmem:[#allocation10 + $0x8] sm:$0xff] %vm81_vm1, %v5550_v26  ;;  %v5547_v44 = vmul.f32 %v5545_v42, %v5504_v20 }
0x388d   :  { %v5549_v58 = vadd.f32 %v5547_v44, %v8452_v52 }
0x388f   :  { %5551 = vst.msk [vmem:[#allocation10] sm:$0xff] %vm81_vm1, %v5549_v58 }
0x3890   :  { %7548 = shalt.err (!%p7545_p10)
}
0x3891   :  { %5564 = dma.vmem_to_hbm [thread:$0]  %s5559_s18, 256, %s8708_s4, [#allocation4], %s7567_s20, %s7567_s20, %s7568_s21  }
0x3892   :  { %7563 = dma.done.wait [#allocation4], 256  }
0x3893   :  { %7564 = vsyncadd [#allocation4], 4294967040 }
0x3894   :  { %5568 = vsyncpa [#allocation3], 1 }
0x3895   :  { %5569 = vsyncpa [#allocation6], 1 }
0x3896   :  { %5570 = vsyncpa [#allocation9], 1 }
0x3897   :  { %5571 = vsyncpa [#allocation4], 1 }

</bundles_post_ra>
